<compile_context>
chip_gen: v5e
topology: v5e:2x2
jax: 0.10.0
libtpu: 0.0.40
codegen_flags: <defaults>
</compile_context>

<pallas_src>
import functools

import jax
import jax.numpy as jnp
from jax import lax
from jax.experimental import pallas as pl
from jax.experimental.pallas import tpu as pltpu

KSIZE = 25    # conv kernel size
STRIDE = 4
PAD = 11
OUT_PAD = 1
NPHASE = STRIDE          # 4 stride phases
NTAP = 7                 # ceil(KSIZE / STRIDE)
THALO = 3                # halo needed by the transposed-conv phase formulation


def _smem_spec():
    # Whole (tiny) array resident in SMEM; kernel reads it as a scalar.
    return pl.BlockSpec(memory_space=pltpu.MemorySpace.SMEM)


def _prelu(x, a):
    # a is a scalar; a == 1.0 is the exact identity.
    return jnp.maximum(x, 0.0) + a * jnp.minimum(x, 0.0)


# ---------------------------------------------------------------------------
# Strided Conv1d (k=25, s=4, p=11) with PReLU fused on the input.
# One fused MXU matmul per grid step: K = NTAP*NPHASE*Cin.
# ---------------------------------------------------------------------------

def _conv1d_kernel(a_ref, ph_ref, w_ref, b_ref, o_ref):
    """ph_ref: (1, 4*Cin, L+6) stride phases of the zero-padded input, stacked
               along channels (index = r*Cin + c).
       w_ref : (Cout, 7*4*Cin), taps stacked along K (index = q*4*Cin + r*Cin + c),
               zero-filled for the 3 nonexistent taps 25..27.
       b_ref : (Cout, 1).  a_ref: (1,) PReLU slope in SMEM.
       o_ref : (1, Cout, L)."""
    L = o_ref.shape[-1]
    x = _prelu(ph_ref[0], a_ref[0])                                  # (4*Cin, L+6)
    slab = jnp.concatenate([x[:, q:q + L] for q in range(NTAP)], axis=0)
    acc = lax.dot_general(w_ref[...], slab,
                          dimension_numbers=(((1,), (0,)), ((), ())),
                          preferred_element_type=jnp.float32)
    o_ref[0] = (acc + b_ref[...]).astype(o_ref.dtype)


def _conv_phase_split(x):
    """(B, Cin, T) -> (B, 4*Cin, T//4 + 6): stride-4 phases of the padded input,
       stacked along channels (index = r*Cin + c).  Pure layout plumbing."""
    B, Cin, T = x.shape
    L = T // STRIDE
    Lp = L + NTAP - 1
    xp = jnp.pad(x, ((0, 0), (0, 0), (PAD, STRIDE * Lp - T - PAD)))
    xp = xp.reshape(B, Cin, Lp, STRIDE)
    xp = jnp.transpose(xp, (0, 3, 1, 2))                             # (B, 4, Cin, Lp)
    return xp.reshape(B, STRIDE * Cin, Lp)


def _prep_conv_weight(w):
    """(Cout, Cin, 25) -> (Cout, 7*4*Cin), W'[o, q*4*Cin + r*Cin + c] = w[o, c, 4q+r]."""
    cout, cin, k = w.shape
    wpad = jnp.pad(w, ((0, 0), (0, 0), (0, NPHASE * NTAP - k)))
    wr = wpad.reshape(cout, cin, NTAP, NPHASE)                       # [o, c, q, r]
    wr = jnp.transpose(wr, (0, 2, 3, 1))                             # [o, q, r, c]
    return wr.reshape(cout, NTAP * NPHASE * cin).astype(jnp.float32)


def conv1d_prelu(x, w, b, a):
    """y = Conv1d_{k25,s4,p11}(PReLU_a(x)); a == 1.0 -> plain conv.
       w/b/a are the pre-stacked arrays from prepare_generator_params."""
    B, Cin, T = x.shape
    assert T % STRIDE == 0
    L = T // STRIDE
    Lp = L + NTAP - 1
    Cout = w.shape[0]
    ph = _conv_phase_split(x)
    return pl.pallas_call(
        _conv1d_kernel,
        out_shape=jax.ShapeDtypeStruct((B, Cout, L), x.dtype),
        grid_spec=pltpu.PrefetchScalarGridSpec(
            num_scalar_prefetch=0,
            grid=(B,),
            in_specs=[
                _smem_spec(),                                             # alpha
                pl.BlockSpec((1, STRIDE * Cin, Lp), lambda i: (i, 0, 0)),
                pl.BlockSpec(w.shape, lambda i: (0, 0)),
                pl.BlockSpec((Cout, 1), lambda i: (0, 0)),
            ],
            out_specs=pl.BlockSpec((1, Cout, L), lambda i: (i, 0, 0)),
        ),
        compiler_params=pltpu.CompilerParams(dimension_semantics=("parallel",)),
    )(a, ph, w, b)


# ---------------------------------------------------------------------------
# ConvTranspose1d (k=25, s=4, p=11, output_padding=1) with PReLU fused on the
# input(s) and optional tanh.  Sub-pixel (phase) formulation; the skip
# connection is passed as a second operand (no wrapper concat).
# One fused MXU matmul per grid step: (4*Cout, 7*Cin_total) x (7*Cin_total, L).
# ---------------------------------------------------------------------------

def _tconv1d_kernel(a_ref, *refs, n_inputs, apply_tanh):
    """refs = (x_0, [x_1,] w, b, o):
       x_i : (1, Cin_i, L+6) inputs padded by 3 on each side.
       w   : (4*Cout, 7*Cin_total); row block r = output phase r, column block m
             = tap m (zero where r + 23 - 4*m falls outside [0, 25)).
       b   : (4*Cout, 1) bias replicated per phase.  a_ref: (1,) slope in SMEM.
       o   : (1, 4, Cout, L) -- the 4 output phases (out[4s+r] = phase_r[s])."""
    xs = refs[:n_inputs]
    w_ref = refs[n_inputs]
    b_ref = refs[n_inputs + 1]
    o_ref = refs[n_inputs + 2]
    L = o_ref.shape[-1]
    cout = o_ref.shape[-2]
    a = a_ref[0]
    parts = [_prelu(xr[0], a) for xr in xs]
    xa = parts[0] if len(parts) == 1 else jnp.concatenate(parts, axis=0)
    slab = jnp.concatenate([xa[:, m:m + L] for m in range(NTAP)], axis=0)
    acc = lax.dot_general(w_ref[...], slab,
                          dimension_numbers=(((1,), (0,)), ((), ())),
                          preferred_element_type=jnp.float32)
    acc = acc + b_ref[...]
    if apply_tanh:
        acc = jnp.tanh(acc)
    o_ref[0] = acc.reshape(NPHASE, cout, L).astype(o_ref.dtype)


def _prep_tconv_weight(w):
    """(Cin, Cout, 25) [torch ConvTranspose1d layout] -> (4*Cout, 7*Cin),
       W'[r*Cout + o, m*Cin + c] = w[c, o, r + 23 - 4m] (zero when out of range)."""
    cin, cout, ksz = w.shape
    ws = jnp.zeros((NPHASE * cout, NTAP * cin), jnp.float32)
    for r in range(NPHASE):
        for m in range(NTAP):
            kk = r + PAD + STRIDE * THALO - STRIDE * m
            if 0 <= kk < ksz:
                ws = ws.at[r * cout:(r + 1) * cout, m * cin:(m + 1) * cin].set(
                    jnp.transpose(w[:, :, kk]).astype(jnp.float32))
    return ws


def tconv1d_prelu(xs, w, b, a, apply_tanh=False):
    """y = [tanh] ConvTranspose1d_{k25,s4,p11,op1}(PReLU_a(concat(xs, axis=1))).
       xs is a single array or a tuple (skip connection fused in-kernel)."""
    if not isinstance(xs, (tuple, list)):
        xs = (xs,)
    B, _, L = xs[0].shape
    Lp = L + 2 * THALO
    Cout = w.shape[0] // NPHASE
    xps = [jnp.pad(xi, ((0, 0), (0, 0), (THALO, THALO))) for xi in xs]
    in_specs = [_smem_spec()]
    in_specs += [pl.BlockSpec((1, xi.shape[1], Lp), lambda i: (i, 0, 0)) for xi in xs]
    in_specs += [pl.BlockSpec(w.shape, lambda i: (0, 0)),
                 pl.BlockSpec((NPHASE * Cout, 1), lambda i: (0, 0))]
    y = pl.pallas_call(
        functools.partial(_tconv1d_kernel, n_inputs=len(xs), apply_tanh=apply_tanh),
        out_shape=jax.ShapeDtypeStruct((B, NPHASE, Cout, L), xs[0].dtype),
        grid_spec=pltpu.PrefetchScalarGridSpec(
            num_scalar_prefetch=0,
            grid=(B,),
            in_specs=in_specs,
            out_specs=pl.BlockSpec((1, NPHASE, Cout, L), lambda i: (i, 0, 0, 0)),
        ),
        compiler_params=pltpu.CompilerParams(dimension_semantics=("parallel",)),
    )(a, *xps, w, b)
    # Interleave phases: out[:, :, 4*s + r] = y[:, r, :, s]  (layout plumbing only).
    return jnp.transpose(y, (0, 2, 3, 1)).reshape(B, Cout, STRIDE * L)


# ---------------------------------------------------------------------------
# SelfAttention (1x1 conv projections + softmax(Q^T K) + V A^T, gamma*out + x),
# with the preceding PReLU fused in (alpha == 1.0 -> identity).
# Softmax normalization is deferred past the V.P matmul.
# ---------------------------------------------------------------------------

def _self_attention_kernel(g_ref, a_ref, x_ref, wq_ref, bq_ref, wk_ref, bk_ref,
                           wv_ref, bv_ref, o_ref):
    x = _prelu(x_ref[0], a_ref[0])                                   # (C, S)
    q = lax.dot_general(wq_ref[...], x, (((1,), (0,)), ((), ())),
                        preferred_element_type=jnp.float32) + bq_ref[...]
    k = lax.dot_general(wk_ref[...], x, (((1,), (0,)), ((), ())),
                        preferred_element_type=jnp.float32) + bk_ref[...]
    v = lax.dot_general(wv_ref[...], x, (((1,), (0,)), ((), ())),
                        preferred_element_type=jnp.float32) + bv_ref[...]
    # eT[j, i] = energy[i, j]; softmax over keys j == axis 0, so the row-sum is
    # a (1, S) lane vector that broadcasts against (C, S) with no relayout.
    eT = lax.dot_general(k, q, (((0,), (0,)), ((), ())),
                         preferred_element_type=jnp.float32)         # (S, S)
    eT = eT - jnp.max(eT, axis=0, keepdims=True)
    pT = jnp.exp(eT)
    inv = 1.0 / jnp.sum(pT, axis=0, keepdims=True)                   # (1, S)
    out = lax.dot_general(v, pT, (((1,), (0,)), ((), ())),
                          preferred_element_type=jnp.float32)        # (C, S)
    o_ref[0] = (g_ref[0] * (out * inv) + x).astype(o_ref.dtype)


def self_attention(x, att):
    """att is the prepared dict (wq,bq,wk,bk,wv,bv,g,a) from prepare_generator_params."""
    B, C, S = x.shape
    Cq = att['wq'].shape[0]
    # Explicit scoped-VMEM budget: S^2 temporaries + projections + double-buffered I/O.
    # NOTE: for very long sequences (S >~ 2048) this should be tiled flash-style
    # over keys; at this model's sizes the full (S, S) tile fits comfortably.
    vmem = 4 * (2 * S * S + 8 * C * S + 4 * Cq * S + C * C + 2 * Cq * C) + (4 << 20)
    vmem = int(min(64 * 1024 * 1024, max(32 * 1024 * 1024, vmem)))
    return pl.pallas_call(
        _self_attention_kernel,
        out_shape=jax.ShapeDtypeStruct((B, C, S), x.dtype),
        grid_spec=pltpu.PrefetchScalarGridSpec(
            num_scalar_prefetch=0,
            grid=(B,),
            in_specs=[
                _smem_spec(),                                  # gamma
                _smem_spec(),                                  # PReLU slope
                pl.BlockSpec((1, C, S), lambda i: (i, 0, 0)),
                pl.BlockSpec((Cq, C), lambda i: (0, 0)),
                pl.BlockSpec((Cq, 1), lambda i: (0, 0)),
                pl.BlockSpec((Cq, C), lambda i: (0, 0)),
                pl.BlockSpec((Cq, 1), lambda i: (0, 0)),
                pl.BlockSpec((C, C), lambda i: (0, 0)),
                pl.BlockSpec((C, 1), lambda i: (0, 0)),
            ],
            out_specs=pl.BlockSpec((1, C, S), lambda i: (i, 0, 0)),
        ),
        compiler_params=pltpu.CompilerParams(
            dimension_semantics=("parallel",), vmem_limit_bytes=vmem),
    )(att['g'], att['a'], x, att['wq'], att['bq'], att['wk'], att['bk'],
      att['wv'], att['bv'])


# ---------------------------------------------------------------------------
# One-time parameter restacking (hoisted out of the per-step forward pass).
# ---------------------------------------------------------------------------

def prepare_generator_params(p):
    def sc(v):
        return jnp.reshape(jnp.asarray(v, jnp.float32), (1,))

    def col(b):
        return jnp.reshape(b, (-1, 1)).astype(jnp.float32)

    def tcol(b):
        return jnp.tile(jnp.reshape(b, (-1, 1)), (NPHASE, 1)).astype(jnp.float32)

    def att(ap, alpha):
        return dict(wq=ap['wq'].astype(jnp.float32), bq=col(ap['bq']),
                    wk=ap['wk'].astype(jnp.float32), bk=col(ap['bk']),
                    wv=ap['wv'].astype(jnp.float32), bv=col(ap['bv']),
                    g=sc(ap['gamma']), a=sc(alpha))

    one = 1.0   # PReLU slope 1.0 == identity
    return {
        'conv1': dict(w=_prep_conv_weight(p['conv1_w']), b=col(p['conv1_b']), a=sc(one)),
        'conv2': dict(w=_prep_conv_weight(p['conv2_w']), b=col(p['conv2_b']), a=sc(p['enc_prelu1'])),
        'conv3': dict(w=_prep_conv_weight(p['conv3_w']), b=col(p['conv3_b']), a=sc(p['enc_prelu2'])),
        'conv4': dict(w=_prep_conv_weight(p['conv4_w']), b=col(p['conv4_b']), a=sc(p['enc_prelu3'])),
        'conv5': dict(w=_prep_conv_weight(p['conv5_w']), b=col(p['conv5_b']), a=sc(p['enc_prelu4'])),
        'att1': att(p['att1'], one),
        'att2': att(p['att2'], p['enc_prelu5']),
        'tconv1': dict(w=_prep_tconv_weight(p['tconv1_w']), b=tcol(p['tconv1_b']), a=sc(one)),
        'tconv2': dict(w=_prep_tconv_weight(p['tconv2_w']), b=tcol(p['tconv2_b']), a=sc(p['dec_prelu1'])),
        'tconv3': dict(w=_prep_tconv_weight(p['tconv3_w']), b=tcol(p['tconv3_b']), a=sc(p['dec_prelu2'])),
        'tconv4': dict(w=_prep_tconv_weight(p['tconv4_w']), b=tcol(p['tconv4_b']), a=sc(p['dec_prelu3'])),
        'tconvf': dict(w=_prep_tconv_weight(p['tconvf_w']), b=tcol(p['tconvf_b']), a=sc(p['dec_prelu4'])),
    }


# ---------------------------------------------------------------------------
# Generator forward pass (Pallas pipeline).
# ---------------------------------------------------------------------------

def generator_forward(prep, x):
    e1 = conv1d_prelu(x, **prep['conv1'])
    e2 = conv1d_prelu(e1, **prep['conv2'])
    e2 = self_attention(e2, prep['att1'])
    e3 = conv1d_prelu(e2, **prep['conv3'])
    e4 = conv1d_prelu(e3, **prep['conv4'])
    e5 = conv1d_prelu(e4, **prep['conv5'])
    att_encoded = self_attention(e5, prep['att2'])
    d4 = tconv1d_prelu(att_encoded, **prep['tconv1'])
    d3 = tconv1d_prelu((d4, e4), **prep['tconv2'])
    d2 = tconv1d_prelu((d3, e3), **prep['tconv3'])
    d1 = tconv1d_prelu((d2, e2), **prep['tconv4'])
    return tconv1d_prelu((d1, e1), **prep['tconvf'], apply_tanh=True)


# ---------------------------------------------------------------------------
# Pure-JAX reference (same math, XLA ops) for correctness checking.
# ---------------------------------------------------------------------------

_HI = lax.Precision.HIGHEST


def _ref_prelu(x, a):
    return jnp.maximum(x, 0.0) + a * jnp.minimum(x, 0.0)


def _ref_conv1d(x, w, b):
    y = lax.conv_general_dilated(x, w, window_strides=(STRIDE,),
                                 padding=[(PAD, PAD)],
                                 dimension_numbers=('NCH', 'OIH', 'NCH'),
                                 precision=_HI)
    return y + b[None, :, None]


def _ref_tconv1d(x, w, b):
    w_conv = jnp.transpose(jnp.flip(w, axis=-1), (1, 0, 2))   # (Cout, Cin, K)
    y = lax.conv_general_dilated(
        x, w_conv, window_strides=(1,),
        padding=[(KSIZE - 1 - PAD, KSIZE - 1 - PAD + OUT_PAD)],
        lhs_dilation=(STRIDE,),
        dimension_numbers=('NCH', 'OIH', 'NCH'),
        precision=_HI)
    return y + b[None, :, None]


def _ref_self_attention(x, att):
    q = jnp.einsum('oc,bcs->bos', att['wq'], x, precision=_HI) + att['bq'][None, :, None]
    k = jnp.einsum('oc,bcs->bos', att['wk'], x, precision=_HI) + att['bk'][None, :, None]
    v = jnp.einsum('oc,bcs->bos', att['wv'], x, precision=_HI) + att['bv'][None, :, None]
    energy = jnp.einsum('bci,bcj->bij', q, k, precision=_HI)
    attn = jax.nn.softmax(energy, axis=-1)
    out = jnp.einsum('bcj,bij->bci', v, attn, precision=_HI)
    return att['gamma'] * out + x


def reference_forward(params, x):
    p = params
    e1 = _ref_conv1d(x, p['conv1_w'], p['conv1_b'])
    e2 = _ref_conv1d(_ref_prelu(e1, p['enc_prelu1']), p['conv2_w'], p['conv2_b'])
    e2 = _ref_self_attention(e2, p['att1'])
    e3 = _ref_conv1d(_ref_prelu(e2, p['enc_prelu2']), p['conv3_w'], p['conv3_b'])
    e4 = _ref_conv1d(_ref_prelu(e3, p['enc_prelu3']), p['conv4_w'], p['conv4_b'])
    e5 = _ref_conv1d(_ref_prelu(e4, p['enc_prelu4']), p['conv5_w'], p['conv5_b'])
    encoded = _ref_prelu(e5, p['enc_prelu5'])
    att_encoded = _ref_self_attention(encoded, p['att2'])
    d4 = _ref_tconv1d(att_encoded, p['tconv1_w'], p['tconv1_b'])
    d4c = _ref_prelu(jnp.concatenate([d4, e4], axis=1), p['dec_prelu1'])
    d3 = _ref_tconv1d(d4c, p['tconv2_w'], p['tconv2_b'])
    d3c = _ref_prelu(jnp.concatenate([d3, e3], axis=1), p['dec_prelu2'])
    d2 = _ref_tconv1d(d3c, p['tconv3_w'], p['tconv3_b'])
    d2c = _ref_prelu(jnp.concatenate([d2, e2], axis=1), p['dec_prelu3'])
    d1 = _ref_tconv1d(d2c, p['tconv4_w'], p['tconv4_b'])
    d1c = _ref_prelu(jnp.concatenate([d1, e1], axis=1), p['dec_prelu4'])
    return jnp.tanh(_ref_tconv1d(d1c, p['tconvf_w'], p['tconvf_b']))


# ---------------------------------------------------------------------------
# Parameter construction (random, deterministic).  Xavier init is a
# training-time detail; the forward-pass semantics are parameter-agnostic.
# Gammas are set non-zero so the attention paths are actually exercised.
# ---------------------------------------------------------------------------

def init_params(key, d=32, c=1):
    keys = iter(jax.random.split(key, 64))

    def conv_w(cin, cout):
        return jax.random.normal(next(keys), (cout, cin, KSIZE), jnp.float32) / jnp.sqrt(cin * KSIZE)

    def tconv_w(cin, cout):
        return jax.random.normal(next(keys), (cin, cout, KSIZE), jnp.float32) / jnp.sqrt(cin * KSIZE)

    def bias(n):
        return 0.1 * jax.random.normal(next(keys), (n,), jnp.float32)

    def prelu_a():
        return 0.25 + 0.1 * jax.random.normal(next(keys), (), jnp.float32)

    def att(cdim):
        cq = cdim // 8
        return dict(
            wq=jax.random.normal(next(keys), (cq, cdim), jnp.float32) / jnp.sqrt(cdim),
            bq=bias(cq),
            wk=jax.random.normal(next(keys), (cq, cdim), jnp.float32) / jnp.sqrt(cdim),
            bk=bias(cq),
            wv=jax.random.normal(next(keys), (cdim, cdim), jnp.float32) / jnp.sqrt(cdim),
            bv=bias(cdim),
            gamma=0.5 * jax.random.normal(next(keys), (), jnp.float32),
        )

    return {
        'conv1_w': conv_w(c, d), 'conv1_b': bias(d),
        'conv2_w': conv_w(d, 2 * d), 'conv2_b': bias(2 * d),
        'conv3_w': conv_w(2 * d, 4 * d), 'conv3_b': bias(4 * d),
        'conv4_w': conv_w(4 * d, 8 * d), 'conv4_b': bias(8 * d),
        'conv5_w': conv_w(8 * d, 16 * d), 'conv5_b': bias(16 * d),
        'enc_prelu1': prelu_a(), 'enc_prelu2': prelu_a(), 'enc_prelu3': prelu_a(),
        'enc_prelu4': prelu_a(), 'enc_prelu5': prelu_a(),
        'att1': att(2 * d),
        'att2': att(16 * d),
        'tconv1_w': tconv_w(16 * d, 8 * d), 'tconv1_b': bias(8 * d),
        'tconv2_w': tconv_w(16 * d, 4 * d), 'tconv2_b': bias(4 * d),
        'tconv3_w': tconv_w(8 * d, 2 * d), 'tconv3_b': bias(2 * d),
        'tconv4_w': tconv_w(4 * d, d), 'tconv4_b': bias(d),
        'tconvf_w': tconv_w(2 * d, c), 'tconvf_b': bias(c),
        'dec_prelu1': prelu_a(), 'dec_prelu2': prelu_a(),
        'dec_prelu3': prelu_a(), 'dec_prelu4': prelu_a(),
    }


if __name__ == "__main__":
    key = jax.random.PRNGKey(0)
    kp, kx = jax.random.split(key)

    # Small shapes consistent with the module: 5 stride-4 encoder levels need
    # T divisible by 4^5; d=4 is the smallest width with valid attention dims.
    d, c, B, T = 4, 1, 2, 2048
    params = init_params(kp, d=d, c=c)
    x = jax.random.normal(kx, (B, c, T), jnp.float32)

    prep = prepare_generator_params(params)       # one-time, outside the jitted step
    out = jax.block_until_ready(jax.jit(generator_forward)(prep, x))
    ref = reference_forward(params, x)

    assert out.shape == (B, c, T), out.shape
    max_err = jnp.max(jnp.abs(out - ref))
    assert jnp.allclose(out, ref, atol=2e-3, rtol=2e-3), ("max abs err", max_err)
    print("KERNEL_OK")
</pallas_src>

<mosaic_0001>
module attributes {stable_mosaic.version = 11 : i64} {
  func.func @_conv1d_kernel(%arg0: i32, %arg1: memref<1xf32, #tpu.memory_space<smem>>, %arg2: memref<1x4x518xf32, #tpu.memory_space<vmem>>, %arg3: memref<4x28xf32, #tpu.memory_space<vmem>>, %arg4: memref<4x1xf32, #tpu.memory_space<vmem>>, %arg5: memref<1x4x512xf32, #tpu.memory_space<vmem>>) attributes {dimension_semantics = [#tpu.dimension_semantics<parallel>], iteration_bounds = array<i64: 2>, scalar_prefetch = 0 : i64, scratch_operands = 0 : i64, tpu.core_type = #tpu.core_type<tc>, window_params = [{transform_indices = @transform_0, window_bounds = array<i64: 1>}, {transform_indices = @transform_1, window_bounds = array<i64: 1, 4, 518>}, {pipeline_mode = #tpu.pipeline_mode<synchronous>, transform_indices = @transform_2, window_bounds = array<i64: 4, 28>}, {pipeline_mode = #tpu.pipeline_mode<synchronous>, transform_indices = @transform_3, window_bounds = array<i64: 4, 1>}, {transform_indices = @transform_4, window_bounds = array<i64: 1, 4, 512>}]} {
    %c0 = arith.constant 0 : index
    %c0_0 = arith.constant 0 : index
    %c0_1 = arith.constant 0 : index
    %0 = vector.load %arg2[%c0, %c0_0, %c0_1] : memref<1x4x518xf32, #tpu.memory_space<vmem>>, vector<1x4x518xf32>
    %1 = vector.shape_cast %0 : vector<1x4x518xf32> to vector<4x518xf32>
    %c0_2 = arith.constant 0 : index
    %2 = memref.load %arg1[%c0_2] : memref<1xf32, #tpu.memory_space<smem>>
    %cst = arith.constant 0.000000e+00 : f32
    %3 = vector.broadcast %cst : f32 to vector<4x518xf32>
    %4 = arith.maximumf %1, %3 : vector<4x518xf32>
    %cst_3 = arith.constant 0.000000e+00 : f32
    %5 = vector.broadcast %cst_3 : f32 to vector<4x518xf32>
    %6 = arith.minimumf %1, %5 : vector<4x518xf32>
    %7 = vector.broadcast %2 : f32 to vector<4x518xf32>
    %8 = arith.mulf %7, %6 : vector<4x518xf32>
    %9 = arith.addf %4, %8 : vector<4x518xf32>
    %10 = vector.extract_strided_slice %9 {offsets = [0, 0], sizes = [4, 512], strides = [1, 1]} : vector<4x518xf32> to vector<4x512xf32>
    %11 = vector.extract_strided_slice %9 {offsets = [0, 1], sizes = [4, 512], strides = [1, 1]} : vector<4x518xf32> to vector<4x512xf32>
    %12 = vector.extract_strided_slice %9 {offsets = [0, 2], sizes = [4, 512], strides = [1, 1]} : vector<4x518xf32> to vector<4x512xf32>
    %13 = vector.extract_strided_slice %9 {offsets = [0, 3], sizes = [4, 512], strides = [1, 1]} : vector<4x518xf32> to vector<4x512xf32>
    %14 = vector.extract_strided_slice %9 {offsets = [0, 4], sizes = [4, 512], strides = [1, 1]} : vector<4x518xf32> to vector<4x512xf32>
    %15 = vector.extract_strided_slice %9 {offsets = [0, 5], sizes = [4, 512], strides = [1, 1]} : vector<4x518xf32> to vector<4x512xf32>
    %16 = vector.extract_strided_slice %9 {offsets = [0, 6], sizes = [4, 512], strides = [1, 1]} : vector<4x518xf32> to vector<4x512xf32>
    %17 = tpu.concatenate %10, %11, %12, %13, %14, %15, %16 in 0 : vector<4x512xf32>, vector<4x512xf32>, vector<4x512xf32>, vector<4x512xf32>, vector<4x512xf32>, vector<4x512xf32>, vector<4x512xf32> -> vector<28x512xf32>
    %c0_4 = arith.constant 0 : index
    %c0_5 = arith.constant 0 : index
    %18 = vector.load %arg3[%c0_4, %c0_5] : memref<4x28xf32, #tpu.memory_space<vmem>>, vector<4x28xf32>
    %cst_6 = arith.constant dense<0.000000e+00> : vector<4x512xf32>
    %19 = tpu.matmul %18, %17, %cst_6 {dimension_numbers = #tpu.dot_dimension_numbers<[1], [0], [0], [1], [0, 0, 1, 1], [], []>} : vector<4x28xf32>, vector<28x512xf32>, vector<4x512xf32> -> vector<4x512xf32>
    %c0_7 = arith.constant 0 : index
    %c0_8 = arith.constant 0 : index
    %20 = vector.load %arg4[%c0_7, %c0_8] : memref<4x1xf32, #tpu.memory_space<vmem>>, vector<4x1xf32>
    %21 = vector.broadcast %20 : vector<4x1xf32> to vector<4x512xf32>
    %22 = arith.addf %19, %21 : vector<4x512xf32>
    %c0_9 = arith.constant 0 : index
    %c0_10 = arith.constant 0 : index
    %c0_11 = arith.constant 0 : index
    %23 = vector.load %arg5[%c0_9, %c0_10, %c0_11] : memref<1x4x512xf32, #tpu.memory_space<vmem>>, vector<1x4x512xf32>
    %24 = vector.shape_cast %23 : vector<1x4x512xf32> to vector<4x512xf32>
    %25 = vector.shape_cast %22 : vector<4x512xf32> to vector<1x4x512xf32>
    tpu.vector_store %arg5[%c0_9, %c0_10, %c0_11], %25 {strides = array<i32>} : memref<1x4x512xf32, #tpu.memory_space<vmem>>, vector<1x4x512xf32>,
    return
  }
  func.func @transform_0(%arg0: i32) -> i32 {
    %c0_i32 = arith.constant 0 : i32
    %c0_i32_0 = arith.constant 0 : i32
    return %c0_i32 : i32
  }
  func.func @transform_1(%arg0: i32) -> (i32, i32, i32) {
    %c0_i32 = arith.constant 0 : i32
    %c0_i32_0 = arith.constant 0 : i32
    %c0_i32_1 = arith.constant 0 : i32
    return %arg0, %c0_i32, %c0_i32_0 : i32, i32, i32
  }
  func.func @transform_2(%arg0: i32) -> (i32, i32) {
    %c0_i32 = arith.constant 0 : i32
    %c0_i32_0 = arith.constant 0 : i32
    %c0_i32_1 = arith.constant 0 : i32
    return %c0_i32, %c0_i32_0 : i32, i32
  }
  func.func @transform_3(%arg0: i32) -> (i32, i32) {
    %c0_i32 = arith.constant 0 : i32
    %c0_i32_0 = arith.constant 0 : i32
    %c0_i32_1 = arith.constant 0 : i32
    return %c0_i32, %c0_i32_0 : i32, i32
  }
  func.func @transform_4(%arg0: i32) -> (i32, i32, i32) {
    %c0_i32 = arith.constant 0 : i32
    %c0_i32_0 = arith.constant 0 : i32
    %c0_i32_1 = arith.constant 0 : i32
    return %arg0, %c0_i32, %c0_i32_0 : i32, i32, i32
  }
}

module attributes {stable_mosaic.version = 11 : i64} {
  func.func @_self_attention_kernel(%arg0: i32, %arg1: memref<1xf32, #tpu.memory_space<smem>>, %arg2: memref<1xf32, #tpu.memory_space<smem>>, %arg3: memref<1x8x128xf32, #tpu.memory_space<vmem>>, %arg4: memref<1x8xf32, #tpu.memory_space<vmem>>, %arg5: memref<1x1xf32, #tpu.memory_space<vmem>>, %arg6: memref<1x8xf32, #tpu.memory_space<vmem>>, %arg7: memref<1x1xf32, #tpu.memory_space<vmem>>, %arg8: memref<8x8xf32, #tpu.memory_space<vmem>>, %arg9: memref<8x1xf32, #tpu.memory_space<vmem>>, %arg10: memref<1x8x128xf32, #tpu.memory_space<vmem>>) attributes {dimension_semantics = [#tpu.dimension_semantics<parallel>], iteration_bounds = array<i64: 2>, scalar_prefetch = 0 : i64, scratch_operands = 0 : i64, tpu.core_type = #tpu.core_type<tc>, window_params = [{transform_indices = @transform_0, window_bounds = array<i64: 1>}, {transform_indices = @transform_1, window_bounds = array<i64: 1>}, {transform_indices = @transform_2, window_bounds = array<i64: 1, 8, 128>}, {pipeline_mode = #tpu.pipeline_mode<synchronous>, transform_indices = @transform_3, window_bounds = array<i64: 1, 8>}, {pipeline_mode = #tpu.pipeline_mode<synchronous>, transform_indices = @transform_4, window_bounds = array<i64: 1, 1>}, {pipeline_mode = #tpu.pipeline_mode<synchronous>, transform_indices = @transform_5, window_bounds = array<i64: 1, 8>}, {pipeline_mode = #tpu.pipeline_mode<synchronous>, transform_indices = @transform_6, window_bounds = array<i64: 1, 1>}, {pipeline_mode = #tpu.pipeline_mode<synchronous>, transform_indices = @transform_7, window_bounds = array<i64: 8, 8>}, {pipeline_mode = #tpu.pipeline_mode<synchronous>, transform_indices = @transform_8, window_bounds = array<i64: 8, 1>}, {transform_indices = @transform_9, window_bounds = array<i64: 1, 8, 128>}]} {
    %c0 = arith.constant 0 : index
    %c0_0 = arith.constant 0 : index
    %c0_1 = arith.constant 0 : index
    %0 = vector.load %arg3[%c0, %c0_0, %c0_1] : memref<1x8x128xf32, #tpu.memory_space<vmem>>, vector<1x8x128xf32>
    %1 = vector.shape_cast %0 : vector<1x8x128xf32> to vector<8x128xf32>
    %c0_2 = arith.constant 0 : index
    %2 = memref.load %arg2[%c0_2] : memref<1xf32, #tpu.memory_space<smem>>
    %cst = arith.constant 0.000000e+00 : f32
    %3 = vector.broadcast %cst : f32 to vector<8x128xf32>
    %4 = arith.maximumf %1, %3 : vector<8x128xf32>
    %cst_3 = arith.constant 0.000000e+00 : f32
    %5 = vector.broadcast %cst_3 : f32 to vector<8x128xf32>
    %6 = arith.minimumf %1, %5 : vector<8x128xf32>
    %7 = vector.broadcast %2 : f32 to vector<8x128xf32>
    %8 = arith.mulf %7, %6 : vector<8x128xf32>
    %9 = arith.addf %4, %8 : vector<8x128xf32>
    %c0_4 = arith.constant 0 : index
    %c0_5 = arith.constant 0 : index
    %10 = vector.load %arg4[%c0_4, %c0_5] : memref<1x8xf32, #tpu.memory_space<vmem>>, vector<1x8xf32>
    %cst_6 = arith.constant dense<0.000000e+00> : vector<1x128xf32>
    %11 = tpu.matmul %10, %9, %cst_6 {dimension_numbers = #tpu.dot_dimension_numbers<[1], [0], [0], [1], [0, 0, 1, 1], [], []>} : vector<1x8xf32>, vector<8x128xf32>, vector<1x128xf32> -> vector<1x128xf32>
    %c0_7 = arith.constant 0 : index
    %c0_8 = arith.constant 0 : index
    %12 = vector.load %arg5[%c0_7, %c0_8] : memref<1x1xf32, #tpu.memory_space<vmem>>, vector<1x1xf32>
    %13 = vector.broadcast %12 : vector<1x1xf32> to vector<1x128xf32>
    %14 = arith.addf %11, %13 : vector<1x128xf32>
    %c0_9 = arith.constant 0 : index
    %c0_10 = arith.constant 0 : index
    %15 = vector.load %arg6[%c0_9, %c0_10] : memref<1x8xf32, #tpu.memory_space<vmem>>, vector<1x8xf32>
    %cst_11 = arith.constant dense<0.000000e+00> : vector<1x128xf32>
    %16 = tpu.matmul %15, %9, %cst_11 {dimension_numbers = #tpu.dot_dimension_numbers<[1], [0], [0], [1], [0, 0, 1, 1], [], []>} : vector<1x8xf32>, vector<8x128xf32>, vector<1x128xf32> -> vector<1x128xf32>
    %c0_12 = arith.constant 0 : index
    %c0_13 = arith.constant 0 : index
    %17 = vector.load %arg7[%c0_12, %c0_13] : memref<1x1xf32, #tpu.memory_space<vmem>>, vector<1x1xf32>
    %18 = vector.broadcast %17 : vector<1x1xf32> to vector<1x128xf32>
    %19 = arith.addf %16, %18 : vector<1x128xf32>
    %c0_14 = arith.constant 0 : index
    %c0_15 = arith.constant 0 : index
    %20 = vector.load %arg8[%c0_14, %c0_15] : memref<8x8xf32, #tpu.memory_space<vmem>>, vector<8x8xf32>
    %cst_16 = arith.constant dense<0.000000e+00> : vector<8x128xf32>
    %21 = tpu.matmul %20, %9, %cst_16 {dimension_numbers = #tpu.dot_dimension_numbers<[1], [0], [0], [1], [0, 0, 1, 1], [], []>} : vector<8x8xf32>, vector<8x128xf32>, vector<8x128xf32> -> vector<8x128xf32>
    %c0_17 = arith.constant 0 : index
    %c0_18 = arith.constant 0 : index
    %22 = vector.load %arg9[%c0_17, %c0_18] : memref<8x1xf32, #tpu.memory_space<vmem>>, vector<8x1xf32>
    %23 = vector.broadcast %22 : vector<8x1xf32> to vector<8x128xf32>
    %24 = arith.addf %21, %23 : vector<8x128xf32>
    %cst_19 = arith.constant dense<0.000000e+00> : vector<128x128xf32>
    %25 = tpu.matmul %19, %14, %cst_19 {dimension_numbers = #tpu.dot_dimension_numbers<[0], [0], [1], [1], [0, 1, 1, 1], [], []>} : vector<1x128xf32>, vector<1x128xf32>, vector<128x128xf32> -> vector<128x128xf32>
    %cst_20 = arith.constant dense<0xFF800000> : vector<128xf32>
    %26 = vector.multi_reduction <maximumf>, %25, %cst_20 [0] : vector<128x128xf32> to vector<128xf32>
    %27 = vector.shape_cast %26 : vector<128xf32> to vector<1x128xf32>
    %28 = vector.broadcast %27 : vector<1x128xf32> to vector<128x128xf32>
    %29 = arith.subf %25, %28 : vector<128x128xf32>
    %30 = math.exp %29 : vector<128x128xf32>
    %cst_21 = arith.constant dense<0.000000e+00> : vector<128xf32>
    %31 = vector.multi_reduction <add>, %30, %cst_21 [0] : vector<128x128xf32> to vector<128xf32>
    %32 = vector.shape_cast %31 : vector<128xf32> to vector<1x128xf32>
    %cst_22 = arith.constant 1.000000e+00 : f32
    %33 = vector.broadcast %cst_22 : f32 to vector<1x128xf32>
    %34 = arith.divf %33, %32 : vector<1x128xf32>
    %cst_23 = arith.constant dense<0.000000e+00> : vector<8x128xf32>
    %35 = tpu.matmul %24, %30, %cst_23 {dimension_numbers = #tpu.dot_dimension_numbers<[1], [0], [0], [1], [0, 0, 1, 1], [], []>} : vector<8x128xf32>, vector<128x128xf32>, vector<8x128xf32> -> vector<8x128xf32>
    %c0_24 = arith.constant 0 : index
    %36 = memref.load %arg1[%c0_24] : memref<1xf32, #tpu.memory_space<smem>>
    %37 = vector.broadcast %34 : vector<1x128xf32> to vector<8x128xf32>
    %38 = arith.mulf %35, %37 : vector<8x128xf32>
    %39 = vector.broadcast %36 : f32 to vector<8x128xf32>
    %40 = arith.mulf %39, %38 : vector<8x128xf32>
    %41 = arith.addf %40, %9 : vector<8x128xf32>
    %c0_25 = arith.constant 0 : index
    %c0_26 = arith.constant 0 : index
    %c0_27 = arith.constant 0 : index
    %42 = vector.load %arg10[%c0_25, %c0_26, %c0_27] : memref<1x8x128xf32, #tpu.memory_space<vmem>>, vector<1x8x128xf32>
    %43 = vector.shape_cast %42 : vector<1x8x128xf32> to vector<8x128xf32>
    %44 = vector.shape_cast %41 : vector<8x128xf32> to vector<1x8x128xf32>
    tpu.vector_store %arg10[%c0_25, %c0_26, %c0_27], %44 {strides = array<i32>} : memref<1x8x128xf32, #tpu.memory_space<vmem>>, vector<1x8x128xf32>,
    return
  }
  func.func @transform_0(%arg0: i32) -> i32 {
    %c0_i32 = arith.constant 0 : i32
    %c0_i32_0 = arith.constant 0 : i32
    return %c0_i32 : i32
  }
  func.func @transform_1(%arg0: i32) -> i32 {
    %c0_i32 = arith.constant 0 : i32
    %c0_i32_0 = arith.constant 0 : i32
    return %c0_i32 : i32
  }
  func.func @transform_2(%arg0: i32) -> (i32, i32, i32) {
    %c0_i32 = arith.constant 0 : i32
    %c0_i32_0 = arith.constant 0 : i32
    %c0_i32_1 = arith.constant 0 : i32
    return %arg0, %c0_i32, %c0_i32_0 : i32, i32, i32
  }
  func.func @transform_3(%arg0: i32) -> (i32, i32) {
    %c0_i32 = arith.constant 0 : i32
    %c0_i32_0 = arith.constant 0 : i32
    %c0_i32_1 = arith.constant 0 : i32
    return %c0_i32, %c0_i32_0 : i32, i32
  }
  func.func @transform_4(%arg0: i32) -> (i32, i32) {
    %c0_i32 = arith.constant 0 : i32
    %c0_i32_0 = arith.constant 0 : i32
    %c0_i32_1 = arith.constant 0 : i32
    return %c0_i32, %c0_i32_0 : i32, i32
  }
  func.func @transform_5(%arg0: i32) -> (i32, i32) {
    %c0_i32 = arith.constant 0 : i32
    %c0_i32_0 = arith.constant 0 : i32
    %c0_i32_1 = arith.constant 0 : i32
    return %c0_i32, %c0_i32_0 : i32, i32
  }
  func.func @transform_6(%arg0: i32) -> (i32, i32) {
    %c0_i32 = arith.constant 0 : i32
    %c0_i32_0 = arith.constant 0 : i32
    %c0_i32_1 = arith.constant 0 : i32
    return %c0_i32, %c0_i32_0 : i32, i32
  }
  func.func @transform_7(%arg0: i32) -> (i32, i32) {
    %c0_i32 = arith.constant 0 : i32
    %c0_i32_0 = arith.constant 0 : i32
    %c0_i32_1 = arith.constant 0 : i32
    return %c0_i32, %c0_i32_0 : i32, i32
  }
  func.func @transform_8(%arg0: i32) -> (i32, i32) {
    %c0_i32 = arith.constant 0 : i32
    %c0_i32_0 = arith.constant 0 : i32
    %c0_i32_1 = arith.constant 0 : i32
    return %c0_i32, %c0_i32_0 : i32, i32
  }
  func.func @transform_9(%arg0: i32) -> (i32, i32, i32) {
    %c0_i32 = arith.constant 0 : i32
    %c0_i32_0 = arith.constant 0 : i32
    %c0_i32_1 = arith.constant 0 : i32
    return %arg0, %c0_i32, %c0_i32_0 : i32, i32, i32
  }
}

module attributes {stable_mosaic.version = 11 : i64} {
  func.func @_conv1d_kernel(%arg0: i32, %arg1: memref<1xf32, #tpu.memory_space<smem>>, %arg2: memref<1x16x134xf32, #tpu.memory_space<vmem>>, %arg3: memref<8x112xf32, #tpu.memory_space<vmem>>, %arg4: memref<8x1xf32, #tpu.memory_space<vmem>>, %arg5: memref<1x8x128xf32, #tpu.memory_space<vmem>>) attributes {dimension_semantics = [#tpu.dimension_semantics<parallel>], iteration_bounds = array<i64: 2>, scalar_prefetch = 0 : i64, scratch_operands = 0 : i64, tpu.core_type = #tpu.core_type<tc>, window_params = [{transform_indices = @transform_0, window_bounds = array<i64: 1>}, {transform_indices = @transform_1, window_bounds = array<i64: 1, 16, 134>}, {pipeline_mode = #tpu.pipeline_mode<synchronous>, transform_indices = @transform_2, window_bounds = array<i64: 8, 112>}, {pipeline_mode = #tpu.pipeline_mode<synchronous>, transform_indices = @transform_3, window_bounds = array<i64: 8, 1>}, {transform_indices = @transform_4, window_bounds = array<i64: 1, 8, 128>}]} {
    %c0 = arith.constant 0 : index
    %c0_0 = arith.constant 0 : index
    %c0_1 = arith.constant 0 : index
    %0 = vector.load %arg2[%c0, %c0_0, %c0_1] : memref<1x16x134xf32, #tpu.memory_space<vmem>>, vector<1x16x134xf32>
    %1 = vector.shape_cast %0 : vector<1x16x134xf32> to vector<16x134xf32>
    %c0_2 = arith.constant 0 : index
    %2 = memref.load %arg1[%c0_2] : memref<1xf32, #tpu.memory_space<smem>>
    %cst = arith.constant 0.000000e+00 : f32
    %3 = vector.broadcast %cst : f32 to vector<16x134xf32>
    %4 = arith.maximumf %1, %3 : vector<16x134xf32>
    %cst_3 = arith.constant 0.000000e+00 : f32
    %5 = vector.broadcast %cst_3 : f32 to vector<16x134xf32>
    %6 = arith.minimumf %1, %5 : vector<16x134xf32>
    %7 = vector.broadcast %2 : f32 to vector<16x134xf32>
    %8 = arith.mulf %7, %6 : vector<16x134xf32>
    %9 = arith.addf %4, %8 : vector<16x134xf32>
    %10 = vector.extract_strided_slice %9 {offsets = [0, 0], sizes = [16, 128], strides = [1, 1]} : vector<16x134xf32> to vector<16x128xf32>
    %11 = vector.extract_strided_slice %9 {offsets = [0, 1], sizes = [16, 128], strides = [1, 1]} : vector<16x134xf32> to vector<16x128xf32>
    %12 = vector.extract_strided_slice %9 {offsets = [0, 2], sizes = [16, 128], strides = [1, 1]} : vector<16x134xf32> to vector<16x128xf32>
    %13 = vector.extract_strided_slice %9 {offsets = [0, 3], sizes = [16, 128], strides = [1, 1]} : vector<16x134xf32> to vector<16x128xf32>
    %14 = vector.extract_strided_slice %9 {offsets = [0, 4], sizes = [16, 128], strides = [1, 1]} : vector<16x134xf32> to vector<16x128xf32>
    %15 = vector.extract_strided_slice %9 {offsets = [0, 5], sizes = [16, 128], strides = [1, 1]} : vector<16x134xf32> to vector<16x128xf32>
    %16 = vector.extract_strided_slice %9 {offsets = [0, 6], sizes = [16, 128], strides = [1, 1]} : vector<16x134xf32> to vector<16x128xf32>
    %17 = tpu.concatenate %10, %11, %12, %13, %14, %15, %16 in 0 : vector<16x128xf32>, vector<16x128xf32>, vector<16x128xf32>, vector<16x128xf32>, vector<16x128xf32>, vector<16x128xf32>, vector<16x128xf32> -> vector<112x128xf32>
    %c0_4 = arith.constant 0 : index
    %c0_5 = arith.constant 0 : index
    %18 = vector.load %arg3[%c0_4, %c0_5] : memref<8x112xf32, #tpu.memory_space<vmem>>, vector<8x112xf32>
    %cst_6 = arith.constant dense<0.000000e+00> : vector<8x128xf32>
    %19 = tpu.matmul %18, %17, %cst_6 {dimension_numbers = #tpu.dot_dimension_numbers<[1], [0], [0], [1], [0, 0, 1, 1], [], []>} : vector<8x112xf32>, vector<112x128xf32>, vector<8x128xf32> -> vector<8x128xf32>
    %c0_7 = arith.constant 0 : index
    %c0_8 = arith.constant 0 : index
    %20 = vector.load %arg4[%c0_7, %c0_8] : memref<8x1xf32, #tpu.memory_space<vmem>>, vector<8x1xf32>
    %21 = vector.broadcast %20 : vector<8x1xf32> to vector<8x128xf32>
    %22 = arith.addf %19, %21 : vector<8x128xf32>
    %c0_9 = arith.constant 0 : index
    %c0_10 = arith.constant 0 : index
    %c0_11 = arith.constant 0 : index
    %23 = vector.load %arg5[%c0_9, %c0_10, %c0_11] : memref<1x8x128xf32, #tpu.memory_space<vmem>>, vector<1x8x128xf32>
    %24 = vector.shape_cast %23 : vector<1x8x128xf32> to vector<8x128xf32>
    %25 = vector.shape_cast %22 : vector<8x128xf32> to vector<1x8x128xf32>
    tpu.vector_store %arg5[%c0_9, %c0_10, %c0_11], %25 {strides = array<i32>} : memref<1x8x128xf32, #tpu.memory_space<vmem>>, vector<1x8x128xf32>,
    return
  }
  func.func @transform_0(%arg0: i32) -> i32 {
    %c0_i32 = arith.constant 0 : i32
    %c0_i32_0 = arith.constant 0 : i32
    return %c0_i32 : i32
  }
  func.func @transform_1(%arg0: i32) -> (i32, i32, i32) {
    %c0_i32 = arith.constant 0 : i32
    %c0_i32_0 = arith.constant 0 : i32
    %c0_i32_1 = arith.constant 0 : i32
    return %arg0, %c0_i32, %c0_i32_0 : i32, i32, i32
  }
  func.func @transform_2(%arg0: i32) -> (i32, i32) {
    %c0_i32 = arith.constant 0 : i32
    %c0_i32_0 = arith.constant 0 : i32
    %c0_i32_1 = arith.constant 0 : i32
    return %c0_i32, %c0_i32_0 : i32, i32
  }
  func.func @transform_3(%arg0: i32) -> (i32, i32) {
    %c0_i32 = arith.constant 0 : i32
    %c0_i32_0 = arith.constant 0 : i32
    %c0_i32_1 = arith.constant 0 : i32
    return %c0_i32, %c0_i32_0 : i32, i32
  }
  func.func @transform_4(%arg0: i32) -> (i32, i32, i32) {
    %c0_i32 = arith.constant 0 : i32
    %c0_i32_0 = arith.constant 0 : i32
    %c0_i32_1 = arith.constant 0 : i32
    return %arg0, %c0_i32, %c0_i32_0 : i32, i32, i32
  }
}

module attributes {stable_mosaic.version = 11 : i64} {
  func.func @_conv1d_kernel(%arg0: i32, %arg1: memref<1xf32, #tpu.memory_space<smem>>, %arg2: memref<1x32x38xf32, #tpu.memory_space<vmem>>, %arg3: memref<16x224xf32, #tpu.memory_space<vmem>>, %arg4: memref<16x1xf32, #tpu.memory_space<vmem>>, %arg5: memref<1x16x32xf32, #tpu.memory_space<vmem>>) attributes {dimension_semantics = [#tpu.dimension_semantics<parallel>], iteration_bounds = array<i64: 2>, scalar_prefetch = 0 : i64, scratch_operands = 0 : i64, tpu.core_type = #tpu.core_type<tc>, window_params = [{transform_indices = @transform_0, window_bounds = array<i64: 1>}, {transform_indices = @transform_1, window_bounds = array<i64: 1, 32, 38>}, {pipeline_mode = #tpu.pipeline_mode<synchronous>, transform_indices = @transform_2, window_bounds = array<i64: 16, 224>}, {pipeline_mode = #tpu.pipeline_mode<synchronous>, transform_indices = @transform_3, window_bounds = array<i64: 16, 1>}, {transform_indices = @transform_4, window_bounds = array<i64: 1, 16, 32>}]} {
    %c0 = arith.constant 0 : index
    %c0_0 = arith.constant 0 : index
    %c0_1 = arith.constant 0 : index
    %0 = vector.load %arg2[%c0, %c0_0, %c0_1] : memref<1x32x38xf32, #tpu.memory_space<vmem>>, vector<1x32x38xf32>
    %1 = vector.shape_cast %0 : vector<1x32x38xf32> to vector<32x38xf32>
    %c0_2 = arith.constant 0 : index
    %2 = memref.load %arg1[%c0_2] : memref<1xf32, #tpu.memory_space<smem>>
    %cst = arith.constant 0.000000e+00 : f32
    %3 = vector.broadcast %cst : f32 to vector<32x38xf32>
    %4 = arith.maximumf %1, %3 : vector<32x38xf32>
    %cst_3 = arith.constant 0.000000e+00 : f32
    %5 = vector.broadcast %cst_3 : f32 to vector<32x38xf32>
    %6 = arith.minimumf %1, %5 : vector<32x38xf32>
    %7 = vector.broadcast %2 : f32 to vector<32x38xf32>
    %8 = arith.mulf %7, %6 : vector<32x38xf32>
    %9 = arith.addf %4, %8 : vector<32x38xf32>
    %10 = vector.extract_strided_slice %9 {offsets = [0, 0], sizes = [32, 32], strides = [1, 1]} : vector<32x38xf32> to vector<32x32xf32>
    %11 = vector.extract_strided_slice %9 {offsets = [0, 1], sizes = [32, 32], strides = [1, 1]} : vector<32x38xf32> to vector<32x32xf32>
    %12 = vector.extract_strided_slice %9 {offsets = [0, 2], sizes = [32, 32], strides = [1, 1]} : vector<32x38xf32> to vector<32x32xf32>
    %13 = vector.extract_strided_slice %9 {offsets = [0, 3], sizes = [32, 32], strides = [1, 1]} : vector<32x38xf32> to vector<32x32xf32>
    %14 = vector.extract_strided_slice %9 {offsets = [0, 4], sizes = [32, 32], strides = [1, 1]} : vector<32x38xf32> to vector<32x32xf32>
    %15 = vector.extract_strided_slice %9 {offsets = [0, 5], sizes = [32, 32], strides = [1, 1]} : vector<32x38xf32> to vector<32x32xf32>
    %16 = vector.extract_strided_slice %9 {offsets = [0, 6], sizes = [32, 32], strides = [1, 1]} : vector<32x38xf32> to vector<32x32xf32>
    %17 = tpu.concatenate %10, %11, %12, %13, %14, %15, %16 in 0 : vector<32x32xf32>, vector<32x32xf32>, vector<32x32xf32>, vector<32x32xf32>, vector<32x32xf32>, vector<32x32xf32>, vector<32x32xf32> -> vector<224x32xf32>
    %c0_4 = arith.constant 0 : index
    %c0_5 = arith.constant 0 : index
    %18 = vector.load %arg3[%c0_4, %c0_5] : memref<16x224xf32, #tpu.memory_space<vmem>>, vector<16x224xf32>
    %cst_6 = arith.constant dense<0.000000e+00> : vector<16x32xf32>
    %19 = tpu.matmul %18, %17, %cst_6 {dimension_numbers = #tpu.dot_dimension_numbers<[1], [0], [0], [1], [0, 0, 1, 1], [], []>} : vector<16x224xf32>, vector<224x32xf32>, vector<16x32xf32> -> vector<16x32xf32>
    %c0_7 = arith.constant 0 : index
    %c0_8 = arith.constant 0 : index
    %20 = vector.load %arg4[%c0_7, %c0_8] : memref<16x1xf32, #tpu.memory_space<vmem>>, vector<16x1xf32>
    %21 = vector.broadcast %20 : vector<16x1xf32> to vector<16x32xf32>
    %22 = arith.addf %19, %21 : vector<16x32xf32>
    %c0_9 = arith.constant 0 : index
    %c0_10 = arith.constant 0 : index
    %c0_11 = arith.constant 0 : index
    %23 = vector.load %arg5[%c0_9, %c0_10, %c0_11] : memref<1x16x32xf32, #tpu.memory_space<vmem>>, vector<1x16x32xf32>
    %24 = vector.shape_cast %23 : vector<1x16x32xf32> to vector<16x32xf32>
    %25 = vector.shape_cast %22 : vector<16x32xf32> to vector<1x16x32xf32>
    tpu.vector_store %arg5[%c0_9, %c0_10, %c0_11], %25 {strides = array<i32>} : memref<1x16x32xf32, #tpu.memory_space<vmem>>, vector<1x16x32xf32>,
    return
  }
  func.func @transform_0(%arg0: i32) -> i32 {
    %c0_i32 = arith.constant 0 : i32
    %c0_i32_0 = arith.constant 0 : i32
    return %c0_i32 : i32
  }
  func.func @transform_1(%arg0: i32) -> (i32, i32, i32) {
    %c0_i32 = arith.constant 0 : i32
    %c0_i32_0 = arith.constant 0 : i32
    %c0_i32_1 = arith.constant 0 : i32
    return %arg0, %c0_i32, %c0_i32_0 : i32, i32, i32
  }
  func.func @transform_2(%arg0: i32) -> (i32, i32) {
    %c0_i32 = arith.constant 0 : i32
    %c0_i32_0 = arith.constant 0 : i32
    %c0_i32_1 = arith.constant 0 : i32
    return %c0_i32, %c0_i32_0 : i32, i32
  }
  func.func @transform_3(%arg0: i32) -> (i32, i32) {
    %c0_i32 = arith.constant 0 : i32
    %c0_i32_0 = arith.constant 0 : i32
    %c0_i32_1 = arith.constant 0 : i32
    return %c0_i32, %c0_i32_0 : i32, i32
  }
  func.func @transform_4(%arg0: i32) -> (i32, i32, i32) {
    %c0_i32 = arith.constant 0 : i32
    %c0_i32_0 = arith.constant 0 : i32
    %c0_i32_1 = arith.constant 0 : i32
    return %arg0, %c0_i32, %c0_i32_0 : i32, i32, i32
  }
}

module attributes {stable_mosaic.version = 11 : i64} {
  func.func @_conv1d_kernel(%arg0: i32, %arg1: memref<1xf32, #tpu.memory_space<smem>>, %arg2: memref<1x64x14xf32, #tpu.memory_space<vmem>>, %arg3: memref<32x448xf32, #tpu.memory_space<vmem>>, %arg4: memref<32x1xf32, #tpu.memory_space<vmem>>, %arg5: memref<1x32x8xf32, #tpu.memory_space<vmem>>) attributes {dimension_semantics = [#tpu.dimension_semantics<parallel>], iteration_bounds = array<i64: 2>, scalar_prefetch = 0 : i64, scratch_operands = 0 : i64, tpu.core_type = #tpu.core_type<tc>, window_params = [{transform_indices = @transform_0, window_bounds = array<i64: 1>}, {transform_indices = @transform_1, window_bounds = array<i64: 1, 64, 14>}, {pipeline_mode = #tpu.pipeline_mode<synchronous>, transform_indices = @transform_2, window_bounds = array<i64: 32, 448>}, {pipeline_mode = #tpu.pipeline_mode<synchronous>, transform_indices = @transform_3, window_bounds = array<i64: 32, 1>}, {transform_indices = @transform_4, window_bounds = array<i64: 1, 32, 8>}]} {
    %c0 = arith.constant 0 : index
    %c0_0 = arith.constant 0 : index
    %c0_1 = arith.constant 0 : index
    %0 = vector.load %arg2[%c0, %c0_0, %c0_1] : memref<1x64x14xf32, #tpu.memory_space<vmem>>, vector<1x64x14xf32>
    %1 = vector.shape_cast %0 : vector<1x64x14xf32> to vector<64x14xf32>
    %c0_2 = arith.constant 0 : index
    %2 = memref.load %arg1[%c0_2] : memref<1xf32, #tpu.memory_space<smem>>
    %cst = arith.constant 0.000000e+00 : f32
    %3 = vector.broadcast %cst : f32 to vector<64x14xf32>
    %4 = arith.maximumf %1, %3 : vector<64x14xf32>
    %cst_3 = arith.constant 0.000000e+00 : f32
    %5 = vector.broadcast %cst_3 : f32 to vector<64x14xf32>
    %6 = arith.minimumf %1, %5 : vector<64x14xf32>
    %7 = vector.broadcast %2 : f32 to vector<64x14xf32>
    %8 = arith.mulf %7, %6 : vector<64x14xf32>
    %9 = arith.addf %4, %8 : vector<64x14xf32>
    %10 = vector.extract_strided_slice %9 {offsets = [0, 0], sizes = [64, 8], strides = [1, 1]} : vector<64x14xf32> to vector<64x8xf32>
    %11 = vector.extract_strided_slice %9 {offsets = [0, 1], sizes = [64, 8], strides = [1, 1]} : vector<64x14xf32> to vector<64x8xf32>
    %12 = vector.extract_strided_slice %9 {offsets = [0, 2], sizes = [64, 8], strides = [1, 1]} : vector<64x14xf32> to vector<64x8xf32>
    %13 = vector.extract_strided_slice %9 {offsets = [0, 3], sizes = [64, 8], strides = [1, 1]} : vector<64x14xf32> to vector<64x8xf32>
    %14 = vector.extract_strided_slice %9 {offsets = [0, 4], sizes = [64, 8], strides = [1, 1]} : vector<64x14xf32> to vector<64x8xf32>
    %15 = vector.extract_strided_slice %9 {offsets = [0, 5], sizes = [64, 8], strides = [1, 1]} : vector<64x14xf32> to vector<64x8xf32>
    %16 = vector.extract_strided_slice %9 {offsets = [0, 6], sizes = [64, 8], strides = [1, 1]} : vector<64x14xf32> to vector<64x8xf32>
    %17 = tpu.concatenate %10, %11, %12, %13, %14, %15, %16 in 0 : vector<64x8xf32>, vector<64x8xf32>, vector<64x8xf32>, vector<64x8xf32>, vector<64x8xf32>, vector<64x8xf32>, vector<64x8xf32> -> vector<448x8xf32>
    %c0_4 = arith.constant 0 : index
    %c0_5 = arith.constant 0 : index
    %18 = vector.load %arg3[%c0_4, %c0_5] : memref<32x448xf32, #tpu.memory_space<vmem>>, vector<32x448xf32>
    %cst_6 = arith.constant dense<0.000000e+00> : vector<32x8xf32>
    %19 = tpu.matmul %18, %17, %cst_6 {dimension_numbers = #tpu.dot_dimension_numbers<[1], [0], [0], [1], [0, 0, 1, 1], [], []>} : vector<32x448xf32>, vector<448x8xf32>, vector<32x8xf32> -> vector<32x8xf32>
    %c0_7 = arith.constant 0 : index
    %c0_8 = arith.constant 0 : index
    %20 = vector.load %arg4[%c0_7, %c0_8] : memref<32x1xf32, #tpu.memory_space<vmem>>, vector<32x1xf32>
    %21 = vector.broadcast %20 : vector<32x1xf32> to vector<32x8xf32>
    %22 = arith.addf %19, %21 : vector<32x8xf32>
    %c0_9 = arith.constant 0 : index
    %c0_10 = arith.constant 0 : index
    %c0_11 = arith.constant 0 : index
    %23 = vector.load %arg5[%c0_9, %c0_10, %c0_11] : memref<1x32x8xf32, #tpu.memory_space<vmem>>, vector<1x32x8xf32>
    %24 = vector.shape_cast %23 : vector<1x32x8xf32> to vector<32x8xf32>
    %25 = vector.shape_cast %22 : vector<32x8xf32> to vector<1x32x8xf32>
    tpu.vector_store %arg5[%c0_9, %c0_10, %c0_11], %25 {strides = array<i32>} : memref<1x32x8xf32, #tpu.memory_space<vmem>>, vector<1x32x8xf32>,
    return
  }
  func.func @transform_0(%arg0: i32) -> i32 {
    %c0_i32 = arith.constant 0 : i32
    %c0_i32_0 = arith.constant 0 : i32
    return %c0_i32 : i32
  }
  func.func @transform_1(%arg0: i32) -> (i32, i32, i32) {
    %c0_i32 = arith.constant 0 : i32
    %c0_i32_0 = arith.constant 0 : i32
    %c0_i32_1 = arith.constant 0 : i32
    return %arg0, %c0_i32, %c0_i32_0 : i32, i32, i32
  }
  func.func @transform_2(%arg0: i32) -> (i32, i32) {
    %c0_i32 = arith.constant 0 : i32
    %c0_i32_0 = arith.constant 0 : i32
    %c0_i32_1 = arith.constant 0 : i32
    return %c0_i32, %c0_i32_0 : i32, i32
  }
  func.func @transform_3(%arg0: i32) -> (i32, i32) {
    %c0_i32 = arith.constant 0 : i32
    %c0_i32_0 = arith.constant 0 : i32
    %c0_i32_1 = arith.constant 0 : i32
    return %c0_i32, %c0_i32_0 : i32, i32
  }
  func.func @transform_4(%arg0: i32) -> (i32, i32, i32) {
    %c0_i32 = arith.constant 0 : i32
    %c0_i32_0 = arith.constant 0 : i32
    %c0_i32_1 = arith.constant 0 : i32
    return %arg0, %c0_i32, %c0_i32_0 : i32, i32, i32
  }
}

module attributes {stable_mosaic.version = 11 : i64} {
  func.func @_conv1d_kernel(%arg0: i32, %arg1: memref<1xf32, #tpu.memory_space<smem>>, %arg2: memref<1x128x8xf32, #tpu.memory_space<vmem>>, %arg3: memref<64x896xf32, #tpu.memory_space<vmem>>, %arg4: memref<64x1xf32, #tpu.memory_space<vmem>>, %arg5: memref<1x64x2xf32, #tpu.memory_space<vmem>>) attributes {dimension_semantics = [#tpu.dimension_semantics<parallel>], iteration_bounds = array<i64: 2>, scalar_prefetch = 0 : i64, scratch_operands = 0 : i64, tpu.core_type = #tpu.core_type<tc>, window_params = [{transform_indices = @transform_0, window_bounds = array<i64: 1>}, {transform_indices = @transform_1, window_bounds = array<i64: 1, 128, 8>}, {pipeline_mode = #tpu.pipeline_mode<synchronous>, transform_indices = @transform_2, window_bounds = array<i64: 64, 896>}, {pipeline_mode = #tpu.pipeline_mode<synchronous>, transform_indices = @transform_3, window_bounds = array<i64: 64, 1>}, {transform_indices = @transform_4, window_bounds = array<i64: 1, 64, 2>}]} {
    %c0 = arith.constant 0 : index
    %c0_0 = arith.constant 0 : index
    %c0_1 = arith.constant 0 : index
    %0 = vector.load %arg2[%c0, %c0_0, %c0_1] : memref<1x128x8xf32, #tpu.memory_space<vmem>>, vector<1x128x8xf32>
    %1 = vector.shape_cast %0 : vector<1x128x8xf32> to vector<128x8xf32>
    %c0_2 = arith.constant 0 : index
    %2 = memref.load %arg1[%c0_2] : memref<1xf32, #tpu.memory_space<smem>>
    %cst = arith.constant 0.000000e+00 : f32
    %3 = vector.broadcast %cst : f32 to vector<128x8xf32>
    %4 = arith.maximumf %1, %3 : vector<128x8xf32>
    %cst_3 = arith.constant 0.000000e+00 : f32
    %5 = vector.broadcast %cst_3 : f32 to vector<128x8xf32>
    %6 = arith.minimumf %1, %5 : vector<128x8xf32>
    %7 = vector.broadcast %2 : f32 to vector<128x8xf32>
    %8 = arith.mulf %7, %6 : vector<128x8xf32>
    %9 = arith.addf %4, %8 : vector<128x8xf32>
    %10 = vector.extract_strided_slice %9 {offsets = [0, 0], sizes = [128, 2], strides = [1, 1]} : vector<128x8xf32> to vector<128x2xf32>
    %11 = vector.extract_strided_slice %9 {offsets = [0, 1], sizes = [128, 2], strides = [1, 1]} : vector<128x8xf32> to vector<128x2xf32>
    %12 = vector.extract_strided_slice %9 {offsets = [0, 2], sizes = [128, 2], strides = [1, 1]} : vector<128x8xf32> to vector<128x2xf32>
    %13 = vector.extract_strided_slice %9 {offsets = [0, 3], sizes = [128, 2], strides = [1, 1]} : vector<128x8xf32> to vector<128x2xf32>
    %14 = vector.extract_strided_slice %9 {offsets = [0, 4], sizes = [128, 2], strides = [1, 1]} : vector<128x8xf32> to vector<128x2xf32>
    %15 = vector.extract_strided_slice %9 {offsets = [0, 5], sizes = [128, 2], strides = [1, 1]} : vector<128x8xf32> to vector<128x2xf32>
    %16 = vector.extract_strided_slice %9 {offsets = [0, 6], sizes = [128, 2], strides = [1, 1]} : vector<128x8xf32> to vector<128x2xf32>
    %17 = tpu.concatenate %10, %11, %12, %13, %14, %15, %16 in 0 : vector<128x2xf32>, vector<128x2xf32>, vector<128x2xf32>, vector<128x2xf32>, vector<128x2xf32>, vector<128x2xf32>, vector<128x2xf32> -> vector<896x2xf32>
    %c0_4 = arith.constant 0 : index
    %c0_5 = arith.constant 0 : index
    %18 = vector.load %arg3[%c0_4, %c0_5] : memref<64x896xf32, #tpu.memory_space<vmem>>, vector<64x896xf32>
    %cst_6 = arith.constant dense<0.000000e+00> : vector<64x2xf32>
    %19 = tpu.matmul %18, %17, %cst_6 {dimension_numbers = #tpu.dot_dimension_numbers<[1], [0], [0], [1], [0, 0, 1, 1], [], []>} : vector<64x896xf32>, vector<896x2xf32>, vector<64x2xf32> -> vector<64x2xf32>
    %c0_7 = arith.constant 0 : index
    %c0_8 = arith.constant 0 : index
    %20 = vector.load %arg4[%c0_7, %c0_8] : memref<64x1xf32, #tpu.memory_space<vmem>>, vector<64x1xf32>
    %21 = vector.broadcast %20 : vector<64x1xf32> to vector<64x2xf32>
    %22 = arith.addf %19, %21 : vector<64x2xf32>
    %c0_9 = arith.constant 0 : index
    %c0_10 = arith.constant 0 : index
    %c0_11 = arith.constant 0 : index
    %23 = vector.load %arg5[%c0_9, %c0_10, %c0_11] : memref<1x64x2xf32, #tpu.memory_space<vmem>>, vector<1x64x2xf32>
    %24 = vector.shape_cast %23 : vector<1x64x2xf32> to vector<64x2xf32>
    %25 = vector.shape_cast %22 : vector<64x2xf32> to vector<1x64x2xf32>
    tpu.vector_store %arg5[%c0_9, %c0_10, %c0_11], %25 {strides = array<i32>} : memref<1x64x2xf32, #tpu.memory_space<vmem>>, vector<1x64x2xf32>,
    return
  }
  func.func @transform_0(%arg0: i32) -> i32 {
    %c0_i32 = arith.constant 0 : i32
    %c0_i32_0 = arith.constant 0 : i32
    return %c0_i32 : i32
  }
  func.func @transform_1(%arg0: i32) -> (i32, i32, i32) {
    %c0_i32 = arith.constant 0 : i32
    %c0_i32_0 = arith.constant 0 : i32
    %c0_i32_1 = arith.constant 0 : i32
    return %arg0, %c0_i32, %c0_i32_0 : i32, i32, i32
  }
  func.func @transform_2(%arg0: i32) -> (i32, i32) {
    %c0_i32 = arith.constant 0 : i32
    %c0_i32_0 = arith.constant 0 : i32
    %c0_i32_1 = arith.constant 0 : i32
    return %c0_i32, %c0_i32_0 : i32, i32
  }
  func.func @transform_3(%arg0: i32) -> (i32, i32) {
    %c0_i32 = arith.constant 0 : i32
    %c0_i32_0 = arith.constant 0 : i32
    %c0_i32_1 = arith.constant 0 : i32
    return %c0_i32, %c0_i32_0 : i32, i32
  }
  func.func @transform_4(%arg0: i32) -> (i32, i32, i32) {
    %c0_i32 = arith.constant 0 : i32
    %c0_i32_0 = arith.constant 0 : i32
    %c0_i32_1 = arith.constant 0 : i32
    return %arg0, %c0_i32, %c0_i32_0 : i32, i32, i32
  }
}

module attributes {stable_mosaic.version = 11 : i64} {
  func.func @_self_attention_kernel(%arg0: i32, %arg1: memref<1xf32, #tpu.memory_space<smem>>, %arg2: memref<1xf32, #tpu.memory_space<smem>>, %arg3: memref<1x64x2xf32, #tpu.memory_space<vmem>>, %arg4: memref<8x64xf32, #tpu.memory_space<vmem>>, %arg5: memref<8x1xf32, #tpu.memory_space<vmem>>, %arg6: memref<8x64xf32, #tpu.memory_space<vmem>>, %arg7: memref<8x1xf32, #tpu.memory_space<vmem>>, %arg8: memref<64x64xf32, #tpu.memory_space<vmem>>, %arg9: memref<64x1xf32, #tpu.memory_space<vmem>>, %arg10: memref<1x64x2xf32, #tpu.memory_space<vmem>>) attributes {dimension_semantics = [#tpu.dimension_semantics<parallel>], iteration_bounds = array<i64: 2>, scalar_prefetch = 0 : i64, scratch_operands = 0 : i64, tpu.core_type = #tpu.core_type<tc>, window_params = [{transform_indices = @transform_0, window_bounds = array<i64: 1>}, {transform_indices = @transform_1, window_bounds = array<i64: 1>}, {transform_indices = @transform_2, window_bounds = array<i64: 1, 64, 2>}, {pipeline_mode = #tpu.pipeline_mode<synchronous>, transform_indices = @transform_3, window_bounds = array<i64: 8, 64>}, {pipeline_mode = #tpu.pipeline_mode<synchronous>, transform_indices = @transform_4, window_bounds = array<i64: 8, 1>}, {pipeline_mode = #tpu.pipeline_mode<synchronous>, transform_indices = @transform_5, window_bounds = array<i64: 8, 64>}, {pipeline_mode = #tpu.pipeline_mode<synchronous>, transform_indices = @transform_6, window_bounds = array<i64: 8, 1>}, {pipeline_mode = #tpu.pipeline_mode<synchronous>, transform_indices = @transform_7, window_bounds = array<i64: 64, 64>}, {pipeline_mode = #tpu.pipeline_mode<synchronous>, transform_indices = @transform_8, window_bounds = array<i64: 64, 1>}, {transform_indices = @transform_9, window_bounds = array<i64: 1, 64, 2>}]} {
    %c0 = arith.constant 0 : index
    %c0_0 = arith.constant 0 : index
    %c0_1 = arith.constant 0 : index
    %0 = vector.load %arg3[%c0, %c0_0, %c0_1] : memref<1x64x2xf32, #tpu.memory_space<vmem>>, vector<1x64x2xf32>
    %1 = vector.shape_cast %0 : vector<1x64x2xf32> to vector<64x2xf32>
    %c0_2 = arith.constant 0 : index
    %2 = memref.load %arg2[%c0_2] : memref<1xf32, #tpu.memory_space<smem>>
    %cst = arith.constant 0.000000e+00 : f32
    %3 = vector.broadcast %cst : f32 to vector<64x2xf32>
    %4 = arith.maximumf %1, %3 : vector<64x2xf32>
    %cst_3 = arith.constant 0.000000e+00 : f32
    %5 = vector.broadcast %cst_3 : f32 to vector<64x2xf32>
    %6 = arith.minimumf %1, %5 : vector<64x2xf32>
    %7 = vector.broadcast %2 : f32 to vector<64x2xf32>
    %8 = arith.mulf %7, %6 : vector<64x2xf32>
    %9 = arith.addf %4, %8 : vector<64x2xf32>
    %c0_4 = arith.constant 0 : index
    %c0_5 = arith.constant 0 : index
    %10 = vector.load %arg4[%c0_4, %c0_5] : memref<8x64xf32, #tpu.memory_space<vmem>>, vector<8x64xf32>
    %cst_6 = arith.constant dense<0.000000e+00> : vector<8x2xf32>
    %11 = tpu.matmul %10, %9, %cst_6 {dimension_numbers = #tpu.dot_dimension_numbers<[1], [0], [0], [1], [0, 0, 1, 1], [], []>} : vector<8x64xf32>, vector<64x2xf32>, vector<8x2xf32> -> vector<8x2xf32>
    %c0_7 = arith.constant 0 : index
    %c0_8 = arith.constant 0 : index
    %12 = vector.load %arg5[%c0_7, %c0_8] : memref<8x1xf32, #tpu.memory_space<vmem>>, vector<8x1xf32>
    %13 = vector.broadcast %12 : vector<8x1xf32> to vector<8x2xf32>
    %14 = arith.addf %11, %13 : vector<8x2xf32>
    %c0_9 = arith.constant 0 : index
    %c0_10 = arith.constant 0 : index
    %15 = vector.load %arg6[%c0_9, %c0_10] : memref<8x64xf32, #tpu.memory_space<vmem>>, vector<8x64xf32>
    %cst_11 = arith.constant dense<0.000000e+00> : vector<8x2xf32>
    %16 = tpu.matmul %15, %9, %cst_11 {dimension_numbers = #tpu.dot_dimension_numbers<[1], [0], [0], [1], [0, 0, 1, 1], [], []>} : vector<8x64xf32>, vector<64x2xf32>, vector<8x2xf32> -> vector<8x2xf32>
    %c0_12 = arith.constant 0 : index
    %c0_13 = arith.constant 0 : index
    %17 = vector.load %arg7[%c0_12, %c0_13] : memref<8x1xf32, #tpu.memory_space<vmem>>, vector<8x1xf32>
    %18 = vector.broadcast %17 : vector<8x1xf32> to vector<8x2xf32>
    %19 = arith.addf %16, %18 : vector<8x2xf32>
    %c0_14 = arith.constant 0 : index
    %c0_15 = arith.constant 0 : index
    %20 = vector.load %arg8[%c0_14, %c0_15] : memref<64x64xf32, #tpu.memory_space<vmem>>, vector<64x64xf32>
    %cst_16 = arith.constant dense<0.000000e+00> : vector<64x2xf32>
    %21 = tpu.matmul %20, %9, %cst_16 {dimension_numbers = #tpu.dot_dimension_numbers<[1], [0], [0], [1], [0, 0, 1, 1], [], []>} : vector<64x64xf32>, vector<64x2xf32>, vector<64x2xf32> -> vector<64x2xf32>
    %c0_17 = arith.constant 0 : index
    %c0_18 = arith.constant 0 : index
    %22 = vector.load %arg9[%c0_17, %c0_18] : memref<64x1xf32, #tpu.memory_space<vmem>>, vector<64x1xf32>
    %23 = vector.broadcast %22 : vector<64x1xf32> to vector<64x2xf32>
    %24 = arith.addf %21, %23 : vector<64x2xf32>
    %cst_19 = arith.constant dense<0.000000e+00> : vector<2x2xf32>
    %25 = tpu.matmul %19, %14, %cst_19 {dimension_numbers = #tpu.dot_dimension_numbers<[0], [0], [1], [1], [0, 1, 1, 1], [], []>} : vector<8x2xf32>, vector<8x2xf32>, vector<2x2xf32> -> vector<2x2xf32>
    %cst_20 = arith.constant dense<0xFF800000> : vector<2xf32>
    %26 = vector.multi_reduction <maximumf>, %25, %cst_20 [0] : vector<2x2xf32> to vector<2xf32>
    %27 = vector.shape_cast %26 : vector<2xf32> to vector<1x2xf32>
    %28 = vector.broadcast %27 : vector<1x2xf32> to vector<2x2xf32>
    %29 = arith.subf %25, %28 : vector<2x2xf32>
    %30 = math.exp %29 : vector<2x2xf32>
    %cst_21 = arith.constant dense<0.000000e+00> : vector<2xf32>
    %31 = vector.multi_reduction <add>, %30, %cst_21 [0] : vector<2x2xf32> to vector<2xf32>
    %32 = vector.shape_cast %31 : vector<2xf32> to vector<1x2xf32>
    %cst_22 = arith.constant 1.000000e+00 : f32
    %33 = vector.broadcast %cst_22 : f32 to vector<1x2xf32>
    %34 = arith.divf %33, %32 : vector<1x2xf32>
    %cst_23 = arith.constant dense<0.000000e+00> : vector<64x2xf32>
    %35 = tpu.matmul %24, %30, %cst_23 {dimension_numbers = #tpu.dot_dimension_numbers<[1], [0], [0], [1], [0, 0, 1, 1], [], []>} : vector<64x2xf32>, vector<2x2xf32>, vector<64x2xf32> -> vector<64x2xf32>
    %c0_24 = arith.constant 0 : index
    %36 = memref.load %arg1[%c0_24] : memref<1xf32, #tpu.memory_space<smem>>
    %37 = vector.broadcast %34 : vector<1x2xf32> to vector<64x2xf32>
    %38 = arith.mulf %35, %37 : vector<64x2xf32>
    %39 = vector.broadcast %36 : f32 to vector<64x2xf32>
    %40 = arith.mulf %39, %38 : vector<64x2xf32>
    %41 = arith.addf %40, %9 : vector<64x2xf32>
    %c0_25 = arith.constant 0 : index
    %c0_26 = arith.constant 0 : index
    %c0_27 = arith.constant 0 : index
    %42 = vector.load %arg10[%c0_25, %c0_26, %c0_27] : memref<1x64x2xf32, #tpu.memory_space<vmem>>, vector<1x64x2xf32>
    %43 = vector.shape_cast %42 : vector<1x64x2xf32> to vector<64x2xf32>
    %44 = vector.shape_cast %41 : vector<64x2xf32> to vector<1x64x2xf32>
    tpu.vector_store %arg10[%c0_25, %c0_26, %c0_27], %44 {strides = array<i32>} : memref<1x64x2xf32, #tpu.memory_space<vmem>>, vector<1x64x2xf32>,
    return
  }
  func.func @transform_0(%arg0: i32) -> i32 {
    %c0_i32 = arith.constant 0 : i32
    %c0_i32_0 = arith.constant 0 : i32
    return %c0_i32 : i32
  }
  func.func @transform_1(%arg0: i32) -> i32 {
    %c0_i32 = arith.constant 0 : i32
    %c0_i32_0 = arith.constant 0 : i32
    return %c0_i32 : i32
  }
  func.func @transform_2(%arg0: i32) -> (i32, i32, i32) {
    %c0_i32 = arith.constant 0 : i32
    %c0_i32_0 = arith.constant 0 : i32
    %c0_i32_1 = arith.constant 0 : i32
    return %arg0, %c0_i32, %c0_i32_0 : i32, i32, i32
  }
  func.func @transform_3(%arg0: i32) -> (i32, i32) {
    %c0_i32 = arith.constant 0 : i32
    %c0_i32_0 = arith.constant 0 : i32
    %c0_i32_1 = arith.constant 0 : i32
    return %c0_i32, %c0_i32_0 : i32, i32
  }
  func.func @transform_4(%arg0: i32) -> (i32, i32) {
    %c0_i32 = arith.constant 0 : i32
    %c0_i32_0 = arith.constant 0 : i32
    %c0_i32_1 = arith.constant 0 : i32
    return %c0_i32, %c0_i32_0 : i32, i32
  }
  func.func @transform_5(%arg0: i32) -> (i32, i32) {
    %c0_i32 = arith.constant 0 : i32
    %c0_i32_0 = arith.constant 0 : i32
    %c0_i32_1 = arith.constant 0 : i32
    return %c0_i32, %c0_i32_0 : i32, i32
  }
  func.func @transform_6(%arg0: i32) -> (i32, i32) {
    %c0_i32 = arith.constant 0 : i32
    %c0_i32_0 = arith.constant 0 : i32
    %c0_i32_1 = arith.constant 0 : i32
    return %c0_i32, %c0_i32_0 : i32, i32
  }
  func.func @transform_7(%arg0: i32) -> (i32, i32) {
    %c0_i32 = arith.constant 0 : i32
    %c0_i32_0 = arith.constant 0 : i32
    %c0_i32_1 = arith.constant 0 : i32
    return %c0_i32, %c0_i32_0 : i32, i32
  }
  func.func @transform_8(%arg0: i32) -> (i32, i32) {
    %c0_i32 = arith.constant 0 : i32
    %c0_i32_0 = arith.constant 0 : i32
    %c0_i32_1 = arith.constant 0 : i32
    return %c0_i32, %c0_i32_0 : i32, i32
  }
  func.func @transform_9(%arg0: i32) -> (i32, i32, i32) {
    %c0_i32 = arith.constant 0 : i32
    %c0_i32_0 = arith.constant 0 : i32
    %c0_i32_1 = arith.constant 0 : i32
    return %arg0, %c0_i32, %c0_i32_0 : i32, i32, i32
  }
}

module attributes {stable_mosaic.version = 11 : i64} {
  func.func @_tconv1d_kernel(%arg0: i32, %arg1: memref<1xf32, #tpu.memory_space<smem>>, %arg2: memref<1x64x8xf32, #tpu.memory_space<vmem>>, %arg3: memref<128x448xf32, #tpu.memory_space<vmem>>, %arg4: memref<128x1xf32, #tpu.memory_space<vmem>>, %arg5: memref<1x4x32x2xf32, #tpu.memory_space<vmem>>) attributes {dimension_semantics = [#tpu.dimension_semantics<parallel>], iteration_bounds = array<i64: 2>, scalar_prefetch = 0 : i64, scratch_operands = 0 : i64, tpu.core_type = #tpu.core_type<tc>, window_params = [{transform_indices = @transform_0, window_bounds = array<i64: 1>}, {transform_indices = @transform_1, window_bounds = array<i64: 1, 64, 8>}, {pipeline_mode = #tpu.pipeline_mode<synchronous>, transform_indices = @transform_2, window_bounds = array<i64: 128, 448>}, {pipeline_mode = #tpu.pipeline_mode<synchronous>, transform_indices = @transform_3, window_bounds = array<i64: 128, 1>}, {transform_indices = @transform_4, window_bounds = array<i64: 1, 4, 32, 2>}]} {
    %c0 = arith.constant 0 : index
    %0 = memref.load %arg1[%c0] : memref<1xf32, #tpu.memory_space<smem>>
    %c0_0 = arith.constant 0 : index
    %c0_1 = arith.constant 0 : index
    %c0_2 = arith.constant 0 : index
    %1 = vector.load %arg2[%c0_0, %c0_1, %c0_2] : memref<1x64x8xf32, #tpu.memory_space<vmem>>, vector<1x64x8xf32>
    %2 = vector.shape_cast %1 : vector<1x64x8xf32> to vector<64x8xf32>
    %cst = arith.constant 0.000000e+00 : f32
    %3 = vector.broadcast %cst : f32 to vector<64x8xf32>
    %4 = arith.maximumf %2, %3 : vector<64x8xf32>
    %cst_3 = arith.constant 0.000000e+00 : f32
    %5 = vector.broadcast %cst_3 : f32 to vector<64x8xf32>
    %6 = arith.minimumf %2, %5 : vector<64x8xf32>
    %7 = vector.broadcast %0 : f32 to vector<64x8xf32>
    %8 = arith.mulf %7, %6 : vector<64x8xf32>
    %9 = arith.addf %4, %8 : vector<64x8xf32>
    %10 = vector.extract_strided_slice %9 {offsets = [0, 0], sizes = [64, 2], strides = [1, 1]} : vector<64x8xf32> to vector<64x2xf32>
    %11 = vector.extract_strided_slice %9 {offsets = [0, 1], sizes = [64, 2], strides = [1, 1]} : vector<64x8xf32> to vector<64x2xf32>
    %12 = vector.extract_strided_slice %9 {offsets = [0, 2], sizes = [64, 2], strides = [1, 1]} : vector<64x8xf32> to vector<64x2xf32>
    %13 = vector.extract_strided_slice %9 {offsets = [0, 3], sizes = [64, 2], strides = [1, 1]} : vector<64x8xf32> to vector<64x2xf32>
    %14 = vector.extract_strided_slice %9 {offsets = [0, 4], sizes = [64, 2], strides = [1, 1]} : vector<64x8xf32> to vector<64x2xf32>
    %15 = vector.extract_strided_slice %9 {offsets = [0, 5], sizes = [64, 2], strides = [1, 1]} : vector<64x8xf32> to vector<64x2xf32>
    %16 = vector.extract_strided_slice %9 {offsets = [0, 6], sizes = [64, 2], strides = [1, 1]} : vector<64x8xf32> to vector<64x2xf32>
    %17 = tpu.concatenate %10, %11, %12, %13, %14, %15, %16 in 0 : vector<64x2xf32>, vector<64x2xf32>, vector<64x2xf32>, vector<64x2xf32>, vector<64x2xf32>, vector<64x2xf32>, vector<64x2xf32> -> vector<448x2xf32>
    %c0_4 = arith.constant 0 : index
    %c0_5 = arith.constant 0 : index
    %18 = vector.load %arg3[%c0_4, %c0_5] : memref<128x448xf32, #tpu.memory_space<vmem>>, vector<128x448xf32>
    %cst_6 = arith.constant dense<0.000000e+00> : vector<128x2xf32>
    %19 = tpu.matmul %18, %17, %cst_6 {dimension_numbers = #tpu.dot_dimension_numbers<[1], [0], [0], [1], [0, 0, 1, 1], [], []>} : vector<128x448xf32>, vector<448x2xf32>, vector<128x2xf32> -> vector<128x2xf32>
    %c0_7 = arith.constant 0 : index
    %c0_8 = arith.constant 0 : index
    %20 = vector.load %arg4[%c0_7, %c0_8] : memref<128x1xf32, #tpu.memory_space<vmem>>, vector<128x1xf32>
    %21 = vector.broadcast %20 : vector<128x1xf32> to vector<128x2xf32>
    %22 = arith.addf %19, %21 : vector<128x2xf32>
    %23 = vector.shape_cast %22 : vector<128x2xf32> to vector<4x32x2xf32>
    %c0_9 = arith.constant 0 : index
    %c0_10 = arith.constant 0 : index
    %c0_11 = arith.constant 0 : index
    %c0_12 = arith.constant 0 : index
    %24 = vector.load %arg5[%c0_9, %c0_10, %c0_11, %c0_12] : memref<1x4x32x2xf32, #tpu.memory_space<vmem>>, vector<1x4x32x2xf32>
    %25 = vector.shape_cast %24 : vector<1x4x32x2xf32> to vector<4x32x2xf32>
    %26 = vector.shape_cast %23 : vector<4x32x2xf32> to vector<1x4x32x2xf32>
    tpu.vector_store %arg5[%c0_9, %c0_10, %c0_11, %c0_12], %26 {strides = array<i32>} : memref<1x4x32x2xf32, #tpu.memory_space<vmem>>, vector<1x4x32x2xf32>,
    return
  }
  func.func @transform_0(%arg0: i32) -> i32 {
    %c0_i32 = arith.constant 0 : i32
    %c0_i32_0 = arith.constant 0 : i32
    return %c0_i32 : i32
  }
  func.func @transform_1(%arg0: i32) -> (i32, i32, i32) {
    %c0_i32 = arith.constant 0 : i32
    %c0_i32_0 = arith.constant 0 : i32
    %c0_i32_1 = arith.constant 0 : i32
    return %arg0, %c0_i32, %c0_i32_0 : i32, i32, i32
  }
  func.func @transform_2(%arg0: i32) -> (i32, i32) {
    %c0_i32 = arith.constant 0 : i32
    %c0_i32_0 = arith.constant 0 : i32
    %c0_i32_1 = arith.constant 0 : i32
    return %c0_i32, %c0_i32_0 : i32, i32
  }
  func.func @transform_3(%arg0: i32) -> (i32, i32) {
    %c0_i32 = arith.constant 0 : i32
    %c0_i32_0 = arith.constant 0 : i32
    %c0_i32_1 = arith.constant 0 : i32
    return %c0_i32, %c0_i32_0 : i32, i32
  }
  func.func @transform_4(%arg0: i32) -> (i32, i32, i32, i32) {
    %c0_i32 = arith.constant 0 : i32
    %c0_i32_0 = arith.constant 0 : i32
    %c0_i32_1 = arith.constant 0 : i32
    %c0_i32_2 = arith.constant 0 : i32
    return %arg0, %c0_i32, %c0_i32_0, %c0_i32_1 : i32, i32, i32, i32
  }
}

module attributes {stable_mosaic.version = 11 : i64} {
  func.func @_tconv1d_kernel(%arg0: i32, %arg1: memref<1xf32, #tpu.memory_space<smem>>, %arg2: memref<1x32x14xf32, #tpu.memory_space<vmem>>, %arg3: memref<1x32x14xf32, #tpu.memory_space<vmem>>, %arg4: memref<64x448xf32, #tpu.memory_space<vmem>>, %arg5: memref<64x1xf32, #tpu.memory_space<vmem>>, %arg6: memref<1x4x16x8xf32, #tpu.memory_space<vmem>>) attributes {dimension_semantics = [#tpu.dimension_semantics<parallel>], iteration_bounds = array<i64: 2>, scalar_prefetch = 0 : i64, scratch_operands = 0 : i64, tpu.core_type = #tpu.core_type<tc>, window_params = [{transform_indices = @transform_0, window_bounds = array<i64: 1>}, {transform_indices = @transform_1, window_bounds = array<i64: 1, 32, 14>}, {transform_indices = @transform_2, window_bounds = array<i64: 1, 32, 14>}, {pipeline_mode = #tpu.pipeline_mode<synchronous>, transform_indices = @transform_3, window_bounds = array<i64: 64, 448>}, {pipeline_mode = #tpu.pipeline_mode<synchronous>, transform_indices = @transform_4, window_bounds = array<i64: 64, 1>}, {transform_indices = @transform_5, window_bounds = array<i64: 1, 4, 16, 8>}]} {
    %c0 = arith.constant 0 : index
    %0 = memref.load %arg1[%c0] : memref<1xf32, #tpu.memory_space<smem>>
    %c0_0 = arith.constant 0 : index
    %c0_1 = arith.constant 0 : index
    %c0_2 = arith.constant 0 : index
    %1 = vector.load %arg2[%c0_0, %c0_1, %c0_2] : memref<1x32x14xf32, #tpu.memory_space<vmem>>, vector<1x32x14xf32>
    %2 = vector.shape_cast %1 : vector<1x32x14xf32> to vector<32x14xf32>
    %cst = arith.constant 0.000000e+00 : f32
    %3 = vector.broadcast %cst : f32 to vector<32x14xf32>
    %4 = arith.maximumf %2, %3 : vector<32x14xf32>
    %cst_3 = arith.constant 0.000000e+00 : f32
    %5 = vector.broadcast %cst_3 : f32 to vector<32x14xf32>
    %6 = arith.minimumf %2, %5 : vector<32x14xf32>
    %7 = vector.broadcast %0 : f32 to vector<32x14xf32>
    %8 = arith.mulf %7, %6 : vector<32x14xf32>
    %9 = arith.addf %4, %8 : vector<32x14xf32>
    %c0_4 = arith.constant 0 : index
    %c0_5 = arith.constant 0 : index
    %c0_6 = arith.constant 0 : index
    %10 = vector.load %arg3[%c0_4, %c0_5, %c0_6] : memref<1x32x14xf32, #tpu.memory_space<vmem>>, vector<1x32x14xf32>
    %11 = vector.shape_cast %10 : vector<1x32x14xf32> to vector<32x14xf32>
    %cst_7 = arith.constant 0.000000e+00 : f32
    %12 = vector.broadcast %cst_7 : f32 to vector<32x14xf32>
    %13 = arith.maximumf %11, %12 : vector<32x14xf32>
    %cst_8 = arith.constant 0.000000e+00 : f32
    %14 = vector.broadcast %cst_8 : f32 to vector<32x14xf32>
    %15 = arith.minimumf %11, %14 : vector<32x14xf32>
    %16 = vector.broadcast %0 : f32 to vector<32x14xf32>
    %17 = arith.mulf %16, %15 : vector<32x14xf32>
    %18 = arith.addf %13, %17 : vector<32x14xf32>
    %19 = tpu.concatenate %9, %18 in 0 : vector<32x14xf32>, vector<32x14xf32> -> vector<64x14xf32>
    %20 = vector.extract_strided_slice %19 {offsets = [0, 0], sizes = [64, 8], strides = [1, 1]} : vector<64x14xf32> to vector<64x8xf32>
    %21 = vector.extract_strided_slice %19 {offsets = [0, 1], sizes = [64, 8], strides = [1, 1]} : vector<64x14xf32> to vector<64x8xf32>
    %22 = vector.extract_strided_slice %19 {offsets = [0, 2], sizes = [64, 8], strides = [1, 1]} : vector<64x14xf32> to vector<64x8xf32>
    %23 = vector.extract_strided_slice %19 {offsets = [0, 3], sizes = [64, 8], strides = [1, 1]} : vector<64x14xf32> to vector<64x8xf32>
    %24 = vector.extract_strided_slice %19 {offsets = [0, 4], sizes = [64, 8], strides = [1, 1]} : vector<64x14xf32> to vector<64x8xf32>
    %25 = vector.extract_strided_slice %19 {offsets = [0, 5], sizes = [64, 8], strides = [1, 1]} : vector<64x14xf32> to vector<64x8xf32>
    %26 = vector.extract_strided_slice %19 {offsets = [0, 6], sizes = [64, 8], strides = [1, 1]} : vector<64x14xf32> to vector<64x8xf32>
    %27 = tpu.concatenate %20, %21, %22, %23, %24, %25, %26 in 0 : vector<64x8xf32>, vector<64x8xf32>, vector<64x8xf32>, vector<64x8xf32>, vector<64x8xf32>, vector<64x8xf32>, vector<64x8xf32> -> vector<448x8xf32>
    %c0_9 = arith.constant 0 : index
    %c0_10 = arith.constant 0 : index
    %28 = vector.load %arg4[%c0_9, %c0_10] : memref<64x448xf32, #tpu.memory_space<vmem>>, vector<64x448xf32>
    %cst_11 = arith.constant dense<0.000000e+00> : vector<64x8xf32>
    %29 = tpu.matmul %28, %27, %cst_11 {dimension_numbers = #tpu.dot_dimension_numbers<[1], [0], [0], [1], [0, 0, 1, 1], [], []>} : vector<64x448xf32>, vector<448x8xf32>, vector<64x8xf32> -> vector<64x8xf32>
    %c0_12 = arith.constant 0 : index
    %c0_13 = arith.constant 0 : index
    %30 = vector.load %arg5[%c0_12, %c0_13] : memref<64x1xf32, #tpu.memory_space<vmem>>, vector<64x1xf32>
    %31 = vector.broadcast %30 : vector<64x1xf32> to vector<64x8xf32>
    %32 = arith.addf %29, %31 : vector<64x8xf32>
    %33 = vector.shape_cast %32 : vector<64x8xf32> to vector<4x16x8xf32>
    %c0_14 = arith.constant 0 : index
    %c0_15 = arith.constant 0 : index
    %c0_16 = arith.constant 0 : index
    %c0_17 = arith.constant 0 : index
    %34 = vector.load %arg6[%c0_14, %c0_15, %c0_16, %c0_17] : memref<1x4x16x8xf32, #tpu.memory_space<vmem>>, vector<1x4x16x8xf32>
    %35 = vector.shape_cast %34 : vector<1x4x16x8xf32> to vector<4x16x8xf32>
    %36 = vector.shape_cast %33 : vector<4x16x8xf32> to vector<1x4x16x8xf32>
    tpu.vector_store %arg6[%c0_14, %c0_15, %c0_16, %c0_17], %36 {strides = array<i32>} : memref<1x4x16x8xf32, #tpu.memory_space<vmem>>, vector<1x4x16x8xf32>,
    return
  }
  func.func @transform_0(%arg0: i32) -> i32 {
    %c0_i32 = arith.constant 0 : i32
    %c0_i32_0 = arith.constant 0 : i32
    return %c0_i32 : i32
  }
  func.func @transform_1(%arg0: i32) -> (i32, i32, i32) {
    %c0_i32 = arith.constant 0 : i32
    %c0_i32_0 = arith.constant 0 : i32
    %c0_i32_1 = arith.constant 0 : i32
    return %arg0, %c0_i32, %c0_i32_0 : i32, i32, i32
  }
  func.func @transform_2(%arg0: i32) -> (i32, i32, i32) {
    %c0_i32 = arith.constant 0 : i32
    %c0_i32_0 = arith.constant 0 : i32
    %c0_i32_1 = arith.constant 0 : i32
    return %arg0, %c0_i32, %c0_i32_0 : i32, i32, i32
  }
  func.func @transform_3(%arg0: i32) -> (i32, i32) {
    %c0_i32 = arith.constant 0 : i32
    %c0_i32_0 = arith.constant 0 : i32
    %c0_i32_1 = arith.constant 0 : i32
    return %c0_i32, %c0_i32_0 : i32, i32
  }
  func.func @transform_4(%arg0: i32) -> (i32, i32) {
    %c0_i32 = arith.constant 0 : i32
    %c0_i32_0 = arith.constant 0 : i32
    %c0_i32_1 = arith.constant 0 : i32
    return %c0_i32, %c0_i32_0 : i32, i32
  }
  func.func @transform_5(%arg0: i32) -> (i32, i32, i32, i32) {
    %c0_i32 = arith.constant 0 : i32
    %c0_i32_0 = arith.constant 0 : i32
    %c0_i32_1 = arith.constant 0 : i32
    %c0_i32_2 = arith.constant 0 : i32
    return %arg0, %c0_i32, %c0_i32_0, %c0_i32_1 : i32, i32, i32, i32
  }
}

module attributes {stable_mosaic.version = 11 : i64} {
  func.func @_tconv1d_kernel(%arg0: i32, %arg1: memref<1xf32, #tpu.memory_space<smem>>, %arg2: memref<1x16x38xf32, #tpu.memory_space<vmem>>, %arg3: memref<1x16x38xf32, #tpu.memory_space<vmem>>, %arg4: memref<32x224xf32, #tpu.memory_space<vmem>>, %arg5: memref<32x1xf32, #tpu.memory_space<vmem>>, %arg6: memref<1x4x8x32xf32, #tpu.memory_space<vmem>>) attributes {dimension_semantics = [#tpu.dimension_semantics<parallel>], iteration_bounds = array<i64: 2>, scalar_prefetch = 0 : i64, scratch_operands = 0 : i64, tpu.core_type = #tpu.core_type<tc>, window_params = [{transform_indices = @transform_0, window_bounds = array<i64: 1>}, {transform_indices = @transform_1, window_bounds = array<i64: 1, 16, 38>}, {transform_indices = @transform_2, window_bounds = array<i64: 1, 16, 38>}, {pipeline_mode = #tpu.pipeline_mode<synchronous>, transform_indices = @transform_3, window_bounds = array<i64: 32, 224>}, {pipeline_mode = #tpu.pipeline_mode<synchronous>, transform_indices = @transform_4, window_bounds = array<i64: 32, 1>}, {transform_indices = @transform_5, window_bounds = array<i64: 1, 4, 8, 32>}]} {
    %c0 = arith.constant 0 : index
    %0 = memref.load %arg1[%c0] : memref<1xf32, #tpu.memory_space<smem>>
    %c0_0 = arith.constant 0 : index
    %c0_1 = arith.constant 0 : index
    %c0_2 = arith.constant 0 : index
    %1 = vector.load %arg2[%c0_0, %c0_1, %c0_2] : memref<1x16x38xf32, #tpu.memory_space<vmem>>, vector<1x16x38xf32>
    %2 = vector.shape_cast %1 : vector<1x16x38xf32> to vector<16x38xf32>
    %cst = arith.constant 0.000000e+00 : f32
    %3 = vector.broadcast %cst : f32 to vector<16x38xf32>
    %4 = arith.maximumf %2, %3 : vector<16x38xf32>
    %cst_3 = arith.constant 0.000000e+00 : f32
    %5 = vector.broadcast %cst_3 : f32 to vector<16x38xf32>
    %6 = arith.minimumf %2, %5 : vector<16x38xf32>
    %7 = vector.broadcast %0 : f32 to vector<16x38xf32>
    %8 = arith.mulf %7, %6 : vector<16x38xf32>
    %9 = arith.addf %4, %8 : vector<16x38xf32>
    %c0_4 = arith.constant 0 : index
    %c0_5 = arith.constant 0 : index
    %c0_6 = arith.constant 0 : index
    %10 = vector.load %arg3[%c0_4, %c0_5, %c0_6] : memref<1x16x38xf32, #tpu.memory_space<vmem>>, vector<1x16x38xf32>
    %11 = vector.shape_cast %10 : vector<1x16x38xf32> to vector<16x38xf32>
    %cst_7 = arith.constant 0.000000e+00 : f32
    %12 = vector.broadcast %cst_7 : f32 to vector<16x38xf32>
    %13 = arith.maximumf %11, %12 : vector<16x38xf32>
    %cst_8 = arith.constant 0.000000e+00 : f32
    %14 = vector.broadcast %cst_8 : f32 to vector<16x38xf32>
    %15 = arith.minimumf %11, %14 : vector<16x38xf32>
    %16 = vector.broadcast %0 : f32 to vector<16x38xf32>
    %17 = arith.mulf %16, %15 : vector<16x38xf32>
    %18 = arith.addf %13, %17 : vector<16x38xf32>
    %19 = tpu.concatenate %9, %18 in 0 : vector<16x38xf32>, vector<16x38xf32> -> vector<32x38xf32>
    %20 = vector.extract_strided_slice %19 {offsets = [0, 0], sizes = [32, 32], strides = [1, 1]} : vector<32x38xf32> to vector<32x32xf32>
    %21 = vector.extract_strided_slice %19 {offsets = [0, 1], sizes = [32, 32], strides = [1, 1]} : vector<32x38xf32> to vector<32x32xf32>
    %22 = vector.extract_strided_slice %19 {offsets = [0, 2], sizes = [32, 32], strides = [1, 1]} : vector<32x38xf32> to vector<32x32xf32>
    %23 = vector.extract_strided_slice %19 {offsets = [0, 3], sizes = [32, 32], strides = [1, 1]} : vector<32x38xf32> to vector<32x32xf32>
    %24 = vector.extract_strided_slice %19 {offsets = [0, 4], sizes = [32, 32], strides = [1, 1]} : vector<32x38xf32> to vector<32x32xf32>
    %25 = vector.extract_strided_slice %19 {offsets = [0, 5], sizes = [32, 32], strides = [1, 1]} : vector<32x38xf32> to vector<32x32xf32>
    %26 = vector.extract_strided_slice %19 {offsets = [0, 6], sizes = [32, 32], strides = [1, 1]} : vector<32x38xf32> to vector<32x32xf32>
    %27 = tpu.concatenate %20, %21, %22, %23, %24, %25, %26 in 0 : vector<32x32xf32>, vector<32x32xf32>, vector<32x32xf32>, vector<32x32xf32>, vector<32x32xf32>, vector<32x32xf32>, vector<32x32xf32> -> vector<224x32xf32>
    %c0_9 = arith.constant 0 : index
    %c0_10 = arith.constant 0 : index
    %28 = vector.load %arg4[%c0_9, %c0_10] : memref<32x224xf32, #tpu.memory_space<vmem>>, vector<32x224xf32>
    %cst_11 = arith.constant dense<0.000000e+00> : vector<32x32xf32>
    %29 = tpu.matmul %28, %27, %cst_11 {dimension_numbers = #tpu.dot_dimension_numbers<[1], [0], [0], [1], [0, 0, 1, 1], [], []>} : vector<32x224xf32>, vector<224x32xf32>, vector<32x32xf32> -> vector<32x32xf32>
    %c0_12 = arith.constant 0 : index
    %c0_13 = arith.constant 0 : index
    %30 = vector.load %arg5[%c0_12, %c0_13] : memref<32x1xf32, #tpu.memory_space<vmem>>, vector<32x1xf32>
    %31 = vector.broadcast %30 : vector<32x1xf32> to vector<32x32xf32>
    %32 = arith.addf %29, %31 : vector<32x32xf32>
    %33 = vector.shape_cast %32 : vector<32x32xf32> to vector<4x8x32xf32>
    %c0_14 = arith.constant 0 : index
    %c0_15 = arith.constant 0 : index
    %c0_16 = arith.constant 0 : index
    %c0_17 = arith.constant 0 : index
    %34 = vector.load %arg6[%c0_14, %c0_15, %c0_16, %c0_17] : memref<1x4x8x32xf32, #tpu.memory_space<vmem>>, vector<1x4x8x32xf32>
    %35 = vector.shape_cast %34 : vector<1x4x8x32xf32> to vector<4x8x32xf32>
    %36 = vector.shape_cast %33 : vector<4x8x32xf32> to vector<1x4x8x32xf32>
    tpu.vector_store %arg6[%c0_14, %c0_15, %c0_16, %c0_17], %36 {strides = array<i32>} : memref<1x4x8x32xf32, #tpu.memory_space<vmem>>, vector<1x4x8x32xf32>,
    return
  }
  func.func @transform_0(%arg0: i32) -> i32 {
    %c0_i32 = arith.constant 0 : i32
    %c0_i32_0 = arith.constant 0 : i32
    return %c0_i32 : i32
  }
  func.func @transform_1(%arg0: i32) -> (i32, i32, i32) {
    %c0_i32 = arith.constant 0 : i32
    %c0_i32_0 = arith.constant 0 : i32
    %c0_i32_1 = arith.constant 0 : i32
    return %arg0, %c0_i32, %c0_i32_0 : i32, i32, i32
  }
  func.func @transform_2(%arg0: i32) -> (i32, i32, i32) {
    %c0_i32 = arith.constant 0 : i32
    %c0_i32_0 = arith.constant 0 : i32
    %c0_i32_1 = arith.constant 0 : i32
    return %arg0, %c0_i32, %c0_i32_0 : i32, i32, i32
  }
  func.func @transform_3(%arg0: i32) -> (i32, i32) {
    %c0_i32 = arith.constant 0 : i32
    %c0_i32_0 = arith.constant 0 : i32
    %c0_i32_1 = arith.constant 0 : i32
    return %c0_i32, %c0_i32_0 : i32, i32
  }
  func.func @transform_4(%arg0: i32) -> (i32, i32) {
    %c0_i32 = arith.constant 0 : i32
    %c0_i32_0 = arith.constant 0 : i32
    %c0_i32_1 = arith.constant 0 : i32
    return %c0_i32, %c0_i32_0 : i32, i32
  }
  func.func @transform_5(%arg0: i32) -> (i32, i32, i32, i32) {
    %c0_i32 = arith.constant 0 : i32
    %c0_i32_0 = arith.constant 0 : i32
    %c0_i32_1 = arith.constant 0 : i32
    %c0_i32_2 = arith.constant 0 : i32
    return %arg0, %c0_i32, %c0_i32_0, %c0_i32_1 : i32, i32, i32, i32
  }
}

module attributes {stable_mosaic.version = 11 : i64} {
  func.func @_tconv1d_kernel(%arg0: i32, %arg1: memref<1xf32, #tpu.memory_space<smem>>, %arg2: memref<1x8x134xf32, #tpu.memory_space<vmem>>, %arg3: memref<1x8x134xf32, #tpu.memory_space<vmem>>, %arg4: memref<16x112xf32, #tpu.memory_space<vmem>>, %arg5: memref<16x1xf32, #tpu.memory_space<vmem>>, %arg6: memref<1x4x4x128xf32, #tpu.memory_space<vmem>>) attributes {dimension_semantics = [#tpu.dimension_semantics<parallel>], iteration_bounds = array<i64: 2>, scalar_prefetch = 0 : i64, scratch_operands = 0 : i64, tpu.core_type = #tpu.core_type<tc>, window_params = [{transform_indices = @transform_0, window_bounds = array<i64: 1>}, {transform_indices = @transform_1, window_bounds = array<i64: 1, 8, 134>}, {transform_indices = @transform_2, window_bounds = array<i64: 1, 8, 134>}, {pipeline_mode = #tpu.pipeline_mode<synchronous>, transform_indices = @transform_3, window_bounds = array<i64: 16, 112>}, {pipeline_mode = #tpu.pipeline_mode<synchronous>, transform_indices = @transform_4, window_bounds = array<i64: 16, 1>}, {transform_indices = @transform_5, window_bounds = array<i64: 1, 4, 4, 128>}]} {
    %c0 = arith.constant 0 : index
    %0 = memref.load %arg1[%c0] : memref<1xf32, #tpu.memory_space<smem>>
    %c0_0 = arith.constant 0 : index
    %c0_1 = arith.constant 0 : index
    %c0_2 = arith.constant 0 : index
    %1 = vector.load %arg2[%c0_0, %c0_1, %c0_2] : memref<1x8x134xf32, #tpu.memory_space<vmem>>, vector<1x8x134xf32>
    %2 = vector.shape_cast %1 : vector<1x8x134xf32> to vector<8x134xf32>
    %cst = arith.constant 0.000000e+00 : f32
    %3 = vector.broadcast %cst : f32 to vector<8x134xf32>
    %4 = arith.maximumf %2, %3 : vector<8x134xf32>
    %cst_3 = arith.constant 0.000000e+00 : f32
    %5 = vector.broadcast %cst_3 : f32 to vector<8x134xf32>
    %6 = arith.minimumf %2, %5 : vector<8x134xf32>
    %7 = vector.broadcast %0 : f32 to vector<8x134xf32>
    %8 = arith.mulf %7, %6 : vector<8x134xf32>
    %9 = arith.addf %4, %8 : vector<8x134xf32>
    %c0_4 = arith.constant 0 : index
    %c0_5 = arith.constant 0 : index
    %c0_6 = arith.constant 0 : index
    %10 = vector.load %arg3[%c0_4, %c0_5, %c0_6] : memref<1x8x134xf32, #tpu.memory_space<vmem>>, vector<1x8x134xf32>
    %11 = vector.shape_cast %10 : vector<1x8x134xf32> to vector<8x134xf32>
    %cst_7 = arith.constant 0.000000e+00 : f32
    %12 = vector.broadcast %cst_7 : f32 to vector<8x134xf32>
    %13 = arith.maximumf %11, %12 : vector<8x134xf32>
    %cst_8 = arith.constant 0.000000e+00 : f32
    %14 = vector.broadcast %cst_8 : f32 to vector<8x134xf32>
    %15 = arith.minimumf %11, %14 : vector<8x134xf32>
    %16 = vector.broadcast %0 : f32 to vector<8x134xf32>
    %17 = arith.mulf %16, %15 : vector<8x134xf32>
    %18 = arith.addf %13, %17 : vector<8x134xf32>
    %19 = tpu.concatenate %9, %18 in 0 : vector<8x134xf32>, vector<8x134xf32> -> vector<16x134xf32>
    %20 = vector.extract_strided_slice %19 {offsets = [0, 0], sizes = [16, 128], strides = [1, 1]} : vector<16x134xf32> to vector<16x128xf32>
    %21 = vector.extract_strided_slice %19 {offsets = [0, 1], sizes = [16, 128], strides = [1, 1]} : vector<16x134xf32> to vector<16x128xf32>
    %22 = vector.extract_strided_slice %19 {offsets = [0, 2], sizes = [16, 128], strides = [1, 1]} : vector<16x134xf32> to vector<16x128xf32>
    %23 = vector.extract_strided_slice %19 {offsets = [0, 3], sizes = [16, 128], strides = [1, 1]} : vector<16x134xf32> to vector<16x128xf32>
    %24 = vector.extract_strided_slice %19 {offsets = [0, 4], sizes = [16, 128], strides = [1, 1]} : vector<16x134xf32> to vector<16x128xf32>
    %25 = vector.extract_strided_slice %19 {offsets = [0, 5], sizes = [16, 128], strides = [1, 1]} : vector<16x134xf32> to vector<16x128xf32>
    %26 = vector.extract_strided_slice %19 {offsets = [0, 6], sizes = [16, 128], strides = [1, 1]} : vector<16x134xf32> to vector<16x128xf32>
    %27 = tpu.concatenate %20, %21, %22, %23, %24, %25, %26 in 0 : vector<16x128xf32>, vector<16x128xf32>, vector<16x128xf32>, vector<16x128xf32>, vector<16x128xf32>, vector<16x128xf32>, vector<16x128xf32> -> vector<112x128xf32>
    %c0_9 = arith.constant 0 : index
    %c0_10 = arith.constant 0 : index
    %28 = vector.load %arg4[%c0_9, %c0_10] : memref<16x112xf32, #tpu.memory_space<vmem>>, vector<16x112xf32>
    %cst_11 = arith.constant dense<0.000000e+00> : vector<16x128xf32>
    %29 = tpu.matmul %28, %27, %cst_11 {dimension_numbers = #tpu.dot_dimension_numbers<[1], [0], [0], [1], [0, 0, 1, 1], [], []>} : vector<16x112xf32>, vector<112x128xf32>, vector<16x128xf32> -> vector<16x128xf32>
    %c0_12 = arith.constant 0 : index
    %c0_13 = arith.constant 0 : index
    %30 = vector.load %arg5[%c0_12, %c0_13] : memref<16x1xf32, #tpu.memory_space<vmem>>, vector<16x1xf32>
    %31 = vector.broadcast %30 : vector<16x1xf32> to vector<16x128xf32>
    %32 = arith.addf %29, %31 : vector<16x128xf32>
    %33 = vector.shape_cast %32 : vector<16x128xf32> to vector<4x4x128xf32>
    %c0_14 = arith.constant 0 : index
    %c0_15 = arith.constant 0 : index
    %c0_16 = arith.constant 0 : index
    %c0_17 = arith.constant 0 : index
    %34 = vector.load %arg6[%c0_14, %c0_15, %c0_16, %c0_17] : memref<1x4x4x128xf32, #tpu.memory_space<vmem>>, vector<1x4x4x128xf32>
    %35 = vector.shape_cast %34 : vector<1x4x4x128xf32> to vector<4x4x128xf32>
    %36 = vector.shape_cast %33 : vector<4x4x128xf32> to vector<1x4x4x128xf32>
    tpu.vector_store %arg6[%c0_14, %c0_15, %c0_16, %c0_17], %36 {strides = array<i32>} : memref<1x4x4x128xf32, #tpu.memory_space<vmem>>, vector<1x4x4x128xf32>,
    return
  }
  func.func @transform_0(%arg0: i32) -> i32 {
    %c0_i32 = arith.constant 0 : i32
    %c0_i32_0 = arith.constant 0 : i32
    return %c0_i32 : i32
  }
  func.func @transform_1(%arg0: i32) -> (i32, i32, i32) {
    %c0_i32 = arith.constant 0 : i32
    %c0_i32_0 = arith.constant 0 : i32
    %c0_i32_1 = arith.constant 0 : i32
    return %arg0, %c0_i32, %c0_i32_0 : i32, i32, i32
  }
  func.func @transform_2(%arg0: i32) -> (i32, i32, i32) {
    %c0_i32 = arith.constant 0 : i32
    %c0_i32_0 = arith.constant 0 : i32
    %c0_i32_1 = arith.constant 0 : i32
    return %arg0, %c0_i32, %c0_i32_0 : i32, i32, i32
  }
  func.func @transform_3(%arg0: i32) -> (i32, i32) {
    %c0_i32 = arith.constant 0 : i32
    %c0_i32_0 = arith.constant 0 : i32
    %c0_i32_1 = arith.constant 0 : i32
    return %c0_i32, %c0_i32_0 : i32, i32
  }
  func.func @transform_4(%arg0: i32) -> (i32, i32) {
    %c0_i32 = arith.constant 0 : i32
    %c0_i32_0 = arith.constant 0 : i32
    %c0_i32_1 = arith.constant 0 : i32
    return %c0_i32, %c0_i32_0 : i32, i32
  }
  func.func @transform_5(%arg0: i32) -> (i32, i32, i32, i32) {
    %c0_i32 = arith.constant 0 : i32
    %c0_i32_0 = arith.constant 0 : i32
    %c0_i32_1 = arith.constant 0 : i32
    %c0_i32_2 = arith.constant 0 : i32
    return %arg0, %c0_i32, %c0_i32_0, %c0_i32_1 : i32, i32, i32, i32
  }
}

module attributes {stable_mosaic.version = 11 : i64} {
  func.func @_tconv1d_kernel(%arg0: i32, %arg1: memref<1xf32, #tpu.memory_space<smem>>, %arg2: memref<1x4x518xf32, #tpu.memory_space<vmem>>, %arg3: memref<1x4x518xf32, #tpu.memory_space<vmem>>, %arg4: memref<4x56xf32, #tpu.memory_space<vmem>>, %arg5: memref<4x1xf32, #tpu.memory_space<vmem>>, %arg6: memref<1x4x1x512xf32, #tpu.memory_space<vmem>>) attributes {dimension_semantics = [#tpu.dimension_semantics<parallel>], iteration_bounds = array<i64: 2>, scalar_prefetch = 0 : i64, scratch_operands = 0 : i64, tpu.core_type = #tpu.core_type<tc>, window_params = [{transform_indices = @transform_0, window_bounds = array<i64: 1>}, {transform_indices = @transform_1, window_bounds = array<i64: 1, 4, 518>}, {transform_indices = @transform_2, window_bounds = array<i64: 1, 4, 518>}, {pipeline_mode = #tpu.pipeline_mode<synchronous>, transform_indices = @transform_3, window_bounds = array<i64: 4, 56>}, {pipeline_mode = #tpu.pipeline_mode<synchronous>, transform_indices = @transform_4, window_bounds = array<i64: 4, 1>}, {transform_indices = @transform_5, window_bounds = array<i64: 1, 4, 1, 512>}]} {
    %c0 = arith.constant 0 : index
    %0 = memref.load %arg1[%c0] : memref<1xf32, #tpu.memory_space<smem>>
    %c0_0 = arith.constant 0 : index
    %c0_1 = arith.constant 0 : index
    %c0_2 = arith.constant 0 : index
    %1 = vector.load %arg2[%c0_0, %c0_1, %c0_2] : memref<1x4x518xf32, #tpu.memory_space<vmem>>, vector<1x4x518xf32>
    %2 = vector.shape_cast %1 : vector<1x4x518xf32> to vector<4x518xf32>
    %cst = arith.constant 0.000000e+00 : f32
    %3 = vector.broadcast %cst : f32 to vector<4x518xf32>
    %4 = arith.maximumf %2, %3 : vector<4x518xf32>
    %cst_3 = arith.constant 0.000000e+00 : f32
    %5 = vector.broadcast %cst_3 : f32 to vector<4x518xf32>
    %6 = arith.minimumf %2, %5 : vector<4x518xf32>
    %7 = vector.broadcast %0 : f32 to vector<4x518xf32>
    %8 = arith.mulf %7, %6 : vector<4x518xf32>
    %9 = arith.addf %4, %8 : vector<4x518xf32>
    %c0_4 = arith.constant 0 : index
    %c0_5 = arith.constant 0 : index
    %c0_6 = arith.constant 0 : index
    %10 = vector.load %arg3[%c0_4, %c0_5, %c0_6] : memref<1x4x518xf32, #tpu.memory_space<vmem>>, vector<1x4x518xf32>
    %11 = vector.shape_cast %10 : vector<1x4x518xf32> to vector<4x518xf32>
    %cst_7 = arith.constant 0.000000e+00 : f32
    %12 = vector.broadcast %cst_7 : f32 to vector<4x518xf32>
    %13 = arith.maximumf %11, %12 : vector<4x518xf32>
    %cst_8 = arith.constant 0.000000e+00 : f32
    %14 = vector.broadcast %cst_8 : f32 to vector<4x518xf32>
    %15 = arith.minimumf %11, %14 : vector<4x518xf32>
    %16 = vector.broadcast %0 : f32 to vector<4x518xf32>
    %17 = arith.mulf %16, %15 : vector<4x518xf32>
    %18 = arith.addf %13, %17 : vector<4x518xf32>
    %19 = tpu.concatenate %9, %18 in 0 : vector<4x518xf32>, vector<4x518xf32> -> vector<8x518xf32>
    %20 = vector.extract_strided_slice %19 {offsets = [0, 0], sizes = [8, 512], strides = [1, 1]} : vector<8x518xf32> to vector<8x512xf32>
    %21 = vector.extract_strided_slice %19 {offsets = [0, 1], sizes = [8, 512], strides = [1, 1]} : vector<8x518xf32> to vector<8x512xf32>
    %22 = vector.extract_strided_slice %19 {offsets = [0, 2], sizes = [8, 512], strides = [1, 1]} : vector<8x518xf32> to vector<8x512xf32>
    %23 = vector.extract_strided_slice %19 {offsets = [0, 3], sizes = [8, 512], strides = [1, 1]} : vector<8x518xf32> to vector<8x512xf32>
    %24 = vector.extract_strided_slice %19 {offsets = [0, 4], sizes = [8, 512], strides = [1, 1]} : vector<8x518xf32> to vector<8x512xf32>
    %25 = vector.extract_strided_slice %19 {offsets = [0, 5], sizes = [8, 512], strides = [1, 1]} : vector<8x518xf32> to vector<8x512xf32>
    %26 = vector.extract_strided_slice %19 {offsets = [0, 6], sizes = [8, 512], strides = [1, 1]} : vector<8x518xf32> to vector<8x512xf32>
    %27 = tpu.concatenate %20, %21, %22, %23, %24, %25, %26 in 0 : vector<8x512xf32>, vector<8x512xf32>, vector<8x512xf32>, vector<8x512xf32>, vector<8x512xf32>, vector<8x512xf32>, vector<8x512xf32> -> vector<56x512xf32>
    %c0_9 = arith.constant 0 : index
    %c0_10 = arith.constant 0 : index
    %28 = vector.load %arg4[%c0_9, %c0_10] : memref<4x56xf32, #tpu.memory_space<vmem>>, vector<4x56xf32>
    %cst_11 = arith.constant dense<0.000000e+00> : vector<4x512xf32>
    %29 = tpu.matmul %28, %27, %cst_11 {dimension_numbers = #tpu.dot_dimension_numbers<[1], [0], [0], [1], [0, 0, 1, 1], [], []>} : vector<4x56xf32>, vector<56x512xf32>, vector<4x512xf32> -> vector<4x512xf32>
    %c0_12 = arith.constant 0 : index
    %c0_13 = arith.constant 0 : index
    %30 = vector.load %arg5[%c0_12, %c0_13] : memref<4x1xf32, #tpu.memory_space<vmem>>, vector<4x1xf32>
    %31 = vector.broadcast %30 : vector<4x1xf32> to vector<4x512xf32>
    %32 = arith.addf %29, %31 : vector<4x512xf32>
    %33 = math.tanh %32 : vector<4x512xf32>
    %34 = vector.shape_cast %33 : vector<4x512xf32> to vector<4x1x512xf32>
    %c0_14 = arith.constant 0 : index
    %c0_15 = arith.constant 0 : index
    %c0_16 = arith.constant 0 : index
    %c0_17 = arith.constant 0 : index
    %35 = vector.load %arg6[%c0_14, %c0_15, %c0_16, %c0_17] : memref<1x4x1x512xf32, #tpu.memory_space<vmem>>, vector<1x4x1x512xf32>
    %36 = vector.shape_cast %35 : vector<1x4x1x512xf32> to vector<4x1x512xf32>
    %37 = vector.shape_cast %34 : vector<4x1x512xf32> to vector<1x4x1x512xf32>
    tpu.vector_store %arg6[%c0_14, %c0_15, %c0_16, %c0_17], %37 {strides = array<i32>} : memref<1x4x1x512xf32, #tpu.memory_space<vmem>>, vector<1x4x1x512xf32>,
    return
  }
  func.func @transform_0(%arg0: i32) -> i32 {
    %c0_i32 = arith.constant 0 : i32
    %c0_i32_0 = arith.constant 0 : i32
    return %c0_i32 : i32
  }
  func.func @transform_1(%arg0: i32) -> (i32, i32, i32) {
    %c0_i32 = arith.constant 0 : i32
    %c0_i32_0 = arith.constant 0 : i32
    %c0_i32_1 = arith.constant 0 : i32
    return %arg0, %c0_i32, %c0_i32_0 : i32, i32, i32
  }
  func.func @transform_2(%arg0: i32) -> (i32, i32, i32) {
    %c0_i32 = arith.constant 0 : i32
    %c0_i32_0 = arith.constant 0 : i32
    %c0_i32_1 = arith.constant 0 : i32
    return %arg0, %c0_i32, %c0_i32_0 : i32, i32, i32
  }
  func.func @transform_3(%arg0: i32) -> (i32, i32) {
    %c0_i32 = arith.constant 0 : i32
    %c0_i32_0 = arith.constant 0 : i32
    %c0_i32_1 = arith.constant 0 : i32
    return %c0_i32, %c0_i32_0 : i32, i32
  }
  func.func @transform_4(%arg0: i32) -> (i32, i32) {
    %c0_i32 = arith.constant 0 : i32
    %c0_i32_0 = arith.constant 0 : i32
    %c0_i32_1 = arith.constant 0 : i32
    return %c0_i32, %c0_i32_0 : i32, i32
  }
  func.func @transform_5(%arg0: i32) -> (i32, i32, i32, i32) {
    %c0_i32 = arith.constant 0 : i32
    %c0_i32_0 = arith.constant 0 : i32
    %c0_i32_1 = arith.constant 0 : i32
    %c0_i32_2 = arith.constant 0 : i32
    return %arg0, %c0_i32, %c0_i32_0, %c0_i32_1 : i32, i32, i32, i32
  }
}

</mosaic_0001>

<bundles_post_ra>
// kernel: generator_forward.13
= control target key start
LH: loop header
LB: loop body
LE: loop exit
PB: predicated region body
PF: predicated region fallthrough
CT: control target
= control target key end

     0   :  { %s517_s17 = smov 0   ;;  %s556_s0 = inlined_call_operand.<no memory space> [shape: f32[1], index: 0, kind: input, shape index: {}]   ;;  %s557_s1 = inlined_call_operand.vmem [shape: f32[2,16,134], index: 1, kind: input, shape index: {}]   ;;  %s558_s2 = inlined_call_operand.vmem [shape: f32[8,112], index: 2, kind: input, shape index: {}]   ;;  %s559_s3 = inlined_call_operand.vmem [shape: f32[8,1], index: 3, kind: input, shape index: {}]   ;;  %s560_s4 = inlined_call_operand.vmem [shape: f32[2,8,128], index: 4, kind: output, shape index: {}]  }
   0x1   :  { %9 = sst [smem:[#allocation2]] %s556_s0 }
   0x2 LB: > { %s386_s18 = sadd.s32 4294967295, %s480_s17   ;;  %p390_p0 = scmp.ge.s32.totalorder %s480_s17, 1  ;;  %s480_s17 = sphi %s517_s17, %s15_s17  }
   0x3   : > { %p163_p1 = scmp.lt.s32.totalorder %s480_s17, 3 }
   0x5   : > { %p164_p2 = pnand %p390_p0, %p163_p1 }
   0x6   : > { %p188_p3 = scmp.lt.s32.totalorder (!%p164_p2), %s386_s18, 1  ;;  %s201_s19 = sld [smem:[#allocation2]] (!%p164_p2) }
   0x7   : > { %167 = sbr.rel (%p164_p2) target bundleno = 304 (0x130), region = 36  ;;  %s482_s23 = smov (!%p164_p2), 122  }
   0x8   : > { %s483_s24 = smov (!%p164_p2), 123   ;;  %s484_s25 = smov (!%p164_p2), 124  }
   0x9   : > { %s485_s26 = smov (!%p164_p2), 125   ;;  %s486_s27 = smov (!%p164_p2), 126  }
   0xa   : > { %s487_s28 = smov (!%p164_p2), 127  }
   0xc   : > { %s562_s18 = smov (!%p188_p3, %s386_s18), 1  ;;  %v210_v2 = vstv %s201_s19  ;;  %vm296_vm0 = vcmask 998400   ;;  %v302_v30 = vld [vmem:[%s559_s3] sm:$0xff]  ;;  %v488_v31 = vmov 0   ;;  %vm283_vm1 = vcmask 1006592  }
   0xd   : > { %s397_s0 = sshll.u32 %s562_s18, 5  ;;  %473 = vset.pattern.permute.xlu0 %v488_v31  ;;  %vm270_vm2 = vcmask 1014784   ;;  %vm257_vm3 = vcmask 1022976   ;;  %vm244_vm4 = vcmask 1031168   ;;  %vm231_vm5 = vcmask 1039360   ;;  %s393_s7 = sshll.u32 %s562_s18, 3 }
   0xe   : > { %s192_s22 = scalar_lea.vmem %s557_s1, %s397_s0  ;;  %vm308_vm6 = vcmask 916480   ;;  %s196_s10 = scalar_lea.vmem %s560_s4, %s393_s7 }
   0xf   : > { %v199_v0 = vld [vmem:[%s192_s22 + $0x10] sm:$0xff]  ;;  %v200_v1 = vld [vmem:[%s192_s22 + $0x18] sm:$0xff]  ;;  %v197_v3 = vld [vmem:[%s192_s22] sm:$0xff] }
  0x10   : > { %v204_v4 = vmax.f32 %v199_v0, 0.0  ;;  %v205_v5 = vmax.f32 %v200_v1, 0.0  ;;  %v208_v6 = vmin.f32 %v199_v0, 0.0  ;;  %v209_v7 = vmin.f32 %v200_v1, 0.0  ;;  %v198_v8 = vld [vmem:[%s192_s22 + $0x8] sm:$0xff] }
  0x11   : > { %v206_v9 = vmin.f32 %v197_v3, 0.0  ;;  %v207_v10 = vmin.f32 %v198_v8, 0.0  ;;  %v202_v13 = vmax.f32 %v197_v3, 0.0  ;;  %v203_v14 = vmax.f32 %v198_v8, 0.0 }
  0x12   : > { %v213_v11 = vmul.f32 %v210_v2, %v208_v6  ;;  %v214_v12 = vmul.f32 %v210_v2, %v209_v7 }
  0x13   : > { %v211_v17 = vmul.f32 %v210_v2, %v206_v9  ;;  %v212_v18 = vmul.f32 %v210_v2, %v207_v10  ;;  %v301_v9 = vld [vmem:[%s558_s2] sm:$0xff] }
  0x14   : > { %v531_v15 = vadd.f32 %v213_v11, %v204_v4  ;;  %v218_v16 = vadd.f32 %v214_v12, %v205_v5 }
  0x15   : > { %v534_v20 = vadd.f32 %v211_v17, %v202_v13  ;;  %v216_v21 = vadd.f32 %v212_v18, %v203_v14 }
  0x16   : > { %v413_v19 = vpack.i.bf16 %v218_v16, %v531_v15 }
  0x17   : > { %v418_v22 = vpack.i.bf16 %v216_v21, %v534_v20 }
  0x18   : > { %414 = vrot.lane.b32.xlu0 %v413_v19, %s482_s23  ;;  %424 = vrot.lane.b32.xlu1 %v413_v19, %s483_s24 }
  0x19   : > { %434 = vrot.lane.b32.xlu2 %v413_v19, %s484_s25 }
  0x20   : > { %419 = vrot.lane.b32.xlu0 %v418_v22, %s482_s23  ;;  %429 = vrot.lane.b32.xlu1 %v418_v22, %s483_s24 }
  0x21   : > { %439 = vrot.lane.b32.xlu2 %v418_v22, %s484_s25 }
  0x28   : > { %444 = vrot.lane.b32.xlu0 %v413_v19, %s485_s26  ;;  %449 = vrot.lane.b32.xlu1 %v418_v22, %s485_s26 }
  0x29   : > { %454 = vrot.lane.b32.xlu2 %v413_v19, %s486_s27 }
  0x30   : > { %459 = vrot.lane.b32.xlu0 %v418_v22, %s486_s27  ;;  %464 = vrot.lane.b32.xlu1 %v413_v19, %s487_s28 }
  0x31   : > { %469 = vrot.lane.b32.xlu2 %v418_v22, %s487_s28 }
  0x38   : > { %305 = vperm.xlu0 %473, %v302_v30  }
  0x73   : > { %v435_v23 = vpop.permute.xlu2 %434 }
  0x74   : > { %v437_v42 = vunpack.i.h.bf16 %v435_v23  ;;  %v436_v43 = vunpack.i.l.bf16 %v435_v23 }
  0x76   : > { %v272_v52 = vsel %vm270_vm2, %v436_v43, %v437_v42 }
  0x7b   : > { %v440_v28 = vpop.permute.xlu2 %439 }
  0x7c   : > { %v442_v45 = vunpack.i.h.bf16 %v440_v28  ;;  %v441_v46 = vunpack.i.l.bf16 %v440_v28 }
  0x7e   : > { %v271_v55 = vsel %vm270_vm2, %v441_v46, %v442_v45 }
  0x83   : > { %v455_v41 = vpop.permute.xlu2 %454 }
  0x84   : > { %v457_v56 = vunpack.i.h.bf16 %v455_v41  ;;  %v456_v57 = vunpack.i.l.bf16 %v455_v41 }
  0x86   : > { %v246_v63 = vsel %vm244_vm4, %v456_v57, %v457_v56 }
  0x8a   : > { %v415_v24 = vpop.permute.xlu0 %414  ;;  %v425_v25 = vpop.permute.xlu1 %424 }
  0x8b   : > { %v417_v26 = vunpack.i.h.bf16 %v415_v24  ;;  %v416_v27 = vunpack.i.l.bf16 %v415_v24  ;;  %v427_v34 = vunpack.i.h.bf16 %v425_v25  ;;  %v426_v35 = vunpack.i.l.bf16 %v425_v25  ;;  %v470_v59 = vpop.permute.xlu2 %469 }
  0x8c   : > { %v472_v0 = vunpack.i.h.bf16 %v470_v59  ;;  %v471_v1 = vunpack.i.l.bf16 %v470_v59 }
  0x8d   : > { %v298_v29 = vsel %vm296_vm0, %v416_v27, %v417_v26  ;;  %v285_v44 = vsel %vm283_vm1, %v426_v35, %v427_v34 }
  0x8e   : > { %314 = vmatpush.msra.mxu0 %v298_v29  ;;  %v232_v8 = vsel %vm231_vm5, %v471_v1, %v472_v0 }
  0x92   : > { %v420_v32 = vpop.permute.xlu0 %419  ;;  %v430_v33 = vpop.permute.xlu1 %429 }
  0x93   : > { %v422_v36 = vunpack.i.h.bf16 %v420_v32  ;;  %v421_v37 = vunpack.i.l.bf16 %v420_v32  ;;  %v432_v38 = vunpack.i.h.bf16 %v430_v33  ;;  %v431_v39 = vunpack.i.l.bf16 %v430_v33 }
  0x95   : > { %v297_v40 = vsel %vm296_vm0, %v421_v37, %v422_v36  ;;  %v284_v47 = vsel %vm283_vm1, %v431_v39, %v432_v38 }
  0x96   : > { %315 = vmatpush.msra.mxu0 %v297_v40 }
  0x98   : > { %316 = vmatpush.msra.mxu0 %v285_v44 }
  0x9a   : > { %v445_v48 = vpop.permute.xlu0 %444  ;;  %317 = vmatpush.msra.mxu0 %v284_v47  ;;  %v450_v49 = vpop.permute.xlu1 %449 }
  0x9b   : > { %v447_v50 = vunpack.i.h.bf16 %v445_v48  ;;  %v446_v51 = vunpack.i.l.bf16 %v445_v48  ;;  %v452_v53 = vunpack.i.h.bf16 %v450_v49  ;;  %v451_v54 = vunpack.i.l.bf16 %v450_v49 }
  0x9c   : > { %318 = vmatpush.msra.mxu0 %v272_v52 }
  0x9d   : > { %v259_v58 = vsel %vm257_vm3, %v446_v51, %v447_v50  ;;  %v258_v60 = vsel %vm257_vm3, %v451_v54, %v452_v53 }
  0x9e   : > { %319 = vmatpush.msra.mxu0 %v271_v55 }
  0xa0   : > { %320 = vmatpush.msra.mxu0 %v259_v58 }
  0xa2   : > { %v460_v61 = vpop.permute.xlu0 %459  ;;  %321 = vmatpush.msra.mxu0 %v258_v60  ;;  %v465_v62 = vpop.permute.xlu1 %464 }
  0xa3   : > { %v462_v2 = vunpack.i.h.bf16 %v460_v61  ;;  %v461_v3 = vunpack.i.l.bf16 %v460_v61  ;;  %v467_v4 = vunpack.i.h.bf16 %v465_v62  ;;  %v466_v5 = vunpack.i.l.bf16 %v465_v62 }
  0xa4   : > { %322 = vmatpush.msra.mxu0 %v246_v63 }
  0xa5   : > { %v245_v6 = vsel %vm244_vm4, %v461_v3, %v462_v2  ;;  %v233_v7 = vsel %vm231_vm5, %v466_v5, %v467_v4 }
  0xa6   : > { %323 = vmatpush.msra.mxu0 %v245_v6 }
  0xa8   : > { %324 = vmatpush.msra.mxu0 %v233_v7 }
  0xaa   : > { %325 = vmatpush.msra.mxu0 %v232_v8  ;;  %v306_v10 = vpop.permute.xlu0 %305 }
  0xac   : > { %326 = vmatpush.msra.mxu0 %v531_v15 }
  0xae   : > { %327 = vmatpush.msra.mxu0 %v534_v20 }
  0xaf   : > { %394 = vmatmul.msk.f32.vlgmr.msra.gmra.mxu0 %vm308_vm6, %v301_v9 }
 0x12c   : > { %v329_v11 = vpop.f32.mrf.mxu0 }
 0x12d   : > { %v330_v12 = vadd.f32 %v329_v11, %v306_v10 }
 0x12f   : > { %332 = vst [vmem:[%s196_s10] sm:$0xff] %v330_v12 }
 0x130 PF: > { %s15_s17 = sadd.s32 1, %s480_s17  }
 0x131   : > { %p12_p4 = scmp.ge.s32.totalorder %s15_s17, 4  }
 0x133   :  { %14 = sbr.rel (!%p12_p4) target bundleno = 2 (0x2), region = 66 }

// kernel: generator_forward.12
= control target key start
LH: loop header
LB: loop body
LE: loop exit
PB: predicated region body
PF: predicated region fallthrough
CT: control target
= control target key end

     0   :  { %s712_s17 = smov 0   ;;  %s862_s0 = inlined_call_operand.<no memory space> [shape: f32[1], index: 0, kind: input, shape index: {}]   ;;  %s863_s1 = inlined_call_operand.vmem [shape: f32[2,4,518], index: 1, kind: input, shape index: {}]   ;;  %s864_s2 = inlined_call_operand.vmem [shape: f32[4,28], index: 2, kind: input, shape index: {}]   ;;  %s865_s3 = inlined_call_operand.vmem [shape: f32[4,1], index: 3, kind: input, shape index: {}]   ;;  %s866_s4 = inlined_call_operand.vmem [shape: f32[2,4,512], index: 4, kind: output, shape index: {}]  }
   0x1   :  { %9 = sst [smem:[#allocation2]] %s862_s0 }
   0x2 LB: > { %s582_s18 = sadd.s32 4294967295, %s675_s17   ;;  %p586_p0 = scmp.ge.s32.totalorder %s675_s17, 1  ;;  %s675_s17 = sphi %s712_s17, %s15_s17  }
   0x3   : > { %p163_p1 = scmp.lt.s32.totalorder %s675_s17, 3 }
   0x5   : > { %p164_p2 = pnand %p586_p0, %p163_p1 }
   0x6   : > { %p189_p3 = scmp.lt.s32.totalorder (!%p164_p2), %s582_s18, 1  ;;  %s202_s19 = sld [smem:[#allocation2]] (!%p164_p2) }
   0x7   : > { %167 = sbr.rel (%p164_p2) target bundleno = 348 (0x15c), region = 36  ;;  %s677_s23 = smov (!%p164_p2), 127  }
   0x8   : > { %s678_s24 = smov (!%p164_p2), 126   ;;  %s679_s25 = smov (!%p164_p2), 125  }
   0x9   : > { %s680_s26 = smov (!%p164_p2), 124   ;;  %s681_s27 = smov (!%p164_p2), 122  }
   0xa   : > { %s682_s28 = smov (!%p164_p2), 123  }
   0xc   : > { %s868_s18 = smov (!%p189_p3, %s582_s18), 1  ;;  %v209_v2 = vstv %s202_s19  ;;  %vm280_vm0 = vcmask 1031168   ;;  %vm403_vm1 = vcmask 1043456   ;;  %vm251_vm2 = vcmask 1039360  }
   0xd   : > { %s601_s0 = smul.u32 20, %s868_s18  ;;  %vm310_vm3 = vcmask 1022976   ;;  %vm398_vm4 = vcmask 998400   ;;  %vm339_vm5 = vcmask 1014784   ;;  %vm369_vm6 = vcmask 1006592   ;;  %s600_s7 = sshll.u32 %s868_s18, 4 }
   0xe   : > { %vm423_vm7 = vcmask 228352   ;;  %s198_s10 = scalar_lea.vmem %s866_s4, %s600_s7 }
   0xf   : > { %s193_s22 = scalar_lea.vmem %s863_s1, %s601_s0 }
  0x10   : > { %v200_v0 = vld [vmem:[%s193_s22 + $0x8] sm:$0xff]  ;;  %v201_v1 = vld [vmem:[%s193_s22 + $0x10] sm:$0xf]  ;;  %v199_v3 = vld [vmem:[%s193_s22] sm:$0xff] }
  0x11   : > { %v204_v4 = vmax.f32 %v200_v0, 0.0  ;;  %v205_v5 = vmax.f32 %v201_v1, 0.0  ;;  %v207_v6 = vmin.f32 %v200_v0, 0.0  ;;  %v208_v7 = vmin.f32 %v201_v1, 0.0 }
  0x12   : > { %v206_v8 = vmin.f32 %v199_v3, 0.0  ;;  %v203_v9 = vmax.f32 %v199_v3, 0.0 }
  0x13   : > { %v211_v10 = vmul.f32 %v209_v2, %v207_v6  ;;  %v212_v11 = vmul.f32 %v209_v2, %v208_v7  ;;  %v683_v7 = vmov 0  }
  0x14   : > { %v210_v12 = vmul.f32 %v209_v2, %v206_v8  ;;  %667 = vset.pattern.permute.xlu2 %v683_v7  ;;  %668 = vset.pattern.permute.xlu0 %v683_v7 }
  0x15   : > { %v726_v13 = vadd.f32 %v211_v10, %v204_v4  ;;  %v215_v14 = vadd.f32 %v212_v11, %v205_v5  ;;  %v417_v5 = vld [vmem:[%s865_s3] sm:$0xf] }
  0x16   : > { %v728_v15 = vadd.f32 %v210_v12, %v203_v9 }
  0x17   : > { %220 = vst [vmem:[#allocation1 + $0x10] ss:$2 sm:$0xff] %v726_v13 }
  0x18   : > { %235 = vst [vmem:[#allocation1 + $0x21] ss:$2 sm:$0xff] %v215_v14 }
  0x19   : > { %218 = vst [vmem:[#allocation1] ss:$2 sm:$0xff] %v728_v15 }
  0x1e   : > { %v732_v16 = vld.sshfl [vmem:[#allocation1 + $0x10] sm:$0xff pattern:$0x75316420]  ;;  %v734_v17 = vld.sshfl [vmem:[#allocation1 + $0x18] sm:$0xff pattern:$0x75316420] }
  0x1f   : > { %233 = vst [vmem:[#allocation1 + $0x11] ss:$2 sm:$0xff] %v726_v13  ;;  %v240_v18 = vld.sshfl [vmem:[#allocation1 + $0x20] sm:$0xff pattern:$0x75316420] }
  0x20   : > { %264 = vst [vmem:[#allocation1 + $0x20] ss:$2 sm:$0xff] %v215_v14  ;;  %v737_v19 = vld.sshfl [vmem:[#allocation1] sm:$0xff pattern:$0x75316420] }
  0x21   : > { %v739_v20 = vld.sshfl [vmem:[#allocation1 + $0x8] sm:$0xff pattern:$0x75316420] }
  0x22   : > { %231 = vst [vmem:[#allocation1 + $0x1] ss:$2 sm:$0xff] %v728_v15 }
  0x26   : > { %v239_v21 = vld.sshfl [vmem:[#allocation1 + $0x18] sm:$0xff pattern:$0x75316420]  ;;  %v238_v22 = vld.sshfl [vmem:[#allocation1 + $0x10] sm:$0xff pattern:$0x75316420] }
  0x27   : > { %v617_v23 = vpack.i.bf16 %v240_v18, %v239_v21  ;;  %262 = vst [vmem:[#allocation1 + $0x10] ss:$2 sm:$0xff] %v726_v13  ;;  %v269_v24 = vld.sshfl [vmem:[#allocation1 + $0x20] sm:$0xff pattern:$0x75316420] }
  0x28   : > { %294 = vst [vmem:[#allocation1 + $0x21] ss:$2 sm:$0xff] %v215_v14 }
  0x29   : > { %618 = vrot.lane.b32.xlu0 %v617_v23, %s677_s23  ;;  %v237_v25 = vld.sshfl [vmem:[#allocation1 + $0x8] sm:$0xff pattern:$0x75316420]  ;;  %v744_v26 = vld.sshfl [vmem:[#allocation1] sm:$0xff pattern:$0x75316420] }
  0x2a   : > { %v622_v27 = vpack.i.bf16 %v237_v25, %v238_v22  ;;  %260 = vst [vmem:[#allocation1] ss:$2 sm:$0xff] %v728_v15 }
  0x2c   : > { %623 = vrot.lane.b32.xlu1 %v622_v27, %s677_s23 }
  0x2e   : > { %v268_v28 = vld.sshfl [vmem:[#allocation1 + $0x18] sm:$0xff pattern:$0x75316420]  ;;  %v267_v29 = vld.sshfl [vmem:[#allocation1 + $0x10] sm:$0xff pattern:$0x75316420] }
  0x2f   : > { %v627_v30 = vpack.i.bf16 %v269_v24, %v268_v28  ;;  %292 = vst [vmem:[#allocation1 + $0x11] ss:$2 sm:$0xff] %v726_v13  ;;  %v299_v31 = vld.sshfl [vmem:[#allocation1 + $0x20] sm:$0xff pattern:$0x75316420] }
  0x30   : > { %323 = vst [vmem:[#allocation1 + $0x20] ss:$2 sm:$0xff] %v215_v14 }
  0x31   : > { %628 = vrot.lane.b32.xlu2 %v627_v30, %s678_s24  ;;  %v266_v32 = vld.sshfl [vmem:[#allocation1 + $0x8] sm:$0xff pattern:$0x75316420]  ;;  %v265_v33 = vld.sshfl [vmem:[#allocation1] sm:$0xff pattern:$0x75316420] }
  0x32   : > { %v632_v34 = vpack.i.bf16 %v266_v32, %v267_v29  ;;  %290 = vst [vmem:[#allocation1 + $0x1] ss:$2 sm:$0xff] %v728_v15 }
  0x34   : > { %633 = vrot.lane.b32.xlu1 %v632_v34, %s678_s24 }
  0x36   : > { %v297_v35 = vld.sshfl [vmem:[#allocation1 + $0x10] sm:$0xff pattern:$0x75316420]  ;;  %v298_v36 = vld.sshfl [vmem:[#allocation1 + $0x18] sm:$0xff pattern:$0x75316420] }
  0x37   : > { %v637_v37 = vpack.i.bf16 %v299_v31, %v298_v36  ;;  %321 = vst [vmem:[#allocation1 + $0x10] ss:$2 sm:$0xff] %v726_v13  ;;  %v328_v38 = vld.sshfl [vmem:[#allocation1 + $0x20] sm:$0xff pattern:$0x75316420] }
  0x38   : > { %353 = vst [vmem:[#allocation1 + $0x21] ss:$2 sm:$0xff] %v215_v14 }
  0x39   : > { %638 = vrot.lane.b32.xlu0 %v637_v37, %s679_s25  ;;  %v296_v39 = vld.sshfl [vmem:[#allocation1 + $0x8] sm:$0xff pattern:$0x75316420]  ;;  %v295_v40 = vld.sshfl [vmem:[#allocation1] sm:$0xff pattern:$0x75316420] }
  0x3a   : > { %v642_v41 = vpack.i.bf16 %v296_v39, %v297_v35  ;;  %319 = vst [vmem:[#allocation1] ss:$2 sm:$0xff] %v728_v15 }
  0x3c   : > { %643 = vrot.lane.b32.xlu2 %v642_v41, %s679_s25 }
  0x3e   : > { %v327_v42 = vld.sshfl [vmem:[#allocation1 + $0x18] sm:$0xff pattern:$0x75316420]  ;;  %v326_v43 = vld.sshfl [vmem:[#allocation1 + $0x10] sm:$0xff pattern:$0x75316420] }
  0x3f   : > { %v358_v44 = vld.sshfl [vmem:[#allocation1 + $0x20] sm:$0xff pattern:$0x75316420]  ;;  %v647_v45 = vpack.i.bf16 %v328_v38, %v327_v42  ;;  %351 = vst [vmem:[#allocation1 + $0x11] ss:$2 sm:$0xff] %v726_v13 }
  0x40   : > { %382 = vst [vmem:[#allocation1 + $0x20] ss:$2 sm:$0xff] %v215_v14 }
  0x41   : > { %648 = vrot.lane.b32.xlu1 %v647_v45, %s680_s26  ;;  %v324_v46 = vld.sshfl [vmem:[#allocation1] sm:$0xff pattern:$0x75316420]  ;;  %v325_v47 = vld.sshfl [vmem:[#allocation1 + $0x8] sm:$0xff pattern:$0x75316420] }
  0x42   : > { %329 = vrot.lane.b32.xlu0 %v324_v46, %s680_s26  ;;  %349 = vst [vmem:[#allocation1 + $0x1] ss:$2 sm:$0xff] %v728_v15  ;;  %v652_v48 = vpack.i.bf16 %v325_v47, %v326_v43 }
  0x46   : > { %v356_v49 = vld.sshfl [vmem:[#allocation1 + $0x10] sm:$0xff pattern:$0x75316420]  ;;  %v357_v50 = vld.sshfl [vmem:[#allocation1 + $0x18] sm:$0xff pattern:$0x75316420] }
  0x47   : > { %v387_v51 = vld.sshfl [vmem:[#allocation1 + $0x20] sm:$0xff pattern:$0x75316420]  ;;  %380 = vst [vmem:[#allocation1 + $0x10] ss:$2 sm:$0xff] %v726_v13  ;;  %v657_v55 = vpack.i.bf16 %v358_v44, %v357_v50 }
  0x49   : > { %653 = vrot.lane.b32.xlu1 %v652_v48, %s680_s26  ;;  %v355_v52 = vld.sshfl [vmem:[#allocation1 + $0x8] sm:$0xff pattern:$0x75316420]  ;;  %v354_v53 = vld.sshfl [vmem:[#allocation1] sm:$0xff pattern:$0x75316420] }
  0x4a   : > { %396 = vrot.lane.b32.xlu0 %v387_v51, %s681_s27  ;;  %v662_v54 = vpack.i.bf16 %v355_v52, %v356_v49  ;;  %378 = vst [vmem:[#allocation1] ss:$2 sm:$0xff] %v728_v15  ;;  %v416_v52 = vld [vmem:[%s864_s2] sm:$0xf] }
  0x4c   : > { %663 = vrot.lane.b32.xlu2 %v662_v54, %s682_s28 }
  0x4e   : > { %v386_v56 = vld.sshfl [vmem:[#allocation1 + $0x18] sm:$0xff pattern:$0x75316420]  ;;  %v385_v57 = vld.sshfl [vmem:[#allocation1 + $0x10] sm:$0xff pattern:$0x75316420] }
  0x51   : > { %658 = vrot.lane.b32.xlu1 %v657_v55, %s682_s28  ;;  %v384_v58 = vld.sshfl [vmem:[#allocation1 + $0x8] sm:$0xff pattern:$0x75316420]  ;;  %v383_v59 = vld.sshfl [vmem:[#allocation1] sm:$0xff pattern:$0x75316420] }
  0x52   : > { %394 = vrot.lane.b32.xlu0 %v386_v56, %s681_s27 }
  0x54   : > { %392 = vrot.lane.b32.xlu2 %v385_v57, %s681_s27 }
  0x59   : > { %359 = vrot.lane.b32.xlu1 %v354_v53, %s682_s28 }
  0x5a   : > { %390 = vrot.lane.b32.xlu0 %v384_v58, %s681_s27 }
  0x5c   : > { %388 = vrot.lane.b32.xlu2 %v383_v59, %s681_s27 }
  0x61   : > { %241 = vrot.lane.b32.xlu1 %v744_v26, %s677_s23 }
  0x62   : > { %300 = vrot.lane.b32.xlu0 %v295_v40, %s679_s25 }
  0x64   : > { %270 = vrot.lane.b32.xlu2 %v265_v33, %s678_s24 }
  0x6c   : > { %420 = vperm.xlu2 %667, %v417_v5  }
  0x8b   : > { %v629_v61 = vpop.permute.xlu2 %628 }
  0x8c   : > { %v631_v9 = vunpack.i.h.bf16 %v629_v61  ;;  %v630_v10 = vunpack.i.l.bf16 %v629_v61 }
  0x8e   : > { %v284_v22 = vsel %vm280_vm0, %v630_v10, %v631_v9 }
  0x96   : > { %v768_v0 = vpop.permute.xlu2 %643 }
  0x97   : > { %v645_v12 = vunpack.i.l.bf16 %v768_v0  ;;  %v646_v50 = vunpack.i.h.bf16 %v768_v0 }
  0x9b   : > { %v619_v62 = vpop.permute.xlu0 %618 }
  0x9c   : > { %v621_v23 = vunpack.i.h.bf16 %v619_v62  ;;  %v620_v25 = vunpack.i.l.bf16 %v619_v62 }
  0x9e   : > { %v764_v60 = vpop.permute.xlu1 %623  ;;  %v255_v47 = vsel %vm251_vm2, %v620_v25, %v621_v23 }
  0x9f   : > { %v625_v26 = vunpack.i.l.bf16 %v764_v60  ;;  %v407_v55 = vsel %vm403_vm1, %v734_v17, %v255_v47  ;;  %v626_v57 = vunpack.i.h.bf16 %v764_v60 }
  0xa1   : > { %v254_v46 = vsel %vm251_vm2, %v625_v26, %v620_v25 }
  0xa2   : > { %v406_v54 = vsel %vm403_vm1, %v732_v16, %v254_v46 }
  0xa6   : > { %v766_v63 = vpop.permute.xlu1 %633  ;;  %v770_v3 = vpop.permute.xlu2 %663 }
  0xa7   : > { %v635_v14 = vunpack.i.l.bf16 %v766_v63  ;;  %v665_v27 = vunpack.i.l.bf16 %v770_v3  ;;  %v666_v41 = vunpack.i.h.bf16 %v770_v3  ;;  %v636_v51 = vunpack.i.h.bf16 %v766_v63 }
  0xa9   : > { %v283_v32 = vsel %vm280_vm0, %v635_v14, %v630_v10  ;;  %v371_v56 = vsel %vm369_vm6, %v666_v41, %v665_v27  ;;  %v282_v60 = vsel %vm280_vm0, %v636_v51, %v635_v14 }
  0xab   : > { %v639_v1 = vpop.permute.xlu0 %638 }
  0xac   : > { %v640_v13 = vunpack.i.l.bf16 %v639_v1  ;;  %v641_v15 = vunpack.i.h.bf16 %v639_v1 }
  0xae   : > { %v779_v11 = vpop.permute.xlu2 %392  ;;  %v313_v33 = vsel %vm310_vm3, %v645_v12, %v640_v13  ;;  %v314_v37 = vsel %vm310_vm3, %v640_v13, %v641_v15 }
  0xaf   : > { %v410_v48 = vsel %vm403_vm1, %v283_v32, %v313_v33  ;;  %v411_v49 = vsel %vm403_vm1, %v284_v22, %v314_v37 }
  0xb3   : > { %v649_v2 = vpop.permute.xlu1 %648 }
  0xb4   : > { %v772_v4 = vpop.permute.xlu0 %329  ;;  %v651_v18 = vunpack.i.h.bf16 %v649_v2  ;;  %v650_v21 = vunpack.i.l.bf16 %v649_v2  ;;  %v312_v2 = vsel %vm310_vm3, %v646_v50, %v645_v12 }
  0xb5   : > { %v409_v5 = vsel %vm403_vm1, %v282_v60, %v312_v2 }
  0xb6   : > { %v343_v36 = vsel %vm339_vm5, %v650_v21, %v651_v18  ;;  %v389_v44 = vpop.permute.xlu2 %388 }
  0xbb   : > { %v777_v6 = vpop.permute.xlu1 %653 }
  0xbc   : > { %v397_v8 = vpop.permute.xlu0 %396  ;;  %v655_v24 = vunpack.i.l.bf16 %v777_v6  ;;  %v656_v45 = vunpack.i.h.bf16 %v777_v6 }
  0xbe   : > { %v342_v38 = vsel %vm339_vm5, %v655_v24, %v650_v21  ;;  %v340_v61 = vsel %vm339_vm5, %v772_v4, %v656_v45  ;;  %v341_v62 = vsel %vm339_vm5, %v656_v45, %v655_v24  ;;  %v253_v4 = vsel %vm251_vm2, %v626_v57, %v625_v26  ;;  %v271_v6 = vpop.permute.xlu2 %270 }
  0xbf   : > { %v413_v3 = vsel %vm403_vm1, %v341_v62, %v371_v56  ;;  %v405_v63 = vsel %vm403_vm1, %v739_v20, %v253_v4  ;;  %v281_v0 = vsel %vm280_vm0, %v271_v6, %v636_v51 }
  0xc3   : > { %v659_v28 = vpop.permute.xlu1 %658 }
  0xc4   : > { %v661_v29 = vunpack.i.h.bf16 %v659_v28  ;;  %v660_v30 = vunpack.i.l.bf16 %v659_v28  ;;  %v395_v31 = vpop.permute.xlu0 %394 }
  0xc5   : > { %v401_v34 = vsel %vm398_vm4, %v779_v11, %v395_v31  ;;  %v402_v35 = vsel %vm398_vm4, %v395_v31, %v397_v8 }
  0xc6   : > { %594 = vmatpush.msk.msra.mxu2 %vm403_vm1, %v401_v34  ;;  %596 = vmatpush.msk.msra.mxu3 %vm403_vm1, %v402_v35  ;;  %v372_v39 = vsel %vm369_vm6, %v665_v27, %v660_v30  ;;  %v373_v40 = vsel %vm369_vm6, %v660_v30, %v661_v29  ;;  %v421_v20 = vpop.permute.xlu2 %420 }
  0xc7   : > { %v414_v42 = vsel %vm403_vm1, %v342_v38, %v372_v39  ;;  %v415_v43 = vsel %vm403_vm1, %v343_v36, %v373_v40 }
  0xc8   : > { %488 = vmatpush.msra.mxu2 %v414_v42  ;;  %508 = vmatpush.msra.mxu3 %v415_v43 }
  0xca   : > { %489 = vmatpush.msra.mxu2 %v410_v48  ;;  %509 = vmatpush.msra.mxu3 %v411_v49 }
  0xcb   : > { %v360_v53 = vpop.permute.xlu1 %359 }
  0xcc   : > { %v370_v58 = vsel %vm369_vm6, %v360_v53, %v666_v41  ;;  %v391_v59 = vpop.permute.xlu0 %390  ;;  %490 = vmatpush.msra.mxu2 %v406_v54  ;;  %510 = vmatpush.msra.mxu3 %v407_v55 }
  0xcd   : > { %v399_v1 = vsel %vm398_vm4, %v389_v44, %v391_v59  ;;  %v400_v16 = vsel %vm398_vm4, %v391_v59, %v779_v11  ;;  %v412_v17 = vsel %vm403_vm1, %v340_v61, %v370_v58  ;;  %597 = vmatmul.msk.f32.vlgmr.msra.gmra.mxu3 %vm423_vm7, %v416_v52  ;;  %595 = vmatmul.msk.f32.vlgmr.msra.gmra.mxu2 %vm423_vm7, %v416_v52 }
  0xce   : > { %590 = vmatpush.msk.msra.mxu0 %vm403_vm1, %v399_v1  ;;  %592 = vmatpush.msk.msra.mxu1 %vm403_vm1, %v400_v16 }
  0xd0   : > { %448 = vmatpush.msra.mxu0 %v412_v17  ;;  %468 = vmatpush.msra.mxu1 %v413_v3 }
  0xd2   : > { %469 = vmatpush.msra.mxu1 %v409_v5 }
  0xd3   : > { %v242_v7 = vpop.permute.xlu1 %241 }
  0xd4   : > { %470 = vmatpush.msra.mxu1 %v405_v63  ;;  %v301_v8 = vpop.permute.xlu0 %300  ;;  %v252_v9 = vsel %vm251_vm2, %v242_v7, %v626_v57 }
  0xd5   : > { %v311_v10 = vsel %vm310_vm3, %v301_v8, %v646_v50  ;;  %593 = vmatmul.msk.f32.vlgmr.msra.gmra.mxu1 %vm423_vm7, %v416_v52  ;;  %v404_v12 = vsel %vm403_vm1, %v737_v19, %v252_v9 }
  0xd6   : > { %v408_v11 = vsel %vm403_vm1, %v281_v0, %v311_v10 }
  0xd7   : > { %449 = vmatpush.msra.mxu0 %v408_v11 }
  0xd9   : > { %450 = vmatpush.msra.mxu0 %v404_v12 }
  0xda   : > { %591 = vmatmul.msk.f32.vlgmr.msra.gmra.mxu0 %vm423_vm7, %v416_v52 }
 0x150   : > { %v512_v13 = vpop.f32.mrf.mxu3  ;;  %v492_v14 = vpop.f32.mrf.mxu2 }
 0x151   : > { %v513_v15 = vadd.f32 %v512_v13, %v421_v20  ;;  %v493_v18 = vadd.f32 %v492_v14, %v421_v20 }
 0x152   : > { %v472_v21 = vpop.f32.mrf.mxu1 }
 0x153   : > { %v520_v22 = vrot.slane %v513_v15, 4  ;;  %v473_v23 = vadd.f32 %v472_v21, %v421_v20 }
 0x155   : > { %v522_v24 = vsel %vm403_vm1, %v493_v18, %v520_v22  ;;  %v519_v25 = vrot.slane %v473_v23, 4 }
 0x156   : > { %526 = vst [vmem:[%s198_s10 + $0x8] sm:$0xff] %v522_v24 }
 0x157   : > { %v452_v19 = vpop.f32.mrf.mxu0 }
 0x158   : > { %v453_v26 = vadd.f32 %v452_v19, %v421_v20 }
 0x15a   : > { %v521_v27 = vsel %vm403_vm1, %v453_v26, %v519_v25 }
 0x15b   : > { %525 = vst [vmem:[%s198_s10] sm:$0xff] %v521_v27 }
 0x15c PF: > { %s15_s17 = sadd.s32 1, %s675_s17  }
 0x15d   : > { %p12_p4 = scmp.ge.s32.totalorder %s15_s17, 4  }
 0x15f   :  { %14 = sbr.rel (!%p12_p4) target bundleno = 2 (0x2), region = 82 }

// kernel: generator_forward.14
= control target key start
LH: loop header
LB: loop body
LE: loop exit
PB: predicated region body
PF: predicated region fallthrough
CT: control target
= control target key end

     0   :  { %s916_s17 = smov 0   ;;  %s1021_s0 = inlined_call_operand.<no memory space> [shape: f32[1], index: 0, kind: input, shape index: {}]   ;;  %s1022_s1 = inlined_call_operand.<no memory space> [shape: f32[1], index: 1, kind: input, shape index: {}]   ;;  %s1023_s2 = inlined_call_operand.vmem [shape: f32[2,8,128], index: 2, kind: input, shape index: {}]   ;;  %s1024_s3 = inlined_call_operand.vmem [shape: f32[1,8], index: 3, kind: input, shape index: {}]   ;;  %s1025_s4 = inlined_call_operand.<no memory space> [shape: f32[1,1], index: 4, kind: input, shape index: {}]   ;;  %s1026_s5 = inlined_call_operand.vmem [shape: f32[1,8], index: 5, kind: input, shape index: {}]   ;;  %s1027_s7 = inlined_call_operand.vmem [shape: f32[8,8], index: 7, kind: input, shape index: {}]   ;;  %s1028_s8 = inlined_call_operand.vmem [shape: f32[8,1], index: 8, kind: input, shape index: {}]   ;;  %s1029_s9 = inlined_call_operand.vmem [shape: f32[2,8,128], index: 9, kind: output, shape index: {}]   ;;  %s1030_s6 = inlined_call_operand.<no memory space> [shape: f32[1,1], index: 6, kind: input, shape index: {}]  }
   0x1   :  { %14 = sst [smem:[#allocation2]] %s1021_s0  ;;  %v16_v0 = vstv %s1025_s4  ;;  %v18_v1 = vstv %s1030_s6 }
   0x2   :  { %15 = sst [smem:[#allocation3]] %s1022_s1  ;;  %17 = vst [vmem:[#allocation4] sm:$0x1] %v16_v0 }
   0x3   :  { %19 = vst [vmem:[#allocation5] sm:$0x1] %v18_v1 }
   0x4 LB: > { %s768_s0 = sadd.s32 4294967295, %s851_s17   ;;  %p772_p0 = scmp.ge.s32.totalorder %s851_s17, 1  ;;  %s851_s17 = sphi %s916_s17, %s25_s17  }
   0x5   : > { %p292_p1 = scmp.lt.s32.totalorder %s851_s17, 3 }
   0x7   : > { %p293_p2 = pnand %p772_p0, %p292_p1 }
   0x8   : > { %p326_p3 = scmp.lt.s32.totalorder (!%p293_p2), %s768_s0, 1  ;;  %s335_s4 = sld [smem:[#allocation3]] (!%p293_p2) }
   0x9   : > { %296 = sbr.rel (%p293_p2) target bundleno = 763 (0x2fb), region = 56  ;;  %s709_s28 = sld [smem:[#allocation2]] (!%p293_p2) }
   0xe   : > { %v374_v2 = vld [vmem:[#allocation5] sm:$0x1]  ;;  %s1032_s0 = smov (!%p326_p3, %s768_s0), 1  ;;  %v853_v3 = vmov 0   ;;  %v338_v5 = vstv %s335_s4  ;;  %vm349_vm0 = vcmask 64512   ;;  %vm515_vm1 = vcmask 1040384  }
   0xf   : > { %809 = vset.pattern.permute.xlu0 %v853_v3  ;;  %810 = vset.pattern.permute.xlu1 %v853_v3  ;;  %s773_s1 = sshll.u32 %s1032_s0, 3  ;;  %v373_v10 = vld [vmem:[%s1026_s5] sm:$0x1]  ;;  %vm466_vm2 = vcmask 7168  }
  0x10   : > { %377 = vperm.xlu0 %809, %v374_v2   ;;  %s329_s19 = scalar_lea.vmem %s1023_s2, %s773_s1  ;;  %v341_v11 = vld [vmem:[%s1024_s3] sm:$0x1]  ;;  %s333_s10 = scalar_lea.vmem %s1029_s9, %s773_s1 }
  0x11   : > { %v334_v4 = vld [vmem:[%s329_s19] sm:$0xff] }
  0x12   : > { %v336_v6 = vmax.f32 %v334_v4, 0.0  ;;  %v337_v7 = vmin.f32 %v334_v4, 0.0  ;;  %v342_v12 = vld [vmem:[#allocation4] sm:$0x1] }
  0x13   : > { %v404_v13 = vld [vmem:[%s1027_s7] sm:$0xff]  ;;  %345 = vperm.xlu1 %810, %v342_v12  }
  0x14   : > { %v339_v8 = vmul.f32 %v338_v5, %v337_v7  ;;  %v405_v14 = vld [vmem:[%s1028_s8] sm:$0xff] }
  0x16   : > { %v932_v9 = vadd.f32 %v339_v8, %v336_v6 }
  0x18   : > { %399 = vmatpush.msra.mxu1 %v932_v9  ;;  %368 = vmatpush.msra.mxu0 %v932_v9 }
  0x19   : > { %776 = vmatmul.msk.f32.vlgmr.msra.gmra.mxu1 %vm349_vm0, %v373_v10  ;;  %429 = vmatpush.msra.mxu2 %v932_v9 }
  0x1a   : > { %775 = vmatmul.msk.f32.vlgmr.msra.gmra.mxu0 %vm349_vm0, %v341_v11  ;;  %777 = vmatmul.msk.f32.vlgmr.msra.gmra.mxu2 %vm349_vm0, %v404_v13 }
  0x1b   : > { %408 = vperm.xlu1 %810, %v405_v14  }
  0x82   : > { %v378_v15 = vpop.permute.xlu0 %377 }
  0x83   : > { %v380_v16 = vperm.slane %v378_v15, 0 }
  0x85   : > { %v346_v19 = vpop.permute.xlu1 %345 }
  0x86   : > { %v348_v20 = vperm.slane %v346_v19, 0 }
  0x96   : > { %v401_v17 = vpop.f32.mrf.mxu1 }
  0x97   : > { %v402_v18 = vadd.f32 %v401_v17, %v380_v16  ;;  %v370_v21 = vpop.f32.mrf.mxu0 }
  0x98   : > { %v371_v22 = vadd.f32 %v370_v21, %v348_v20 }
  0x99   : > { %434 = vxpose.xlu0.b32.start.end [1/1] (short) %v402_v18, 128 }
  0x9a   : > { %778 = vmatpush.msk.msrb.mxu1 %vm515_vm1, %v371_v22  ;;  %797 = vmatpush.msk.msrb.mxu2 %vm515_vm1, %v371_v22 }
  0x9b   : > { %798 = vmatpush.msk.msra.mxu3 %vm515_vm1, %v371_v22 }
  0x9d   : > { %v965_v39 = vpop.f32.mrf.mxu2 }
 0x13d   : > { %v450_v23 = vpop.trf.xlu0 }
 0x13e   : > { %779 = vmatmul.msk.f32.vlgmr.msrb.gmra.mxu1 %vm466_vm2, %v450_v23 }
 0x145   : > { %v451_v24 = vpop.trf.xlu0 }
 0x146   : > { %780 = vmatmul.msk.f32.gmra.mxu1 %vm466_vm2, %v451_v24 }
 0x14d   : > { %v452_v25 = vpop.trf.xlu0 }
 0x14e   : > { %781 = vmatmul.msk.f32.gmra.mxu1 %vm466_vm2, %v452_v25 }
 0x155   : > { %v453_v26 = vpop.trf.xlu0 }
 0x156   : > { %782 = vmatmul.msk.f32.gmra.mxu1 %vm466_vm2, %v453_v26 }
 0x15d   : > { %v454_v27 = vpop.trf.xlu0 }
 0x15e   : > { %783 = vmatmul.msk.f32.gmra.mxu1 %vm466_vm2, %v454_v27 }
 0x165   : > { %v455_v28 = vpop.trf.xlu0 }
 0x166   : > { %784 = vmatmul.msk.f32.vlgmr.msrb.gmra.mxu2 %vm466_vm2, %v455_v28 }
 0x16d   : > { %v456_v29 = vpop.trf.xlu0 }
 0x16e   : > { %785 = vmatmul.msk.f32.gmra.mxu2 %vm466_vm2, %v456_v29 }
 0x175   : > { %v457_v30 = vpop.trf.xlu0 }
 0x176   : > { %786 = vmatmul.msk.f32.gmra.mxu2 %vm466_vm2, %v457_v30 }
 0x17d   : > { %v458_v31 = vpop.trf.xlu0 }
 0x17e   : > { %787 = vmatmul.msk.f32.gmra.mxu2 %vm466_vm2, %v458_v31 }
 0x185   : > { %v459_v32 = vpop.trf.xlu0 }
 0x186   : > { %788 = vmatmul.msk.f32.gmra.mxu2 %vm466_vm2, %v459_v32 }
 0x18d   : > { %v460_v33 = vpop.trf.xlu0 }
 0x18e   : > { %789 = vmatmul.msk.f32.vlgmr.msra.gmra.mxu3 %vm466_vm2, %v460_v33 }
 0x195   : > { %v461_v34 = vpop.trf.xlu0 }
 0x196   : > { %790 = vmatmul.msk.f32.gmra.mxu3 %vm466_vm2, %v461_v34 }
 0x19d   : > { %v462_v35 = vpop.trf.xlu0 }
 0x19e   : > { %791 = vmatmul.msk.f32.gmra.mxu3 %vm466_vm2, %v462_v35 }
 0x1a5   : > { %v463_v36 = vpop.trf.xlu0 }
 0x1a6   : > { %792 = vmatmul.msk.f32.gmra.mxu3 %vm466_vm2, %v463_v36 }
 0x1ad   : > { %v464_v37 = vpop.trf.xlu0 }
 0x1ae   : > { %793 = vmatmul.msk.f32.gmra.mxu3 %vm466_vm2, %v464_v37 }
 0x1b5   : > { %v465_v38 = vpop.trf.xlu0 }
 0x1b6   : > { %794 = vmatmul.msk.f32.gmra.mxu3 %vm466_vm2, %v465_v38 }
 0x1bb   : > { %v967_v40 = vpop.f32.mrf.mxu1 }
 0x1c3   : > { %v971_v43 = vpop.f32.mrf.mxu1 }
 0x1cb   : > { %v975_v46 = vpop.f32.mrf.mxu1 }
 0x1d3   : > { %v979_v49 = vpop.f32.mrf.mxu1 }
 0x1db   : > { %v981_v53 = vpop.f32.mrf.mxu1 }
 0x1dc   : > { %v584_v56 = vmax.f32 %v967_v40, %v981_v53 }
 0x1e9   : > { %v969_v41 = vpop.f32.mrf.mxu2 }
 0x1ea   : > { %v585_v55 = vmax.f32 %v971_v43, %v969_v41 }
 0x1f1   : > { %v973_v44 = vpop.f32.mrf.mxu2 }
 0x1f2   : > { %v586_v57 = vmax.f32 %v975_v46, %v973_v44 }
 0x1f9   : > { %v977_v47 = vpop.f32.mrf.mxu2 }
 0x1fa   : > { %v587_v58 = vmax.f32 %v979_v49, %v977_v47 }
 0x201   : > { %v560_v50 = vpop.f32.mrf.mxu2 }
 0x202   : > { %v588_v60 = vmax.f32 %v584_v56, %v560_v50 }
 0x209   : > { %v563_v54 = vpop.f32.mrf.mxu2 }
 0x20a   : > { %v589_v59 = vmax.f32 %v585_v55, %v563_v54 }
 0x211   : > { %v566_v42 = vpop.f32.mrf.mxu3 }
 0x212   : > { %v590_v61 = vmax.f32 %v586_v57, %v566_v42 }
 0x219   : > { %v569_v45 = vpop.f32.mrf.mxu3 }
 0x21a   : > { %v591_v62 = vmax.f32 %v587_v58, %v569_v45 }
 0x221   : > { %v572_v48 = vpop.f32.mrf.mxu3 }
 0x222   : > { %v592_v1 = vmax.f32 %v588_v60, %v572_v48 }
 0x229   : > { %v575_v51 = vpop.f32.mrf.mxu3 }
 0x22a   : > { %v593_v63 = vmax.f32 %v589_v59, %v575_v51 }
 0x22c   : > { %v596_v4 = vmax.f32 %v592_v1, %v593_v63 }
 0x231   : > { %v578_v52 = vpop.f32.mrf.mxu3 }
 0x232   : > { %v594_v2 = vmax.f32 %v590_v61, %v578_v52 }
 0x239   : > { %v581_v0 = vpop.f32.mrf.mxu3 }
 0x23a   : > { %v595_v3 = vmax.f32 %v591_v62, %v581_v0 }
 0x23c   : > { %v597_v5 = vmax.f32 %v594_v2, %v595_v3 }
 0x23e   : > { %v598_v6 = vmax.f32 %v596_v4, %v597_v5  ;;  %v409_v5 = vpop.permute.xlu1 %408 }
 0x240   : > { %v599_v7 = vrot.slane %v598_v6, 4 }
 0x242   : > { %v600_v8 = vmax.f32 %v598_v6, %v599_v7  ;;  %v432_v7 = vadd.f32 %v965_v39, %v409_v5 }
 0x244   : > { %v601_v10 = vrot.slane %v600_v8, 2 }
 0x246   : > { %v602_v11 = vmax.f32 %v600_v8, %v601_v10 }
 0x248   : > { %v603_v12 = vrot.slane %v602_v11, 1 }
 0x24a   : > { %v604_v13 = vmax.f32 %v602_v11, %v603_v12 }
 0x24c   : > { %v620_v14 = vsub.f32 %v581_v0, %v604_v13  ;;  %v619_v15 = vsub.f32 %v578_v52, %v604_v13  ;;  %v618_v16 = vsub.f32 %v575_v51, %v604_v13  ;;  %v617_v19 = vsub.f32 %v572_v48, %v604_v13 }
 0x24d   : > { %v616_v21 = vsub.f32 %v569_v45, %v604_v13  ;;  %v615_v23 = vsub.f32 %v566_v42, %v604_v13  ;;  %v614_v25 = vsub.f32 %v563_v54, %v604_v13  ;;  %v613_v26 = vsub.f32 %v560_v50, %v604_v13 }
 0x24e   : > { %v651_v17 = vmul.f32 1.442695, %v620_v14  ;;  %v649_v18 = vmul.f32 1.442695, %v619_v15  ;;  %v647_v20 = vmul.f32 1.442695, %v618_v16  ;;  %v606_v29 = vsub.f32 %v971_v43, %v604_v13 }
 0x24f   : > { %v645_v22 = vmul.f32 1.442695, %v617_v19  ;;  %v643_v24 = vmul.f32 1.442695, %v616_v21  ;;  %v641_v28 = vmul.f32 1.442695, %v615_v23  ;;  %v605_v30 = vsub.f32 %v967_v40, %v604_v13 }
 0x250   : > { %811 = vpow2.f32 %v651_v17  ;;  %v639_v32 = vmul.f32 1.442695, %v614_v25  ;;  %v612_v33 = vsub.f32 %v977_v47, %v604_v13  ;;  %v637_v34 = vmul.f32 1.442695, %v613_v26 }
 0x251   : > { %813 = vpow2.f32 %v649_v18  ;;  %v607_v35 = vsub.f32 %v975_v46, %v604_v13  ;;  %v611_v37 = vsub.f32 %v973_v44, %v604_v13  ;;  %v623_v38 = vmul.f32 1.442695, %v606_v29 }
 0x252   : > { %815 = vpow2.f32 %v647_v20  ;;  %v608_v40 = vsub.f32 %v979_v49, %v604_v13  ;;  %v621_v42 = vmul.f32 1.442695, %v605_v30  ;;  %v635_v45 = vmul.f32 1.442695, %v612_v33 }
 0x253   : > { %817 = vpow2.f32 %v645_v22  ;;  %v610_v47 = vsub.f32 %v969_v41, %v604_v13  ;;  %v609_v46 = vsub.f32 %v981_v53, %v604_v13  ;;  %v625_v48 = vmul.f32 1.442695, %v607_v35 }
 0x254   : > { %819 = vpow2.f32 %v643_v24  ;;  %v633_v51 = vmul.f32 1.442695, %v611_v37  ;;  %v627_v44 = vmul.f32 1.442695, %v608_v40  ;;  %v711_v33 = vstv %s709_s28 }
 0x255   : > { %821 = vpow2.f32 %v641_v28  ;;  %v631_v49 = vmul.f32 1.442695, %v610_v47  ;;  %v629_v54 = vmul.f32 1.442695, %v609_v46 }
 0x256   : > { %v991_v27 = vpop.eup %811  ;;  %823 = vpow2.f32 %v639_v32 }
 0x257   : > { %689 = vmatpush.msrb.mxu0 %v991_v27  ;;  %v996_v31 = vpop.eup %813  ;;  %825 = vpow2.f32 %v637_v34 }
 0x258   : > { %v1001_v36 = vpop.eup %815  ;;  %827 = vpow2.f32 %v623_v38 }
 0x259   : > { %690 = vmatpush.msrb.mxu0 %v996_v31  ;;  %v818_v43 = vpop.eup %817  ;;  %829 = vpow2.f32 %v621_v42 }
 0x25a   : > { %v820_v50 = vpop.eup %819  ;;  %831 = vpow2.f32 %v635_v45 }
 0x25b   : > { %691 = vmatpush.msrb.mxu0 %v1001_v36  ;;  %v822_v52 = vpop.eup %821  ;;  %833 = vpow2.f32 %v625_v48 }
 0x25c   : > { %v824_v55 = vpop.eup %823  ;;  %835 = vpow2.f32 %v633_v51 }
 0x25d   : > { %692 = vmatpush.msrb.mxu0 %v818_v43  ;;  %v826_v41 = vpop.eup %825  ;;  %837 = vpow2.f32 %v627_v44 }
 0x25e   : > { %v828_v56 = vpop.eup %827  ;;  %839 = vpow2.f32 %v631_v49 }
 0x25f   : > { %693 = vmatpush.msrb.mxu0 %v820_v50  ;;  %v830_v53 = vpop.eup %829  ;;  %841 = vpow2.f32 %v629_v54 }
 0x260   : > { %v832_v57 = vpop.eup %831  ;;  %v653_v58 = vadd.f32 %v830_v53, %v828_v56 }
 0x261   : > { %694 = vmatpush.msrb.mxu0 %v822_v52  ;;  %v834_v59 = vpop.eup %833 }
 0x262   : > { %v836_v60 = vpop.eup %835  ;;  %v654_v61 = vadd.f32 %v834_v59, %v653_v58 }
 0x263   : > { %695 = vmatpush.msrb.mxu0 %v824_v55  ;;  %v838_v62 = vpop.eup %837 }
 0x264   : > { %v840_v63 = vpop.eup %839  ;;  %v655_v0 = vadd.f32 %v838_v62, %v654_v61 }
 0x265   : > { %696 = vmatpush.msrb.mxu0 %v826_v41  ;;  %v842_v1 = vpop.eup %841 }
 0x266   : > { %v656_v2 = vadd.f32 %v842_v1, %v655_v0 }
 0x267   : > { %697 = vmatpush.msrb.mxu0 %v832_v57 }
 0x268   : > { %v657_v3 = vadd.f32 %v840_v63, %v656_v2 }
 0x269   : > { %698 = vmatpush.msrb.mxu0 %v836_v60 }
 0x26a   : > { %v658_v4 = vadd.f32 %v836_v60, %v657_v3 }
 0x26b   : > { %699 = vmatpush.msrb.mxu0 %v840_v63 }
 0x26c   : > { %v659_v6 = vadd.f32 %v832_v57, %v658_v4 }
 0x26d   : > { %700 = vmatpush.msrb.mxu0 %v842_v1 }
 0x26e   : > { %v660_v8 = vadd.f32 %v826_v41, %v659_v6 }
 0x26f   : > { %701 = vmatpush.msrb.mxu0 %v838_v62 }
 0x270   : > { %v661_v10 = vadd.f32 %v824_v55, %v660_v8 }
 0x271   : > { %702 = vmatpush.msrb.mxu0 %v834_v59 }
 0x272   : > { %v662_v11 = vadd.f32 %v822_v52, %v661_v10 }
 0x273   : > { %703 = vmatpush.msrb.mxu0 %v828_v56 }
 0x274   : > { %v663_v12 = vadd.f32 %v820_v50, %v662_v11 }
 0x275   : > { %704 = vmatpush.msrb.mxu0 %v830_v53 }
 0x276   : > { %705 = vmatmul.f32.vlgmr.msrb.gmra.mxu0 %v432_v7  ;;  %v664_v13 = vadd.f32 %v818_v43, %v663_v12 }
 0x278   : > { %v665_v14 = vadd.f32 %v1001_v36, %v664_v13 }
 0x27a   : > { %v666_v15 = vadd.f32 %v996_v31, %v665_v14 }
 0x27c   : > { %v667_v16 = vadd.f32 %v991_v27, %v666_v15 }
 0x27e   : > { %v668_v17 = vrot.slane %v667_v16, 4 }
 0x280   : > { %v669_v18 = vadd.f32 %v668_v17, %v667_v16 }
 0x282   : > { %v670_v19 = vrot.slane %v669_v18, 2 }
 0x284   : > { %v671_v20 = vadd.f32 %v670_v19, %v669_v18 }
 0x286   : > { %v672_v21 = vrot.slane %v671_v20, 1 }
 0x288   : > { %v673_v22 = vadd.f32 %v672_v21, %v671_v20 }
 0x28a   : > { %843 = vrcp.f32 %v673_v22  ;;  %v685_v28 = vand.u32 2147483648, %v673_v22  ;;  %vm679_vm4 = vweird.f32 %v673_v22  ;;  %v683_v29 = vand.u32 2147483647, %v673_v22 }
 0x28c   : > { %v686_v30 = vor.u32 1.1754944e-38, %v685_v28  ;;  %vm684_vm6 = vcmp.eq.f32.partialorder %v683_v29, 8.507059e+37 }
 0x290   : > { %v844_v39 = vpop.eup %843 }
 0x291   : > { %v675_v23 = vmul.f32 %v844_v39, %v673_v22  ;;  %vm680_vm3 = vweird.f32 %v844_v39 }
 0x292   : > { %vm681_vm5 = vmor %vm679_vm4, %vm680_vm3 }
 0x293   : > { %v676_v24 = vsub.f32 1.0, %v675_v23 }
 0x295   : > { %v677_v25 = vmul.f32 %v844_v39, %v676_v24 }
 0x297   : > { %v678_v26 = vadd.f32 %v844_v39, %v677_v25 }
 0x299   : > { %v682_v27 = vsel %vm681_vm5, %v844_v39, %v678_v26 }
 0x29a   : > { %v687_v31 = vsel %vm684_vm6, %v686_v30, %v682_v27 }
 0x2f3   : > { %v706_v32 = vpop.f32.mrf.mxu0 }
 0x2f4   : > { %v710_v34 = vmul.f32 %v706_v32, %v687_v31 }
 0x2f6   : > { %v712_v35 = vmul.f32 %v711_v33, %v710_v34 }
 0x2f8   : > { %v713_v36 = vadd.f32 %v712_v35, %v932_v9 }
 0x2fa   : > { %714 = vst [vmem:[%s333_s10] sm:$0xff] %v713_v36 }
 0x2fb PF: > { %s25_s17 = sadd.s32 1, %s851_s17  }
 0x2fc   : > { %p22_p4 = scmp.ge.s32.totalorder %s25_s17, 4  }
 0x2fe   :  { %24 = sbr.rel (!%p22_p4) target bundleno = 4 (0x4), region = 86 }

// kernel: generator_forward.15
= control target key start
LH: loop header
LB: loop body
LE: loop exit
PB: predicated region body
PF: predicated region fallthrough
CT: control target
= control target key end

     0   :  { %s575_s17 = smov 0   ;;  %s634_s0 = inlined_call_operand.<no memory space> [shape: f32[1], index: 0, kind: input, shape index: {}]   ;;  %s635_s1 = inlined_call_operand.vmem [shape: f32[2,32,38], index: 1, kind: input, shape index: {}]   ;;  %s636_s2 = inlined_call_operand.vmem [shape: f32[16,224], index: 2, kind: input, shape index: {}]   ;;  %s637_s3 = inlined_call_operand.vmem [shape: f32[16,1], index: 3, kind: input, shape index: {}]   ;;  %s638_s4 = inlined_call_operand.vmem [shape: f32[2,16,32], index: 4, kind: output, shape index: {}]  }
   0x1   :  { %9 = sst [smem:[#allocation2]] %s634_s0 }
   0x2 LB: > { %s424_s18 = sadd.s32 4294967295, %s538_s17   ;;  %p428_p0 = scmp.ge.s32.totalorder %s538_s17, 1  ;;  %s538_s17 = sphi %s575_s17, %s15_s17  }
   0x3   : > { %p163_p1 = scmp.lt.s32.totalorder %s538_s17, 3 }
   0x5   : > { %p164_p2 = pnand %p428_p0, %p163_p1 }
   0x6   : > { %p189_p3 = scmp.lt.s32.totalorder (!%p164_p2), %s424_s18, 1  ;;  %s203_s19 = sld [smem:[#allocation2]] (!%p164_p2) }
   0x7   : > { %167 = sbr.rel (%p164_p2) target bundleno = 314 (0x13a), region = 36  ;;  %s540_s23 = smov (!%p164_p2), 125  }
   0x8   : > { %s541_s24 = smov (!%p164_p2), 126   ;;  %s542_s25 = smov (!%p164_p2), 122  }
   0x9   : > { %s543_s26 = smov (!%p164_p2), 127   ;;  %s544_s27 = smov (!%p164_p2), 123  }
   0xa   : > { %s545_s28 = smov (!%p164_p2), 124  }
   0xc   : > { %s640_s18 = smov (!%p189_p3, %s424_s18), 1  ;;  %v212_v2 = vstv %s203_s19  ;;  %v301_v39 = vld [vmem:[%s637_s3] sm:$0xff]  ;;  %v546_v42 = vmov 0   ;;  %v302_v48 = vld [vmem:[%s637_s3 + $0x8] sm:$0xff]  ;;  %v299_v63 = vld [vmem:[%s636_s2 + $0x10] sm:$0xff]  ;;  %vm313_vm0 = vcmask 785408  }
   0xd   : > { %s437_s0 = sshll.u32 %s640_s18, 5  ;;  %530 = vset.pattern.permute.xlu0 %v546_v42  ;;  %531 = vset.pattern.permute.xlu1 %v546_v42  ;;  %v297_v61 = vld [vmem:[%s636_s2] sm:$0xff]  ;;  %s438_s15 = sshll.u32 %s640_s18, 4  ;;  %vm366_vm1 = vcmask 261120  }
   0xe   : > { %s193_s22 = scalar_lea.vmem %s635_s1, %s437_s0  ;;  %s198_s0 = scalar_lea.vmem %s638_s4, %s438_s15 }
   0xf   : > { %v201_v0 = vld [vmem:[%s193_s22 + $0x10] sm:$0xff]  ;;  %v202_v1 = vld [vmem:[%s193_s22 + $0x18] sm:$0xff]  ;;  %v199_v3 = vld [vmem:[%s193_s22] sm:$0xff] }
  0x10   : > { %v206_v4 = vmax.f32 %v201_v0, 0.0  ;;  %v207_v5 = vmax.f32 %v202_v1, 0.0  ;;  %v210_v6 = vmin.f32 %v201_v0, 0.0  ;;  %v211_v7 = vmin.f32 %v202_v1, 0.0  ;;  %v200_v8 = vld [vmem:[%s193_s22 + $0x8] sm:$0xff]  ;;  %v300_v1 = vld [vmem:[%s636_s2 + $0x18] sm:$0xff] }
  0x11   : > { %v208_v9 = vmin.f32 %v199_v3, 0.0  ;;  %v209_v10 = vmin.f32 %v200_v8, 0.0  ;;  %v204_v13 = vmax.f32 %v199_v3, 0.0  ;;  %v205_v14 = vmax.f32 %v200_v8, 0.0  ;;  %v298_v0 = vld [vmem:[%s636_s2 + $0x8] sm:$0xff] }
  0x12   : > { %v215_v11 = vmul.f32 %v212_v2, %v210_v6  ;;  %v216_v12 = vmul.f32 %v212_v2, %v211_v7 }
  0x13   : > { %v213_v15 = vmul.f32 %v212_v2, %v208_v9  ;;  %v214_v16 = vmul.f32 %v212_v2, %v209_v10 }
  0x14   : > { %v589_v17 = vadd.f32 %v215_v11, %v206_v4  ;;  %v591_v18 = vadd.f32 %v216_v12, %v207_v5 }
  0x15   : > { %v595_v20 = vadd.f32 %v213_v15, %v204_v13  ;;  %v597_v21 = vadd.f32 %v214_v16, %v205_v14 }
  0x16   : > { %v470_v19 = vpack.i.bf16 %v589_v17, %v591_v18 }
  0x17   : > { %v490_v22 = vpack.i.bf16 %v595_v20, %v597_v21 }
  0x18   : > { %471 = vrot.lane.b32.xlu0 %v470_v19, %s540_s23  ;;  %481 = vrot.lane.b32.xlu1 %v470_v19, %s541_s24 }
  0x19   : > { %491 = vrot.lane.b32.xlu2 %v490_v22, %s541_s24 }
  0x20   : > { %476 = vrot.lane.b32.xlu0 %v490_v22, %s540_s23  ;;  %486 = vrot.lane.b32.xlu1 %v470_v19, %s542_s25 }
  0x21   : > { %496 = vrot.lane.b32.xlu2 %v490_v22, %s542_s25 }
  0x28   : > { %501 = vrot.lane.b32.xlu0 %v470_v19, %s543_s26  ;;  %506 = vrot.lane.b32.xlu1 %v470_v19, %s544_s27 }
  0x29   : > { %511 = vrot.lane.b32.xlu2 %v490_v22, %s543_s26 }
  0x30   : > { %516 = vrot.lane.b32.xlu0 %v490_v22, %s544_s27  ;;  %521 = vrot.lane.b32.xlu1 %v470_v19, %s545_s28 }
  0x31   : > { %526 = vrot.lane.b32.xlu2 %v490_v22, %s545_s28 }
  0x38   : > { %305 = vperm.xlu0 %530, %v301_v39   ;;  %310 = vperm.xlu1 %531, %v302_v48  }
  0x73   : > { %v492_v23 = vpop.permute.xlu2 %491 }
  0x74   : > { %v493_v43 = vunpack.i.l.bf16 %v492_v23  ;;  %v494_v46 = vunpack.i.h.bf16 %v492_v23 }
  0x7b   : > { %v497_v32 = vpop.permute.xlu2 %496 }
  0x7c   : > { %v498_v35 = vunpack.i.l.bf16 %v497_v32  ;;  %v499_v37 = vunpack.i.h.bf16 %v497_v32 }
  0x83   : > { %v512_v47 = vpop.permute.xlu2 %511 }
  0x84   : > { %v513_v51 = vunpack.i.l.bf16 %v512_v47  ;;  %v514_v55 = vunpack.i.h.bf16 %v512_v47 }
  0x8a   : > { %v472_v24 = vpop.permute.xlu0 %471  ;;  %v482_v25 = vpop.permute.xlu1 %481 }
  0x8b   : > { %v473_v26 = vunpack.i.l.bf16 %v472_v24  ;;  %v474_v27 = vunpack.i.h.bf16 %v472_v24  ;;  %v483_v36 = vunpack.i.l.bf16 %v482_v25  ;;  %v484_v38 = vunpack.i.h.bf16 %v482_v25  ;;  %v527_v58 = vpop.permute.xlu2 %526 }
  0x8c   : > { %v528_v59 = vunpack.i.l.bf16 %v527_v58  ;;  %v529_v62 = vunpack.i.h.bf16 %v527_v58 }
  0x8d   : > { %320 = vmatpush.msra.mxu0 %v473_v26  ;;  %439 = vmatpush.msra.mxu2 %v473_v26 }
  0x8f   : > { %321 = vmatpush.msra.mxu0 %v474_v27  ;;  %440 = vmatpush.msra.mxu2 %v474_v27 }
  0x92   : > { %v477_v28 = vpop.permute.xlu0 %476  ;;  %v487_v29 = vpop.permute.xlu1 %486 }
  0x93   : > { %v478_v30 = vunpack.i.l.bf16 %v477_v28  ;;  %v488_v31 = vunpack.i.l.bf16 %v487_v29  ;;  %v489_v33 = vunpack.i.h.bf16 %v487_v29  ;;  %v479_v34 = vunpack.i.h.bf16 %v477_v28 }
  0x95   : > { %322 = vmatpush.msra.mxu0 %v478_v30  ;;  %441 = vmatpush.msra.mxu2 %v478_v30 }
  0x96   : > { %347 = vmatpush.msra.mxu1 %v488_v31 }
  0x97   : > { %323 = vmatpush.msra.mxu0 %v479_v34  ;;  %442 = vmatpush.msra.mxu2 %v479_v34 }
  0x98   : > { %348 = vmatpush.msra.mxu1 %v489_v33 }
  0x99   : > { %324 = vmatpush.msra.mxu0 %v483_v36  ;;  %443 = vmatpush.msra.mxu2 %v483_v36 }
  0x9a   : > { %v502_v40 = vpop.permute.xlu0 %501  ;;  %349 = vmatpush.msra.mxu1 %v498_v35  ;;  %v507_v41 = vpop.permute.xlu1 %506 }
  0x9b   : > { %325 = vmatpush.msra.mxu0 %v484_v38  ;;  %444 = vmatpush.msra.mxu2 %v484_v38  ;;  %v508_v44 = vunpack.i.l.bf16 %v507_v41  ;;  %v509_v45 = vunpack.i.h.bf16 %v507_v41  ;;  %v503_v49 = vunpack.i.l.bf16 %v502_v40  ;;  %v504_v50 = vunpack.i.h.bf16 %v502_v40 }
  0x9c   : > { %350 = vmatpush.msra.mxu1 %v499_v37 }
  0x9d   : > { %326 = vmatpush.msra.mxu0 %v493_v43  ;;  %445 = vmatpush.msra.mxu2 %v493_v43 }
  0x9e   : > { %351 = vmatpush.msra.mxu1 %v508_v44 }
  0x9f   : > { %327 = vmatpush.msra.mxu0 %v494_v46  ;;  %446 = vmatpush.msra.mxu2 %v494_v46 }
  0xa0   : > { %352 = vmatpush.msra.mxu1 %v509_v45 }
  0xa1   : > { %328 = vmatpush.msra.mxu0 %v503_v49  ;;  %447 = vmatpush.msra.mxu2 %v503_v49 }
  0xa2   : > { %v517_v52 = vpop.permute.xlu0 %516  ;;  %v522_v54 = vpop.permute.xlu1 %521 }
  0xa3   : > { %329 = vmatpush.msra.mxu0 %v504_v50  ;;  %448 = vmatpush.msra.mxu2 %v504_v50  ;;  %v518_v53 = vunpack.i.l.bf16 %v517_v52  ;;  %v519_v56 = vunpack.i.h.bf16 %v517_v52  ;;  %v523_v57 = vunpack.i.l.bf16 %v522_v54  ;;  %v524_v60 = vunpack.i.h.bf16 %v522_v54 }
  0xa5   : > { %330 = vmatpush.msra.mxu0 %v513_v51  ;;  %449 = vmatpush.msra.mxu2 %v513_v51 }
  0xa6   : > { %353 = vmatpush.msra.mxu1 %v518_v53 }
  0xa7   : > { %331 = vmatpush.msra.mxu0 %v514_v55  ;;  %450 = vmatpush.msra.mxu2 %v514_v55 }
  0xa8   : > { %354 = vmatpush.msra.mxu1 %v519_v56 }
  0xa9   : > { %332 = vmatpush.msra.mxu0 %v591_v18  ;;  %451 = vmatpush.msra.mxu2 %v591_v18 }
  0xaa   : > { %355 = vmatpush.msra.mxu1 %v523_v57  ;;  %v306_v2 = vpop.permute.xlu0 %305  ;;  %v311_v7 = vpop.permute.xlu1 %310 }
  0xab   : > { %333 = vmatpush.msra.mxu0 %v589_v17  ;;  %452 = vmatpush.msra.mxu2 %v589_v17 }
  0xac   : > { %356 = vmatpush.msra.mxu1 %v524_v60 }
  0xad   : > { %334 = vmatpush.msra.mxu0 %v597_v21  ;;  %453 = vmatpush.msra.mxu2 %v597_v21 }
  0xae   : > { %357 = vmatpush.msra.mxu1 %v528_v59 }
  0xaf   : > { %335 = vmatpush.msra.mxu0 %v595_v20  ;;  %454 = vmatpush.msra.mxu2 %v595_v20 }
  0xb0   : > { %358 = vmatpush.msra.mxu1 %v529_v62  ;;  %336 = vmatmul.f32.vlgmr.msra.gmra.mxu0 %v297_v61 }
  0xb1   : > { %339 = vmatmul.f32.vlgmr.msra.gmra.mxu2 %v299_v63  ;;  %433 = vmatmul.msk.f32.vlgmr.msra.gmra.mxu1 %vm313_vm0, %v298_v0 }
  0xb9   : > { %434 = vmatmul.msk.f32.gmra.mxu1 %vm313_vm0, %v300_v1 }
 0x12d   : > { %v337_v3 = vpop.f32.mrf.mxu0 }
 0x12e   : > { %v338_v4 = vadd.f32 %v337_v3, %v306_v2  ;;  %v360_v5 = vpop.f32.mrf.mxu1 }
 0x130   : > { %v361_v6 = vadd.f32 %v360_v5, %v338_v4 }
 0x132   : > { %367 = vst.msk [vmem:[%s198_s0] sm:$0xff] %vm366_vm1, %v361_v6 }
 0x134   : > { %v340_v8 = vpop.f32.mrf.mxu2 }
 0x135   : > { %v341_v9 = vadd.f32 %v340_v8, %v311_v7 }
 0x136   : > { %v363_v10 = vpop.f32.mrf.mxu1 }
 0x137   : > { %v364_v11 = vadd.f32 %v363_v10, %v341_v9 }
 0x139   : > { %368 = vst.msk [vmem:[%s198_s0 + $0x8] sm:$0xff] %vm366_vm1, %v364_v11 }
 0x13a PF: > { %s15_s17 = sadd.s32 1, %s538_s17  }
 0x13b   : > { %p12_p4 = scmp.ge.s32.totalorder %s15_s17, 4  }
 0x13d   :  { %14 = sbr.rel (!%p12_p4) target bundleno = 2 (0x2), region = 66 }

// kernel: generator_forward.16
= control target key start
LH: loop header
LB: loop body
LE: loop exit
PB: predicated region body
PF: predicated region fallthrough
CT: control target
= control target key end

     0   :  { %s820_s17 = smov 0   ;;  %s959_s0 = inlined_call_operand.<no memory space> [shape: f32[1], index: 0, kind: input, shape index: {}]   ;;  %s960_s1 = inlined_call_operand.vmem [shape: f32[2,64,14], index: 1, kind: input, shape index: {}]   ;;  %s961_s2 = inlined_call_operand.vmem [shape: f32[32,448], index: 2, kind: input, shape index: {}]   ;;  %s962_s3 = inlined_call_operand.vmem [shape: f32[32,1], index: 3, kind: input, shape index: {}]   ;;  %s963_s4 = inlined_call_operand.vmem [shape: f32[2,32,8], index: 4, kind: output, shape index: {}]  }
   0x1   :  { %9 = sst [smem:[#allocation2]] %s959_s0 }
   0x2 LB: > { %s622_s18 = sadd.s32 4294967295, %s783_s17   ;;  %p626_p0 = scmp.ge.s32.totalorder %s783_s17, 1  ;;  %s783_s17 = sphi %s820_s17, %s15_s17  }
   0x3   : > { %p163_p1 = scmp.lt.s32.totalorder %s783_s17, 3 }
   0x5   : > { %p164_p2 = pnand %p626_p0, %p163_p1 }
   0x6   : > { %p189_p3 = scmp.lt.s32.totalorder (!%p164_p2), %s622_s18, 1  ;;  %s207_s19 = sld [smem:[#allocation2]] (!%p164_p2) }
   0x7   : > { %167 = sbr.rel (%p164_p2) target bundleno = 361 (0x169), region = 36  ;;  %s785_s23 = smov (!%p164_p2), 125  }
   0x8   : > { %s786_s24 = smov (!%p164_p2), 123   ;;  %s787_s25 = smov (!%p164_p2), 127  }
   0x9   : > { %s788_s26 = smov (!%p164_p2), 122   ;;  %s789_s27 = smov (!%p164_p2), 124  }
   0xa   : > { %s790_s28 = smov (!%p164_p2), 126  }
   0xc   : > { %s965_s18 = smov (!%p189_p3, %s622_s18), 1  ;;  %v224_v2 = vstv %s207_s19  ;;  %vm433_vm0 = vcmask 523264   ;;  %vm562_vm1 = vcmask 64512  }
   0xd   : > { %s637_s0 = sshll.u32 %s965_s18, 6 }
   0xe   : > { %s834_s22 = scalar_lea.vmem %s960_s1, %s637_s0  ;;  %s638_s0 = sshll.u32 %s965_s18, 5 }
   0xf   : > { %v205_v0 = vld [vmem:[%s834_s22 + $0x30] sm:$0xff]  ;;  %v206_v1 = vld [vmem:[%s834_s22 + $0x38] sm:$0xff]  ;;  %v203_v3 = vld [vmem:[%s834_s22 + $0x20] sm:$0xff] }
  0x10   : > { %v214_v4 = vmax.f32 %v205_v0, 0.0  ;;  %v215_v5 = vmax.f32 %v206_v1, 0.0  ;;  %v222_v6 = vmin.f32 %v205_v0, 0.0  ;;  %v223_v7 = vmin.f32 %v206_v1, 0.0  ;;  %v204_v8 = vld [vmem:[%s834_s22 + $0x28] sm:$0xff]  ;;  %v201_v21 = vld [vmem:[%s834_s22 + $0x10] sm:$0xff] }
  0x11   : > { %v212_v9 = vmax.f32 %v203_v3, 0.0  ;;  %v213_v10 = vmax.f32 %v204_v8, 0.0  ;;  %v220_v11 = vmin.f32 %v203_v3, 0.0  ;;  %v221_v12 = vmin.f32 %v204_v8, 0.0  ;;  %v202_v22 = vld [vmem:[%s834_s22 + $0x18] sm:$0xff]  ;;  %v199_v31 = vld [vmem:[%s834_s22] sm:$0xff] }
  0x12   : > { %v231_v13 = vmul.f32 %v224_v2, %v222_v6  ;;  %v232_v14 = vmul.f32 %v224_v2, %v223_v7  ;;  %v218_v25 = vmin.f32 %v201_v21, 0.0  ;;  %v219_v26 = vmin.f32 %v202_v22, 0.0  ;;  %v200_v32 = vld [vmem:[%s834_s22 + $0x8] sm:$0xff]  ;;  %s198_s22 = scalar_lea.vmem %s963_s4, %s638_s0 }
  0x13   : > { %v229_v15 = vmul.f32 %v224_v2, %v220_v11  ;;  %v230_v16 = vmul.f32 %v224_v2, %v221_v12  ;;  %v210_v27 = vmax.f32 %v201_v21, 0.0  ;;  %v211_v28 = vmax.f32 %v202_v22, 0.0 }
  0x14   : > { %v840_v17 = vadd.f32 %v231_v13, %v214_v4  ;;  %v842_v18 = vadd.f32 %v232_v14, %v215_v5  ;;  %v227_v29 = vmul.f32 %v224_v2, %v218_v25  ;;  %v228_v30 = vmul.f32 %v224_v2, %v219_v26 }
  0x15   : > { %v844_v19 = vadd.f32 %v229_v15, %v212_v9  ;;  %v846_v20 = vadd.f32 %v230_v16, %v213_v10  ;;  %v216_v35 = vmin.f32 %v199_v31, 0.0  ;;  %v217_v36 = vmin.f32 %v200_v32, 0.0 }
  0x16   : > { %v664_v23 = vpack.i.bf16 %v840_v17, %v842_v18  ;;  %v859_v33 = vadd.f32 %v227_v29, %v210_v27  ;;  %v861_v34 = vadd.f32 %v228_v30, %v211_v28  ;;  %v208_v37 = vmax.f32 %v199_v31, 0.0 }
  0x17   : > { %v674_v24 = vpack.i.bf16 %v844_v19, %v846_v20  ;;  %v209_v38 = vmax.f32 %v200_v32, 0.0  ;;  %v225_v40 = vmul.f32 %v224_v2, %v216_v35  ;;  %v226_v41 = vmul.f32 %v224_v2, %v217_v36 }
  0x18   : > { %665 = vrot.lane.b32.xlu1 %v664_v23, %s785_s23  ;;  %655 = vrot.lane.b32.xlu0 %v664_v23, %s786_s24  ;;  %v689_v39 = vpack.i.bf16 %v859_v33, %v861_v34 }
  0x19   : > { %675 = vrot.lane.b32.xlu2 %v674_v24, %s787_s25  ;;  %v867_v42 = vadd.f32 %v225_v40, %v208_v37  ;;  %v869_v43 = vadd.f32 %v226_v41, %v209_v38  ;;  %v409_v41 = vld [vmem:[%s962_s3] sm:$0xff] }
  0x1b   : > { %v704_v44 = vpack.i.bf16 %v867_v42, %v869_v43 }
  0x20   : > { %660 = vrot.lane.b32.xlu0 %v664_v23, %s787_s25  ;;  %670 = vrot.lane.b32.xlu1 %v674_v24, %s786_s24 }
  0x21   : > { %680 = vrot.lane.b32.xlu2 %v674_v24, %s785_s23 }
  0x28   : > { %690 = vrot.lane.b32.xlu1 %v689_v39, %s787_s25  ;;  %685 = vrot.lane.b32.xlu0 %v689_v39, %s786_s24 }
  0x29   : > { %695 = vrot.lane.b32.xlu2 %v689_v39, %s785_s23 }
  0x30   : > { %705 = vrot.lane.b32.xlu1 %v704_v44, %s787_s25  ;;  %700 = vrot.lane.b32.xlu0 %v704_v44, %s786_s24 }
  0x31   : > { %710 = vrot.lane.b32.xlu2 %v704_v44, %s785_s23 }
  0x38   : > { %720 = vrot.lane.b32.xlu1 %v664_v23, %s788_s26  ;;  %715 = vrot.lane.b32.xlu0 %v664_v23, %s789_s27 }
  0x39   : > { %725 = vrot.lane.b32.xlu2 %v664_v23, %s790_s28 }
  0x40   : > { %735 = vrot.lane.b32.xlu1 %v674_v24, %s788_s26  ;;  %730 = vrot.lane.b32.xlu0 %v674_v24, %s789_s27 }
  0x41   : > { %740 = vrot.lane.b32.xlu2 %v674_v24, %s790_s28 }
  0x48   : > { %750 = vrot.lane.b32.xlu1 %v689_v39, %s788_s26  ;;  %745 = vrot.lane.b32.xlu0 %v689_v39, %s789_s27 }
  0x49   : > { %755 = vrot.lane.b32.xlu2 %v689_v39, %s790_s28 }
  0x50   : > { %765 = vrot.lane.b32.xlu1 %v704_v44, %s788_s26  ;;  %760 = vrot.lane.b32.xlu0 %v704_v44, %s789_s27 }
  0x51   : > { %770 = vrot.lane.b32.xlu2 %v704_v44, %s790_s28 }
  0x73   : > { %v676_v45 = vpop.permute.xlu2 %675 }
  0x74   : > { %v677_v3 = vunpack.i.l.bf16 %v676_v45  ;;  %v678_v5 = vunpack.i.h.bf16 %v676_v45 }
  0x7b   : > { %v681_v46 = vpop.permute.xlu2 %680 }
  0x7c   : > { %v682_v55 = vunpack.i.l.bf16 %v681_v46  ;;  %v683_v56 = vunpack.i.h.bf16 %v681_v46 }
  0x83   : > { %v696_v47 = vpop.permute.xlu2 %695 }
  0x84   : > { %v697_v59 = vunpack.i.l.bf16 %v696_v47  ;;  %v698_v0 = vunpack.i.h.bf16 %v696_v47 }
  0x8a   : > { %v666_v48 = vpop.permute.xlu1 %665  ;;  %v656_v49 = vpop.permute.xlu0 %655 }
  0x8b   : > { %v667_v50 = vunpack.i.l.bf16 %v666_v48  ;;  %v657_v51 = vunpack.i.l.bf16 %v656_v49  ;;  %v668_v52 = vunpack.i.h.bf16 %v666_v48  ;;  %v711_v53 = vpop.permute.xlu2 %710  ;;  %v658_v54 = vunpack.i.h.bf16 %v656_v49  ;;  %v393_v48 = vld [vmem:[%s961_s2] sm:$0xff] }
  0x8c   : > { %v712_v2 = vunpack.i.l.bf16 %v711_v53  ;;  %v713_v4 = vunpack.i.h.bf16 %v711_v53 }
  0x8d   : > { %475 = vmatpush.msra.mxu1 %v667_v50  ;;  %504 = vmatpush.msra.mxu2 %v657_v51 }
  0x8f   : > { %476 = vmatpush.msra.mxu1 %v668_v52  ;;  %505 = vmatpush.msra.mxu2 %v658_v54  ;;  %v397_v54 = vld [vmem:[%s961_s2 + $0x20] sm:$0xff] }
  0x91   : > { %477 = vmatpush.msra.mxu1 %v682_v55  ;;  %v412_v55 = vld [vmem:[%s962_s3 + $0x18] sm:$0xff] }
  0x92   : > { %v661_v57 = vpop.permute.xlu0 %660  ;;  %v671_v58 = vpop.permute.xlu1 %670 }
  0x93   : > { %v662_v60 = vunpack.i.l.bf16 %v661_v57  ;;  %v672_v61 = vunpack.i.l.bf16 %v671_v58  ;;  %v673_v62 = vunpack.i.h.bf16 %v671_v58  ;;  %478 = vmatpush.msra.mxu1 %v683_v56  ;;  %v726_v63 = vpop.permute.xlu2 %725  ;;  %v663_v1 = vunpack.i.h.bf16 %v661_v57  ;;  %v411_v56 = vld [vmem:[%s962_s3 + $0x10] sm:$0xff] }
  0x94   : > { %v727_v8 = vunpack.i.l.bf16 %v726_v63  ;;  %v728_v13 = vunpack.i.h.bf16 %v726_v63  ;;  %v395_v63 = vld [vmem:[%s961_s2 + $0x10] sm:$0xff] }
  0x95   : > { %446 = vmatpush.msra.mxu0 %v662_v60  ;;  %506 = vmatpush.msra.mxu2 %v672_v61 }
  0x96   : > { %479 = vmatpush.msra.mxu1 %v697_v59 }
  0x97   : > { %447 = vmatpush.msra.mxu0 %v663_v1  ;;  %507 = vmatpush.msra.mxu2 %v673_v62  ;;  %v401_v1 = vld [vmem:[%s961_s2 + $0x40] sm:$0xff] }
  0x98   : > { %480 = vmatpush.msra.mxu1 %v698_v0  ;;  %v396_v0 = vld [vmem:[%s961_s2 + $0x18] sm:$0xff] }
  0x99   : > { %448 = vmatpush.msra.mxu0 %v677_v3  ;;  %v399_v3 = vld [vmem:[%s961_s2 + $0x30] sm:$0xff] }
  0x9a   : > { %v691_v6 = vpop.permute.xlu1 %690  ;;  %v686_v7 = vpop.permute.xlu0 %685  ;;  %481 = vmatpush.msra.mxu1 %v712_v2  ;;  %v406_v2 = vld [vmem:[%s961_s2 + $0x68] sm:$0xff] }
  0x9b   : > { %449 = vmatpush.msra.mxu0 %v678_v5  ;;  %v692_v9 = vunpack.i.l.bf16 %v691_v6  ;;  %v687_v10 = vunpack.i.l.bf16 %v686_v7  ;;  %v693_v11 = vunpack.i.h.bf16 %v691_v6  ;;  %v741_v12 = vpop.permute.xlu2 %740  ;;  %v688_v14 = vunpack.i.h.bf16 %v686_v7  ;;  %v405_v5 = vld [vmem:[%s961_s2 + $0x60] sm:$0xff]  ;;  %v403_v6 = vld [vmem:[%s961_s2 + $0x50] sm:$0xff]  ;;  %v404_v7 = vld [vmem:[%s961_s2 + $0x58] sm:$0xff] }
  0x9c   : > { %482 = vmatpush.msra.mxu1 %v713_v4  ;;  %v742_v15 = vunpack.i.l.bf16 %v741_v12  ;;  %v743_v16 = vunpack.i.h.bf16 %v741_v12  ;;  %v400_v4 = vld [vmem:[%s961_s2 + $0x38] sm:$0xff] }
  0x9d   : > { %450 = vmatpush.msra.mxu0 %v692_v9  ;;  %508 = vmatpush.msra.mxu2 %v687_v10  ;;  %v408_v9 = vld [vmem:[%s961_s2 + $0x78] sm:$0xff] }
  0x9e   : > { %483 = vmatpush.msra.mxu1 %v727_v8  ;;  %v407_v8 = vld [vmem:[%s961_s2 + $0x70] sm:$0xff] }
  0x9f   : > { %451 = vmatpush.msra.mxu0 %v693_v11  ;;  %509 = vmatpush.msra.mxu2 %v688_v14 }
  0xa0   : > { %484 = vmatpush.msra.mxu1 %v728_v13 }
  0xa2   : > { %v706_v21 = vpop.permute.xlu1 %705  ;;  %v701_v22 = vpop.permute.xlu0 %700  ;;  %485 = vmatpush.msra.mxu1 %v742_v15 }
  0xa3   : > { %v707_v23 = vunpack.i.l.bf16 %v706_v21  ;;  %v702_v24 = vunpack.i.l.bf16 %v701_v22  ;;  %v708_v25 = vunpack.i.h.bf16 %v706_v21  ;;  %v756_v26 = vpop.permute.xlu2 %755  ;;  %v703_v29 = vunpack.i.h.bf16 %v701_v22 }
  0xa4   : > { %486 = vmatpush.msra.mxu1 %v743_v16  ;;  %v757_v27 = vunpack.i.l.bf16 %v756_v26  ;;  %v758_v28 = vunpack.i.h.bf16 %v756_v26 }
  0xa5   : > { %452 = vmatpush.msra.mxu0 %v707_v23  ;;  %510 = vmatpush.msra.mxu2 %v702_v24 }
  0xa6   : > { %487 = vmatpush.msra.mxu1 %v757_v27 }
  0xa7   : > { %453 = vmatpush.msra.mxu0 %v708_v25  ;;  %511 = vmatpush.msra.mxu2 %v703_v29 }
  0xa8   : > { %488 = vmatpush.msra.mxu1 %v758_v28 }
  0xa9   : > { %454 = vmatpush.msra.mxu0 %v842_v18  ;;  %v394_v18 = vld [vmem:[%s961_s2 + $0x8] sm:$0xff] }
  0xaa   : > { %v721_v30 = vpop.permute.xlu1 %720  ;;  %v716_v31 = vpop.permute.xlu0 %715 }
  0xab   : > { %v717_v32 = vunpack.i.l.bf16 %v716_v31  ;;  %v722_v35 = vunpack.i.l.bf16 %v721_v30  ;;  %v723_v36 = vunpack.i.h.bf16 %v721_v30  ;;  %455 = vmatpush.msra.mxu0 %v840_v17  ;;  %v771_v37 = vpop.permute.xlu2 %770  ;;  %v718_v40 = vunpack.i.h.bf16 %v716_v31 }
  0xac   : > { %v772_v38 = vunpack.i.l.bf16 %v771_v37  ;;  %v773_v39 = vunpack.i.h.bf16 %v771_v37  ;;  %v791_v17 = vmov 0  }
  0xad   : > { %512 = vmatpush.msra.mxu2 %v717_v32  ;;  %541 = vmatpush.msra.mxu3 %v722_v35 }
  0xae   : > { %456 = vmatpush.msra.mxu0 %v846_v20  ;;  %489 = vmatpush.msra.mxu1 %v772_v38 }
  0xaf   : > { %513 = vmatpush.msra.mxu2 %v718_v40  ;;  %542 = vmatpush.msra.mxu3 %v723_v36 }
  0xb0   : > { %457 = vmatpush.msra.mxu0 %v844_v19  ;;  %490 = vmatpush.msra.mxu1 %v773_v39 }
  0xb1   : > { %491 = vmatmul.f32.vlgmr.msra.gmra.mxu1 %v394_v18  ;;  %774 = vset.pattern.permute.xlu0 %v791_v17 }
  0xb2   : > { %v736_v44 = vpop.permute.xlu1 %735  ;;  %v731_v45 = vpop.permute.xlu0 %730  ;;  %458 = vmatpush.msra.mxu0 %v861_v34  ;;  %415 = vperm.xlu0 %774, %v409_v41   ;;  %v398_v34 = vld [vmem:[%s961_s2 + $0x28] sm:$0xff] }
  0xb3   : > { %v732_v20 = vunpack.i.l.bf16 %v731_v45  ;;  %v737_v46 = vunpack.i.l.bf16 %v736_v44  ;;  %v738_v47 = vunpack.i.h.bf16 %v736_v44  ;;  %775 = vset.pattern.permute.xlu1 %v791_v17  ;;  %776 = vset.pattern.permute.xlu2 %v791_v17  ;;  %v733_v19 = vunpack.i.h.bf16 %v731_v45 }
  0xb4   : > { %459 = vmatpush.msra.mxu0 %v859_v33  ;;  %v410_v33 = vld [vmem:[%s962_s3 + $0x8] sm:$0xff]  ;;  %425 = vperm.xlu2 %776, %v411_v56  }
  0xb5   : > { %514 = vmatpush.msra.mxu2 %v732_v20  ;;  %543 = vmatpush.msra.mxu3 %v737_v46 }
  0xb6   : > { %460 = vmatpush.msra.mxu0 %v869_v43  ;;  %420 = vperm.xlu1 %775, %v410_v33  }
  0xb7   : > { %515 = vmatpush.msra.mxu2 %v733_v19  ;;  %544 = vmatpush.msra.mxu3 %v738_v47 }
  0xb8   : > { %461 = vmatpush.msra.mxu0 %v867_v42  ;;  %v402_v42 = vld [vmem:[%s961_s2 + $0x48] sm:$0xff] }
  0xb9   : > { %462 = vmatmul.f32.vlgmr.msra.gmra.mxu0 %v393_v48  ;;  %494 = vmatmul.f32.gmra.mxu1 %v398_v34 }
  0xba   : > { %v751_v49 = vpop.permute.xlu1 %750  ;;  %v746_v43 = vpop.permute.xlu0 %745 }
  0xbb   : > { %v747_v50 = vunpack.i.l.bf16 %v746_v43  ;;  %v752_v51 = vunpack.i.l.bf16 %v751_v49  ;;  %v753_v52 = vunpack.i.h.bf16 %v751_v49  ;;  %v748_v53 = vunpack.i.h.bf16 %v746_v43 }
  0xbd   : > { %516 = vmatpush.msra.mxu2 %v747_v50  ;;  %545 = vmatpush.msra.mxu3 %v752_v51 }
  0xbe   : > { %430 = vperm.xlu1 %775, %v412_v55  }
  0xbf   : > { %517 = vmatpush.msra.mxu2 %v748_v53  ;;  %546 = vmatpush.msra.mxu3 %v753_v52 }
  0xc1   : > { %465 = vmatmul.f32.gmra.mxu0 %v397_v54  ;;  %497 = vmatmul.f32.gmra.mxu1 %v402_v42 }
  0xc2   : > { %v766_v57 = vpop.permute.xlu1 %765  ;;  %v761_v58 = vpop.permute.xlu0 %760 }
  0xc3   : > { %v762_v59 = vunpack.i.l.bf16 %v761_v58  ;;  %v767_v60 = vunpack.i.l.bf16 %v766_v57  ;;  %v768_v61 = vunpack.i.h.bf16 %v766_v57  ;;  %v763_v62 = vunpack.i.h.bf16 %v761_v58 }
  0xc5   : > { %518 = vmatpush.msra.mxu2 %v762_v59  ;;  %547 = vmatpush.msra.mxu3 %v767_v60 }
  0xc7   : > { %519 = vmatpush.msra.mxu2 %v763_v62  ;;  %548 = vmatpush.msra.mxu3 %v768_v61 }
  0xc8   : > { %520 = vmatmul.f32.vlgmr.msra.gmra.mxu2 %v395_v63  ;;  %631 = vmatmul.msk.f32.vlgmr.msra.gmra.mxu3 %vm433_vm0, %v396_v0 }
  0xc9   : > { %468 = vmatmul.f32.gmra.mxu0 %v401_v1  ;;  %500 = vmatmul.f32.gmra.mxu1 %v406_v2 }
  0xd0   : > { %523 = vmatmul.f32.gmra.mxu2 %v399_v3  ;;  %632 = vmatmul.msk.f32.gmra.mxu3 %vm433_vm0, %v400_v4 }
  0xd1   : > { %471 = vmatmul.f32.gmra.mxu0 %v405_v5 }
  0xd8   : > { %526 = vmatmul.f32.gmra.mxu2 %v403_v6  ;;  %633 = vmatmul.msk.f32.gmra.mxu3 %vm433_vm0, %v404_v7 }
  0xe0   : > { %529 = vmatmul.f32.gmra.mxu2 %v407_v8  ;;  %634 = vmatmul.msk.f32.gmra.mxu3 %vm433_vm0, %v408_v9 }
 0x10e   : > { %v426_v29 = vpop.permute.xlu2 %425 }
 0x124   : > { %v416_v12 = vpop.permute.xlu0 %415 }
 0x128   : > { %v421_v16 = vpop.permute.xlu1 %420 }
 0x12e   : > { %v492_v11 = vpop.f32.mrf.mxu1 }
 0x130   : > { %v431_v39 = vpop.permute.xlu1 %430 }
 0x136   : > { %v463_v10 = vpop.f32.mrf.mxu0  ;;  %v495_v21 = vpop.f32.mrf.mxu1 }
 0x137   : > { %v464_v13 = vadd.f32 %v463_v10, %v416_v12 }
 0x139   : > { %v493_v15 = vadd.f32 %v492_v11, %v464_v13 }
 0x13e   : > { %v466_v14 = vpop.f32.mrf.mxu0  ;;  %v498_v36 = vpop.f32.mrf.mxu1 }
 0x13f   : > { %v467_v25 = vadd.f32 %v466_v14, %v421_v16 }
 0x141   : > { %v496_v28 = vadd.f32 %v495_v21, %v467_v25 }
 0x146   : > { %v469_v27 = vpop.f32.mrf.mxu0  ;;  %v501_v20 = vpop.f32.mrf.mxu1 }
 0x147   : > { %v470_v35 = vadd.f32 %v469_v27, %v426_v29 }
 0x149   : > { %v499_v38 = vadd.f32 %v498_v36, %v470_v35 }
 0x14b   : > { %v521_v22 = vpop.f32.mrf.mxu2  ;;  %v550_v23 = vpop.f32.mrf.mxu3 }
 0x14c   : > { %v522_v24 = vadd.f32 %v521_v22, %v493_v15 }
 0x14e   : > { %v551_v26 = vadd.f32 %v550_v23, %v522_v24  ;;  %v472_v40 = vpop.f32.mrf.mxu0 }
 0x14f   : > { %v473_v44 = vadd.f32 %v472_v40, %v431_v39 }
 0x150   : > { %563 = vst.msk [vmem:[%s198_s22] sm:$0xff] %vm562_vm1, %v551_v26 }
 0x151   : > { %v502_v46 = vadd.f32 %v501_v20, %v473_v44 }
 0x153   : > { %v524_v30 = vpop.f32.mrf.mxu2  ;;  %v553_v31 = vpop.f32.mrf.mxu3 }
 0x154   : > { %v525_v32 = vadd.f32 %v524_v30, %v496_v28 }
 0x156   : > { %v554_v37 = vadd.f32 %v553_v31, %v525_v32 }
 0x158   : > { %564 = vst.msk [vmem:[%s198_s22 + $0x8] sm:$0xff] %vm562_vm1, %v554_v37 }
 0x15b   : > { %v527_v18 = vpop.f32.mrf.mxu2  ;;  %v556_v17 = vpop.f32.mrf.mxu3 }
 0x15c   : > { %v528_v41 = vadd.f32 %v527_v18, %v499_v38 }
 0x15e   : > { %v557_v45 = vadd.f32 %v556_v17, %v528_v41 }
 0x160   : > { %565 = vst.msk [vmem:[%s198_s22 + $0x10] sm:$0xff] %vm562_vm1, %v557_v45 }
 0x163   : > { %v530_v47 = vpop.f32.mrf.mxu2  ;;  %v559_v19 = vpop.f32.mrf.mxu3 }
 0x164   : > { %v531_v48 = vadd.f32 %v530_v47, %v502_v46 }
 0x166   : > { %v560_v34 = vadd.f32 %v559_v19, %v531_v48 }
 0x168   : > { %566 = vst.msk [vmem:[%s198_s22 + $0x18] sm:$0xff] %vm562_vm1, %v560_v34 }
 0x169 PF: > { %s15_s17 = sadd.s32 1, %s783_s17  }
 0x16a   : > { %p12_p4 = scmp.ge.s32.totalorder %s15_s17, 4  }
 0x16c   :  { %14 = sbr.rel (!%p12_p4) target bundleno = 2 (0x2), region = 66 }

// kernel: generator_forward.18
= control target key start
LH: loop header
LB: loop body
LE: loop exit
PB: predicated region body
PF: predicated region fallthrough
CT: control target
= control target key end

     0   :  { %s931_s13 = smov 0   ;;  %s1112_s0 = inlined_call_operand.<no memory space> [shape: f32[1], index: 0, kind: input, shape index: {}]   ;;  %s1113_s1 = inlined_call_operand.<no memory space> [shape: f32[1], index: 1, kind: input, shape index: {}]   ;;  %s1114_s2 = inlined_call_operand.vmem [shape: f32[2,64,2], index: 2, kind: input, shape index: {}]   ;;  %s1115_s3 = inlined_call_operand.vmem [shape: f32[8,64], index: 3, kind: input, shape index: {}]   ;;  %s1116_s4 = inlined_call_operand.vmem [shape: f32[8,1], index: 4, kind: input, shape index: {}]   ;;  %s1117_s5 = inlined_call_operand.vmem [shape: f32[8,64], index: 5, kind: input, shape index: {}]   ;;  %s1118_s6 = inlined_call_operand.vmem [shape: f32[8,1], index: 6, kind: input, shape index: {}]   ;;  %s1119_s7 = inlined_call_operand.vmem [shape: f32[64,64], index: 7, kind: input, shape index: {}]   ;;  %s1120_s8 = inlined_call_operand.vmem [shape: f32[64,1], index: 8, kind: input, shape index: {}]   ;;  %s1121_s9 = inlined_call_operand.vmem [shape: f32[2,64,2], index: 9, kind: output, shape index: {}]  }
   0x1   :  { %14 = sst [smem:[#allocation2]] %s1112_s0 }
   0x2   :  { %15 = sst [smem:[#allocation3]] %s1113_s1 }
   0x3 LB: > { %s807_s14 = sadd.s32 4294967295, %s872_s13   ;;  %p811_p0 = scmp.ge.s32.totalorder %s872_s13, 1  ;;  %s872_s13 = sphi %s931_s13, %s21_s13  }
   0x4   : > { %p289_p1 = scmp.lt.s32.totalorder %s872_s13, 3 }
   0x6   : > { %p290_p2 = pnand %p811_p0, %p289_p1 }
   0x7   : > { %p325_p3 = scmp.lt.s32.totalorder (!%p290_p2), %s807_s14, 1  ;;  %s343_s1 = sld [smem:[#allocation3]] (!%p290_p2) }
   0x8   : > { %293 = sbr.rel (%p290_p2) target bundleno = 663 (0x297), region = 56  ;;  %s718_s18 = sld [smem:[#allocation2]] (!%p290_p2) }
   0xd   : > { %v409_v0 = vld [vmem:[%s1118_s6] sm:$0xff]  ;;  %v874_v1 = vmov 0   ;;  %s1123_s14 = smov (!%p325_p3, %s807_s14), 1  ;;  %v360_v4 = vstv %s343_s1  ;;  %v451_v33 = vld [vmem:[%s1120_s8 + $0x28] sm:$0xff]  ;;  %vm384_vm0 = vcmask 523264   ;;  %v441_v48 = vld [vmem:[%s1119_s7 + $0x18] sm:$0xff] }
   0xe   : > { %859 = vset.pattern.permute.xlu0 %v874_v1  ;;  %861 = vset.pattern.permute.xlu2 %v874_v1  ;;  %s838_s16 = sshll.u32 %s1123_s14, 6  ;;  %v378_v2 = vld [vmem:[%s1116_s4] sm:$0xff]  ;;  %v447_v49 = vld [vmem:[%s1120_s8 + $0x8] sm:$0xff]  ;;  %v444_v60 = vld [vmem:[%s1119_s7 + $0x30] sm:$0xff]  ;;  %vm591_vm1 = vcmask 64512   ;;  %vm615_vm2 = vcmask 9216  }
   0xf   : > { %412 = vperm.xlu0 %859, %v409_v0   ;;  %s329_s19 = scalar_lea.vmem %s1114_s2, %s838_s16  ;;  %v446_v45 = vld [vmem:[%s1120_s8] sm:$0xff]  ;;  %v443_v52 = vld [vmem:[%s1119_s7 + $0x28] sm:$0xff]  ;;  %v440_v61 = vld [vmem:[%s1119_s7 + $0x10] sm:$0xff]  ;;  %vm673_vm3 = vcmask 1041408   ;;  %vm648_vm4 = vcmask 15360   ;;  %s1083_s21 = scalar_lea.vmem %s1121_s9, %s838_s16 }
  0x10   : > { %v342_v3 = vld [vmem:[%s329_s19 + $0x38] sm:$0xff]  ;;  %v341_v5 = vld [vmem:[%s329_s19 + $0x30] sm:$0xff]  ;;  %v340_v6 = vld [vmem:[%s329_s19 + $0x28] sm:$0xff] }
  0x11   : > { %v351_v7 = vmax.f32 %v342_v3, 0.0  ;;  %v359_v8 = vmin.f32 %v342_v3, 0.0  ;;  %v350_v9 = vmax.f32 %v341_v5, 0.0  ;;  %v358_v10 = vmin.f32 %v341_v5, 0.0  ;;  %v339_v11 = vld [vmem:[%s329_s19 + $0x20] sm:$0xff]  ;;  %v338_v12 = vld [vmem:[%s329_s19 + $0x18] sm:$0xff] }
  0x12   : > { %v357_v13 = vmin.f32 %v340_v6, 0.0  ;;  %v356_v14 = vmin.f32 %v339_v11, 0.0  ;;  %v337_v15 = vld [vmem:[%s329_s19 + $0x10] sm:$0xff]  ;;  %v349_v18 = vmax.f32 %v340_v6, 0.0  ;;  %v355_v19 = vmin.f32 %v338_v12, 0.0  ;;  %v336_v22 = vld [vmem:[%s329_s19 + $0x8] sm:$0xff] }
  0x13   : > { %v368_v16 = vmul.f32 %v360_v4, %v359_v8  ;;  %v367_v17 = vmul.f32 %v360_v4, %v358_v10  ;;  %v348_v21 = vmax.f32 %v339_v11, 0.0  ;;  %v354_v26 = vmin.f32 %v337_v15, 0.0  ;;  %v335_v27 = vld [vmem:[%s329_s19] sm:$0xff]  ;;  %v439_v53 = vld [vmem:[%s1119_s7 + $0x8] sm:$0xff]  ;;  %v448_v62 = vld [vmem:[%s1120_s8 + $0x10] sm:$0xff] }
  0x14   : > { %v366_v20 = vmul.f32 %v360_v4, %v357_v13  ;;  %v365_v25 = vmul.f32 %v360_v4, %v356_v14  ;;  %v347_v29 = vmax.f32 %v338_v12, 0.0  ;;  %v364_v30 = vmul.f32 %v360_v4, %v355_v19  ;;  %v377_v46 = vld [vmem:[%s1115_s3] sm:$0xff]  ;;  %v449_v63 = vld [vmem:[%s1120_s8 + $0x18] sm:$0xff] }
  0x15   : > { %v955_v23 = vadd.f32 %v368_v16, %v351_v7  ;;  %v957_v24 = vadd.f32 %v367_v17, %v350_v9  ;;  %v353_v31 = vmin.f32 %v336_v22, 0.0  ;;  %v346_v34 = vmax.f32 %v337_v15, 0.0  ;;  %v408_v47 = vld [vmem:[%s1117_s5] sm:$0xff]  ;;  %471 = vperm.xlu2 %861, %v449_v63   ;;  %v445_v0 = vld [vmem:[%s1119_s7 + $0x38] sm:$0xff] }
  0x16   : > { %v961_v28 = vadd.f32 %v366_v20, %v349_v18  ;;  %v966_v32 = vadd.f32 %v365_v25, %v348_v21  ;;  %v363_v35 = vmul.f32 %v360_v4, %v354_v26  ;;  %v352_v36 = vmin.f32 %v335_v27, 0.0  ;;  %v442_v50 = vld [vmem:[%s1119_s7 + $0x20] sm:$0xff]  ;;  %v453_v3 = vld [vmem:[%s1120_s8 + $0x38] sm:$0xff] }
  0x17   : > { %381 = vperm.xlu0 %859, %v378_v2   ;;  %396 = vmatpush.msra.mxu0 %v955_v23  ;;  %v974_v37 = vadd.f32 %v364_v30, %v347_v29  ;;  %v345_v38 = vmax.f32 %v336_v22, 0.0  ;;  %v362_v39 = vmul.f32 %v360_v4, %v353_v31  ;;  %v344_v41 = vmax.f32 %v335_v27, 0.0  ;;  %v438_v51 = vld [vmem:[%s1119_s7] sm:$0xff]  ;;  %v452_v2 = vld [vmem:[%s1120_s8 + $0x30] sm:$0xff] }
  0x18   : > { %426 = vmatpush.msra.mxu1 %v955_v23  ;;  %840 = vmatpush.msra.mxu2 %v955_v23  ;;  %v979_v40 = vadd.f32 %v363_v35, %v346_v34  ;;  %v361_v42 = vmul.f32 %v360_v4, %v352_v36 }
  0x19   : > { %397 = vmatpush.msra.mxu0 %v957_v24  ;;  %v984_v43 = vadd.f32 %v362_v39, %v345_v38 }
  0x1a   : > { %427 = vmatpush.msra.mxu1 %v957_v24  ;;  %841 = vmatpush.msra.mxu2 %v957_v24  ;;  %v989_v44 = vadd.f32 %v361_v42, %v344_v41 }
  0x1b   : > { %398 = vmatpush.msra.mxu0 %v961_v28 }
  0x1c   : > { %428 = vmatpush.msra.mxu1 %v961_v28  ;;  %842 = vmatpush.msra.mxu2 %v961_v28 }
  0x1d   : > { %399 = vmatpush.msra.mxu0 %v966_v32 }
  0x1e   : > { %429 = vmatpush.msra.mxu1 %v966_v32  ;;  %843 = vmatpush.msra.mxu2 %v966_v32 }
  0x1f   : > { %481 = vperm.xlu0 %859, %v451_v33   ;;  %400 = vmatpush.msra.mxu0 %v974_v37 }
  0x20   : > { %430 = vmatpush.msra.mxu1 %v974_v37  ;;  %844 = vmatpush.msra.mxu2 %v974_v37 }
  0x21   : > { %401 = vmatpush.msra.mxu0 %v979_v40 }
  0x22   : > { %431 = vmatpush.msra.mxu1 %v979_v40  ;;  %845 = vmatpush.msra.mxu2 %v979_v40 }
  0x23   : > { %402 = vmatpush.msra.mxu0 %v984_v43 }
  0x24   : > { %432 = vmatpush.msra.mxu1 %v984_v43  ;;  %846 = vmatpush.msra.mxu2 %v984_v43 }
  0x25   : > { %403 = vmatpush.msra.mxu0 %v989_v44 }
  0x26   : > { %433 = vmatpush.msra.mxu1 %v989_v44  ;;  %847 = vmatpush.msra.mxu2 %v989_v44 }
  0x27   : > { %456 = vperm.xlu0 %859, %v446_v45   ;;  %816 = vmatmul.msk.f32.vlgmr.msra.gmra.mxu0 %vm384_vm0, %v377_v46 }
  0x28   : > { %817 = vmatmul.msk.f32.vlgmr.msra.gmra.mxu1 %vm384_vm0, %v408_v47  ;;  %526 = vmatpush.msrb.mxu0 %v955_v23 }
  0x29   : > { %821 = vmatmul.msk.f32.vlgmr.msra.gmra.mxu2 %vm384_vm0, %v441_v48 }
  0x2a   : > { %527 = vmatpush.msrb.mxu0 %v957_v24 }
  0x2c   : > { %528 = vmatpush.msrb.mxu0 %v961_v28 }
  0x2e   : > { %529 = vmatpush.msrb.mxu0 %v966_v32 }
  0x2f   : > { %461 = vperm.xlu0 %859, %v447_v49  }
  0x30   : > { %530 = vmatpush.msrb.mxu0 %v974_v37 }
  0x31   : > { %822 = vmatmul.msk.f32.gmra.mxu2 %vm384_vm0, %v442_v50 }
  0x32   : > { %531 = vmatpush.msrb.mxu0 %v979_v40 }
  0x34   : > { %532 = vmatpush.msrb.mxu0 %v984_v43 }
  0x36   : > { %533 = vmatpush.msrb.mxu0 %v989_v44 }
  0x37   : > { %818 = vmatmul.msk.f32.vlgmr.msrb.gmra.mxu0 %vm384_vm0, %v438_v51 }
  0x39   : > { %823 = vmatmul.msk.f32.gmra.mxu2 %vm384_vm0, %v443_v52 }
  0x3f   : > { %819 = vmatmul.msk.f32.gmra.mxu0 %vm384_vm0, %v439_v53 }
  0x41   : > { %824 = vmatmul.msk.f32.gmra.mxu2 %vm384_vm0, %v444_v60 }
  0x47   : > { %820 = vmatmul.msk.f32.gmra.mxu0 %vm384_vm0, %v440_v61 }
  0x49   : > { %825 = vmatmul.msk.f32.gmra.mxu2 %vm384_vm0, %v445_v0 }
  0x6f   : > { %v472_v29 = vpop.permute.xlu2 %471 }
  0x81   : > { %v413_v54 = vpop.permute.xlu0 %412 }
  0x89   : > { %v382_v55 = vpop.permute.xlu0 %381 }
  0x91   : > { %v482_v13 = vpop.permute.xlu0 %481 }
  0x99   : > { %v457_v20 = vpop.permute.xlu0 %456 }
  0xa1   : > { %v462_v31 = vpop.permute.xlu0 %461 }
  0xa4   : > { %v405_v56 = vpop.f32.mrf.mxu0 }
  0xa5   : > { %v406_v57 = vadd.f32 %v405_v56, %v382_v55  ;;  %v435_v58 = vpop.f32.mrf.mxu1 }
  0xa6   : > { %v436_v59 = vadd.f32 %v435_v58, %v413_v54 }
  0xa7   : > { %610 = vmatpush.msrb.mxu1 %v406_v57 }
  0xa8   : > { %559 = vxpose.xlu1.b32.start.end [1/1] (short) (narrow) %v436_v59, 8 }
  0xac   : > { %v544_v22 = vpop.f32.mrf.mxu2 }
  0xad   : > { %v545_v30 = vadd.f32 %v544_v22, %v472_v29 }
  0xb4   : > { %v535_v6 = vpop.f32.mrf.mxu0  ;;  %v547_v34 = vpop.f32.mrf.mxu2 }
  0xb5   : > { %v536_v26 = vadd.f32 %v535_v6, %v457_v20 }
  0xbc   : > { %v538_v14 = vpop.f32.mrf.mxu0  ;;  %v550_v38 = vpop.f32.mrf.mxu2 }
  0xbd   : > { %v539_v33 = vadd.f32 %v538_v14, %v462_v31  ;;  %v551_v39 = vadd.f32 %v550_v38, %v482_v13 }
  0xc4   : > { %v541_v19 = vpop.f32.mrf.mxu0  ;;  %v553_v42 = vpop.f32.mrf.mxu2 }
  0xcc   : > { %v556_v47 = vpop.f32.mrf.mxu2 }
  0xfb   : > { %860 = vset.pattern.permute.xlu1 %v874_v1  ;;  %v450_v1 = vld [vmem:[%s1120_s8 + $0x20] sm:$0xff] }
  0xfc   : > { %476 = vperm.xlu2 %861, %v450_v1  }
 0x102   : > { %466 = vperm.xlu1 %860, %v448_v62  }
 0x104   : > { %486 = vperm.xlu2 %861, %v452_v2   ;;  %v727_v2 = vstv %s718_s18 }
 0x10c   : > { %491 = vperm.xlu2 %861, %v453_v3  }
 0x14c   : > { %v575_v4 = vpop.trf.xlu1 }
 0x14d   : > { %826 = vmatmul.msk.f32.vlgmr.msrb.gmra.mxu1 %vm591_vm1, %v575_v4 }
 0x156   : > { %v477_v35 = vpop.permute.xlu2 %476 }
 0x157   : > { %v548_v36 = vadd.f32 %v547_v34, %v477_v35 }
 0x15e   : > { %v487_v41 = vpop.permute.xlu2 %486 }
 0x15f   : > { %v554_v45 = vadd.f32 %v553_v42, %v487_v41 }
 0x166   : > { %v492_v46 = vpop.permute.xlu2 %491 }
 0x167   : > { %v557_v48 = vadd.f32 %v556_v47, %v492_v46 }
 0x174   : > { %v467_v18 = vpop.permute.xlu1 %466 }
 0x175   : > { %v542_v21 = vadd.f32 %v541_v19, %v467_v18 }
 0x1ca   : > { %v612_v5 = vpop.f32.mrf.mxu1 }
 0x1cb   : > { %v616_v7 = vsel %vm615_vm2, %v612_v5, -inf }
 0x1cc   : > { %v617_v8 = vrot.slane %v616_v7, 4 }
 0x1ce   : > { %v618_v9 = vmax.f32 %v616_v7, %v617_v8 }
 0x1d0   : > { %v619_v10 = vrot.slane %v618_v9, 2 }
 0x1d2   : > { %v620_v11 = vmax.f32 %v618_v9, %v619_v10 }
 0x1d4   : > { %v621_v12 = vrot.slane %v620_v11, 1 }
 0x1d6   : > { %v622_v15 = vmax.f32 %v620_v11, %v621_v12 }
 0x1d8   : > { %v623_v16 = vsub.f32 %v612_v5, %v622_v15 }
 0x1da   : > { %v624_v17 = vmul.f32 1.442695, %v623_v16 }
 0x1dc   : > { %862 = vpow2.f32 %v624_v17 }
 0x1e2   : > { %v863_v25 = vpop.eup %862 }
 0x1e3   : > { %v626_v27 = vsel %vm615_vm2, %v863_v25, 0.0  ;;  %827 = vmatpush.msk.msra.mxu1 %vm673_vm3, %v863_v25  ;;  %848 = vmatpush.msk.msra.mxu3 %vm673_vm3, %v863_v25 }
 0x1e4   : > { %828 = vmatmul.msk.f32.vlgmr.msra.gmra.mxu1 %vm648_vm4, %v536_v26  ;;  %830 = vmatmul.msk.f32.vlgmr.msra.gmra.mxu3 %vm648_vm4, %v542_v21  ;;  %v627_v49 = vrot.slane %v626_v27, 4 }
 0x1e6   : > { %v628_v50 = vadd.f32 %v627_v49, %v626_v27 }
 0x1e8   : > { %v629_v51 = vrot.slane %v628_v50, 2 }
 0x1ea   : > { %v630_v52 = vadd.f32 %v629_v51, %v628_v50 }
 0x1ec   : > { %829 = vmatmul.msk.f32.gmra.mxu1 %vm648_vm4, %v539_v33  ;;  %831 = vmatmul.msk.f32.gmra.mxu3 %vm648_vm4, %v545_v30  ;;  %v631_v53 = vrot.slane %v630_v52, 1 }
 0x1ee   : > { %v632_v54 = vadd.f32 %v631_v53, %v630_v52 }
 0x1f0   : > { %864 = vrcp.f32 %v632_v54  ;;  %v644_v60 = vand.u32 2147483648, %v632_v54  ;;  %vm638_vm6 = vweird.f32 %v632_v54  ;;  %v642_v61 = vand.u32 2147483647, %v632_v54 }
 0x1f2   : > { %v645_v63 = vor.u32 1.1754944e-38, %v644_v60  ;;  %vm643_vm8 = vcmp.eq.f32.partialorder %v642_v61, 8.507059e+37 }
 0x1f4   : > { %832 = vmatmul.msk.f32.gmra.mxu3 %vm648_vm4, %v548_v36 }
 0x1f6   : > { %v865_v55 = vpop.eup %864 }
 0x1f7   : > { %v634_v56 = vmul.f32 %v865_v55, %v632_v54  ;;  %vm639_vm5 = vweird.f32 %v865_v55 }
 0x1f8   : > { %vm640_vm7 = vmor %vm638_vm6, %vm639_vm5 }
 0x1f9   : > { %v635_v57 = vsub.f32 1.0, %v634_v56 }
 0x1fb   : > { %v636_v58 = vmul.f32 %v865_v55, %v635_v57 }
 0x1fc   : > { %833 = vmatmul.msk.f32.gmra.mxu3 %vm648_vm4, %v551_v39 }
 0x1fd   : > { %v637_v59 = vadd.f32 %v865_v55, %v636_v58 }
 0x1ff   : > { %v641_v62 = vsel %vm640_vm7, %v865_v55, %v637_v59 }
 0x200   : > { %v646_v0 = vsel %vm643_vm8, %v645_v63, %v641_v62 }
 0x204   : > { %834 = vmatmul.msk.f32.gmra.mxu3 %vm648_vm4, %v554_v45 }
 0x20c   : > { %835 = vmatmul.msk.f32.gmra.mxu3 %vm648_vm4, %v557_v48 }
 0x261   : > { %v694_v1 = vpop.f32.mrf.mxu1 }
 0x262   : > { %v719_v3 = vmul.f32 %v694_v1, %v646_v0 }
 0x264   : > { %v728_v4 = vmul.f32 %v727_v2, %v719_v3 }
 0x266   : > { %v736_v5 = vadd.f32 %v728_v4, %v989_v44 }
 0x267   : > { %v700_v6 = vpop.f32.mrf.mxu3 }
 0x268   : > { %744 = vst.msk [vmem:[%s1083_s21] sm:$0xff] %vm648_vm4, %v736_v5  ;;  %v721_v7 = vmul.f32 %v700_v6, %v646_v0 }
 0x269   : > { %v697_v8 = vpop.f32.mrf.mxu1 }
 0x26a   : > { %v730_v9 = vmul.f32 %v727_v2, %v721_v7  ;;  %v720_v10 = vmul.f32 %v697_v8, %v646_v0 }
 0x26c   : > { %v738_v11 = vadd.f32 %v730_v9, %v979_v40  ;;  %v729_v12 = vmul.f32 %v727_v2, %v720_v10 }
 0x26e   : > { %746 = vst.msk [vmem:[%s1083_s21 + $0x10] sm:$0xff] %vm648_vm4, %v738_v11  ;;  %v737_v13 = vadd.f32 %v729_v12, %v984_v43 }
 0x26f   : > { %v703_v14 = vpop.f32.mrf.mxu3 }
 0x270   : > { %745 = vst.msk [vmem:[%s1083_s21 + $0x8] sm:$0xff] %vm648_vm4, %v737_v13  ;;  %v722_v44 = vmul.f32 %v703_v14, %v646_v0 }
 0x272   : > { %v731_v15 = vmul.f32 %v727_v2, %v722_v44 }
 0x274   : > { %v739_v16 = vadd.f32 %v731_v15, %v974_v37 }
 0x276   : > { %747 = vst.msk [vmem:[%s1083_s21 + $0x18] sm:$0xff] %vm648_vm4, %v739_v16 }
 0x277   : > { %v706_v17 = vpop.f32.mrf.mxu3 }
 0x278   : > { %v723_v18 = vmul.f32 %v706_v17, %v646_v0 }
 0x27a   : > { %v732_v19 = vmul.f32 %v727_v2, %v723_v18 }
 0x27c   : > { %v740_v40 = vadd.f32 %v732_v19, %v966_v32 }
 0x27e   : > { %748 = vst.msk [vmem:[%s1083_s21 + $0x20] sm:$0xff] %vm648_vm4, %v740_v40 }
 0x27f   : > { %v709_v43 = vpop.f32.mrf.mxu3 }
 0x280   : > { %v724_v20 = vmul.f32 %v709_v43, %v646_v0 }
 0x282   : > { %v733_v21 = vmul.f32 %v727_v2, %v724_v20 }
 0x284   : > { %v741_v22 = vadd.f32 %v733_v21, %v961_v28 }
 0x286   : > { %749 = vst.msk [vmem:[%s1083_s21 + $0x28] sm:$0xff] %vm648_vm4, %v741_v22 }
 0x287   : > { %v712_v25 = vpop.f32.mrf.mxu3 }
 0x288   : > { %v725_v37 = vmul.f32 %v712_v25, %v646_v0 }
 0x28a   : > { %v734_v26 = vmul.f32 %v727_v2, %v725_v37 }
 0x28c   : > { %v742_v27 = vadd.f32 %v734_v26, %v957_v24 }
 0x28e   : > { %750 = vst.msk [vmem:[%s1083_s21 + $0x30] sm:$0xff] %vm648_vm4, %v742_v27 }
 0x28f   : > { %v715_v29 = vpop.f32.mrf.mxu3 }
 0x290   : > { %v726_v30 = vmul.f32 %v715_v29, %v646_v0 }
 0x292   : > { %v735_v32 = vmul.f32 %v727_v2, %v726_v30 }
 0x294   : > { %v743_v31 = vadd.f32 %v735_v32, %v955_v23 }
 0x296   : > { %751 = vst.msk [vmem:[%s1083_s21 + $0x38] sm:$0xff] %vm648_vm4, %v743_v31 }
 0x297 PF: > { %s21_s13 = sadd.s32 1, %s872_s13  }
 0x298   : > { %p18_p4 = scmp.ge.s32.totalorder %s21_s13, 4  }
 0x29a   :  { %20 = sbr.rel (!%p18_p4) target bundleno = 3 (0x3), region = 86 }

// kernel: generator_forward.17
= control target key start
LH: loop header
LB: loop body
LE: loop exit
PB: predicated region body
PF: predicated region fallthrough
CT: control target
= control target key end

     0   :  { %s1402_s17 = smov 0   ;;  %s1821_s0 = inlined_call_operand.<no memory space> [shape: f32[1], index: 0, kind: input, shape index: {}]   ;;  %s1822_s1 = inlined_call_operand.vmem [shape: f32[2,128,8], index: 1, kind: input, shape index: {}]   ;;  %s1823_s2 = inlined_call_operand.vmem [shape: f32[64,896], index: 2, kind: input, shape index: {}]   ;;  %s1824_s3 = inlined_call_operand.vmem [shape: f32[64,1], index: 3, kind: input, shape index: {}]   ;;  %s1825_s4 = inlined_call_operand.vmem [shape: f32[2,64,2], index: 4, kind: output, shape index: {}]  }
   0x1   :  { %9 = sst [smem:[#allocation2]] %s1821_s0 }
   0x2 LB: > { %s1040_s18 = sadd.s32 4294967295, %s1365_s17   ;;  %p1044_p0 = scmp.ge.s32.totalorder %s1365_s17, 1  ;;  %s1365_s17 = sphi %s1402_s17, %s15_s17  }
   0x3   : > { %p163_p1 = scmp.lt.s32.totalorder %s1365_s17, 3 }
   0x5   : > { %p164_p2 = pnand %p1044_p0, %p163_p1 }
   0x6   : > { %p189_p3 = scmp.lt.s32.totalorder (!%p164_p2), %s1040_s18, 1  ;;  %s215_s19 = sld [smem:[#allocation2]] (!%p164_p2) }
   0x7   : > { %167 = sbr.rel (%p164_p2) target bundleno = 441 (0x1b9), region = 36  ;;  %s1367_s23 = smov (!%p164_p2), 127  }
   0x8   : > { %s1368_s24 = smov (!%p164_p2), 126   ;;  %s1369_s25 = smov (!%p164_p2), 125  }
   0x9   : > { %s1370_s26 = smov (!%p164_p2), 124   ;;  %s1371_s27 = smov (!%p164_p2), 122  }
   0xa   : > { %s1372_s28 = smov (!%p164_p2), 123  }
   0xc   : > { %s1827_s18 = smov (!%p189_p3, %s1040_s18), 1  ;;  %v1420_v2 = vstv %s215_s19  ;;  %vm976_vm0 = vcmask 15360  }
   0xd   : > { %s1051_s0 = sshll.u32 %s1827_s18, 7  ;;  %s1052_s6 = sshll.u32 %s1827_s18, 6 }
   0xe   : > { %s1416_s22 = scalar_lea.vmem %s1822_s1, %s1051_s0  ;;  %s1789_s9 = scalar_lea.vmem %s1825_s4, %s1052_s6 }
   0xf   : > { %v203_v0 = vld [vmem:[%s1416_s22 + $0x20] sm:$0xff]  ;;  %v204_v1 = vld [vmem:[%s1416_s22 + $0x28] sm:$0xff]  ;;  %v205_v9 = vld [vmem:[%s1416_s22 + $0x30] sm:$0xff] }
  0x10   : > { %v199_v3 = vld [vmem:[%s1416_s22] sm:$0xff]  ;;  %v220_v4 = vmax.f32 %v203_v0, 0.0  ;;  %v221_v5 = vmax.f32 %v204_v1, 0.0  ;;  %v236_v6 = vmin.f32 %v203_v0, 0.0  ;;  %v237_v7 = vmin.f32 %v204_v1, 0.0  ;;  %v200_v8 = vld [vmem:[%s1416_s22 + $0x8] sm:$0xff] }
  0x11   : > { %v216_v10 = vmax.f32 %v199_v3, 0.0  ;;  %v217_v11 = vmax.f32 %v200_v8, 0.0  ;;  %v232_v12 = vmin.f32 %v199_v3, 0.0  ;;  %v233_v13 = vmin.f32 %v200_v8, 0.0  ;;  %v206_v14 = vld [vmem:[%s1416_s22 + $0x38] sm:$0xff]  ;;  %v201_v23 = vld [vmem:[%s1416_s22 + $0x10] sm:$0xff] }
  0x12   : > { %v253_v15 = vmul.f32 %v1420_v2, %v236_v6  ;;  %v254_v16 = vmul.f32 %v1420_v2, %v237_v7  ;;  %v222_v17 = vmax.f32 %v205_v9, 0.0  ;;  %v223_v18 = vmax.f32 %v206_v14, 0.0  ;;  %v202_v24 = vld [vmem:[%s1416_s22 + $0x18] sm:$0xff]  ;;  %v211_v32 = vld [vmem:[%s1416_s22 + $0x60] sm:$0xff]  ;;  %v212_v33 = vld [vmem:[%s1416_s22 + $0x68] sm:$0xff] }
  0x13   : > { %v249_v19 = vmul.f32 %v1420_v2, %v232_v12  ;;  %v250_v20 = vmul.f32 %v1420_v2, %v233_v13  ;;  %v238_v21 = vmin.f32 %v205_v9, 0.0  ;;  %v239_v22 = vmin.f32 %v206_v14, 0.0  ;;  %v213_v38 = vld [vmem:[%s1416_s22 + $0x70] sm:$0xff]  ;;  %v214_v46 = vld [vmem:[%s1416_s22 + $0x78] sm:$0xff]  ;;  %v207_v55 = vld [vmem:[%s1416_s22 + $0x40] sm:$0xff] }
  0x14   : > { %v1432_v25 = vadd.f32 %v253_v15, %v220_v4  ;;  %v1434_v26 = vadd.f32 %v254_v16, %v221_v5  ;;  %v218_v27 = vmax.f32 %v201_v23, 0.0  ;;  %v219_v35 = vmax.f32 %v202_v24, 0.0  ;;  %v208_v58 = vld [vmem:[%s1416_s22 + $0x48] sm:$0xff]  ;;  %v209_v63 = vld [vmem:[%s1416_s22 + $0x50] sm:$0xff]  ;;  %v210_v0 = vld [vmem:[%s1416_s22 + $0x58] sm:$0xff] }
  0x15   : > { %v1436_v28 = vadd.f32 %v249_v19, %v216_v10  ;;  %v1438_v29 = vadd.f32 %v250_v20, %v217_v11  ;;  %v255_v30 = vmul.f32 %v1420_v2, %v238_v21  ;;  %v256_v31 = vmul.f32 %v1420_v2, %v239_v22 }
  0x16   : > { %v1126_v34 = vpack.i.bf16 %v1434_v26, %v1432_v25  ;;  %v234_v36 = vmin.f32 %v201_v23, 0.0  ;;  %v235_v37 = vmin.f32 %v202_v24, 0.0  ;;  %v244_v44 = vmin.f32 %v211_v32, 0.0 }
  0x17   : > { %v1116_v39 = vpack.i.bf16 %v1438_v29, %v1436_v28  ;;  %v1449_v40 = vadd.f32 %v255_v30, %v222_v17  ;;  %v1451_v41 = vadd.f32 %v256_v31, %v223_v18  ;;  %v245_v45 = vmin.f32 %v212_v33, 0.0 }
  0x18   : > { %1127 = vrot.lane.b32.xlu1 %v1126_v34, %s1367_s23  ;;  %v251_v42 = vmul.f32 %v1420_v2, %v234_v36  ;;  %v252_v43 = vmul.f32 %v1420_v2, %v235_v37  ;;  %v246_v47 = vmin.f32 %v213_v38, 0.0  ;;  %v228_v50 = vmax.f32 %v211_v32, 0.0 }
  0x19   : > { %1117 = vrot.lane.b32.xlu0 %v1116_v39, %s1367_s23  ;;  %v229_v51 = vmax.f32 %v212_v33, 0.0  ;;  %v261_v52 = vmul.f32 %v1420_v2, %v244_v44  ;;  %v262_v53 = vmul.f32 %v1420_v2, %v245_v45  ;;  %v247_v54 = vmin.f32 %v214_v46, 0.0  ;;  %v613_v44 = vld [vmem:[%s1823_s2 + $0xe0] sm:$0xff] }
  0x1a   : > { %v1458_v48 = vadd.f32 %v251_v42, %v218_v27  ;;  %v1460_v49 = vadd.f32 %v252_v43, %v219_v35  ;;  %v1131_v56 = vpack.i.bf16 %v1451_v41, %v1449_v40  ;;  %v231_v57 = vmax.f32 %v214_v46, 0.0 }
  0x1b   : > { %v230_v60 = vmax.f32 %v213_v38, 0.0  ;;  %v263_v61 = vmul.f32 %v1420_v2, %v246_v47  ;;  %v264_v62 = vmul.f32 %v1420_v2, %v247_v54  ;;  %v224_v1 = vmax.f32 %v207_v55, 0.0  ;;  %v585_v54 = vld [vmem:[%s1823_s2] sm:$0xff] }
  0x1c   : > { %v1121_v59 = vpack.i.bf16 %v1460_v49, %v1458_v48  ;;  %v240_v3 = vmin.f32 %v207_v55, 0.0  ;;  %v277_v4 = vadd.f32 %v261_v52, %v228_v50  ;;  %v278_v5 = vadd.f32 %v262_v53, %v229_v51  ;;  %v620_v55 = vld [vmem:[%s1823_s2 + $0x118] sm:$0xff] }
  0x1d   : > { %v225_v6 = vmax.f32 %v208_v58, 0.0  ;;  %v241_v7 = vmin.f32 %v208_v58, 0.0  ;;  %v280_v8 = vadd.f32 %v264_v62, %v231_v57  ;;  %v242_v9 = vmin.f32 %v209_v63, 0.0 }
  0x1e   : > { %v243_v10 = vmin.f32 %v210_v0, 0.0  ;;  %v257_v11 = vmul.f32 %v1420_v2, %v240_v3  ;;  %v279_v12 = vadd.f32 %v263_v61, %v230_v60  ;;  %v226_v15 = vmax.f32 %v209_v63, 0.0 }
  0x1f   : > { %v258_v13 = vmul.f32 %v1420_v2, %v241_v7  ;;  %1053 = vmatpush.msra.mxu3 %v280_v8  ;;  %689 = vmatpush.msra.mxu0 %v280_v8  ;;  %v1478_v17 = vpack.i.bf16 %v277_v4, %v278_v5  ;;  %v227_v18 = vmax.f32 %v210_v0, 0.0  ;;  %v259_v19 = vmul.f32 %v1420_v2, %v242_v9 }
  0x20   : > { %1132 = vrot.lane.b32.xlu1 %v1131_v56, %s1367_s23  ;;  %v273_v14 = vadd.f32 %v257_v11, %v224_v1  ;;  %v260_v20 = vmul.f32 %v1420_v2, %v243_v10  ;;  %v1482_v21 = vpack.i.bf16 %v279_v12, %v280_v8  ;;  %v1181_v27 = vpack.i.bf16 %v1432_v25, %v1434_v26 }
  0x21   : > { %1122 = vrot.lane.b32.xlu0 %v1121_v59, %s1367_s23  ;;  %v274_v16 = vadd.f32 %v258_v13, %v225_v6  ;;  %1054 = vmatpush.msra.mxu3 %v279_v12  ;;  %v275_v23 = vadd.f32 %v259_v19, %v226_v15  ;;  %v1176_v30 = vpack.i.bf16 %v1449_v40, %v1451_v41 }
  0x22   : > { %690 = vmatpush.msra.mxu0 %v279_v12  ;;  %v276_v24 = vadd.f32 %v260_v20, %v227_v18  ;;  %v1514_v32 = vpack.i.bf16 %v1436_v28, %v1438_v29  ;;  %v599_v18 = vld [vmem:[%s1823_s2 + $0x70] sm:$0xff] }
  0x23   : > { %v1136_v22 = vpack.i.bf16 %v274_v16, %v273_v14  ;;  %1055 = vmatpush.msra.mxu3 %v278_v5  ;;  %v1171_v31 = vpack.i.bf16 %v273_v14, %v274_v16 }
  0x24   : > { %691 = vmatpush.msra.mxu0 %v278_v5  ;;  %v1166_v2 = vpack.i.bf16 %v275_v23, %v276_v24  ;;  %v627_v5 = vld [vmem:[%s1823_s2 + $0x150] sm:$0xff] }
  0x25   : > { %1137 = vrot.lane.b32.xlu2 %v1136_v22, %s1367_s23  ;;  %1056 = vmatpush.msra.mxu3 %v277_v4 }
  0x26   : > { %692 = vmatpush.msra.mxu0 %v277_v4  ;;  %v592_v4 = vld [vmem:[%s1823_s2 + $0x38] sm:$0xff] }
  0x27   : > { %1057 = vmatpush.msra.mxu3 %v276_v24 }
  0x28   : > { %1152 = vrot.lane.b32.xlu1 %v1478_v17, %s1368_s24  ;;  %693 = vmatpush.msra.mxu0 %v276_v24 }
  0x29   : > { %1147 = vrot.lane.b32.xlu0 %v1482_v21, %s1367_s23  ;;  %1058 = vmatpush.msra.mxu3 %v275_v23 }
  0x2a   : > { %694 = vmatpush.msra.mxu0 %v275_v23  ;;  %v1373_v23 = vmov 0  }
  0x2b   : > { %1059 = vmatpush.msra.mxu3 %v274_v16  ;;  %1356 = vset.pattern.permute.xlu0 %v1373_v23 }
  0x2c   : > { %695 = vmatpush.msra.mxu0 %v274_v16  ;;  %1357 = vset.pattern.permute.xlu1 %v1373_v23 }
  0x2d   : > { %1142 = vrot.lane.b32.xlu2 %v1482_v21, %s1368_s24  ;;  %1060 = vmatpush.msra.mxu3 %v273_v14 }
  0x2e   : > { %696 = vmatpush.msra.mxu0 %v273_v14  ;;  %1358 = vset.pattern.permute.xlu2 %v1373_v23 }
  0x2f   : > { %1061 = vmatpush.msra.mxu3 %v1451_v41 }
  0x30   : > { %1167 = vrot.lane.b32.xlu1 %v1166_v2, %s1367_s23  ;;  %697 = vmatpush.msra.mxu0 %v1451_v41 }
  0x31   : > { %1162 = vrot.lane.b32.xlu0 %v1166_v2, %s1368_s24  ;;  %1062 = vmatpush.msra.mxu3 %v1449_v40 }
  0x32   : > { %698 = vmatpush.msra.mxu0 %v1449_v40 }
  0x33   : > { %1063 = vmatpush.msra.mxu3 %v1434_v26 }
  0x34   : > { %699 = vmatpush.msra.mxu0 %v1434_v26 }
  0x35   : > { %1157 = vrot.lane.b32.xlu2 %v1478_v17, %s1367_s23  ;;  %1064 = vmatpush.msra.mxu3 %v1432_v25 }
  0x36   : > { %700 = vmatpush.msra.mxu0 %v1432_v25  ;;  %v1186_v25 = vpack.i.bf16 %v1458_v48, %v1460_v49 }
  0x37   : > { %1065 = vmatpush.msra.mxu3 %v1460_v49 }
  0x38   : > { %1182 = vrot.lane.b32.xlu1 %v1181_v27, %s1368_s24  ;;  %701 = vmatpush.msra.mxu0 %v1460_v49 }
  0x39   : > { %1177 = vrot.lane.b32.xlu0 %v1176_v30, %s1368_s24  ;;  %1066 = vmatpush.msra.mxu3 %v1458_v48 }
  0x3a   : > { %702 = vmatpush.msra.mxu0 %v1458_v48 }
  0x3b   : > { %1067 = vmatpush.msra.mxu3 %v1438_v29 }
  0x3c   : > { %703 = vmatpush.msra.mxu0 %v1438_v29 }
  0x3d   : > { %1172 = vrot.lane.b32.xlu2 %v1171_v31, %s1368_s24  ;;  %1068 = vmatpush.msra.mxu3 %v1436_v28 }
  0x3e   : > { %704 = vmatpush.msra.mxu0 %v1436_v28  ;;  %717 = vmatmul.f32.vlgmr.msra.gmra.mxu3 %v613_v44 }
  0x3f   : > { %705 = vmatmul.f32.vlgmr.msra.gmra.mxu0 %v585_v54  ;;  %v646_v54 = vld [vmem:[%s1824_s3 + $0x28] sm:$0xff] }
  0x40   : > { %1197 = vrot.lane.b32.xlu1 %v1482_v21, %s1369_s25 }
  0x41   : > { %1192 = vrot.lane.b32.xlu0 %v1514_v32, %s1368_s24 }
  0x45   : > { %1187 = vrot.lane.b32.xlu2 %v1186_v25, %s1368_s24 }
  0x46   : > { %720 = vmatmul.f32.gmra.mxu3 %v620_v55 }
  0x47   : > { %708 = vmatmul.f32.gmra.mxu0 %v592_v4  ;;  %v643_v4 = vld [vmem:[%s1824_s3 + $0x10] sm:$0xff] }
  0x48   : > { %1212 = vrot.lane.b32.xlu1 %v1166_v2, %s1369_s25 }
  0x49   : > { %1207 = vrot.lane.b32.xlu0 %v1482_v21, %s1370_s26 }
  0x4d   : > { %1202 = vrot.lane.b32.xlu2 %v1478_v17, %s1369_s25 }
  0x4e   : > { %723 = vmatmul.f32.gmra.mxu3 %v627_v5 }
  0x4f   : > { %711 = vmatmul.f32.gmra.mxu0 %v599_v18  ;;  %v645_v18 = vld [vmem:[%s1824_s3 + $0x20] sm:$0xff] }
  0x50   : > { %1227 = vrot.lane.b32.xlu1 %v1166_v2, %s1370_s26 }
  0x51   : > { %1222 = vrot.lane.b32.xlu0 %v1171_v31, %s1369_s25 }
  0x55   : > { %1217 = vrot.lane.b32.xlu2 %v1478_v17, %s1370_s26 }
  0x58   : > { %1242 = vrot.lane.b32.xlu1 %v1181_v27, %s1369_s25 }
  0x59   : > { %1237 = vrot.lane.b32.xlu0 %v1171_v31, %s1370_s26 }
  0x5d   : > { %1232 = vrot.lane.b32.xlu2 %v1176_v30, %s1369_s25 }
  0x60   : > { %1257 = vrot.lane.b32.xlu1 %v1181_v27, %s1370_s26 }
  0x61   : > { %1252 = vrot.lane.b32.xlu0 %v1186_v25, %s1369_s25 }
  0x65   : > { %1247 = vrot.lane.b32.xlu2 %v1176_v30, %s1370_s26 }
  0x68   : > { %1272 = vrot.lane.b32.xlu1 %v1514_v32, %s1370_s26 }
  0x69   : > { %1267 = vrot.lane.b32.xlu0 %v1186_v25, %s1370_s26 }
  0x6d   : > { %1262 = vrot.lane.b32.xlu2 %v1514_v32, %s1369_s25 }
  0x70   : > { %1287 = vrot.lane.b32.xlu1 %v1478_v17, %s1371_s27 }
  0x71   : > { %1282 = vrot.lane.b32.xlu0 %v1482_v21, %s1372_s28 }
  0x75   : > { %1277 = vrot.lane.b32.xlu2 %v1482_v21, %s1371_s27 }
  0x78   : > { %1302 = vrot.lane.b32.xlu1 %v1166_v2, %s1372_s28 }
  0x79   : > { %1297 = vrot.lane.b32.xlu0 %v1166_v2, %s1371_s27 }
  0x7d   : > { %1292 = vrot.lane.b32.xlu2 %v1478_v17, %s1372_s28 }
  0x7f   : > { %v1138_v26 = vpop.permute.xlu2 %1137 }
  0x80   : > { %1317 = vrot.lane.b32.xlu1 %v1176_v30, %s1371_s27  ;;  %v1140_v59 = vunpack.i.h.bf16 %v1138_v26  ;;  %v1139_v62 = vunpack.i.l.bf16 %v1138_v26  ;;  %v587_v26 = vld [vmem:[%s1823_s2 + $0x10] sm:$0xff] }
  0x81   : > { %1312 = vrot.lane.b32.xlu0 %v1171_v31, %s1372_s28 }
  0x85   : > { %1307 = vrot.lane.b32.xlu2 %v1171_v31, %s1371_s27 }
  0x87   : > { %v1143_v28 = vpop.permute.xlu2 %1142 }
  0x88   : > { %1332 = vrot.lane.b32.xlu1 %v1181_v27, %s1372_s28  ;;  %v1144_v33 = vunpack.i.l.bf16 %v1143_v28  ;;  %v1145_v34 = vunpack.i.h.bf16 %v1143_v28 }
  0x89   : > { %1327 = vrot.lane.b32.xlu0 %v1181_v27, %s1371_s27 }
  0x8a   : > { %v1542_v29 = vpop.permute.xlu1 %1127  ;;  %771 = vmatpush.msra.mxu2 %v1144_v33  ;;  %v586_v33 = vld [vmem:[%s1823_s2 + $0x8] sm:$0xff] }
  0x8b   : > { %v1544_v35 = vpop.permute.xlu0 %1117  ;;  %v1130_v8 = vunpack.i.h.bf16 %v1542_v29  ;;  %v1129_v12 = vunpack.i.l.bf16 %v1542_v29 }
  0x8c   : > { %772 = vmatpush.msra.mxu2 %v1145_v34  ;;  %v1120_v24 = vunpack.i.h.bf16 %v1544_v35 }
  0x8d   : > { %1322 = vrot.lane.b32.xlu2 %v1176_v30, %s1372_s28 }
  0x8f   : > { %v1158_v36 = vpop.permute.xlu2 %1157 }
  0x90   : > { %1347 = vrot.lane.b32.xlu1 %v1514_v32, %s1371_s27  ;;  %v1159_v47 = vunpack.i.l.bf16 %v1158_v36  ;;  %v1160_v50 = vunpack.i.h.bf16 %v1158_v36 }
  0x91   : > { %1342 = vrot.lane.b32.xlu0 %v1186_v25, %s1372_s28 }
  0x92   : > { %v1133_v37 = vpop.permute.xlu1 %1132 }
  0x93   : > { %v1549_v38 = vpop.permute.xlu0 %1122  ;;  %v1135_v1 = vunpack.i.h.bf16 %v1133_v37  ;;  %v1134_v6 = vunpack.i.l.bf16 %v1133_v37  ;;  %v634_v37 = vld [vmem:[%s1823_s2 + $0x188] sm:$0xff] }
  0x94   : > { %v1125_v16 = vunpack.i.h.bf16 %v1549_v38  ;;  %v1124_v21 = vunpack.i.l.bf16 %v1549_v38  ;;  %726 = vmatmul.f32.gmra.mxu3 %v634_v37 }
  0x95   : > { %1337 = vrot.lane.b32.xlu2 %v1186_v25, %s1371_s27 }
  0x97   : > { %v1173_v39 = vpop.permute.xlu2 %1172 }
  0x98   : > { %v1174_v58 = vunpack.i.l.bf16 %v1173_v39  ;;  %v1175_v63 = vunpack.i.h.bf16 %v1173_v39 }
  0x9a   : > { %v1153_v40 = vpop.permute.xlu1 %1152 }
  0x9b   : > { %v1148_v41 = vpop.permute.xlu0 %1147  ;;  %v1154_v42 = vunpack.i.l.bf16 %v1153_v40  ;;  %v1155_v45 = vunpack.i.h.bf16 %v1153_v40  ;;  %v641_v40 = vld [vmem:[%s1824_s3] sm:$0xff] }
  0x9c   : > { %v1149_v43 = vunpack.i.l.bf16 %v1148_v41  ;;  %v1150_v46 = vunpack.i.h.bf16 %v1148_v41  ;;  %v642_v41 = vld [vmem:[%s1824_s3 + $0x8] sm:$0xff]  ;;  %651 = vperm.xlu0 %1356, %v641_v40   ;;  %v621_v40 = vld [vmem:[%s1823_s2 + $0x120] sm:$0xff] }
  0x9d   : > { %773 = vmatpush.msra.mxu2 %v1154_v42  ;;  %1352 = vrot.lane.b32.xlu2 %v1514_v32, %s1372_s28  ;;  %v1119_v32 = vunpack.i.l.bf16 %v1544_v35  ;;  %v606_v35 = vld [vmem:[%s1823_s2 + $0xa8] sm:$0xff] }
  0x9e   : > { %730 = vmatpush.msra.mxu1 %v1149_v43  ;;  %714 = vmatmul.f32.gmra.mxu0 %v606_v35 }
  0x9f   : > { %774 = vmatpush.msra.mxu2 %v1155_v45  ;;  %v1556_v48 = vpop.permute.xlu2 %1187  ;;  %656 = vperm.xlu1 %1357, %v642_v41   ;;  %v594_v45 = vld [vmem:[%s1823_s2 + $0x48] sm:$0xff] }
  0xa0   : > { %731 = vmatpush.msra.mxu1 %v1150_v46  ;;  %v1189_v17 = vunpack.i.l.bf16 %v1556_v48  ;;  %v1190_v22 = vunpack.i.h.bf16 %v1556_v48 }
  0xa2   : > { %732 = vmatpush.msra.mxu1 %v1159_v47  ;;  %v1168_v49 = vpop.permute.xlu1 %1167 }
  0xa3   : > { %v1163_v51 = vpop.permute.xlu0 %1162  ;;  %v1169_v52 = vunpack.i.l.bf16 %v1168_v49  ;;  %v1170_v56 = vunpack.i.h.bf16 %v1168_v49  ;;  %v593_v49 = vld [vmem:[%s1823_s2 + $0x40] sm:$0xff] }
  0xa4   : > { %733 = vmatpush.msra.mxu1 %v1160_v50  ;;  %v1164_v53 = vunpack.i.l.bf16 %v1163_v51  ;;  %v1165_v57 = vunpack.i.h.bf16 %v1163_v51  ;;  %676 = vperm.xlu0 %1356, %v646_v54  }
  0xa5   : > { %661 = vperm.xlu2 %1358, %v643_v4  }
  0xa6   : > { %734 = vmatpush.msra.mxu1 %v1169_v52  ;;  %775 = vmatpush.msra.mxu2 %v1164_v53  ;;  %v644_v53 = vld [vmem:[%s1824_s3 + $0x18] sm:$0xff] }
  0xa7   : > { %v1203_v60 = vpop.permute.xlu2 %1202  ;;  %666 = vperm.xlu1 %1357, %v644_v53   ;;  %v628_v53 = vld [vmem:[%s1823_s2 + $0x158] sm:$0xff] }
  0xa8   : > { %735 = vmatpush.msra.mxu1 %v1170_v56  ;;  %776 = vmatpush.msra.mxu2 %v1165_v57  ;;  %v1204_v20 = vunpack.i.l.bf16 %v1203_v60  ;;  %v1205_v27 = vunpack.i.h.bf16 %v1203_v60 }
  0xaa   : > { %736 = vmatpush.msra.mxu1 %v1140_v59  ;;  %777 = vmatpush.msra.mxu2 %v1174_v58  ;;  %v1183_v61 = vpop.permute.xlu1 %1182  ;;  %v601_v58 = vld [vmem:[%s1823_s2 + $0x80] sm:$0xff] }
  0xab   : > { %v1178_v0 = vpop.permute.xlu0 %1177  ;;  %v1184_v9 = vunpack.i.l.bf16 %v1183_v61  ;;  %v1185_v13 = vunpack.i.h.bf16 %v1183_v61 }
  0xac   : > { %737 = vmatpush.msra.mxu1 %v1139_v62  ;;  %778 = vmatpush.msra.mxu2 %v1175_v63  ;;  %v1179_v3 = vunpack.i.l.bf16 %v1178_v0  ;;  %v1180_v7 = vunpack.i.h.bf16 %v1178_v0  ;;  %v600_v62 = vld [vmem:[%s1823_s2 + $0x78] sm:$0xff] }
  0xad   : > { %671 = vperm.xlu2 %1358, %v645_v18   ;;  %v617_v18 = vld [vmem:[%s1823_s2 + $0x100] sm:$0xff] }
  0xae   : > { %738 = vmatpush.msra.mxu1 %v1135_v1  ;;  %779 = vmatpush.msra.mxu2 %v1179_v3  ;;  %v647_v3 = vld [vmem:[%s1824_s3 + $0x30] sm:$0xff] }
  0xaf   : > { %v1571_v10 = vpop.permute.xlu2 %1217  ;;  %681 = vperm.xlu1 %1357, %v647_v3   ;;  %v635_v3 = vld [vmem:[%s1823_s2 + $0x190] sm:$0xff] }
  0xb0   : > { %739 = vmatpush.msra.mxu1 %v1134_v6  ;;  %780 = vmatpush.msra.mxu2 %v1180_v7  ;;  %v1219_v39 = vunpack.i.l.bf16 %v1571_v10  ;;  %v1220_v44 = vunpack.i.h.bf16 %v1571_v10 }
  0xb2   : > { %740 = vmatpush.msra.mxu1 %v1130_v8  ;;  %781 = vmatpush.msra.mxu2 %v1184_v9  ;;  %v1198_v11 = vpop.permute.xlu1 %1197  ;;  %v608_v8 = vld [vmem:[%s1823_s2 + $0xb8] sm:$0xff] }
  0xb3   : > { %v1193_v14 = vpop.permute.xlu0 %1192  ;;  %v1199_v15 = vunpack.i.l.bf16 %v1198_v11  ;;  %v1200_v19 = vunpack.i.h.bf16 %v1198_v11 }
  0xb4   : > { %741 = vmatpush.msra.mxu1 %v1129_v12  ;;  %782 = vmatpush.msra.mxu2 %v1185_v13  ;;  %v1194_v2 = vunpack.i.l.bf16 %v1193_v14  ;;  %v1195_v25 = vunpack.i.h.bf16 %v1193_v14  ;;  %v607_v14 = vld [vmem:[%s1823_s2 + $0xb0] sm:$0xff] }
  0xb5   : > { %812 = vmatpush.msrb.mxu3 %v1199_v15 }
  0xb6   : > { %742 = vmatpush.msra.mxu1 %v1125_v16  ;;  %783 = vmatpush.msra.mxu2 %v1189_v17 }
  0xb7   : > { %813 = vmatpush.msrb.mxu3 %v1200_v19  ;;  %v1582_v30 = vpop.permute.xlu2 %1232 }
  0xb8   : > { %743 = vmatpush.msra.mxu1 %v1124_v21  ;;  %784 = vmatpush.msra.mxu2 %v1190_v22  ;;  %v1234_v51 = vunpack.i.l.bf16 %v1582_v30  ;;  %v1235_v57 = vunpack.i.h.bf16 %v1582_v30  ;;  %v588_v21 = vld [vmem:[%s1823_s2 + $0x18] sm:$0xff]  ;;  %v615_v22 = vld [vmem:[%s1823_s2 + $0xf0] sm:$0xff] }
  0xb9   : > { %814 = vmatpush.msrb.mxu3 %v1204_v20 }
  0xba   : > { %744 = vmatpush.msra.mxu1 %v1120_v24  ;;  %785 = vmatpush.msra.mxu2 %v1194_v2  ;;  %v1213_v31 = vpop.permute.xlu1 %1212 }
  0xbb   : > { %v1208_v28 = vpop.permute.xlu0 %1207  ;;  %815 = vmatpush.msrb.mxu3 %v1205_v27  ;;  %v1214_v29 = vunpack.i.l.bf16 %v1213_v31  ;;  %v1215_v36 = vunpack.i.h.bf16 %v1213_v31  ;;  %v614_v27 = vld [vmem:[%s1823_s2 + $0xe8] sm:$0xff] }
  0xbc   : > { %745 = vmatpush.msra.mxu1 %v1119_v32  ;;  %786 = vmatpush.msra.mxu2 %v1195_v25  ;;  %v1209_v34 = vunpack.i.l.bf16 %v1208_v28  ;;  %v1210_v38 = vunpack.i.h.bf16 %v1208_v28  ;;  %v589_v28 = vld [vmem:[%s1823_s2 + $0x20] sm:$0xff] }
  0xbd   : > { %816 = vmatpush.msrb.mxu3 %v1214_v29  ;;  %787 = vmatmul.f32.vlgmr.msra.gmra.mxu2 %v587_v26  ;;  %v595_v26 = vld [vmem:[%s1823_s2 + $0x50] sm:$0xff] }
  0xbe   : > { %853 = vmatpush.msrb.mxu0 %v1209_v34  ;;  %746 = vmatmul.f32.vlgmr.msra.gmra.mxu1 %v586_v33 }
  0xbf   : > { %817 = vmatpush.msrb.mxu3 %v1215_v36  ;;  %v1248_v42 = vpop.permute.xlu2 %1247 }
  0xc0   : > { %854 = vmatpush.msrb.mxu0 %v1210_v38  ;;  %v1249_v1 = vunpack.i.l.bf16 %v1248_v42  ;;  %v1250_v7 = vunpack.i.h.bf16 %v1248_v42 }
  0xc2   : > { %855 = vmatpush.msrb.mxu0 %v1219_v39  ;;  %v1228_v43 = vpop.permute.xlu1 %1227  ;;  %v622_v39 = vld [vmem:[%s1823_s2 + $0x128] sm:$0xff] }
  0xc3   : > { %v1223_v46 = vpop.permute.xlu0 %1222  ;;  %v1229_v47 = vunpack.i.l.bf16 %v1228_v43  ;;  %v1230_v52 = vunpack.i.h.bf16 %v1228_v43  ;;  %v602_v43 = vld [vmem:[%s1823_s2 + $0x88] sm:$0xff] }
  0xc4   : > { %856 = vmatpush.msrb.mxu0 %v1220_v44  ;;  %v1224_v48 = vunpack.i.l.bf16 %v1223_v46  ;;  %v1225_v50 = vunpack.i.h.bf16 %v1223_v46  ;;  %v596_v44 = vld [vmem:[%s1823_s2 + $0x58] sm:$0xff] }
  0xc5   : > { %790 = vmatmul.f32.gmra.mxu2 %v594_v45 }
  0xc6   : > { %818 = vmatpush.msrb.mxu3 %v1224_v48  ;;  %857 = vmatpush.msrb.mxu0 %v1229_v47 }
  0xc7   : > { %749 = vmatmul.f32.gmra.mxu1 %v593_v49  ;;  %v1263_v55 = vpop.permute.xlu2 %1262 }
  0xc8   : > { %819 = vmatpush.msrb.mxu3 %v1225_v50  ;;  %858 = vmatpush.msrb.mxu0 %v1230_v52  ;;  %v1264_v16 = vunpack.i.l.bf16 %v1263_v55  ;;  %v1265_v20 = vunpack.i.h.bf16 %v1263_v55  ;;  %v629_v52 = vld [vmem:[%s1823_s2 + $0x160] sm:$0xff] }
  0xc9   : > { %v609_v55 = vld [vmem:[%s1823_s2 + $0xc0] sm:$0xff] }
  0xca   : > { %820 = vmatpush.msrb.mxu3 %v1234_v51  ;;  %v1243_v56 = vpop.permute.xlu1 %1242 }
  0xcb   : > { %v1238_v59 = vpop.permute.xlu0 %1237  ;;  %v1244_v60 = vunpack.i.l.bf16 %v1243_v56  ;;  %v1245_v0 = vunpack.i.h.bf16 %v1243_v56  ;;  %v603_v56 = vld [vmem:[%s1823_s2 + $0x90] sm:$0xff] }
  0xcc   : > { %821 = vmatpush.msrb.mxu3 %v1235_v57  ;;  %v1239_v61 = vunpack.i.l.bf16 %v1238_v59  ;;  %v1240_v63 = vunpack.i.h.bf16 %v1238_v59 }
  0xcd   : > { %793 = vmatmul.f32.gmra.mxu2 %v601_v58 }
  0xce   : > { %859 = vmatpush.msrb.mxu0 %v1239_v61  ;;  %822 = vmatpush.msrb.mxu3 %v1244_v60 }
  0xcf   : > { %752 = vmatmul.f32.gmra.mxu1 %v600_v62  ;;  %v1278_v5 = vpop.permute.xlu2 %1277 }
  0xd0   : > { %860 = vmatpush.msrb.mxu0 %v1240_v63  ;;  %823 = vmatpush.msrb.mxu3 %v1245_v0  ;;  %v1279_v9 = vunpack.i.l.bf16 %v1278_v5  ;;  %v1280_v12 = vunpack.i.h.bf16 %v1278_v5  ;;  %v648_v0 = vld [vmem:[%s1824_s3 + $0x38] sm:$0xff] }
  0xd1   : > { %686 = vperm.xlu2 %1358, %v648_v0  }
  0xd2   : > { %861 = vmatpush.msrb.mxu0 %v1249_v1  ;;  %v1258_v6 = vpop.permute.xlu1 %1257  ;;  %935 = vmatpush.msrb.mxu2 %v1279_v9  ;;  %v636_v1 = vld [vmem:[%s1823_s2 + $0x198] sm:$0xff] }
  0xd3   : > { %v1253_v10 = vpop.permute.xlu0 %1252  ;;  %v1259_v11 = vunpack.i.l.bf16 %v1258_v6  ;;  %v1260_v17 = vunpack.i.h.bf16 %v1258_v6  ;;  %v616_v6 = vld [vmem:[%s1823_s2 + $0xf8] sm:$0xff] }
  0xd4   : > { %862 = vmatpush.msrb.mxu0 %v1250_v7  ;;  %v1254_v13 = vunpack.i.l.bf16 %v1253_v10  ;;  %v1255_v15 = vunpack.i.h.bf16 %v1253_v10  ;;  %936 = vmatpush.msrb.mxu2 %v1280_v12  ;;  %v610_v7 = vld [vmem:[%s1823_s2 + $0xc8] sm:$0xff] }
  0xd5   : > { %796 = vmatmul.f32.gmra.mxu2 %v608_v8 }
  0xd6   : > { %824 = vmatpush.msrb.mxu3 %v1254_v13  ;;  %863 = vmatpush.msrb.mxu0 %v1259_v11 }
  0xd7   : > { %755 = vmatmul.f32.gmra.mxu1 %v607_v14  ;;  %v1293_v24 = vpop.permute.xlu2 %1292 }
  0xd8   : > { %825 = vmatpush.msrb.mxu3 %v1255_v15  ;;  %864 = vmatpush.msrb.mxu0 %v1260_v17  ;;  %v1294_v37 = vunpack.i.l.bf16 %v1293_v24  ;;  %v1295_v41 = vunpack.i.h.bf16 %v1293_v24  ;;  %v623_v17 = vld [vmem:[%s1823_s2 + $0x130] sm:$0xff] }
  0xda   : > { %826 = vmatpush.msrb.mxu3 %v1264_v16  ;;  %v1273_v19 = vpop.permute.xlu1 %1272 }
  0xdb   : > { %v1268_v23 = vpop.permute.xlu0 %1267  ;;  %v1274_v31 = vunpack.i.l.bf16 %v1273_v19  ;;  %v1275_v25 = vunpack.i.h.bf16 %v1273_v19 }
  0xdc   : > { %827 = vmatpush.msrb.mxu3 %v1265_v20  ;;  %v1269_v2 = vunpack.i.l.bf16 %v1268_v23  ;;  %v1270_v30 = vunpack.i.h.bf16 %v1268_v23 }
  0xdd   : > { %828 = vmatmul.f32.vlgmr.msrb.gmra.mxu3 %v588_v21  ;;  %799 = vmatmul.f32.gmra.mxu2 %v615_v22 }
  0xde   : > { %865 = vmatpush.msrb.mxu0 %v1269_v2  ;;  %1085 = vmatpush.msra.mxu3 %v1279_v9  ;;  %v591_v2 = vld [vmem:[%s1823_s2 + $0x30] sm:$0xff] }
  0xdf   : > { %758 = vmatmul.f32.gmra.mxu1 %v614_v27  ;;  %v1308_v35 = vpop.permute.xlu2 %1307 }
  0xe0   : > { %866 = vmatpush.msrb.mxu0 %v1270_v30  ;;  %1086 = vmatpush.msra.mxu3 %v1280_v12  ;;  %v1309_v49 = vunpack.i.l.bf16 %v1308_v35  ;;  %v1310_v57 = vunpack.i.h.bf16 %v1308_v35  ;;  %v638_v35 = vld [vmem:[%s1823_s2 + $0x1a8] sm:$0xff] }
  0xe2   : > { %867 = vmatpush.msrb.mxu0 %v1274_v31  ;;  %v1288_v32 = vpop.permute.xlu1 %1287  ;;  %v630_v31 = vld [vmem:[%s1823_s2 + $0x168] sm:$0xff] }
  0xe3   : > { %v1283_v29 = vpop.permute.xlu0 %1282  ;;  %v1289_v33 = vunpack.i.l.bf16 %v1288_v32  ;;  %v1290_v38 = vunpack.i.h.bf16 %v1288_v32  ;;  %v624_v32 = vld [vmem:[%s1823_s2 + $0x138] sm:$0xff] }
  0xe4   : > { %v1284_v34 = vunpack.i.l.bf16 %v1283_v29  ;;  %868 = vmatpush.msrb.mxu0 %v1275_v25  ;;  %v1285_v36 = vunpack.i.h.bf16 %v1283_v29  ;;  %v604_v25 = vld [vmem:[%s1823_s2 + $0x98] sm:$0xff]  ;;  %v631_v29 = vld [vmem:[%s1823_s2 + $0x170] sm:$0xff] }
  0xe5   : > { %831 = vmatmul.f32.gmra.mxu3 %v595_v26  ;;  %869 = vmatmul.f32.vlgmr.msrb.gmra.mxu0 %v589_v28  ;;  %v598_v26 = vld [vmem:[%s1823_s2 + $0x68] sm:$0xff]  ;;  %v637_v28 = vld [vmem:[%s1823_s2 + $0x1a0] sm:$0xff] }
  0xe6   : > { %894 = vmatpush.msra.mxu0 %v1284_v34  ;;  %1069 = vmatpush.msrb.mxu1 %v1284_v34  ;;  %v605_v34 = vld [vmem:[%s1823_s2 + $0xa0] sm:$0xff] }
  0xe7   : > { %937 = vmatpush.msrb.mxu2 %v1289_v33  ;;  %1087 = vmatpush.msra.mxu3 %v1289_v33  ;;  %v1323_v51 = vpop.permute.xlu2 %1322  ;;  %v611_v33 = vld [vmem:[%s1823_s2 + $0xd0] sm:$0xff] }
  0xe8   : > { %895 = vmatpush.msra.mxu0 %v1285_v36  ;;  %1070 = vmatpush.msrb.mxu1 %v1285_v36  ;;  %v1324_v63 = vunpack.i.l.bf16 %v1323_v51  ;;  %v1325_v8 = vunpack.i.h.bf16 %v1323_v51  ;;  %v633_v36 = vld [vmem:[%s1823_s2 + $0x180] sm:$0xff] }
  0xe9   : > { %938 = vmatpush.msrb.mxu2 %v1290_v38  ;;  %1088 = vmatpush.msra.mxu3 %v1290_v38  ;;  %v612_v38 = vld [vmem:[%s1823_s2 + $0xd8] sm:$0xff] }
  0xea   : > { %v1303_v42 = vpop.permute.xlu1 %1302  ;;  %896 = vmatpush.msra.mxu0 %v1294_v37  ;;  %1071 = vmatpush.msrb.mxu1 %v1294_v37  ;;  %v618_v37 = vld [vmem:[%s1823_s2 + $0x108] sm:$0xff] }
  0xeb   : > { %v1304_v45 = vunpack.i.l.bf16 %v1303_v42  ;;  %v1298_v46 = vpop.permute.xlu0 %1297  ;;  %802 = vmatmul.f32.gmra.mxu2 %v622_v39  ;;  %761 = vmatmul.f32.gmra.mxu1 %v621_v40  ;;  %v1305_v50 = vunpack.i.h.bf16 %v1303_v42  ;;  %v590_v39 = vld [vmem:[%s1823_s2 + $0x28] sm:$0xff]  ;;  %v640_v40 = vld [vmem:[%s1823_s2 + $0x1b8] sm:$0xff]  ;;  %v619_v42 = vld [vmem:[%s1823_s2 + $0x110] sm:$0xff] }
  0xec   : > { %897 = vmatpush.msra.mxu0 %v1295_v41  ;;  %1072 = vmatpush.msrb.mxu1 %v1295_v41  ;;  %v1299_v47 = vunpack.i.l.bf16 %v1298_v46  ;;  %v1300_v48 = vunpack.i.h.bf16 %v1298_v46  ;;  %v625_v41 = vld [vmem:[%s1823_s2 + $0x140] sm:$0xff]  ;;  %v639_v46 = vld [vmem:[%s1823_s2 + $0x1b0] sm:$0xff] }
  0xed   : > { %834 = vmatmul.f32.gmra.mxu3 %v602_v43  ;;  %872 = vmatmul.f32.gmra.mxu0 %v596_v44  ;;  %v597_v43 = vld [vmem:[%s1823_s2 + $0x60] sm:$0xff]  ;;  %v632_v44 = vld [vmem:[%s1823_s2 + $0x178] sm:$0xff] }
  0xee   : > { %939 = vmatpush.msrb.mxu2 %v1299_v47  ;;  %1089 = vmatpush.msra.mxu3 %v1299_v47  ;;  %v706_v47 = vpop.f32.mrf.mxu0 }
  0xef   : > { %898 = vmatpush.msra.mxu0 %v1304_v45  ;;  %1073 = vmatpush.msrb.mxu1 %v1304_v45  ;;  %v1338_v4 = vpop.permute.xlu2 %1337  ;;  %v626_v45 = vld [vmem:[%s1823_s2 + $0x148] sm:$0xff] }
  0xf0   : > { %940 = vmatpush.msrb.mxu2 %v1300_v48  ;;  %1090 = vmatpush.msra.mxu3 %v1300_v48  ;;  %v1339_v13 = vunpack.i.l.bf16 %v1338_v4  ;;  %v1340_v16 = vunpack.i.h.bf16 %v1338_v4 }
  0xf1   : > { %899 = vmatpush.msra.mxu0 %v1305_v50  ;;  %1074 = vmatpush.msrb.mxu1 %v1305_v50 }
  0xf2   : > { %v1318_v54 = vpop.permute.xlu1 %1317  ;;  %941 = vmatpush.msrb.mxu2 %v1309_v49  ;;  %1091 = vmatpush.msra.mxu3 %v1309_v49  ;;  %v1763_v49 = vpop.f32.mrf.mxu3 }
  0xf3   : > { %v1313_v58 = vpop.permute.xlu0 %1312  ;;  %805 = vmatmul.f32.gmra.mxu2 %v629_v52  ;;  %764 = vmatmul.f32.gmra.mxu1 %v628_v53  ;;  %v1319_v59 = vunpack.i.l.bf16 %v1318_v54  ;;  %v1320_v62 = vunpack.i.h.bf16 %v1318_v54 }
  0xf4   : > { %942 = vmatpush.msrb.mxu2 %v1310_v57  ;;  %v1314_v60 = vunpack.i.l.bf16 %v1313_v58  ;;  %1092 = vmatpush.msra.mxu3 %v1310_v57  ;;  %v1315_v61 = vunpack.i.h.bf16 %v1313_v58 }
  0xf5   : > { %837 = vmatmul.f32.gmra.mxu3 %v609_v55  ;;  %875 = vmatmul.f32.gmra.mxu0 %v603_v56 }
  0xf6   : > { %1075 = vmatpush.msrb.mxu1 %v1314_v60  ;;  %943 = vmatpush.msrb.mxu2 %v1319_v59  ;;  %v709_v53 = vpop.f32.mrf.mxu0 }
  0xf7   : > { %900 = vmatpush.msra.mxu0 %v1314_v60  ;;  %1093 = vmatpush.msra.mxu3 %v1319_v59  ;;  %v1353_v21 = vpop.permute.xlu2 %1352 }
  0xf8   : > { %1076 = vmatpush.msrb.mxu1 %v1315_v61  ;;  %944 = vmatpush.msrb.mxu2 %v1320_v62  ;;  %v1354_v27 = vunpack.i.l.bf16 %v1353_v21  ;;  %v1355_v30 = vunpack.i.h.bf16 %v1353_v21 }
  0xf9   : > { %901 = vmatpush.msra.mxu0 %v1315_v61  ;;  %1094 = vmatpush.msra.mxu3 %v1320_v62 }
  0xfa   : > { %v1333_v5 = vpop.permute.xlu1 %1332  ;;  %1077 = vmatpush.msrb.mxu1 %v1324_v63  ;;  %v1765_v58 = vpop.f32.mrf.mxu3 }
  0xfb   : > { %v1328_v9 = vpop.permute.xlu0 %1327  ;;  %808 = vmatmul.f32.gmra.mxu2 %v636_v1  ;;  %767 = vmatmul.f32.gmra.mxu1 %v635_v3  ;;  %v1334_v10 = vunpack.i.l.bf16 %v1333_v5  ;;  %v1335_v14 = vunpack.i.h.bf16 %v1333_v5 }
  0xfc   : > { %v1329_v11 = vunpack.i.l.bf16 %v1328_v9  ;;  %1078 = vmatpush.msrb.mxu1 %v1325_v8  ;;  %902 = vmatpush.msra.mxu0 %v1324_v63  ;;  %v1330_v12 = vunpack.i.h.bf16 %v1328_v9 }
  0xfd   : > { %840 = vmatmul.f32.gmra.mxu3 %v616_v6  ;;  %878 = vmatmul.f32.gmra.mxu0 %v610_v7 }
  0xfe   : > { %945 = vmatpush.msrb.mxu2 %v1329_v11  ;;  %1079 = vmatpush.msrb.mxu1 %v1334_v10  ;;  %v712_v0 = vpop.f32.mrf.mxu0 }
  0xff   : > { %903 = vmatpush.msra.mxu0 %v1325_v8  ;;  %1095 = vmatpush.msra.mxu3 %v1329_v11 }
 0x100   : > { %946 = vmatpush.msrb.mxu2 %v1330_v12  ;;  %1080 = vmatpush.msrb.mxu1 %v1335_v14 }
 0x101   : > { %1096 = vmatpush.msra.mxu3 %v1330_v12  ;;  %904 = vmatpush.msra.mxu0 %v1334_v10 }
 0x102   : > { %947 = vmatpush.msrb.mxu2 %v1339_v13  ;;  %v1348_v15 = vpop.permute.xlu1 %1347  ;;  %v724_v63 = vpop.f32.mrf.mxu3 }
 0x103   : > { %v1343_v19 = vpop.permute.xlu0 %1342  ;;  %v1349_v20 = vunpack.i.l.bf16 %v1348_v15  ;;  %905 = vmatpush.msra.mxu0 %v1335_v14  ;;  %1097 = vmatpush.msra.mxu3 %v1339_v13  ;;  %v1350_v24 = vunpack.i.h.bf16 %v1348_v15 }
 0x104   : > { %948 = vmatpush.msrb.mxu2 %v1340_v16  ;;  %v1344_v22 = vunpack.i.l.bf16 %v1343_v19  ;;  %v1345_v23 = vunpack.i.h.bf16 %v1343_v19 }
 0x105   : > { %843 = vmatmul.f32.gmra.mxu3 %v623_v17  ;;  %881 = vmatmul.f32.gmra.mxu0 %v617_v18 }
 0x106   : > { %1081 = vmatpush.msrb.mxu1 %v1344_v22  ;;  %949 = vmatpush.msrb.mxu2 %v1349_v20 }
 0x107   : > { %1098 = vmatpush.msra.mxu3 %v1340_v16  ;;  %906 = vmatpush.msra.mxu0 %v1344_v22 }
 0x108   : > { %1082 = vmatpush.msrb.mxu1 %v1345_v23  ;;  %950 = vmatpush.msrb.mxu2 %v1350_v24 }
 0x109   : > { %951 = vmatmul.f32.vlgmr.msrb.gmra.mxu2 %v591_v2  ;;  %907 = vmatpush.msra.mxu0 %v1345_v23 }
 0x10a   : > { %1083 = vmatpush.msrb.mxu1 %v1354_v27  ;;  %1099 = vmatpush.msra.mxu3 %v1349_v20 }
 0x10b   : > { %908 = vmatpush.msra.mxu0 %v1354_v27  ;;  %v662_v27 = vpop.permute.xlu2 %661 }
 0x10c   : > { %1084 = vmatpush.msrb.mxu1 %v1355_v30  ;;  %1100 = vmatpush.msra.mxu3 %v1350_v24 }
 0x10d   : > { %846 = vmatmul.f32.gmra.mxu3 %v630_v31  ;;  %884 = vmatmul.f32.gmra.mxu0 %v624_v32  ;;  %v713_v31 = vadd.f32 %v712_v0, %v662_v27 }
 0x10e   : > { %916 = vmatmul.f32.vlgmr.msrb.gmra.mxu1 %v604_v25  ;;  %909 = vmatpush.msra.mxu0 %v1355_v30  ;;  %v652_v48 = vpop.permute.xlu0 %651 }
 0x10f   : > { %v707_v50 = vadd.f32 %v706_v47, %v652_v48 }
 0x111   : > { %954 = vmatmul.f32.gmra.mxu2 %v598_v26  ;;  %v657_v55 = vpop.permute.xlu1 %656 }
 0x112   : > { %v710_v57 = vadd.f32 %v709_v53, %v657_v55 }
 0x115   : > { %849 = vmatmul.f32.gmra.mxu3 %v637_v28  ;;  %887 = vmatmul.f32.gmra.mxu0 %v631_v29 }
 0x116   : > { %919 = vmatmul.f32.gmra.mxu1 %v611_v33 }
 0x117   : > { %v1769_v4 = vpop.f32.mrf.mxu3 }
 0x119   : > { %957 = vmatmul.f32.gmra.mxu2 %v605_v34  ;;  %v667_v29 = vpop.permute.xlu1 %666 }
 0x11b   : > { %v715_v5 = vpop.f32.mrf.mxu0 }
 0x11c   : > { %v716_v34 = vadd.f32 %v715_v5, %v667_v29 }
 0x11d   : > { %890 = vmatmul.f32.gmra.mxu0 %v638_v35  ;;  %969 = vmatmul.f32.vlgmr.msra.gmra.mxu3 %v633_v36 }
 0x11e   : > { %922 = vmatmul.f32.gmra.mxu1 %v618_v37 }
 0x121   : > { %960 = vmatmul.f32.gmra.mxu2 %v612_v38 }
 0x125   : > { %910 = vmatmul.f32.vlgmr.msra.gmra.mxu0 %v590_v39  ;;  %972 = vmatmul.f32.gmra.mxu3 %v640_v40 }
 0x126   : > { %925 = vmatmul.f32.gmra.mxu1 %v625_v41 }
 0x129   : > { %963 = vmatmul.f32.gmra.mxu2 %v619_v42 }
 0x12d   : > { %913 = vmatmul.f32.gmra.mxu0 %v597_v43 }
 0x12e   : > { %928 = vmatmul.f32.gmra.mxu1 %v632_v44 }
 0x131   : > { %966 = vmatmul.f32.gmra.mxu2 %v626_v45 }
 0x136   : > { %931 = vmatmul.f32.gmra.mxu1 %v639_v46  ;;  %v672_v46 = vpop.permute.xlu2 %671 }
 0x137   : > { %v719_v53 = vadd.f32 %v1763_v49, %v672_v46 }
 0x13b   : > { %v747_v51 = vpop.f32.mrf.mxu1 }
 0x13c   : > { %v748_v52 = vadd.f32 %v747_v51, %v707_v50  ;;  %v682_v50 = vpop.permute.xlu1 %681 }
 0x140   : > { %v788_v54 = vpop.f32.mrf.mxu2 }
 0x141   : > { %v789_v56 = vadd.f32 %v788_v54, %v748_v52  ;;  %v725_v54 = vadd.f32 %v724_v63, %v682_v50 }
 0x144   : > { %v750_v59 = vpop.f32.mrf.mxu1 }
 0x145   : > { %v751_v60 = vadd.f32 %v750_v59, %v710_v57 }
 0x148   : > { %v791_v61 = vpop.f32.mrf.mxu2 }
 0x149   : > { %v1767_v62 = vadd.f32 %v791_v61, %v751_v60 }
 0x14c   : > { %v753_v1 = vpop.f32.mrf.mxu1 }
 0x14d   : > { %v754_v28 = vadd.f32 %v753_v1, %v713_v31 }
 0x150   : > { %v794_v3 = vpop.f32.mrf.mxu2 }
 0x151   : > { %v795_v35 = vadd.f32 %v794_v3, %v754_v28 }
 0x154   : > { %v756_v6 = vpop.f32.mrf.mxu1 }
 0x155   : > { %v757_v39 = vadd.f32 %v756_v6, %v716_v34  ;;  %v677_v6 = vpop.permute.xlu0 %676 }
 0x158   : > { %v797_v7 = vpop.f32.mrf.mxu2 }
 0x159   : > { %v798_v43 = vadd.f32 %v797_v7, %v757_v39 }
 0x15c   : > { %v759_v10 = vpop.f32.mrf.mxu1 }
 0x15d   : > { %v760_v57 = vadd.f32 %v759_v10, %v719_v53 }
 0x160   : > { %v829_v8 = vpop.f32.mrf.mxu3  ;;  %v800_v11 = vpop.f32.mrf.mxu2 }
 0x161   : > { %v830_v48 = vadd.f32 %v829_v8, %v789_v56  ;;  %v801_v1 = vadd.f32 %v800_v11, %v760_v57 }
 0x162   : > { %v870_v9 = vpop.f32.mrf.mxu0 }
 0x163   : > { %v871_v55 = vadd.f32 %v870_v9, %v830_v48 }
 0x168   : > { %v832_v12 = vpop.f32.mrf.mxu3  ;;  %v1773_v14 = vpop.f32.mrf.mxu1 }
 0x169   : > { %v833_v49 = vadd.f32 %v832_v12, %v1767_v62 }
 0x16a   : > { %v1771_v13 = vpop.f32.mrf.mxu0 }
 0x16e   : > { %v1775_v16 = vpop.f32.mrf.mxu2 }
 0x170   : > { %v835_v15 = vpop.f32.mrf.mxu3  ;;  %v765_v18 = vpop.f32.mrf.mxu1 }
 0x171   : > { %v836_v38 = vadd.f32 %v835_v15, %v795_v35  ;;  %v766_v61 = vadd.f32 %v765_v18, %v725_v54  ;;  %v687_v15 = vpop.permute.xlu2 %686  ;;  %v874_v18 = vadd.f32 %v1771_v13, %v833_v49 }
 0x172   : > { %v876_v17 = vpop.f32.mrf.mxu0  ;;  %v728_v11 = vadd.f32 %v1769_v4, %v687_v15 }
 0x173   : > { %v877_v41 = vadd.f32 %v876_v17, %v836_v38 }
 0x176   : > { %v806_v20 = vpop.f32.mrf.mxu2 }
 0x177   : > { %v807_v7 = vadd.f32 %v806_v20, %v766_v61 }
 0x178   : > { %v838_v19 = vpop.f32.mrf.mxu3  ;;  %v1777_v23 = vpop.f32.mrf.mxu1 }
 0x179   : > { %v839_v51 = vadd.f32 %v838_v19, %v798_v43  ;;  %v722_v19 = vadd.f32 %v1765_v58, %v677_v6  ;;  %v769_v62 = vadd.f32 %v1777_v23, %v728_v11 }
 0x17a   : > { %v879_v21 = vpop.f32.mrf.mxu0 }
 0x17b   : > { %v880_v59 = vadd.f32 %v879_v21, %v839_v51  ;;  %v763_v20 = vadd.f32 %v1773_v14, %v722_v19 }
 0x17d   : > { %v804_v58 = vadd.f32 %v1775_v16, %v763_v20 }
 0x17e   : > { %v1779_v2 = vpop.f32.mrf.mxu2 }
 0x180   : > { %v841_v24 = vpop.f32.mrf.mxu3 }
 0x181   : > { %v842_v17 = vadd.f32 %v841_v24, %v801_v1 }
 0x182   : > { %v882_v22 = vpop.f32.mrf.mxu0 }
 0x183   : > { %v883_v21 = vadd.f32 %v882_v22, %v842_v17 }
 0x188   : > { %v1783_v26 = vpop.f32.mrf.mxu3 }
 0x189   : > { %v845_v14 = vadd.f32 %v1783_v26, %v804_v58 }
 0x18a   : > { %v1781_v30 = vpop.f32.mrf.mxu0 }
 0x18b   : > { %v917_v32 = vpop.f32.mrf.mxu1  ;;  %v886_v16 = vadd.f32 %v1781_v30, %v845_v14 }
 0x18c   : > { %v952_v25 = vpop.f32.mrf.mxu2  ;;  %v918_v44 = vadd.f32 %v917_v32, %v877_v41 }
 0x190   : > { %v847_v40 = vpop.f32.mrf.mxu3 }
 0x191   : > { %v848_v10 = vadd.f32 %v847_v40, %v807_v7 }
 0x192   : > { %v888_v33 = vpop.f32.mrf.mxu0 }
 0x193   : > { %v920_v36 = vpop.f32.mrf.mxu1  ;;  %v889_v12 = vadd.f32 %v888_v33, %v848_v10 }
 0x194   : > { %v955_v37 = vpop.f32.mrf.mxu2  ;;  %v921_v3 = vadd.f32 %v920_v36, %v880_v59 }
 0x198   : > { %v850_v60 = vpop.f32.mrf.mxu3 }
 0x19a   : > { %v891_v42 = vpop.f32.mrf.mxu0 }
 0x19b   : > { %v923_v45 = vpop.f32.mrf.mxu1 }
 0x19c   : > { %v958_v47 = vpop.f32.mrf.mxu2  ;;  %v924_v31 = vadd.f32 %v923_v45, %v883_v21 }
 0x19d   : > { %v959_v52 = vadd.f32 %v958_v47, %v918_v44 }
 0x19f   : > { %979 = vst.msk [vmem:[%s1789_s9 + $0x10] sm:$0xff] %vm976_vm0, %v959_v52 }
 0x1a0   : > { %v970_v27 = vpop.f32.mrf.mxu3 }
 0x1a2   : > { %v911_v0 = vpop.f32.mrf.mxu0 }
 0x1a3   : > { %v912_v5 = vadd.f32 %v911_v0, %v871_v55  ;;  %v926_v56 = vpop.f32.mrf.mxu1 }
 0x1a4   : > { %v961_v8 = vpop.f32.mrf.mxu2 }
 0x1a5   : > { %v953_v63 = vadd.f32 %v952_v25, %v912_v5  ;;  %v962_v9 = vadd.f32 %v961_v8, %v921_v3  ;;  %v810_v25 = vadd.f32 %v1779_v2, %v769_v62  ;;  %v927_v2 = vadd.f32 %v926_v56, %v886_v16 }
 0x1a7   : > { %977 = vst.msk [vmem:[%s1789_s9] sm:$0xff] %vm976_vm0, %v953_v63  ;;  %v851_v23 = vadd.f32 %v850_v60, %v810_v25 }
 0x1a8   : > { %980 = vst.msk [vmem:[%s1789_s9 + $0x18] sm:$0xff] %vm976_vm0, %v962_v9  ;;  %v973_v36 = vpop.f32.mrf.mxu3 }
 0x1a9   : > { %v892_v33 = vadd.f32 %v891_v42, %v851_v23 }
 0x1aa   : > { %v914_v24 = vpop.f32.mrf.mxu0 }
 0x1ab   : > { %v915_v32 = vadd.f32 %v914_v24, %v874_v18  ;;  %v929_v4 = vpop.f32.mrf.mxu1 }
 0x1ac   : > { %v930_v28 = vadd.f32 %v929_v4, %v889_v12  ;;  %v964_v13 = vpop.f32.mrf.mxu2 }
 0x1ad   : > { %v956_v22 = vadd.f32 %v955_v37, %v915_v32  ;;  %v965_v29 = vadd.f32 %v964_v13, %v924_v31 }
 0x1ae   : > { %v971_v34 = vadd.f32 %v970_v27, %v930_v28 }
 0x1af   : > { %978 = vst.msk [vmem:[%s1789_s9 + $0x8] sm:$0xff] %vm976_vm0, %v956_v22 }
 0x1b0   : > { %981 = vst.msk [vmem:[%s1789_s9 + $0x20] sm:$0xff] %vm976_vm0, %v965_v29 }
 0x1b1   : > { %983 = vst.msk [vmem:[%s1789_s9 + $0x30] sm:$0xff] %vm976_vm0, %v971_v34 }
 0x1b3   : > { %v932_v35 = vpop.f32.mrf.mxu1 }
 0x1b4   : > { %v933_v38 = vadd.f32 %v932_v35, %v892_v33  ;;  %v967_v26 = vpop.f32.mrf.mxu2 }
 0x1b5   : > { %v968_v37 = vadd.f32 %v967_v26, %v927_v2 }
 0x1b6   : > { %v974_v39 = vadd.f32 %v973_v36, %v933_v38 }
 0x1b7   : > { %982 = vst.msk [vmem:[%s1789_s9 + $0x28] sm:$0xff] %vm976_vm0, %v968_v37 }
 0x1b8   : > { %984 = vst.msk [vmem:[%s1789_s9 + $0x38] sm:$0xff] %vm976_vm0, %v974_v39 }
 0x1b9 PF: > { %s15_s17 = sadd.s32 1, %s1365_s17  }
 0x1ba   : > { %p12_p4 = scmp.ge.s32.totalorder %s15_s17, 4  }
 0x1bc   :  { %14 = sbr.rel (!%p12_p4) target bundleno = 2 (0x2), region = 66 }

// kernel: generator_forward.19
= control target key start
LH: loop header
LB: loop body
LE: loop exit
PB: predicated region body
PF: predicated region fallthrough
CT: control target
= control target key end

     0   :  { %s1144_s17 = smov 0   ;;  %s1505_s0 = inlined_call_operand.<no memory space> [shape: f32[1], index: 0, kind: input, shape index: {}]   ;;  %s1506_s1 = inlined_call_operand.vmem [shape: f32[2,64,8], index: 1, kind: input, shape index: {}]   ;;  %s1507_s2 = inlined_call_operand.vmem [shape: f32[128,448], index: 2, kind: input, shape index: {}]   ;;  %s1508_s3 = inlined_call_operand.vmem [shape: f32[128,1], index: 3, kind: input, shape index: {}]   ;;  %s1509_s4 = inlined_call_operand.vmem [shape: f32[2,4,32,2], index: 4, kind: output, shape index: {}]  }
   0x1   :  { %9 = sst [smem:[#allocation2]] %s1505_s0 }
   0x2 LB: > { %s934_s18 = sadd.s32 4294967295, %s1107_s17   ;;  %p938_p0 = scmp.ge.s32.totalorder %s1107_s17, 1  ;;  %s1107_s17 = sphi %s1144_s17, %s15_s17  }
   0x3   : > { %p163_p1 = scmp.lt.s32.totalorder %s1107_s17, 3 }
   0x5   : > { %p164_p2 = pnand %p938_p0, %p163_p1 }
   0x6   : > { %p189_p3 = scmp.lt.s32.totalorder (!%p164_p2), %s934_s18, 1  ;;  %s199_s19 = sld [smem:[#allocation2]] (!%p164_p2) }
   0x7   : > { %167 = sbr.rel (%p164_p2) target bundleno = 457 (0x1c9), region = 36  ;;  %s1109_s23 = smov (!%p164_p2), 125  }
   0x8   : > { %s1110_s24 = smov (!%p164_p2), 123   ;;  %s1111_s25 = smov (!%p164_p2), 127  }
   0x9   : > { %s1112_s26 = smov (!%p164_p2), 122   ;;  %s1113_s27 = smov (!%p164_p2), 124  }
   0xa   : > { %s1114_s28 = smov (!%p164_p2), 126  }
   0xc   : > { %s1511_s18 = smov (!%p189_p3, %s934_s18), 1  ;;  %v224_v2 = vstv %s199_s19  ;;  %vm553_vm0 = vcmask 523264   ;;  %vm862_vm1 = vcmask 15360  }
   0xd   : > { %s961_s0 = sshll.u32 %s1511_s18, 6  ;;  %s962_s13 = sshll.u32 %s1511_s18, 7 }
   0xe   : > { %s1158_s22 = scalar_lea.vmem %s1506_s1, %s961_s0  ;;  %s1468_s16 = scalar_lea.vmem %s1509_s4, %s962_s13 }
   0xf   : > { %v206_v0 = vld [vmem:[%s1158_s22 + $0x30] sm:$0xff]  ;;  %v207_v1 = vld [vmem:[%s1158_s22 + $0x38] sm:$0xff]  ;;  %v204_v3 = vld [vmem:[%s1158_s22 + $0x20] sm:$0xff] }
  0x10   : > { %v214_v4 = vmax.f32 %v206_v0, 0.0  ;;  %v215_v5 = vmax.f32 %v207_v1, 0.0  ;;  %v222_v6 = vmin.f32 %v206_v0, 0.0  ;;  %v223_v7 = vmin.f32 %v207_v1, 0.0  ;;  %v205_v8 = vld [vmem:[%s1158_s22 + $0x28] sm:$0xff]  ;;  %v202_v21 = vld [vmem:[%s1158_s22 + $0x10] sm:$0xff] }
  0x11   : > { %v212_v9 = vmax.f32 %v204_v3, 0.0  ;;  %v213_v10 = vmax.f32 %v205_v8, 0.0  ;;  %v220_v11 = vmin.f32 %v204_v3, 0.0  ;;  %v221_v12 = vmin.f32 %v205_v8, 0.0  ;;  %v203_v22 = vld [vmem:[%s1158_s22 + $0x18] sm:$0xff]  ;;  %v200_v31 = vld [vmem:[%s1158_s22] sm:$0xff] }
  0x12   : > { %v231_v13 = vmul.f32 %v224_v2, %v222_v6  ;;  %v232_v14 = vmul.f32 %v224_v2, %v223_v7  ;;  %v218_v25 = vmin.f32 %v202_v21, 0.0  ;;  %v219_v26 = vmin.f32 %v203_v22, 0.0  ;;  %v201_v32 = vld [vmem:[%s1158_s22 + $0x8] sm:$0xff] }
  0x13   : > { %v229_v15 = vmul.f32 %v224_v2, %v220_v11  ;;  %v230_v16 = vmul.f32 %v224_v2, %v221_v12  ;;  %v210_v27 = vmax.f32 %v202_v21, 0.0  ;;  %v211_v28 = vmax.f32 %v203_v22, 0.0 }
  0x14   : > { %v1164_v17 = vadd.f32 %v231_v13, %v214_v4  ;;  %v1166_v18 = vadd.f32 %v232_v14, %v215_v5  ;;  %v227_v29 = vmul.f32 %v224_v2, %v218_v25  ;;  %v228_v30 = vmul.f32 %v224_v2, %v219_v26 }
  0x15   : > { %v1168_v19 = vadd.f32 %v229_v15, %v212_v9  ;;  %v1170_v20 = vadd.f32 %v230_v16, %v213_v10  ;;  %v216_v35 = vmin.f32 %v200_v31, 0.0  ;;  %v217_v36 = vmin.f32 %v201_v32, 0.0 }
  0x16   : > { %v988_v23 = vpack.i.bf16 %v1164_v17, %v1166_v18  ;;  %v1183_v33 = vadd.f32 %v227_v29, %v210_v27  ;;  %v1185_v34 = vadd.f32 %v228_v30, %v211_v28  ;;  %v208_v37 = vmax.f32 %v200_v31, 0.0 }
  0x17   : > { %v998_v24 = vpack.i.bf16 %v1168_v19, %v1170_v20  ;;  %v209_v38 = vmax.f32 %v201_v32, 0.0  ;;  %v225_v40 = vmul.f32 %v224_v2, %v216_v35  ;;  %v226_v41 = vmul.f32 %v224_v2, %v217_v36 }
  0x18   : > { %989 = vrot.lane.b32.xlu1 %v988_v23, %s1109_s23  ;;  %979 = vrot.lane.b32.xlu0 %v988_v23, %s1110_s24  ;;  %v1013_v39 = vpack.i.bf16 %v1183_v33, %v1185_v34 }
  0x19   : > { %999 = vrot.lane.b32.xlu2 %v998_v24, %s1111_s25  ;;  %v1191_v42 = vadd.f32 %v225_v40, %v208_v37  ;;  %v1193_v43 = vadd.f32 %v226_v41, %v209_v38 }
  0x1b   : > { %v1028_v44 = vpack.i.bf16 %v1191_v42, %v1193_v43 }
  0x20   : > { %984 = vrot.lane.b32.xlu0 %v988_v23, %s1111_s25  ;;  %994 = vrot.lane.b32.xlu1 %v998_v24, %s1110_s24 }
  0x21   : > { %1004 = vrot.lane.b32.xlu2 %v998_v24, %s1109_s23 }
  0x28   : > { %1014 = vrot.lane.b32.xlu1 %v1013_v39, %s1111_s25  ;;  %1009 = vrot.lane.b32.xlu0 %v1013_v39, %s1110_s24 }
  0x29   : > { %1019 = vrot.lane.b32.xlu2 %v1013_v39, %s1109_s23 }
  0x30   : > { %1029 = vrot.lane.b32.xlu1 %v1028_v44, %s1111_s25  ;;  %1024 = vrot.lane.b32.xlu0 %v1028_v44, %s1110_s24 }
  0x31   : > { %1034 = vrot.lane.b32.xlu2 %v1028_v44, %s1109_s23 }
  0x38   : > { %1044 = vrot.lane.b32.xlu1 %v988_v23, %s1112_s26  ;;  %1039 = vrot.lane.b32.xlu0 %v988_v23, %s1113_s27 }
  0x39   : > { %1049 = vrot.lane.b32.xlu2 %v988_v23, %s1114_s28 }
  0x40   : > { %1059 = vrot.lane.b32.xlu1 %v998_v24, %s1112_s26  ;;  %1054 = vrot.lane.b32.xlu0 %v998_v24, %s1113_s27 }
  0x41   : > { %1064 = vrot.lane.b32.xlu2 %v998_v24, %s1114_s28 }
  0x48   : > { %1074 = vrot.lane.b32.xlu1 %v1013_v39, %s1112_s26  ;;  %1069 = vrot.lane.b32.xlu0 %v1013_v39, %s1113_s27 }
  0x49   : > { %1079 = vrot.lane.b32.xlu2 %v1013_v39, %s1114_s28 }
  0x50   : > { %1089 = vrot.lane.b32.xlu1 %v1028_v44, %s1112_s26  ;;  %1084 = vrot.lane.b32.xlu0 %v1028_v44, %s1113_s27 }
  0x51   : > { %1094 = vrot.lane.b32.xlu2 %v1028_v44, %s1114_s28  ;;  %v1115_v44 = vmov 0  }
  0x52   : > { %1098 = vset.pattern.permute.xlu0 %v1115_v44  ;;  %1099 = vset.pattern.permute.xlu1 %v1115_v44 }
  0x53   : > { %1100 = vset.pattern.permute.xlu2 %v1115_v44  ;;  %v468_v44 = vld [vmem:[%s1508_s3 + $0x58] sm:$0xff] }
  0x73   : > { %v1000_v45 = vpop.permute.xlu2 %999 }
  0x74   : > { %v1001_v3 = vunpack.i.l.bf16 %v1000_v45  ;;  %v1002_v5 = vunpack.i.h.bf16 %v1000_v45 }
  0x7b   : > { %v1005_v46 = vpop.permute.xlu2 %1004 }
  0x7c   : > { %v1006_v55 = vunpack.i.l.bf16 %v1005_v46  ;;  %v1007_v56 = vunpack.i.h.bf16 %v1005_v46 }
  0x83   : > { %v1020_v47 = vpop.permute.xlu2 %1019 }
  0x84   : > { %v1021_v59 = vunpack.i.l.bf16 %v1020_v47  ;;  %v1022_v0 = vunpack.i.h.bf16 %v1020_v47  ;;  %v393_v47 = vld [vmem:[%s1507_s2] sm:$0xff] }
  0x8a   : > { %v990_v48 = vpop.permute.xlu1 %989  ;;  %v980_v49 = vpop.permute.xlu0 %979 }
  0x8b   : > { %v991_v50 = vunpack.i.l.bf16 %v990_v48  ;;  %v981_v51 = vunpack.i.l.bf16 %v980_v49  ;;  %v992_v52 = vunpack.i.h.bf16 %v990_v48  ;;  %v1035_v53 = vpop.permute.xlu2 %1034  ;;  %v982_v54 = vunpack.i.h.bf16 %v980_v49  ;;  %v398_v48 = vld [vmem:[%s1507_s2 + $0x28] sm:$0xff] }
  0x8c   : > { %v1036_v2 = vunpack.i.l.bf16 %v1035_v53  ;;  %v1037_v4 = vunpack.i.h.bf16 %v1035_v53 }
  0x8d   : > { %667 = vmatpush.msra.mxu1 %v991_v50  ;;  %732 = vmatpush.msra.mxu2 %v981_v51 }
  0x8f   : > { %668 = vmatpush.msra.mxu1 %v992_v52  ;;  %733 = vmatpush.msra.mxu2 %v982_v54  ;;  %v402_v54 = vld [vmem:[%s1507_s2 + $0x48] sm:$0xff] }
  0x91   : > { %669 = vmatpush.msra.mxu1 %v1006_v55 }
  0x92   : > { %v985_v57 = vpop.permute.xlu0 %984  ;;  %v995_v58 = vpop.permute.xlu1 %994 }
  0x93   : > { %v986_v60 = vunpack.i.l.bf16 %v985_v57  ;;  %v996_v61 = vunpack.i.l.bf16 %v995_v58  ;;  %v997_v62 = vunpack.i.h.bf16 %v995_v58  ;;  %670 = vmatpush.msra.mxu1 %v1007_v56  ;;  %v1050_v63 = vpop.permute.xlu2 %1049  ;;  %v987_v1 = vunpack.i.h.bf16 %v985_v57 }
  0x94   : > { %v1051_v8 = vunpack.i.l.bf16 %v1050_v63  ;;  %v1052_v13 = vunpack.i.h.bf16 %v1050_v63  ;;  %v396_v63 = vld [vmem:[%s1507_s2 + $0x18] sm:$0xff] }
  0x95   : > { %602 = vmatpush.msra.mxu0 %v986_v60  ;;  %734 = vmatpush.msra.mxu2 %v996_v61  ;;  %v401_v61 = vld [vmem:[%s1507_s2 + $0x40] sm:$0xff] }
  0x96   : > { %671 = vmatpush.msra.mxu1 %v1021_v59 }
  0x97   : > { %603 = vmatpush.msra.mxu0 %v987_v1  ;;  %735 = vmatpush.msra.mxu2 %v997_v62  ;;  %v395_v62 = vld [vmem:[%s1507_s2 + $0x10] sm:$0xff]  ;;  %v460_v1 = vld [vmem:[%s1508_s3 + $0x18] sm:$0xff] }
  0x98   : > { %672 = vmatpush.msra.mxu1 %v1022_v0  ;;  %v406_v0 = vld [vmem:[%s1507_s2 + $0x68] sm:$0xff] }
  0x99   : > { %604 = vmatpush.msra.mxu0 %v1001_v3  ;;  %v399_v3 = vld [vmem:[%s1507_s2 + $0x30] sm:$0xff] }
  0x9a   : > { %v1015_v6 = vpop.permute.xlu1 %1014  ;;  %v1010_v7 = vpop.permute.xlu0 %1009  ;;  %673 = vmatpush.msra.mxu1 %v1036_v2  ;;  %v405_v2 = vld [vmem:[%s1507_s2 + $0x60] sm:$0xff] }
  0x9b   : > { %605 = vmatpush.msra.mxu0 %v1002_v5  ;;  %v1016_v9 = vunpack.i.l.bf16 %v1015_v6  ;;  %v1011_v10 = vunpack.i.l.bf16 %v1010_v7  ;;  %v1017_v11 = vunpack.i.h.bf16 %v1015_v6  ;;  %v1065_v12 = vpop.permute.xlu2 %1064  ;;  %v1012_v14 = vunpack.i.h.bf16 %v1010_v7  ;;  %v410_v5 = vld [vmem:[%s1507_s2 + $0x88] sm:$0xff]  ;;  %v409_v6 = vld [vmem:[%s1507_s2 + $0x80] sm:$0xff]  ;;  %v403_v7 = vld [vmem:[%s1507_s2 + $0x50] sm:$0xff] }
  0x9c   : > { %674 = vmatpush.msra.mxu1 %v1037_v4  ;;  %v1066_v15 = vunpack.i.l.bf16 %v1065_v12  ;;  %v1067_v16 = vunpack.i.h.bf16 %v1065_v12  ;;  %v400_v4 = vld [vmem:[%s1507_s2 + $0x38] sm:$0xff]  ;;  %v413_v12 = vld [vmem:[%s1507_s2 + $0xa0] sm:$0xff] }
  0x9d   : > { %606 = vmatpush.msra.mxu0 %v1016_v9  ;;  %736 = vmatpush.msra.mxu2 %v1011_v10  ;;  %v414_v9 = vld [vmem:[%s1507_s2 + $0xa8] sm:$0xff]  ;;  %v459_v10 = vld [vmem:[%s1508_s3 + $0x10] sm:$0xff] }
  0x9e   : > { %675 = vmatpush.msra.mxu1 %v1051_v8  ;;  %v404_v8 = vld [vmem:[%s1507_s2 + $0x58] sm:$0xff]  ;;  %485 = vperm.xlu2 %1100, %v459_v10  }
  0x9f   : > { %607 = vmatpush.msra.mxu0 %v1017_v11  ;;  %737 = vmatpush.msra.mxu2 %v1012_v14  ;;  %v462_v11 = vld [vmem:[%s1508_s3 + $0x28] sm:$0xff]  ;;  %v408_v14 = vld [vmem:[%s1507_s2 + $0x78] sm:$0xff] }
  0xa0   : > { %676 = vmatpush.msra.mxu1 %v1052_v13  ;;  %v407_v13 = vld [vmem:[%s1507_s2 + $0x70] sm:$0xff] }
  0xa2   : > { %v1030_v21 = vpop.permute.xlu1 %1029  ;;  %v1025_v22 = vpop.permute.xlu0 %1024  ;;  %677 = vmatpush.msra.mxu1 %v1066_v15  ;;  %v418_v15 = vld [vmem:[%s1507_s2 + $0xc8] sm:$0xff] }
  0xa3   : > { %v1031_v23 = vunpack.i.l.bf16 %v1030_v21  ;;  %v1026_v24 = vunpack.i.l.bf16 %v1025_v22  ;;  %v1032_v25 = vunpack.i.h.bf16 %v1030_v21  ;;  %v1080_v26 = vpop.permute.xlu2 %1079  ;;  %v1027_v29 = vunpack.i.h.bf16 %v1025_v22  ;;  %v417_v21 = vld [vmem:[%s1507_s2 + $0xc0] sm:$0xff]  ;;  %v411_v22 = vld [vmem:[%s1507_s2 + $0x90] sm:$0xff] }
  0xa4   : > { %678 = vmatpush.msra.mxu1 %v1067_v16  ;;  %v1081_v27 = vunpack.i.l.bf16 %v1080_v26  ;;  %v1082_v28 = vunpack.i.h.bf16 %v1080_v26  ;;  %v463_v16 = vld [vmem:[%s1508_s3 + $0x30] sm:$0xff]  ;;  %v421_v26 = vld [vmem:[%s1507_s2 + $0xe0] sm:$0xff] }
  0xa5   : > { %608 = vmatpush.msra.mxu0 %v1031_v23  ;;  %738 = vmatpush.msra.mxu2 %v1026_v24  ;;  %v412_v23 = vld [vmem:[%s1507_s2 + $0x98] sm:$0xff]  ;;  %v422_v24 = vld [vmem:[%s1507_s2 + $0xe8] sm:$0xff] }
  0xa6   : > { %679 = vmatpush.msra.mxu1 %v1081_v27  ;;  %v415_v27 = vld [vmem:[%s1507_s2 + $0xb0] sm:$0xff] }
  0xa7   : > { %609 = vmatpush.msra.mxu0 %v1032_v25  ;;  %739 = vmatpush.msra.mxu2 %v1027_v29  ;;  %v461_v25 = vld [vmem:[%s1508_s3 + $0x20] sm:$0xff]  ;;  %v426_v29 = vld [vmem:[%s1507_s2 + $0x108] sm:$0xff] }
  0xa8   : > { %680 = vmatpush.msra.mxu1 %v1082_v28  ;;  %495 = vperm.xlu2 %1100, %v461_v25   ;;  %v416_v28 = vld [vmem:[%s1507_s2 + $0xb8] sm:$0xff] }
  0xa9   : > { %610 = vmatpush.msra.mxu0 %v1166_v18  ;;  %v394_v18 = vld [vmem:[%s1507_s2 + $0x8] sm:$0xff] }
  0xaa   : > { %v1045_v30 = vpop.permute.xlu1 %1044  ;;  %v1040_v31 = vpop.permute.xlu0 %1039 }
  0xab   : > { %611 = vmatpush.msra.mxu0 %v1164_v17  ;;  %v1041_v32 = vunpack.i.l.bf16 %v1040_v31  ;;  %v1046_v35 = vunpack.i.l.bf16 %v1045_v30  ;;  %v1095_v36 = vpop.permute.xlu2 %1094  ;;  %v1047_v37 = vunpack.i.h.bf16 %v1045_v30  ;;  %v1042_v40 = vunpack.i.h.bf16 %v1040_v31  ;;  %v457_v17 = vld [vmem:[%s1508_s3] sm:$0xff]  ;;  %v466_v30 = vld [vmem:[%s1508_s3 + $0x48] sm:$0xff] }
  0xac   : > { %v1096_v38 = vunpack.i.l.bf16 %v1095_v36  ;;  %v1097_v39 = vunpack.i.h.bf16 %v1095_v36  ;;  %475 = vperm.xlu0 %1098, %v457_v17   ;;  %v465_v31 = vld [vmem:[%s1508_s3 + $0x40] sm:$0xff]  ;;  %v420_v36 = vld [vmem:[%s1507_s2 + $0xd8] sm:$0xff]  ;;  %v434_v17 = vld [vmem:[%s1507_s2 + $0x148] sm:$0xff] }
  0xad   : > { %612 = vmatpush.msra.mxu0 %v1170_v20  ;;  %740 = vmatpush.msra.mxu2 %v1041_v32  ;;  %v425_v32 = vld [vmem:[%s1507_s2 + $0x100] sm:$0xff] }
  0xae   : > { %805 = vmatpush.msra.mxu3 %v1046_v35  ;;  %681 = vmatpush.msra.mxu1 %v1096_v38  ;;  %v419_v35 = vld [vmem:[%s1507_s2 + $0xd0] sm:$0xff]  ;;  %v469_v38 = vld [vmem:[%s1508_s3 + $0x60] sm:$0xff] }
  0xaf   : > { %613 = vmatpush.msra.mxu0 %v1168_v19  ;;  %741 = vmatpush.msra.mxu2 %v1042_v40  ;;  %v423_v40 = vld [vmem:[%s1507_s2 + $0xf0] sm:$0xff] }
  0xb0   : > { %806 = vmatpush.msra.mxu3 %v1047_v37  ;;  %682 = vmatpush.msra.mxu1 %v1097_v39  ;;  %v430_v37 = vld [vmem:[%s1507_s2 + $0x128] sm:$0xff]  ;;  %v429_v39 = vld [vmem:[%s1507_s2 + $0x120] sm:$0xff] }
  0xb1   : > { %614 = vmatpush.msra.mxu0 %v1185_v34  ;;  %683 = vmatmul.f32.vlgmr.msra.gmra.mxu1 %v394_v18  ;;  %v424_v18 = vld [vmem:[%s1507_s2 + $0xf8] sm:$0xff] }
  0xb2   : > { %v1060_v20 = vpop.permute.xlu1 %1059  ;;  %v1055_v41 = vpop.permute.xlu0 %1054 }
  0xb3   : > { %615 = vmatpush.msra.mxu0 %v1183_v33  ;;  %v1056_v45 = vunpack.i.l.bf16 %v1055_v41  ;;  %v1061_v46 = vunpack.i.l.bf16 %v1060_v20  ;;  %v1062_v19 = vunpack.i.h.bf16 %v1060_v20  ;;  %v1057_v34 = vunpack.i.h.bf16 %v1055_v41  ;;  %v458_v33 = vld [vmem:[%s1508_s3 + $0x8] sm:$0xff]  ;;  %v464_v20 = vld [vmem:[%s1508_s3 + $0x38] sm:$0xff] }
  0xb4   : > { %480 = vperm.xlu1 %1099, %v458_v33   ;;  %500 = vperm.xlu0 %1098, %v462_v11   ;;  %v472_v41 = vld [vmem:[%s1508_s3 + $0x78] sm:$0xff]  ;;  %v431_v33 = vld [vmem:[%s1507_s2 + $0x130] sm:$0xff] }
  0xb5   : > { %616 = vmatpush.msra.mxu0 %v1193_v43  ;;  %742 = vmatpush.msra.mxu2 %v1056_v45  ;;  %v433_v45 = vld [vmem:[%s1507_s2 + $0x140] sm:$0xff] }
  0xb6   : > { %807 = vmatpush.msra.mxu3 %v1061_v46  ;;  %510 = vperm.xlu2 %1100, %v464_v20   ;;  %v427_v46 = vld [vmem:[%s1507_s2 + $0x110] sm:$0xff] }
  0xb7   : > { %617 = vmatpush.msra.mxu0 %v1191_v42  ;;  %743 = vmatpush.msra.mxu2 %v1057_v34  ;;  %v397_v42 = vld [vmem:[%s1507_s2 + $0x20] sm:$0xff]  ;;  %v438_v34 = vld [vmem:[%s1507_s2 + $0x168] sm:$0xff] }
  0xb8   : > { %808 = vmatpush.msra.mxu3 %v1062_v19  ;;  %618 = vmatmul.f32.vlgmr.msra.gmra.mxu0 %v393_v47  ;;  %v428_v19 = vld [vmem:[%s1507_s2 + $0x118] sm:$0xff]  ;;  %v471_v47 = vld [vmem:[%s1508_s3 + $0x70] sm:$0xff] }
  0xb9   : > { %686 = vmatmul.f32.gmra.mxu1 %v398_v48  ;;  %v437_v48 = vld [vmem:[%s1507_s2 + $0x160] sm:$0xff] }
  0xba   : > { %v1075_v43 = vpop.permute.xlu1 %1074  ;;  %v1070_v49 = vpop.permute.xlu0 %1069 }
  0xbb   : > { %v1071_v50 = vunpack.i.l.bf16 %v1070_v49  ;;  %v1076_v51 = vunpack.i.l.bf16 %v1075_v43  ;;  %v1077_v52 = vunpack.i.h.bf16 %v1075_v43  ;;  %v1072_v53 = vunpack.i.h.bf16 %v1070_v49  ;;  %v432_v43 = vld [vmem:[%s1507_s2 + $0x138] sm:$0xff]  ;;  %v442_v49 = vld [vmem:[%s1507_s2 + $0x188] sm:$0xff] }
  0xbc   : > { %490 = vperm.xlu1 %1099, %v460_v1   ;;  %515 = vperm.xlu0 %1098, %v465_v31   ;;  %v448_v1 = vld [vmem:[%s1507_s2 + $0x1b8] sm:$0xff] }
  0xbd   : > { %744 = vmatpush.msra.mxu2 %v1071_v50  ;;  %809 = vmatpush.msra.mxu3 %v1076_v51  ;;  %v441_v50 = vld [vmem:[%s1507_s2 + $0x180] sm:$0xff]  ;;  %v435_v51 = vld [vmem:[%s1507_s2 + $0x150] sm:$0xff] }
  0xbf   : > { %745 = vmatpush.msra.mxu2 %v1072_v53  ;;  %810 = vmatpush.msra.mxu3 %v1077_v52  ;;  %v436_v52 = vld [vmem:[%s1507_s2 + $0x158] sm:$0xff]  ;;  %v446_v53 = vld [vmem:[%s1507_s2 + $0x1a8] sm:$0xff] }
  0xc0   : > { %621 = vmatmul.f32.gmra.mxu0 %v397_v42  ;;  %v467_v42 = vld [vmem:[%s1508_s3 + $0x50] sm:$0xff] }
  0xc1   : > { %689 = vmatmul.f32.gmra.mxu1 %v402_v54  ;;  %525 = vperm.xlu2 %1100, %v467_v42   ;;  %v445_v54 = vld [vmem:[%s1507_s2 + $0x1a0] sm:$0xff] }
  0xc2   : > { %v1090_v55 = vpop.permute.xlu1 %1089  ;;  %v1085_v56 = vpop.permute.xlu0 %1084 }
  0xc3   : > { %v1086_v57 = vunpack.i.l.bf16 %v1085_v56  ;;  %v1091_v58 = vunpack.i.l.bf16 %v1090_v55  ;;  %v1092_v59 = vunpack.i.h.bf16 %v1090_v55  ;;  %v1087_v60 = vunpack.i.h.bf16 %v1085_v56  ;;  %v439_v55 = vld [vmem:[%s1507_s2 + $0x170] sm:$0xff]  ;;  %v440_v56 = vld [vmem:[%s1507_s2 + $0x178] sm:$0xff] }
  0xc4   : > { %505 = vperm.xlu1 %1099, %v463_v16   ;;  %530 = vperm.xlu0 %1098, %v468_v44  }
  0xc5   : > { %746 = vmatpush.msra.mxu2 %v1086_v57  ;;  %811 = vmatpush.msra.mxu3 %v1091_v58  ;;  %v450_v57 = vld [vmem:[%s1507_s2 + $0x1c8] sm:$0xff] }
  0xc6   : > { %v470_v58 = vld [vmem:[%s1508_s3 + $0x68] sm:$0xff] }
  0xc7   : > { %747 = vmatpush.msra.mxu2 %v1087_v60  ;;  %812 = vmatpush.msra.mxu3 %v1092_v59  ;;  %v449_v59 = vld [vmem:[%s1507_s2 + $0x1c0] sm:$0xff]  ;;  %v443_v60 = vld [vmem:[%s1507_s2 + $0x190] sm:$0xff] }
  0xc8   : > { %624 = vmatmul.f32.gmra.mxu0 %v401_v61  ;;  %748 = vmatmul.f32.vlgmr.msra.gmra.mxu2 %v395_v62  ;;  %v444_v61 = vld [vmem:[%s1507_s2 + $0x198] sm:$0xff]  ;;  %v454_v62 = vld [vmem:[%s1507_s2 + $0x1e8] sm:$0xff] }
  0xc9   : > { %943 = vmatmul.msk.f32.vlgmr.msra.gmra.mxu3 %vm553_vm0, %v396_v63  ;;  %692 = vmatmul.f32.gmra.mxu1 %v406_v0  ;;  %v453_v63 = vld [vmem:[%s1507_s2 + $0x1e0] sm:$0xff]  ;;  %v447_v0 = vld [vmem:[%s1507_s2 + $0x1b0] sm:$0xff] }
  0xca   : > { %540 = vperm.xlu2 %1100, %v470_v58  }
  0xcc   : > { %520 = vperm.xlu1 %1099, %v466_v30   ;;  %545 = vperm.xlu0 %1098, %v471_v47  }
  0xd0   : > { %627 = vmatmul.f32.gmra.mxu0 %v405_v2  ;;  %751 = vmatmul.f32.gmra.mxu2 %v399_v3 }
  0xd1   : > { %944 = vmatmul.msk.f32.gmra.mxu3 %vm553_vm0, %v400_v4  ;;  %695 = vmatmul.f32.gmra.mxu1 %v410_v5  ;;  %v451_v4 = vld [vmem:[%s1507_s2 + $0x1d0] sm:$0xff]  ;;  %v452_v5 = vld [vmem:[%s1507_s2 + $0x1d8] sm:$0xff] }
  0xd4   : > { %535 = vperm.xlu1 %1099, %v469_v38  }
  0xd8   : > { %630 = vmatmul.f32.gmra.mxu0 %v409_v6  ;;  %754 = vmatmul.f32.gmra.mxu2 %v403_v7 }
  0xd9   : > { %945 = vmatmul.msk.f32.gmra.mxu3 %vm553_vm0, %v404_v8  ;;  %698 = vmatmul.f32.gmra.mxu1 %v414_v9  ;;  %v455_v8 = vld [vmem:[%s1507_s2 + $0x1f0] sm:$0xff]  ;;  %v456_v9 = vld [vmem:[%s1507_s2 + $0x1f8] sm:$0xff] }
  0xdc   : > { %550 = vperm.xlu1 %1099, %v472_v41  }
  0xe0   : > { %633 = vmatmul.f32.gmra.mxu0 %v413_v12  ;;  %757 = vmatmul.f32.gmra.mxu2 %v407_v13 }
  0xe1   : > { %946 = vmatmul.msk.f32.gmra.mxu3 %vm553_vm0, %v408_v14  ;;  %701 = vmatmul.f32.gmra.mxu1 %v418_v15 }
  0xe8   : > { %636 = vmatmul.f32.gmra.mxu0 %v417_v21  ;;  %760 = vmatmul.f32.gmra.mxu2 %v411_v22 }
  0xe9   : > { %947 = vmatmul.msk.f32.gmra.mxu3 %vm553_vm0, %v412_v23  ;;  %704 = vmatmul.f32.gmra.mxu1 %v422_v24 }
  0xf0   : > { %639 = vmatmul.f32.gmra.mxu0 %v421_v26  ;;  %763 = vmatmul.f32.gmra.mxu2 %v415_v27 }
  0xf1   : > { %948 = vmatmul.msk.f32.gmra.mxu3 %vm553_vm0, %v416_v28  ;;  %707 = vmatmul.f32.gmra.mxu1 %v426_v29 }
  0xf8   : > { %642 = vmatmul.f32.gmra.mxu0 %v425_v32  ;;  %766 = vmatmul.f32.gmra.mxu2 %v419_v35  ;;  %v486_v28 = vpop.permute.xlu2 %485 }
  0xf9   : > { %949 = vmatmul.msk.f32.gmra.mxu3 %vm553_vm0, %v420_v36  ;;  %710 = vmatmul.f32.gmra.mxu1 %v430_v37 }
 0x100   : > { %645 = vmatmul.f32.gmra.mxu0 %v429_v39  ;;  %769 = vmatmul.f32.gmra.mxu2 %v423_v40 }
 0x101   : > { %950 = vmatmul.msk.f32.gmra.mxu3 %vm553_vm0, %v424_v18  ;;  %713 = vmatmul.f32.gmra.mxu1 %v434_v17 }
 0x108   : > { %648 = vmatmul.f32.gmra.mxu0 %v433_v45  ;;  %772 = vmatmul.f32.gmra.mxu2 %v427_v46 }
 0x109   : > { %951 = vmatmul.msk.f32.gmra.mxu3 %vm553_vm0, %v428_v19  ;;  %716 = vmatmul.f32.gmra.mxu1 %v438_v34  ;;  %v496_v19 = vpop.permute.xlu2 %495 }
 0x110   : > { %651 = vmatmul.f32.gmra.mxu0 %v437_v48  ;;  %775 = vmatmul.f32.gmra.mxu2 %v431_v33 }
 0x111   : > { %952 = vmatmul.msk.f32.gmra.mxu3 %vm553_vm0, %v432_v43  ;;  %719 = vmatmul.f32.gmra.mxu1 %v442_v49 }
 0x118   : > { %654 = vmatmul.f32.gmra.mxu0 %v441_v50  ;;  %778 = vmatmul.f32.gmra.mxu2 %v435_v51 }
 0x119   : > { %953 = vmatmul.msk.f32.gmra.mxu3 %vm553_vm0, %v436_v52  ;;  %722 = vmatmul.f32.gmra.mxu1 %v446_v53 }
 0x11e   : > { %v476_v11 = vpop.permute.xlu0 %475 }
 0x120   : > { %657 = vmatmul.f32.gmra.mxu0 %v445_v54  ;;  %781 = vmatmul.f32.gmra.mxu2 %v439_v55 }
 0x121   : > { %954 = vmatmul.msk.f32.gmra.mxu3 %vm553_vm0, %v440_v56  ;;  %725 = vmatmul.f32.gmra.mxu1 %v450_v57 }
 0x126   : > { %v481_v16 = vpop.permute.xlu1 %480  ;;  %v501_v52 = vpop.permute.xlu0 %500 }
 0x128   : > { %660 = vmatmul.f32.gmra.mxu0 %v449_v59  ;;  %784 = vmatmul.f32.gmra.mxu2 %v443_v60 }
 0x129   : > { %955 = vmatmul.msk.f32.gmra.mxu3 %vm553_vm0, %v444_v61  ;;  %728 = vmatmul.f32.gmra.mxu1 %v454_v62 }
 0x12e   : > { %v684_v2 = vpop.f32.mrf.mxu1  ;;  %v491_v39 = vpop.permute.xlu1 %490 }
 0x130   : > { %663 = vmatmul.f32.gmra.mxu0 %v453_v63  ;;  %787 = vmatmul.f32.gmra.mxu2 %v447_v0 }
 0x131   : > { %956 = vmatmul.msk.f32.gmra.mxu3 %vm553_vm0, %v448_v1 }
 0x135   : > { %v619_v3 = vpop.f32.mrf.mxu0 }
 0x136   : > { %v687_v6 = vpop.f32.mrf.mxu1  ;;  %v620_v12 = vadd.f32 %v619_v3, %v476_v11  ;;  %v506_v60 = vpop.permute.xlu1 %505 }
 0x138   : > { %790 = vmatmul.f32.gmra.mxu2 %v451_v4  ;;  %v685_v15 = vadd.f32 %v684_v2, %v620_v12 }
 0x139   : > { %957 = vmatmul.msk.f32.gmra.mxu3 %vm553_vm0, %v452_v5  ;;  %v511_v5 = vpop.permute.xlu2 %510 }
 0x13d   : > { %v622_v7 = vpop.f32.mrf.mxu0 }
 0x13e   : > { %v690_v10 = vpop.f32.mrf.mxu1  ;;  %v623_v24 = vadd.f32 %v622_v7, %v481_v16 }
 0x140   : > { %793 = vmatmul.f32.gmra.mxu2 %v455_v8  ;;  %v688_v27 = vadd.f32 %v687_v6, %v623_v24 }
 0x141   : > { %958 = vmatmul.msk.f32.gmra.mxu3 %vm553_vm0, %v456_v9 }
 0x145   : > { %v625_v13 = vpop.f32.mrf.mxu0 }
 0x146   : > { %v693_v14 = vpop.f32.mrf.mxu1  ;;  %v626_v35 = vadd.f32 %v625_v13, %v486_v28  ;;  %v516_v13 = vpop.permute.xlu0 %515 }
 0x148   : > { %v691_v38 = vadd.f32 %v690_v10, %v626_v35 }
 0x14b   : > { %v749_v21 = vpop.f32.mrf.mxu2 }
 0x14c   : > { %v750_v22 = vadd.f32 %v749_v21, %v685_v15  ;;  %v814_v23 = vpop.f32.mrf.mxu3 }
 0x14d   : > { %v628_v25 = vpop.f32.mrf.mxu0 }
 0x14e   : > { %v815_v26 = vadd.f32 %v814_v23, %v750_v22  ;;  %v696_v29 = vpop.f32.mrf.mxu1  ;;  %v629_v41 = vadd.f32 %v628_v25, %v491_v39 }
 0x150   : > { %863 = vst.msk [vmem:[%s1468_s16] sm:$0xff] %vm862_vm1, %v815_v26  ;;  %v694_v46 = vadd.f32 %v693_v14, %v629_v41  ;;  %v521_v26 = vpop.permute.xlu1 %520 }
 0x153   : > { %v752_v30 = vpop.f32.mrf.mxu2 }
 0x154   : > { %v753_v31 = vadd.f32 %v752_v30, %v688_v27  ;;  %v817_v32 = vpop.f32.mrf.mxu3 }
 0x155   : > { %v631_v36 = vpop.f32.mrf.mxu0 }
 0x156   : > { %v818_v37 = vadd.f32 %v817_v32, %v753_v31  ;;  %v699_v18 = vpop.f32.mrf.mxu1  ;;  %v632_v33 = vadd.f32 %v631_v36, %v496_v19  ;;  %v526_v36 = vpop.permute.xlu2 %525 }
 0x158   : > { %864 = vst.msk [vmem:[%s1468_s16 + $0x8] sm:$0xff] %vm862_vm1, %v818_v37  ;;  %v697_v51 = vadd.f32 %v696_v29, %v632_v33 }
 0x15b   : > { %v755_v40 = vpop.f32.mrf.mxu2 }
 0x15c   : > { %v756_v17 = vadd.f32 %v755_v40, %v691_v38  ;;  %v820_v20 = vpop.f32.mrf.mxu3 }
 0x15d   : > { %v634_v44 = vpop.f32.mrf.mxu0 }
 0x15e   : > { %v821_v45 = vadd.f32 %v820_v20, %v756_v17  ;;  %v702_v49 = vpop.f32.mrf.mxu1  ;;  %v635_v55 = vadd.f32 %v634_v44, %v501_v52  ;;  %v531_v44 = vpop.permute.xlu0 %530 }
 0x15f   : > { %v536_v52 = vpop.permute.xlu1 %535 }
 0x160   : > { %865 = vst.msk [vmem:[%s1468_s16 + $0x10] sm:$0xff] %vm862_vm1, %v821_v45  ;;  %v700_v59 = vadd.f32 %v699_v18, %v635_v55 }
 0x163   : > { %v758_v34 = vpop.f32.mrf.mxu2 }
 0x164   : > { %v759_v47 = vadd.f32 %v758_v34, %v694_v46  ;;  %v823_v48 = vpop.f32.mrf.mxu3 }
 0x165   : > { %v637_v43 = vpop.f32.mrf.mxu0 }
 0x166   : > { %v824_v50 = vadd.f32 %v823_v48, %v759_v47  ;;  %v705_v58 = vpop.f32.mrf.mxu1  ;;  %v638_v0 = vadd.f32 %v637_v43, %v506_v60 }
 0x168   : > { %866 = vst.msk [vmem:[%s1468_s16 + $0x18] sm:$0xff] %vm862_vm1, %v824_v50  ;;  %v703_v3 = vadd.f32 %v702_v49, %v638_v0 }
 0x16b   : > { %v761_v53 = vpop.f32.mrf.mxu2 }
 0x16c   : > { %v762_v42 = vadd.f32 %v761_v53, %v697_v51  ;;  %v826_v54 = vpop.f32.mrf.mxu3 }
 0x16d   : > { %v640_v56 = vpop.f32.mrf.mxu0 }
 0x16e   : > { %v827_v57 = vadd.f32 %v826_v54, %v762_v42  ;;  %v708_v4 = vpop.f32.mrf.mxu1  ;;  %v641_v9 = vadd.f32 %v640_v56, %v511_v5  ;;  %v541_v56 = vpop.permute.xlu2 %540 }
 0x170   : > { %867 = vst.msk [vmem:[%s1468_s16 + $0x20] sm:$0xff] %vm862_vm1, %v827_v57  ;;  %v706_v12 = vadd.f32 %v705_v58, %v641_v9 }
 0x173   : > { %v764_v61 = vpop.f32.mrf.mxu2 }
 0x174   : > { %v765_v62 = vadd.f32 %v764_v61, %v700_v59  ;;  %v829_v63 = vpop.f32.mrf.mxu3 }
 0x175   : > { %v643_v1 = vpop.f32.mrf.mxu0 }
 0x176   : > { %v830_v2 = vadd.f32 %v829_v63, %v765_v62  ;;  %v711_v14 = vpop.f32.mrf.mxu1  ;;  %v644_v22 = vadd.f32 %v643_v1, %v516_v13  ;;  %v551_v13 = vpop.permute.xlu1 %550 }
 0x178   : > { %868 = vst.msk [vmem:[%s1468_s16 + $0x28] sm:$0xff] %vm862_vm1, %v830_v2  ;;  %v709_v24 = vadd.f32 %v708_v4, %v644_v22  ;;  %v546_v4 = vpop.permute.xlu0 %545 }
 0x17b   : > { %v767_v6 = vpop.f32.mrf.mxu2 }
 0x17c   : > { %v768_v7 = vadd.f32 %v767_v6, %v703_v3  ;;  %v832_v8 = vpop.f32.mrf.mxu3 }
 0x17d   : > { %v646_v11 = vpop.f32.mrf.mxu0 }
 0x17e   : > { %v833_v10 = vadd.f32 %v832_v8, %v768_v7  ;;  %v647_v28 = vadd.f32 %v646_v11, %v521_v26  ;;  %v714_v31 = vpop.f32.mrf.mxu1 }
 0x180   : > { %869 = vst.msk [vmem:[%s1468_s16 + $0x30] sm:$0xff] %vm862_vm1, %v833_v10  ;;  %v712_v35 = vadd.f32 %v711_v14, %v647_v28 }
 0x183   : > { %v770_v15 = vpop.f32.mrf.mxu2 }
 0x184   : > { %v771_v16 = vadd.f32 %v770_v15, %v706_v12  ;;  %v835_v21 = vpop.f32.mrf.mxu3 }
 0x185   : > { %v649_v25 = vpop.f32.mrf.mxu0 }
 0x186   : > { %v836_v23 = vadd.f32 %v835_v21, %v771_v16  ;;  %v650_v18 = vadd.f32 %v649_v25, %v526_v36  ;;  %v717_v20 = vpop.f32.mrf.mxu1 }
 0x188   : > { %870 = vst.msk [vmem:[%s1468_s16 + $0x38] sm:$0xff] %vm862_vm1, %v836_v23  ;;  %v715_v41 = vadd.f32 %v714_v31, %v650_v18 }
 0x18b   : > { %v773_v27 = vpop.f32.mrf.mxu2 }
 0x18c   : > { %v774_v29 = vadd.f32 %v773_v27, %v709_v24  ;;  %v838_v30 = vpop.f32.mrf.mxu3 }
 0x18d   : > { %v652_v37 = vpop.f32.mrf.mxu0 }
 0x18e   : > { %v839_v32 = vadd.f32 %v838_v30, %v774_v29  ;;  %v653_v46 = vadd.f32 %v652_v37, %v531_v44  ;;  %v720_v43 = vpop.f32.mrf.mxu1 }
 0x190   : > { %871 = vst.msk [vmem:[%s1468_s16 + $0x40] sm:$0xff] %vm862_vm1, %v839_v32  ;;  %v718_v33 = vadd.f32 %v717_v20, %v653_v46 }
 0x193   : > { %v776_v38 = vpop.f32.mrf.mxu2 }
 0x194   : > { %v777_v39 = vadd.f32 %v776_v38, %v712_v35  ;;  %v841_v40 = vpop.f32.mrf.mxu3 }
 0x195   : > { %v655_v47 = vpop.f32.mrf.mxu0 }
 0x196   : > { %v842_v17 = vadd.f32 %v841_v40, %v777_v39  ;;  %v656_v53 = vadd.f32 %v655_v47, %v536_v52  ;;  %v723_v57 = vpop.f32.mrf.mxu1 }
 0x198   : > { %872 = vst.msk [vmem:[%s1468_s16 + $0x48] sm:$0xff] %vm862_vm1, %v842_v17  ;;  %v721_v55 = vadd.f32 %v720_v43, %v656_v53 }
 0x19b   : > { %v779_v45 = vpop.f32.mrf.mxu2 }
 0x19c   : > { %v780_v19 = vadd.f32 %v779_v45, %v715_v41  ;;  %v844_v34 = vpop.f32.mrf.mxu3 }
 0x19d   : > { %v658_v54 = vpop.f32.mrf.mxu0 }
 0x19e   : > { %v845_v48 = vadd.f32 %v844_v34, %v780_v19  ;;  %v659_v61 = vadd.f32 %v658_v54, %v541_v56  ;;  %v726_v5 = vpop.f32.mrf.mxu1 }
 0x1a0   : > { %873 = vst.msk [vmem:[%s1468_s16 + $0x50] sm:$0xff] %vm862_vm1, %v845_v48  ;;  %v724_v0 = vadd.f32 %v723_v57, %v659_v61 }
 0x1a3   : > { %v782_v49 = vpop.f32.mrf.mxu2 }
 0x1a4   : > { %v783_v50 = vadd.f32 %v782_v49, %v718_v33  ;;  %v847_v51 = vpop.f32.mrf.mxu3 }
 0x1a5   : > { %v661_v63 = vpop.f32.mrf.mxu0 }
 0x1a6   : > { %v848_v42 = vadd.f32 %v847_v51, %v783_v50  ;;  %v662_v6 = vadd.f32 %v661_v63, %v546_v4  ;;  %v729_v16 = vpop.f32.mrf.mxu1 }
 0x1a8   : > { %874 = vst.msk [vmem:[%s1468_s16 + $0x58] sm:$0xff] %vm862_vm1, %v848_v42  ;;  %v727_v8 = vadd.f32 %v726_v5, %v662_v6 }
 0x1ab   : > { %v785_v58 = vpop.f32.mrf.mxu2 }
 0x1ac   : > { %v786_v59 = vadd.f32 %v785_v58, %v721_v55  ;;  %v850_v60 = vpop.f32.mrf.mxu3 }
 0x1ad   : > { %v664_v9 = vpop.f32.mrf.mxu0 }
 0x1ae   : > { %v851_v62 = vadd.f32 %v850_v60, %v786_v59  ;;  %v665_v14 = vadd.f32 %v664_v9, %v551_v13 }
 0x1b0   : > { %875 = vst.msk [vmem:[%s1468_s16 + $0x60] sm:$0xff] %vm862_vm1, %v851_v62  ;;  %v730_v21 = vadd.f32 %v729_v16, %v665_v14 }
 0x1b3   : > { %v788_v1 = vpop.f32.mrf.mxu2 }
 0x1b4   : > { %v789_v2 = vadd.f32 %v788_v1, %v724_v0  ;;  %v853_v3 = vpop.f32.mrf.mxu3 }
 0x1b6   : > { %v854_v7 = vadd.f32 %v853_v3, %v789_v2 }
 0x1b8   : > { %876 = vst.msk [vmem:[%s1468_s16 + $0x68] sm:$0xff] %vm862_vm1, %v854_v7 }
 0x1bb   : > { %v791_v10 = vpop.f32.mrf.mxu2 }
 0x1bc   : > { %v792_v11 = vadd.f32 %v791_v10, %v727_v8  ;;  %v856_v12 = vpop.f32.mrf.mxu3 }
 0x1be   : > { %v857_v15 = vadd.f32 %v856_v12, %v792_v11 }
 0x1c0   : > { %877 = vst.msk [vmem:[%s1468_s16 + $0x70] sm:$0xff] %vm862_vm1, %v857_v15 }
 0x1c3   : > { %v794_v22 = vpop.f32.mrf.mxu2 }
 0x1c4   : > { %v795_v23 = vadd.f32 %v794_v22, %v730_v21  ;;  %v859_v24 = vpop.f32.mrf.mxu3 }
 0x1c6   : > { %v860_v25 = vadd.f32 %v859_v24, %v795_v23 }
 0x1c8   : > { %878 = vst.msk [vmem:[%s1468_s16 + $0x78] sm:$0xff] %vm862_vm1, %v860_v25 }
 0x1c9 PF: > { %s15_s17 = sadd.s32 1, %s1107_s17  }
 0x1ca   : > { %p12_p4 = scmp.ge.s32.totalorder %s15_s17, 4  }
 0x1cc   :  { %14 = sbr.rel (!%p12_p4) target bundleno = 2 (0x2), region = 66 }

// kernel: generator_forward.21
= control target key start
LH: loop header
LB: loop body
LE: loop exit
PB: predicated region body
PF: predicated region fallthrough
CT: control target
= control target key end

     0   :  { %s693_s20 = smov 0   ;;  %s781_s0 = inlined_call_operand.<no memory space> [shape: f32[1], index: 0, kind: input, shape index: {}]   ;;  %s782_s1 = inlined_call_operand.vmem [shape: f32[2,16,38], index: 1, kind: input, shape index: {}]   ;;  %s783_s2 = inlined_call_operand.vmem [shape: f32[2,16,38], index: 2, kind: input, shape index: {}]   ;;  %s784_s3 = inlined_call_operand.vmem [shape: f32[32,224], index: 3, kind: input, shape index: {}]   ;;  %s785_s4 = inlined_call_operand.vmem [shape: f32[32,1], index: 4, kind: input, shape index: {}]   ;;  %s786_s5 = inlined_call_operand.vmem [shape: f32[2,4,8,32], index: 5, kind: output, shape index: {}]  }
   0x1   :  { %10 = sst [smem:[#allocation2]] %s781_s0 }
   0x2 LB: > { %s519_s21 = sadd.s32 4294967295, %s651_s20   ;;  %p523_p0 = scmp.ge.s32.totalorder %s651_s20, 1  ;;  %s651_s20 = sphi %s693_s20, %s16_s20  }
   0x3   : > { %p198_p1 = scmp.lt.s32.totalorder %s651_s20, 3 }
   0x5   : > { %p199_p2 = pnand %p523_p0, %p198_p1 }
   0x6   : > { %p231_p3 = scmp.lt.s32.totalorder (!%p199_p2), %s519_s21, 1  ;;  %s246_s22 = sld [smem:[#allocation2]] (!%p199_p2) }
   0x7   : > { %202 = sbr.rel (%p199_p2) target bundleno = 330 (0x14a), region = 40  ;;  %s653_s29 = smov (!%p199_p2), 125  }
   0x8   : > { %s654_s30 = smov (!%p199_p2), 126   ;;  %s655_s6 = smov (!%p199_p2), 122  }
   0x9   : > { %s656_s7 = smov (!%p199_p2), 127   ;;  %s657_s8 = smov (!%p199_p2), 123  }
   0xa   : > { %s658_s9 = smov (!%p199_p2), 124  }
   0xc   : > { %s788_s21 = smov (!%p231_p3, %s519_s21), 1  ;;  %v253_v0 = vstv %s246_s22  ;;  %v353_v49 = vld [vmem:[%s785_s4 + $0x8] sm:$0xff]  ;;  %v659_v51 = vmov 0   ;;  %v352_v52 = vld [vmem:[%s785_s4] sm:$0xff]  ;;  %v346_v62 = vld [vmem:[%s784_s3 + $0x10] sm:$0xff]  ;;  %vm376_vm0 = vcmask 785408  }
   0xd   : > { %s536_s0 = sshll.u32 %s788_s21, 4  ;;  %643 = vset.pattern.permute.xlu1 %v659_v51  ;;  %642 = vset.pattern.permute.xlu0 %v659_v51  ;;  %v347_v63 = vld [vmem:[%s784_s3 + $0x18] sm:$0xff]  ;;  %s538_s10 = sshll.u32 %s788_s21, 5  ;;  %vm447_vm1 = vcmask 261120  }
   0xe   : > { %s240_s25 = scalar_lea.vmem %s783_s2, %s536_s0  ;;  %s235_s28 = scalar_lea.vmem %s782_s1, %s536_s0  ;;  %644 = vset.pattern.permute.xlu2 %v659_v51 }
   0xf   : > { %v258_v1 = vld [vmem:[%s240_s25] sm:$0xff]  ;;  %v259_v2 = vld [vmem:[%s240_s25 + $0x8] sm:$0xff]  ;;  %s245_s13 = scalar_lea.vmem %s786_s5, %s538_s10 }
  0x10   : > { %v247_v3 = vld [vmem:[%s235_s28] sm:$0xff]  ;;  %v260_v4 = vmax.f32 %v258_v1, 0.0  ;;  %v261_v5 = vmax.f32 %v259_v2, 0.0  ;;  %v262_v6 = vmin.f32 %v258_v1, 0.0  ;;  %v263_v7 = vmin.f32 %v259_v2, 0.0  ;;  %v248_v8 = vld [vmem:[%s235_s28 + $0x8] sm:$0xff] }
  0x11   : > { %v251_v9 = vmin.f32 %v247_v3, 0.0  ;;  %v252_v10 = vmin.f32 %v248_v8, 0.0  ;;  %v249_v13 = vmax.f32 %v247_v3, 0.0  ;;  %v250_v14 = vmax.f32 %v248_v8, 0.0  ;;  %v345_v1 = vld [vmem:[%s784_s3 + $0x8] sm:$0xff]  ;;  %v355_v2 = vld [vmem:[%s785_s4 + $0x18] sm:$0xff] }
  0x12   : > { %v264_v11 = vmul.f32 %v262_v6, %v253_v0  ;;  %v265_v12 = vmul.f32 %v263_v7, %v253_v0  ;;  %v354_v3 = vld [vmem:[%s785_s4 + $0x10] sm:$0xff]  ;;  %v351_v7 = vld [vmem:[%s784_s3 + $0x38] sm:$0xff] }
  0x13   : > { %v254_v15 = vmul.f32 %v253_v0, %v251_v9  ;;  %v255_v16 = vmul.f32 %v253_v0, %v252_v10  ;;  %v344_v0 = vld [vmem:[%s784_s3] sm:$0xff]  ;;  %v350_v6 = vld [vmem:[%s784_s3 + $0x30] sm:$0xff] }
  0x14   : > { %v710_v17 = vadd.f32 %v264_v11, %v260_v4  ;;  %v712_v18 = vadd.f32 %v265_v12, %v261_v5  ;;  %v348_v4 = vld [vmem:[%s784_s3 + $0x20] sm:$0xff]  ;;  %v349_v5 = vld [vmem:[%s784_s3 + $0x28] sm:$0xff] }
  0x15   : > { %v716_v20 = vadd.f32 %v254_v15, %v249_v13  ;;  %v718_v21 = vadd.f32 %v255_v16, %v250_v14 }
  0x16   : > { %v582_v19 = vpack.i.bf16 %v710_v17, %v712_v18 }
  0x17   : > { %v602_v22 = vpack.i.bf16 %v716_v20, %v718_v21 }
  0x18   : > { %583 = vrot.lane.b32.xlu0 %v582_v19, %s653_s29  ;;  %593 = vrot.lane.b32.xlu1 %v582_v19, %s654_s30 }
  0x19   : > { %603 = vrot.lane.b32.xlu2 %v602_v22, %s654_s30 }
  0x20   : > { %588 = vrot.lane.b32.xlu0 %v602_v22, %s653_s29  ;;  %598 = vrot.lane.b32.xlu1 %v582_v19, %s655_s6 }
  0x21   : > { %608 = vrot.lane.b32.xlu2 %v602_v22, %s655_s6 }
  0x28   : > { %613 = vrot.lane.b32.xlu0 %v582_v19, %s656_s7  ;;  %618 = vrot.lane.b32.xlu1 %v582_v19, %s657_s8 }
  0x29   : > { %623 = vrot.lane.b32.xlu2 %v602_v22, %s656_s7 }
  0x30   : > { %628 = vrot.lane.b32.xlu0 %v602_v22, %s657_s8  ;;  %633 = vrot.lane.b32.xlu1 %v582_v19, %s658_s9 }
  0x31   : > { %638 = vrot.lane.b32.xlu2 %v602_v22, %s658_s9 }
  0x38   : > { %363 = vperm.xlu1 %643, %v353_v49   ;;  %358 = vperm.xlu0 %642, %v352_v52  }
  0x39   : > { %368 = vperm.xlu2 %644, %v354_v3  }
  0x40   : > { %373 = vperm.xlu1 %643, %v355_v2  }
  0x73   : > { %v604_v23 = vpop.permute.xlu2 %603 }
  0x74   : > { %v605_v41 = vunpack.i.l.bf16 %v604_v23  ;;  %v606_v44 = vunpack.i.h.bf16 %v604_v23 }
  0x7b   : > { %v609_v32 = vpop.permute.xlu2 %608 }
  0x7c   : > { %v610_v35 = vunpack.i.l.bf16 %v609_v32  ;;  %v611_v37 = vunpack.i.h.bf16 %v609_v32 }
  0x83   : > { %v624_v45 = vpop.permute.xlu2 %623 }
  0x84   : > { %v625_v48 = vunpack.i.l.bf16 %v624_v45  ;;  %v626_v56 = vunpack.i.h.bf16 %v624_v45 }
  0x8a   : > { %v584_v24 = vpop.permute.xlu0 %583  ;;  %v594_v25 = vpop.permute.xlu1 %593 }
  0x8b   : > { %v585_v26 = vunpack.i.l.bf16 %v584_v24  ;;  %v586_v27 = vunpack.i.h.bf16 %v584_v24  ;;  %v595_v36 = vunpack.i.l.bf16 %v594_v25  ;;  %v596_v38 = vunpack.i.h.bf16 %v594_v25  ;;  %v639_v58 = vpop.permute.xlu2 %638 }
  0x8c   : > { %v640_v60 = vunpack.i.l.bf16 %v639_v58  ;;  %v641_v61 = vunpack.i.h.bf16 %v639_v58 }
  0x8d   : > { %389 = vmatpush.msra.mxu0 %v585_v26  ;;  %539 = vmatpush.msra.mxu2 %v585_v26 }
  0x8f   : > { %390 = vmatpush.msra.mxu0 %v586_v27  ;;  %540 = vmatpush.msra.mxu2 %v586_v27 }
  0x92   : > { %v589_v28 = vpop.permute.xlu0 %588  ;;  %v599_v29 = vpop.permute.xlu1 %598 }
  0x93   : > { %v590_v30 = vunpack.i.l.bf16 %v589_v28  ;;  %v600_v31 = vunpack.i.l.bf16 %v599_v29  ;;  %v601_v33 = vunpack.i.h.bf16 %v599_v29  ;;  %v591_v34 = vunpack.i.h.bf16 %v589_v28 }
  0x95   : > { %391 = vmatpush.msra.mxu0 %v590_v30  ;;  %541 = vmatpush.msra.mxu2 %v590_v30 }
  0x96   : > { %422 = vmatpush.msra.mxu1 %v600_v31  ;;  %555 = vmatpush.msra.mxu3 %v600_v31 }
  0x97   : > { %392 = vmatpush.msra.mxu0 %v591_v34  ;;  %542 = vmatpush.msra.mxu2 %v591_v34 }
  0x98   : > { %423 = vmatpush.msra.mxu1 %v601_v33  ;;  %556 = vmatpush.msra.mxu3 %v601_v33 }
  0x99   : > { %393 = vmatpush.msra.mxu0 %v595_v36  ;;  %543 = vmatpush.msra.mxu2 %v595_v36 }
  0x9a   : > { %v614_v39 = vpop.permute.xlu0 %613  ;;  %424 = vmatpush.msra.mxu1 %v610_v35  ;;  %557 = vmatpush.msra.mxu3 %v610_v35  ;;  %v619_v40 = vpop.permute.xlu1 %618 }
  0x9b   : > { %394 = vmatpush.msra.mxu0 %v596_v38  ;;  %544 = vmatpush.msra.mxu2 %v596_v38  ;;  %v620_v42 = vunpack.i.l.bf16 %v619_v40  ;;  %v621_v43 = vunpack.i.h.bf16 %v619_v40  ;;  %v615_v46 = vunpack.i.l.bf16 %v614_v39  ;;  %v616_v47 = vunpack.i.h.bf16 %v614_v39 }
  0x9c   : > { %425 = vmatpush.msra.mxu1 %v611_v37  ;;  %558 = vmatpush.msra.mxu3 %v611_v37 }
  0x9d   : > { %395 = vmatpush.msra.mxu0 %v605_v41  ;;  %545 = vmatpush.msra.mxu2 %v605_v41 }
  0x9e   : > { %426 = vmatpush.msra.mxu1 %v620_v42  ;;  %559 = vmatpush.msra.mxu3 %v620_v42 }
  0x9f   : > { %396 = vmatpush.msra.mxu0 %v606_v44  ;;  %546 = vmatpush.msra.mxu2 %v606_v44 }
  0xa0   : > { %427 = vmatpush.msra.mxu1 %v621_v43  ;;  %560 = vmatpush.msra.mxu3 %v621_v43 }
  0xa1   : > { %397 = vmatpush.msra.mxu0 %v615_v46  ;;  %547 = vmatpush.msra.mxu2 %v615_v46 }
  0xa2   : > { %v629_v50 = vpop.permute.xlu0 %628  ;;  %v634_v54 = vpop.permute.xlu1 %633 }
  0xa3   : > { %398 = vmatpush.msra.mxu0 %v616_v47  ;;  %548 = vmatpush.msra.mxu2 %v616_v47  ;;  %v630_v53 = vunpack.i.l.bf16 %v629_v50  ;;  %v631_v55 = vunpack.i.h.bf16 %v629_v50  ;;  %v635_v57 = vunpack.i.l.bf16 %v634_v54  ;;  %v636_v59 = vunpack.i.h.bf16 %v634_v54 }
  0xa5   : > { %399 = vmatpush.msra.mxu0 %v625_v48  ;;  %549 = vmatpush.msra.mxu2 %v625_v48 }
  0xa6   : > { %428 = vmatpush.msra.mxu1 %v630_v53  ;;  %561 = vmatpush.msra.mxu3 %v630_v53 }
  0xa7   : > { %400 = vmatpush.msra.mxu0 %v626_v56  ;;  %550 = vmatpush.msra.mxu2 %v626_v56 }
  0xa8   : > { %429 = vmatpush.msra.mxu1 %v631_v55  ;;  %562 = vmatpush.msra.mxu3 %v631_v55 }
  0xa9   : > { %551 = vmatpush.msra.mxu2 %v712_v18  ;;  %401 = vmatpush.msra.mxu0 %v712_v18  ;;  %v369_v18 = vpop.permute.xlu2 %368 }
  0xaa   : > { %430 = vmatpush.msra.mxu1 %v635_v57  ;;  %563 = vmatpush.msra.mxu3 %v635_v57  ;;  %v359_v8 = vpop.permute.xlu0 %358  ;;  %v364_v12 = vpop.permute.xlu1 %363 }
  0xab   : > { %552 = vmatpush.msra.mxu2 %v710_v17  ;;  %402 = vmatpush.msra.mxu0 %v710_v17 }
  0xac   : > { %431 = vmatpush.msra.mxu1 %v636_v59  ;;  %564 = vmatpush.msra.mxu3 %v636_v59 }
  0xad   : > { %553 = vmatpush.msra.mxu2 %v718_v21  ;;  %403 = vmatpush.msra.mxu0 %v718_v21 }
  0xae   : > { %432 = vmatpush.msra.mxu1 %v640_v60  ;;  %565 = vmatpush.msra.mxu3 %v640_v60 }
  0xaf   : > { %554 = vmatpush.msra.mxu2 %v716_v20  ;;  %404 = vmatpush.msra.mxu0 %v716_v20 }
  0xb0   : > { %433 = vmatpush.msra.mxu1 %v641_v61  ;;  %566 = vmatpush.msra.mxu3 %v641_v61 }
  0xb1   : > { %408 = vmatmul.f32.vlgmr.msra.gmra.mxu2 %v346_v62  ;;  %531 = vmatmul.msk.f32.vlgmr.msra.gmra.mxu3 %vm376_vm0, %v347_v63 }
  0xb2   : > { %405 = vmatmul.f32.vlgmr.msra.gmra.mxu0 %v344_v0  ;;  %530 = vmatmul.msk.f32.vlgmr.msra.gmra.mxu1 %vm376_vm0, %v345_v1  ;;  %v374_v23 = vpop.permute.xlu1 %373 }
  0xb9   : > { %411 = vmatmul.f32.gmra.mxu2 %v348_v4  ;;  %532 = vmatmul.msk.f32.gmra.mxu3 %vm376_vm0, %v349_v5 }
  0xc1   : > { %414 = vmatmul.f32.gmra.mxu2 %v350_v6  ;;  %533 = vmatmul.msk.f32.gmra.mxu3 %vm376_vm0, %v351_v7 }
 0x12f   : > { %v406_v9 = vpop.f32.mrf.mxu0  ;;  %v435_v10 = vpop.f32.mrf.mxu1 }
 0x130   : > { %v407_v11 = vadd.f32 %v406_v9, %v359_v8 }
 0x132   : > { %v436_v13 = vadd.f32 %v435_v10, %v407_v11 }
 0x134   : > { %v409_v14 = vpop.f32.mrf.mxu2  ;;  %v438_v15 = vpop.f32.mrf.mxu3  ;;  %448 = vst.msk [vmem:[%s245_s13] sm:$0xff] %vm447_vm1, %v436_v13 }
 0x135   : > { %v410_v16 = vadd.f32 %v409_v14, %v364_v12 }
 0x137   : > { %v439_v17 = vadd.f32 %v438_v15, %v410_v16 }
 0x139   : > { %449 = vst.msk [vmem:[%s245_s13 + $0x8] sm:$0xff] %vm447_vm1, %v439_v17 }
 0x13c   : > { %v412_v19 = vpop.f32.mrf.mxu2  ;;  %v441_v20 = vpop.f32.mrf.mxu3 }
 0x13d   : > { %v413_v21 = vadd.f32 %v412_v19, %v369_v18 }
 0x13f   : > { %v442_v22 = vadd.f32 %v441_v20, %v413_v21 }
 0x141   : > { %450 = vst.msk [vmem:[%s245_s13 + $0x10] sm:$0xff] %vm447_vm1, %v442_v22 }
 0x144   : > { %v415_v24 = vpop.f32.mrf.mxu2  ;;  %v444_v25 = vpop.f32.mrf.mxu3 }
 0x145   : > { %v416_v26 = vadd.f32 %v415_v24, %v374_v23 }
 0x147   : > { %v445_v27 = vadd.f32 %v444_v25, %v416_v26 }
 0x149   : > { %451 = vst.msk [vmem:[%s245_s13 + $0x18] sm:$0xff] %vm447_vm1, %v445_v27 }
 0x14a PF: > { %s16_s20 = sadd.s32 1, %s651_s20  }
 0x14b   : > { %p13_p4 = scmp.ge.s32.totalorder %s16_s20, 4  }
 0x14d   :  { %15 = sbr.rel (!%p13_p4) target bundleno = 2 (0x2), region = 73 }

// kernel: generator_forward.20
= control target key start
LH: loop header
LB: loop body
LE: loop exit
PB: predicated region body
PF: predicated region fallthrough
CT: control target
= control target key end

     0   :  { %s995_s20 = smov 0   ;;  %s1205_s0 = inlined_call_operand.<no memory space> [shape: f32[1], index: 0, kind: input, shape index: {}]   ;;  %s1206_s1 = inlined_call_operand.vmem [shape: f32[2,32,14], index: 1, kind: input, shape index: {}]   ;;  %s1207_s2 = inlined_call_operand.vmem [shape: f32[2,32,14], index: 2, kind: input, shape index: {}]   ;;  %s1208_s3 = inlined_call_operand.vmem [shape: f32[64,448], index: 3, kind: input, shape index: {}]   ;;  %s1209_s4 = inlined_call_operand.vmem [shape: f32[64,1], index: 4, kind: input, shape index: {}]   ;;  %s1210_s5 = inlined_call_operand.vmem [shape: f32[2,4,16,8], index: 5, kind: output, shape index: {}]  }
   0x1   :  { %10 = sst [smem:[#allocation2]] %s1205_s0 }
   0x2 LB: > { %s785_s21 = sadd.s32 4294967295, %s953_s20   ;;  %p789_p0 = scmp.ge.s32.totalorder %s953_s20, 1  ;;  %s953_s20 = sphi %s995_s20, %s16_s20  }
   0x3   : > { %p198_p1 = scmp.lt.s32.totalorder %s953_s20, 3 }
   0x5   : > { %p199_p2 = pnand %p789_p0, %p198_p1 }
   0x6   : > { %p231_p3 = scmp.lt.s32.totalorder (!%p199_p2), %s785_s21, 1  ;;  %s246_s22 = sld [smem:[#allocation2]] (!%p199_p2) }
   0x7   : > { %202 = sbr.rel (%p199_p2) target bundleno = 393 (0x189), region = 40  ;;  %s955_s29 = smov (!%p199_p2), 125  }
   0x8   : > { %s956_s30 = smov (!%p199_p2), 123   ;;  %s957_s6 = smov (!%p199_p2), 127  }
   0x9   : > { %s958_s7 = smov (!%p199_p2), 122   ;;  %s959_s8 = smov (!%p199_p2), 124  }
   0xa   : > { %s960_s9 = smov (!%p199_p2), 126  }
   0xc   : > { %s1212_s21 = smov (!%p231_p3, %s785_s21), 1  ;;  %v259_v0 = vstv %s246_s22  ;;  %vm520_vm0 = vcmask 523264   ;;  %vm709_vm1 = vcmask 64512  }
   0xd   : > { %s806_s0 = sshll.u32 %s1212_s21, 5  ;;  %s808_s18 = sshll.u32 %s1212_s21, 6 }
   0xe   : > { %s240_s25 = scalar_lea.vmem %s1207_s2, %s806_s0  ;;  %s235_s28 = scalar_lea.vmem %s1206_s1, %s806_s0 }
   0xf   : > { %v270_v1 = vld [vmem:[%s240_s25 + $0x10] sm:$0xff]  ;;  %v271_v2 = vld [vmem:[%s240_s25 + $0x18] sm:$0xff]  ;;  %v268_v3 = vld [vmem:[%s240_s25] sm:$0xff]  ;;  %s1184_s0 = scalar_lea.vmem %s1210_s5, %s808_s18 }
  0x10   : > { %v274_v4 = vmax.f32 %v270_v1, 0.0  ;;  %v275_v5 = vmax.f32 %v271_v2, 0.0  ;;  %v278_v6 = vmin.f32 %v270_v1, 0.0  ;;  %v279_v7 = vmin.f32 %v271_v2, 0.0  ;;  %v269_v8 = vld [vmem:[%s240_s25 + $0x8] sm:$0xff]  ;;  %v249_v21 = vld [vmem:[%s235_s28 + $0x10] sm:$0xff] }
  0x11   : > { %v272_v9 = vmax.f32 %v268_v3, 0.0  ;;  %v273_v10 = vmax.f32 %v269_v8, 0.0  ;;  %v276_v11 = vmin.f32 %v268_v3, 0.0  ;;  %v277_v12 = vmin.f32 %v269_v8, 0.0  ;;  %v250_v22 = vld [vmem:[%s235_s28 + $0x18] sm:$0xff]  ;;  %v247_v31 = vld [vmem:[%s235_s28] sm:$0xff] }
  0x12   : > { %v282_v13 = vmul.f32 %v278_v6, %v259_v0  ;;  %v283_v14 = vmul.f32 %v279_v7, %v259_v0  ;;  %v257_v25 = vmin.f32 %v249_v21, 0.0  ;;  %v258_v26 = vmin.f32 %v250_v22, 0.0  ;;  %v248_v32 = vld [vmem:[%s235_s28 + $0x8] sm:$0xff] }
  0x13   : > { %v280_v15 = vmul.f32 %v276_v11, %v259_v0  ;;  %v281_v16 = vmul.f32 %v277_v12, %v259_v0  ;;  %v253_v27 = vmax.f32 %v249_v21, 0.0  ;;  %v254_v28 = vmax.f32 %v250_v22, 0.0 }
  0x14   : > { %v1012_v17 = vadd.f32 %v282_v13, %v274_v4  ;;  %v1014_v18 = vadd.f32 %v283_v14, %v275_v5  ;;  %v262_v29 = vmul.f32 %v259_v0, %v257_v25  ;;  %v263_v30 = vmul.f32 %v259_v0, %v258_v26 }
  0x15   : > { %v1016_v19 = vadd.f32 %v280_v15, %v272_v9  ;;  %v1018_v20 = vadd.f32 %v281_v16, %v273_v10  ;;  %v255_v35 = vmin.f32 %v247_v31, 0.0  ;;  %v256_v36 = vmin.f32 %v248_v32, 0.0 }
  0x16   : > { %v834_v23 = vpack.i.bf16 %v1012_v17, %v1014_v18  ;;  %v1027_v33 = vadd.f32 %v262_v29, %v253_v27  ;;  %v1029_v34 = vadd.f32 %v263_v30, %v254_v28  ;;  %v251_v37 = vmax.f32 %v247_v31, 0.0 }
  0x17   : > { %v844_v24 = vpack.i.bf16 %v1016_v19, %v1018_v20  ;;  %v252_v38 = vmax.f32 %v248_v32, 0.0  ;;  %v260_v40 = vmul.f32 %v259_v0, %v255_v35  ;;  %v261_v41 = vmul.f32 %v259_v0, %v256_v36 }
  0x18   : > { %835 = vrot.lane.b32.xlu1 %v834_v23, %s955_s29  ;;  %825 = vrot.lane.b32.xlu0 %v834_v23, %s956_s30  ;;  %v859_v39 = vpack.i.bf16 %v1027_v33, %v1029_v34 }
  0x19   : > { %845 = vrot.lane.b32.xlu2 %v844_v24, %s957_s6  ;;  %v1035_v42 = vadd.f32 %v260_v40, %v251_v37  ;;  %v1037_v43 = vadd.f32 %v261_v41, %v252_v38 }
  0x1b   : > { %v874_v44 = vpack.i.bf16 %v1035_v42, %v1037_v43 }
  0x20   : > { %830 = vrot.lane.b32.xlu0 %v834_v23, %s957_s6  ;;  %840 = vrot.lane.b32.xlu1 %v844_v24, %s956_s30 }
  0x21   : > { %850 = vrot.lane.b32.xlu2 %v844_v24, %s955_s29 }
  0x28   : > { %860 = vrot.lane.b32.xlu1 %v859_v39, %s957_s6  ;;  %855 = vrot.lane.b32.xlu0 %v859_v39, %s956_s30 }
  0x29   : > { %865 = vrot.lane.b32.xlu2 %v859_v39, %s955_s29 }
  0x30   : > { %875 = vrot.lane.b32.xlu1 %v874_v44, %s957_s6  ;;  %870 = vrot.lane.b32.xlu0 %v874_v44, %s956_s30 }
  0x31   : > { %880 = vrot.lane.b32.xlu2 %v874_v44, %s955_s29 }
  0x38   : > { %890 = vrot.lane.b32.xlu1 %v834_v23, %s958_s7  ;;  %885 = vrot.lane.b32.xlu0 %v834_v23, %s959_s8 }
  0x39   : > { %895 = vrot.lane.b32.xlu2 %v834_v23, %s960_s9 }
  0x40   : > { %905 = vrot.lane.b32.xlu1 %v844_v24, %s958_s7  ;;  %900 = vrot.lane.b32.xlu0 %v844_v24, %s959_s8 }
  0x41   : > { %910 = vrot.lane.b32.xlu2 %v844_v24, %s960_s9 }
  0x48   : > { %920 = vrot.lane.b32.xlu1 %v859_v39, %s958_s7  ;;  %915 = vrot.lane.b32.xlu0 %v859_v39, %s959_s8 }
  0x49   : > { %925 = vrot.lane.b32.xlu2 %v859_v39, %s960_s9 }
  0x50   : > { %935 = vrot.lane.b32.xlu1 %v874_v44, %s958_s7  ;;  %930 = vrot.lane.b32.xlu0 %v874_v44, %s959_s8 }
  0x51   : > { %940 = vrot.lane.b32.xlu2 %v874_v44, %s960_s9 }
  0x73   : > { %v846_v45 = vpop.permute.xlu2 %845 }
  0x74   : > { %v847_v3 = vunpack.i.l.bf16 %v846_v45  ;;  %v848_v5 = vunpack.i.h.bf16 %v846_v45 }
  0x7b   : > { %v851_v46 = vpop.permute.xlu2 %850 }
  0x7c   : > { %v852_v55 = vunpack.i.l.bf16 %v851_v46  ;;  %v853_v56 = vunpack.i.h.bf16 %v851_v46 }
  0x83   : > { %v866_v47 = vpop.permute.xlu2 %865 }
  0x84   : > { %v867_v59 = vunpack.i.l.bf16 %v866_v47  ;;  %v868_v0 = vunpack.i.h.bf16 %v866_v47 }
  0x8a   : > { %v836_v48 = vpop.permute.xlu1 %835  ;;  %v826_v49 = vpop.permute.xlu0 %825 }
  0x8b   : > { %v837_v50 = vunpack.i.l.bf16 %v836_v48  ;;  %v827_v51 = vunpack.i.l.bf16 %v826_v49  ;;  %v838_v52 = vunpack.i.h.bf16 %v836_v48  ;;  %v881_v53 = vpop.permute.xlu2 %880  ;;  %v828_v54 = vunpack.i.h.bf16 %v826_v49  ;;  %v440_v48 = vld [vmem:[%s1208_s3] sm:$0xff] }
  0x8c   : > { %v882_v2 = vunpack.i.l.bf16 %v881_v53  ;;  %v883_v4 = vunpack.i.h.bf16 %v881_v53 }
  0x8d   : > { %586 = vmatpush.msra.mxu1 %v837_v50  ;;  %627 = vmatpush.msra.mxu2 %v827_v51 }
  0x8f   : > { %587 = vmatpush.msra.mxu1 %v838_v52  ;;  %628 = vmatpush.msra.mxu2 %v828_v54  ;;  %v444_v54 = vld [vmem:[%s1208_s3 + $0x20] sm:$0xff] }
  0x91   : > { %588 = vmatpush.msra.mxu1 %v852_v55 }
  0x92   : > { %v831_v57 = vpop.permute.xlu0 %830  ;;  %v841_v58 = vpop.permute.xlu1 %840 }
  0x93   : > { %v832_v60 = vunpack.i.l.bf16 %v831_v57  ;;  %v842_v61 = vunpack.i.l.bf16 %v841_v58  ;;  %v843_v62 = vunpack.i.h.bf16 %v841_v58  ;;  %589 = vmatpush.msra.mxu1 %v853_v56  ;;  %v896_v63 = vpop.permute.xlu2 %895  ;;  %v833_v1 = vunpack.i.h.bf16 %v831_v57 }
  0x94   : > { %v897_v8 = vunpack.i.l.bf16 %v896_v63  ;;  %v898_v13 = vunpack.i.h.bf16 %v896_v63  ;;  %v448_v63 = vld [vmem:[%s1208_s3 + $0x40] sm:$0xff] }
  0x95   : > { %545 = vmatpush.msra.mxu0 %v832_v60  ;;  %629 = vmatpush.msra.mxu2 %v842_v61  ;;  %v442_v61 = vld [vmem:[%s1208_s3 + $0x10] sm:$0xff] }
  0x96   : > { %590 = vmatpush.msra.mxu1 %v867_v59 }
  0x97   : > { %546 = vmatpush.msra.mxu0 %v833_v1  ;;  %630 = vmatpush.msra.mxu2 %v843_v62  ;;  %v443_v62 = vld [vmem:[%s1208_s3 + $0x18] sm:$0xff] }
  0x98   : > { %591 = vmatpush.msra.mxu1 %v868_v0  ;;  %v453_v0 = vld [vmem:[%s1208_s3 + $0x68] sm:$0xff]  ;;  %v475_v1 = vld [vmem:[%s1209_s4 + $0x18] sm:$0xff] }
  0x99   : > { %547 = vmatpush.msra.mxu0 %v847_v3  ;;  %v447_v3 = vld [vmem:[%s1208_s3 + $0x38] sm:$0xff] }
  0x9a   : > { %v861_v6 = vpop.permute.xlu1 %860  ;;  %v856_v7 = vpop.permute.xlu0 %855  ;;  %592 = vmatpush.msra.mxu1 %v882_v2  ;;  %v446_v2 = vld [vmem:[%s1208_s3 + $0x30] sm:$0xff] }
  0x9b   : > { %548 = vmatpush.msra.mxu0 %v848_v5  ;;  %v862_v9 = vunpack.i.l.bf16 %v861_v6  ;;  %v857_v10 = vunpack.i.l.bf16 %v856_v7  ;;  %v863_v11 = vunpack.i.h.bf16 %v861_v6  ;;  %v911_v12 = vpop.permute.xlu2 %910  ;;  %v858_v14 = vunpack.i.h.bf16 %v856_v7  ;;  %v457_v5 = vld [vmem:[%s1208_s3 + $0x88] sm:$0xff]  ;;  %v450_v6 = vld [vmem:[%s1208_s3 + $0x50] sm:$0xff]  ;;  %v451_v7 = vld [vmem:[%s1208_s3 + $0x58] sm:$0xff] }
  0x9c   : > { %593 = vmatpush.msra.mxu1 %v883_v4  ;;  %v912_v15 = vunpack.i.l.bf16 %v911_v12  ;;  %v913_v16 = vunpack.i.h.bf16 %v911_v12  ;;  %v452_v4 = vld [vmem:[%s1208_s3 + $0x60] sm:$0xff]  ;;  %v477_v12 = vld [vmem:[%s1209_s4 + $0x28] sm:$0xff] }
  0x9d   : > { %549 = vmatpush.msra.mxu0 %v862_v9  ;;  %631 = vmatpush.msra.mxu2 %v857_v10  ;;  %v461_v9 = vld [vmem:[%s1208_s3 + $0xa8] sm:$0xff]  ;;  %v474_v10 = vld [vmem:[%s1209_s4 + $0x10] sm:$0xff] }
  0x9e   : > { %594 = vmatpush.msra.mxu1 %v897_v8  ;;  %v456_v8 = vld [vmem:[%s1208_s3 + $0x80] sm:$0xff] }
  0x9f   : > { %550 = vmatpush.msra.mxu0 %v863_v11  ;;  %632 = vmatpush.msra.mxu2 %v858_v14  ;;  %v478_v11 = vld [vmem:[%s1209_s4 + $0x30] sm:$0xff]  ;;  %v455_v14 = vld [vmem:[%s1208_s3 + $0x78] sm:$0xff] }
  0xa0   : > { %595 = vmatpush.msra.mxu1 %v898_v13  ;;  %v454_v13 = vld [vmem:[%s1208_s3 + $0x70] sm:$0xff] }
  0xa2   : > { %v876_v21 = vpop.permute.xlu1 %875  ;;  %v871_v22 = vpop.permute.xlu0 %870  ;;  %596 = vmatpush.msra.mxu1 %v912_v15  ;;  %v460_v15 = vld [vmem:[%s1208_s3 + $0xa0] sm:$0xff] }
  0xa3   : > { %v877_v23 = vunpack.i.l.bf16 %v876_v21  ;;  %v872_v24 = vunpack.i.l.bf16 %v871_v22  ;;  %v878_v25 = vunpack.i.h.bf16 %v876_v21  ;;  %v926_v26 = vpop.permute.xlu2 %925  ;;  %v873_v29 = vunpack.i.h.bf16 %v871_v22  ;;  %v476_v21 = vld [vmem:[%s1209_s4 + $0x20] sm:$0xff]  ;;  %v458_v22 = vld [vmem:[%s1208_s3 + $0x90] sm:$0xff] }
  0xa4   : > { %597 = vmatpush.msra.mxu1 %v913_v16  ;;  %v927_v27 = vunpack.i.l.bf16 %v926_v26  ;;  %v928_v28 = vunpack.i.h.bf16 %v926_v26  ;;  %v465_v16 = vld [vmem:[%s1208_s3 + $0xc8] sm:$0xff]  ;;  %v479_v26 = vld [vmem:[%s1209_s4 + $0x38] sm:$0xff] }
  0xa5   : > { %551 = vmatpush.msra.mxu0 %v877_v23  ;;  %633 = vmatpush.msra.mxu2 %v872_v24  ;;  %v459_v23 = vld [vmem:[%s1208_s3 + $0x98] sm:$0xff]  ;;  %v464_v24 = vld [vmem:[%s1208_s3 + $0xc0] sm:$0xff] }
  0xa6   : > { %598 = vmatpush.msra.mxu1 %v927_v27  ;;  %v462_v27 = vld [vmem:[%s1208_s3 + $0xb0] sm:$0xff] }
  0xa7   : > { %552 = vmatpush.msra.mxu0 %v878_v25  ;;  %634 = vmatpush.msra.mxu2 %v873_v29  ;;  %v469_v25 = vld [vmem:[%s1208_s3 + $0xe8] sm:$0xff]  ;;  %v468_v29 = vld [vmem:[%s1208_s3 + $0xe0] sm:$0xff] }
  0xa8   : > { %599 = vmatpush.msra.mxu1 %v928_v28  ;;  %v463_v28 = vld [vmem:[%s1208_s3 + $0xb8] sm:$0xff] }
  0xa9   : > { %553 = vmatpush.msra.mxu0 %v1014_v18  ;;  %v441_v18 = vld [vmem:[%s1208_s3 + $0x8] sm:$0xff] }
  0xaa   : > { %v891_v30 = vpop.permute.xlu1 %890  ;;  %v886_v31 = vpop.permute.xlu0 %885 }
  0xab   : > { %554 = vmatpush.msra.mxu0 %v1012_v17  ;;  %v887_v32 = vunpack.i.l.bf16 %v886_v31  ;;  %v892_v35 = vunpack.i.l.bf16 %v891_v30  ;;  %v893_v36 = vunpack.i.h.bf16 %v891_v30  ;;  %v941_v37 = vpop.permute.xlu2 %940  ;;  %v888_v40 = vunpack.i.h.bf16 %v886_v31  ;;  %v472_v17 = vld [vmem:[%s1209_s4] sm:$0xff]  ;;  %v466_v30 = vld [vmem:[%s1208_s3 + $0xd0] sm:$0xff]  ;;  %v467_v31 = vld [vmem:[%s1208_s3 + $0xd8] sm:$0xff] }
  0xac   : > { %v942_v38 = vunpack.i.l.bf16 %v941_v37  ;;  %v943_v39 = vunpack.i.h.bf16 %v941_v37 }
  0xad   : > { %635 = vmatpush.msra.mxu2 %v887_v32  ;;  %676 = vmatpush.msra.mxu3 %v892_v35  ;;  %v470_v32 = vld [vmem:[%s1208_s3 + $0xf0] sm:$0xff]  ;;  %v471_v35 = vld [vmem:[%s1208_s3 + $0xf8] sm:$0xff] }
  0xae   : > { %555 = vmatpush.msra.mxu0 %v1018_v20  ;;  %600 = vmatpush.msra.mxu1 %v942_v38  ;;  %v961_v20 = vmov 0  }
  0xaf   : > { %636 = vmatpush.msra.mxu2 %v888_v40  ;;  %677 = vmatpush.msra.mxu3 %v893_v36 }
  0xb0   : > { %556 = vmatpush.msra.mxu0 %v1016_v19  ;;  %601 = vmatpush.msra.mxu1 %v943_v39 }
  0xb1   : > { %602 = vmatmul.f32.vlgmr.msra.gmra.mxu1 %v441_v18  ;;  %944 = vset.pattern.permute.xlu0 %v961_v20 }
  0xb2   : > { %v906_v41 = vpop.permute.xlu1 %905  ;;  %v901_v44 = vpop.permute.xlu0 %900  ;;  %557 = vmatpush.msra.mxu0 %v1029_v34  ;;  %482 = vperm.xlu0 %944, %v472_v17   ;;  %v445_v34 = vld [vmem:[%s1208_s3 + $0x28] sm:$0xff] }
  0xb3   : > { %v902_v45 = vunpack.i.l.bf16 %v901_v44  ;;  %v907_v46 = vunpack.i.l.bf16 %v906_v41  ;;  %v908_v47 = vunpack.i.h.bf16 %v906_v41  ;;  %945 = vset.pattern.permute.xlu1 %v961_v20  ;;  %946 = vset.pattern.permute.xlu2 %v961_v20  ;;  %v903_v19 = vunpack.i.h.bf16 %v901_v44 }
  0xb4   : > { %558 = vmatpush.msra.mxu0 %v1027_v33  ;;  %v473_v33 = vld [vmem:[%s1209_s4 + $0x8] sm:$0xff]  ;;  %492 = vperm.xlu2 %946, %v474_v10  }
  0xb5   : > { %637 = vmatpush.msra.mxu2 %v902_v45  ;;  %678 = vmatpush.msra.mxu3 %v907_v46 }
  0xb6   : > { %559 = vmatpush.msra.mxu0 %v1037_v43  ;;  %487 = vperm.xlu1 %945, %v473_v33  }
  0xb7   : > { %638 = vmatpush.msra.mxu2 %v903_v19  ;;  %679 = vmatpush.msra.mxu3 %v908_v47 }
  0xb8   : > { %560 = vmatpush.msra.mxu0 %v1035_v42  ;;  %v449_v42 = vld [vmem:[%s1208_s3 + $0x48] sm:$0xff] }
  0xb9   : > { %561 = vmatmul.f32.vlgmr.msra.gmra.mxu0 %v440_v48  ;;  %605 = vmatmul.f32.gmra.mxu1 %v445_v34 }
  0xba   : > { %v921_v49 = vpop.permute.xlu1 %920  ;;  %v916_v43 = vpop.permute.xlu0 %915  ;;  %507 = vperm.xlu0 %944, %v477_v12  }
  0xbb   : > { %v917_v50 = vunpack.i.l.bf16 %v916_v43  ;;  %v922_v51 = vunpack.i.l.bf16 %v921_v49  ;;  %v923_v52 = vunpack.i.h.bf16 %v921_v49  ;;  %v918_v53 = vunpack.i.h.bf16 %v916_v43 }
  0xbc   : > { %502 = vperm.xlu2 %946, %v476_v21  }
  0xbd   : > { %639 = vmatpush.msra.mxu2 %v917_v50  ;;  %680 = vmatpush.msra.mxu3 %v922_v51 }
  0xbe   : > { %497 = vperm.xlu1 %945, %v475_v1  }
  0xbf   : > { %640 = vmatpush.msra.mxu2 %v918_v53  ;;  %681 = vmatpush.msra.mxu3 %v923_v52 }
  0xc1   : > { %564 = vmatmul.f32.gmra.mxu0 %v444_v54  ;;  %608 = vmatmul.f32.gmra.mxu1 %v449_v42 }
  0xc2   : > { %v936_v55 = vpop.permute.xlu1 %935  ;;  %v931_v56 = vpop.permute.xlu0 %930 }
  0xc3   : > { %v932_v57 = vunpack.i.l.bf16 %v931_v56  ;;  %v937_v58 = vunpack.i.l.bf16 %v936_v55  ;;  %v938_v59 = vunpack.i.h.bf16 %v936_v55  ;;  %v933_v60 = vunpack.i.h.bf16 %v931_v56 }
  0xc4   : > { %517 = vperm.xlu2 %946, %v479_v26  }
  0xc5   : > { %641 = vmatpush.msra.mxu2 %v932_v57  ;;  %682 = vmatpush.msra.mxu3 %v937_v58 }
  0xc6   : > { %512 = vperm.xlu1 %945, %v478_v11  }
  0xc7   : > { %642 = vmatpush.msra.mxu2 %v933_v60  ;;  %683 = vmatpush.msra.mxu3 %v938_v59 }
  0xc8   : > { %643 = vmatmul.f32.vlgmr.msra.gmra.mxu2 %v442_v61  ;;  %796 = vmatmul.msk.f32.vlgmr.msra.gmra.mxu3 %vm520_vm0, %v443_v62 }
  0xc9   : > { %567 = vmatmul.f32.gmra.mxu0 %v448_v63  ;;  %611 = vmatmul.f32.gmra.mxu1 %v453_v0 }
  0xd0   : > { %646 = vmatmul.f32.gmra.mxu2 %v446_v2  ;;  %797 = vmatmul.msk.f32.gmra.mxu3 %vm520_vm0, %v447_v3 }
  0xd1   : > { %570 = vmatmul.f32.gmra.mxu0 %v452_v4  ;;  %614 = vmatmul.f32.gmra.mxu1 %v457_v5 }
  0xd8   : > { %649 = vmatmul.f32.gmra.mxu2 %v450_v6  ;;  %798 = vmatmul.msk.f32.gmra.mxu3 %vm520_vm0, %v451_v7 }
  0xd9   : > { %573 = vmatmul.f32.gmra.mxu0 %v456_v8  ;;  %617 = vmatmul.f32.gmra.mxu1 %v461_v9 }
  0xe0   : > { %652 = vmatmul.f32.gmra.mxu2 %v454_v13  ;;  %799 = vmatmul.msk.f32.gmra.mxu3 %vm520_vm0, %v455_v14 }
  0xe1   : > { %576 = vmatmul.f32.gmra.mxu0 %v460_v15  ;;  %620 = vmatmul.f32.gmra.mxu1 %v465_v16 }
  0xe8   : > { %655 = vmatmul.f32.gmra.mxu2 %v458_v22  ;;  %800 = vmatmul.msk.f32.gmra.mxu3 %vm520_vm0, %v459_v23 }
  0xe9   : > { %579 = vmatmul.f32.gmra.mxu0 %v464_v24  ;;  %623 = vmatmul.f32.gmra.mxu1 %v469_v25 }
  0xf0   : > { %658 = vmatmul.f32.gmra.mxu2 %v462_v27  ;;  %801 = vmatmul.msk.f32.gmra.mxu3 %vm520_vm0, %v463_v28 }
  0xf1   : > { %582 = vmatmul.f32.gmra.mxu0 %v468_v29 }
  0xf8   : > { %661 = vmatmul.f32.gmra.mxu2 %v466_v30  ;;  %802 = vmatmul.msk.f32.gmra.mxu3 %vm520_vm0, %v467_v31 }
 0x100   : > { %664 = vmatmul.f32.gmra.mxu2 %v470_v32  ;;  %803 = vmatmul.msk.f32.gmra.mxu3 %vm520_vm0, %v471_v35 }
 0x10e   : > { %v493_v33 = vpop.permute.xlu2 %492 }
 0x116   : > { %v503_v0 = vpop.permute.xlu2 %502 }
 0x11e   : > { %v518_v28 = vpop.permute.xlu2 %517 }
 0x124   : > { %v483_v39 = vpop.permute.xlu0 %482 }
 0x128   : > { %v488_v44 = vpop.permute.xlu1 %487 }
 0x12c   : > { %v508_v8 = vpop.permute.xlu0 %507 }
 0x12e   : > { %v603_v37 = vpop.f32.mrf.mxu1 }
 0x130   : > { %v498_v55 = vpop.permute.xlu1 %497 }
 0x136   : > { %v562_v36 = vpop.f32.mrf.mxu0  ;;  %v606_v40 = vpop.f32.mrf.mxu1 }
 0x137   : > { %v563_v18 = vadd.f32 %v562_v36, %v483_v39 }
 0x138   : > { %v513_v21 = vpop.permute.xlu1 %512 }
 0x139   : > { %v604_v41 = vadd.f32 %v603_v37, %v563_v18 }
 0x13e   : > { %v565_v38 = vpop.f32.mrf.mxu0  ;;  %v609_v46 = vpop.f32.mrf.mxu1 }
 0x13f   : > { %v566_v19 = vadd.f32 %v565_v38, %v488_v44 }
 0x141   : > { %v607_v34 = vadd.f32 %v606_v40, %v566_v19 }
 0x146   : > { %v568_v17 = vpop.f32.mrf.mxu0  ;;  %v612_v53 = vpop.f32.mrf.mxu1 }
 0x147   : > { %v569_v52 = vadd.f32 %v568_v17, %v493_v33 }
 0x149   : > { %v610_v42 = vadd.f32 %v609_v46, %v569_v52 }
 0x14b   : > { %v644_v20 = vpop.f32.mrf.mxu2  ;;  %v685_v45 = vpop.f32.mrf.mxu3 }
 0x14c   : > { %v645_v47 = vadd.f32 %v644_v20, %v604_v41 }
 0x14e   : > { %v686_v48 = vadd.f32 %v685_v45, %v645_v47  ;;  %v571_v49 = vpop.f32.mrf.mxu0  ;;  %v615_v62 = vpop.f32.mrf.mxu1 }
 0x14f   : > { %v572_v60 = vadd.f32 %v571_v49, %v498_v55 }
 0x150   : > { %710 = vst.msk [vmem:[%s1184_s0] sm:$0xff] %vm709_vm1, %v686_v48 }
 0x151   : > { %v613_v63 = vadd.f32 %v612_v53, %v572_v60 }
 0x153   : > { %v647_v43 = vpop.f32.mrf.mxu2  ;;  %v688_v50 = vpop.f32.mrf.mxu3 }
 0x154   : > { %v648_v51 = vadd.f32 %v647_v43, %v607_v34 }
 0x156   : > { %v689_v54 = vadd.f32 %v688_v50, %v648_v51  ;;  %v574_v58 = vpop.f32.mrf.mxu0  ;;  %v618_v9 = vpop.f32.mrf.mxu1 }
 0x157   : > { %v575_v4 = vadd.f32 %v574_v58, %v503_v0 }
 0x158   : > { %711 = vst.msk [vmem:[%s1184_s0 + $0x8] sm:$0xff] %vm709_vm1, %v689_v54 }
 0x159   : > { %v616_v7 = vadd.f32 %v615_v62, %v575_v4 }
 0x15b   : > { %v650_v56 = vpop.f32.mrf.mxu2  ;;  %v691_v57 = vpop.f32.mrf.mxu3 }
 0x15c   : > { %v651_v59 = vadd.f32 %v650_v56, %v610_v42 }
 0x15e   : > { %v692_v61 = vadd.f32 %v691_v57, %v651_v59  ;;  %v577_v5 = vpop.f32.mrf.mxu0  ;;  %v621_v25 = vpop.f32.mrf.mxu1 }
 0x15f   : > { %v578_v13 = vadd.f32 %v577_v5, %v508_v8 }
 0x160   : > { %712 = vst.msk [vmem:[%s1184_s0 + $0x10] sm:$0xff] %vm709_vm1, %v692_v61 }
 0x161   : > { %v619_v16 = vadd.f32 %v618_v9, %v578_v13 }
 0x163   : > { %v653_v1 = vpop.f32.mrf.mxu2  ;;  %v694_v2 = vpop.f32.mrf.mxu3 }
 0x164   : > { %v654_v3 = vadd.f32 %v653_v1, %v613_v63 }
 0x166   : > { %v695_v6 = vadd.f32 %v694_v2, %v654_v3  ;;  %v580_v15 = vpop.f32.mrf.mxu0  ;;  %v624_v38 = vpop.f32.mrf.mxu1 }
 0x167   : > { %v581_v26 = vadd.f32 %v580_v15, %v513_v21 }
 0x168   : > { %713 = vst.msk [vmem:[%s1184_s0 + $0x18] sm:$0xff] %vm709_vm1, %v695_v6 }
 0x169   : > { %v622_v30 = vadd.f32 %v621_v25, %v581_v26 }
 0x16b   : > { %v656_v10 = vpop.f32.mrf.mxu2  ;;  %v697_v11 = vpop.f32.mrf.mxu3 }
 0x16c   : > { %v657_v12 = vadd.f32 %v656_v10, %v616_v7 }
 0x16e   : > { %v698_v14 = vadd.f32 %v697_v11, %v657_v12  ;;  %v583_v29 = vpop.f32.mrf.mxu0 }
 0x16f   : > { %v584_v36 = vadd.f32 %v583_v29, %v518_v28 }
 0x170   : > { %714 = vst.msk [vmem:[%s1184_s0 + $0x20] sm:$0xff] %vm709_vm1, %v698_v14 }
 0x171   : > { %v625_v39 = vadd.f32 %v624_v38, %v584_v36 }
 0x173   : > { %v659_v22 = vpop.f32.mrf.mxu2  ;;  %v700_v23 = vpop.f32.mrf.mxu3 }
 0x174   : > { %v660_v24 = vadd.f32 %v659_v22, %v619_v16 }
 0x176   : > { %v701_v27 = vadd.f32 %v700_v23, %v660_v24 }
 0x178   : > { %715 = vst.msk [vmem:[%s1184_s0 + $0x28] sm:$0xff] %vm709_vm1, %v701_v27 }
 0x17b   : > { %v662_v31 = vpop.f32.mrf.mxu2  ;;  %v703_v32 = vpop.f32.mrf.mxu3 }
 0x17c   : > { %v663_v35 = vadd.f32 %v662_v31, %v622_v30 }
 0x17e   : > { %v704_v37 = vadd.f32 %v703_v32, %v663_v35 }
 0x180   : > { %716 = vst.msk [vmem:[%s1184_s0 + $0x30] sm:$0xff] %vm709_vm1, %v704_v37 }
 0x183   : > { %v665_v40 = vpop.f32.mrf.mxu2  ;;  %v706_v18 = vpop.f32.mrf.mxu3 }
 0x184   : > { %v666_v17 = vadd.f32 %v665_v40, %v625_v39 }
 0x186   : > { %v707_v41 = vadd.f32 %v706_v18, %v666_v17 }
 0x188   : > { %717 = vst.msk [vmem:[%s1184_s0 + $0x38] sm:$0xff] %vm709_vm1, %v707_v41 }
 0x189 PF: > { %s16_s20 = sadd.s32 1, %s953_s20  }
 0x18a   : > { %p13_p4 = scmp.ge.s32.totalorder %s16_s20, 4  }
 0x18c   :  { %15 = sbr.rel (!%p13_p4) target bundleno = 2 (0x2), region = 73 }

// kernel: generator_forward.22
= control target key start
LH: loop header
LB: loop body
LE: loop exit
PB: predicated region body
PF: predicated region fallthrough
CT: control target
= control target key end

     0   :  { %s628_s20 = smov 0   ;;  %s681_s0 = inlined_call_operand.<no memory space> [shape: f32[1], index: 0, kind: input, shape index: {}]   ;;  %s682_s1 = inlined_call_operand.vmem [shape: f32[2,8,134], index: 1, kind: input, shape index: {}]   ;;  %s683_s2 = inlined_call_operand.vmem [shape: f32[2,8,134], index: 2, kind: input, shape index: {}]   ;;  %s684_s3 = inlined_call_operand.vmem [shape: f32[16,112], index: 3, kind: input, shape index: {}]   ;;  %s685_s4 = inlined_call_operand.vmem [shape: f32[16,1], index: 4, kind: input, shape index: {}]   ;;  %s686_s5 = inlined_call_operand.vmem [shape: f32[2,4,4,128], index: 5, kind: output, shape index: {}]  }
   0x1   :  { %10 = sst [smem:[#allocation2]] %s681_s0 }
   0x2 LB: > { %s471_s21 = sadd.s32 4294967295, %s586_s20   ;;  %p475_p0 = scmp.ge.s32.totalorder %s586_s20, 1  ;;  %s586_s20 = sphi %s628_s20, %s16_s20  }
   0x3   : > { %p198_p1 = scmp.lt.s32.totalorder %s586_s20, 3 }
   0x5   : > { %p199_p2 = pnand %p475_p0, %p198_p1 }
   0x6   : > { %p231_p3 = scmp.lt.s32.totalorder (!%p199_p2), %s471_s21, 1  ;;  %s246_s22 = sld [smem:[#allocation2]] (!%p199_p2) }
   0x7   : > { %202 = sbr.rel (%p199_p2) target bundleno = 307 (0x133), region = 40  ;;  %s588_s29 = smov (!%p199_p2), 122  }
   0x8   : > { %s589_s30 = smov (!%p199_p2), 123   ;;  %s590_s6 = smov (!%p199_p2), 124  }
   0x9   : > { %s591_s7 = smov (!%p199_p2), 125   ;;  %s592_s8 = smov (!%p199_p2), 126  }
   0xa   : > { %s593_s9 = smov (!%p199_p2), 127  }
   0xc   : > { %s688_s21 = smov (!%p231_p3, %s471_s21), 1  ;;  %v253_v0 = vstv %s246_s22  ;;  %vm345_vm0 = vcmask 998400   ;;  %v353_v30 = vld [vmem:[%s685_s4 + $0x8] sm:$0xff]  ;;  %v352_v31 = vld [vmem:[%s685_s4] sm:$0xff]  ;;  %v594_v32 = vmov 0   ;;  %vm332_vm1 = vcmask 1006592  }
   0xd   : > { %s636_s23 = sshll.u32 %s688_s21, 4  ;;  %579 = vset.pattern.permute.xlu1 %v594_v32  ;;  %578 = vset.pattern.permute.xlu0 %v594_v32  ;;  %vm319_vm2 = vcmask 1014784   ;;  %vm306_vm3 = vcmask 1022976   ;;  %vm293_vm4 = vcmask 1031168   ;;  %vm280_vm5 = vcmask 1039360  }
   0xe   : > { %s240_s25 = scalar_lea.vmem %s683_s2, %s636_s23  ;;  %s235_s28 = scalar_lea.vmem %s682_s1, %s636_s23  ;;  %vm364_vm6 = vcmask 916480  }
   0xf   : > { %v258_v1 = vld [vmem:[%s240_s25] sm:$0xff]  ;;  %v259_v2 = vld [vmem:[%s240_s25 + $0x8] sm:$0xff]  ;;  %s245_s21 = scalar_lea.vmem %s686_s5, %s636_s23 }
  0x10   : > { %v247_v3 = vld [vmem:[%s235_s28] sm:$0xff]  ;;  %v260_v4 = vmax.f32 %v258_v1, 0.0  ;;  %v261_v5 = vmax.f32 %v259_v2, 0.0  ;;  %v262_v6 = vmin.f32 %v258_v1, 0.0  ;;  %v263_v7 = vmin.f32 %v259_v2, 0.0  ;;  %v248_v8 = vld [vmem:[%s235_s28 + $0x8] sm:$0xff] }
  0x11   : > { %v251_v9 = vmin.f32 %v247_v3, 0.0  ;;  %v252_v10 = vmin.f32 %v248_v8, 0.0  ;;  %v249_v13 = vmax.f32 %v247_v3, 0.0  ;;  %v250_v14 = vmax.f32 %v248_v8, 0.0 }
  0x12   : > { %v264_v11 = vmul.f32 %v262_v6, %v253_v0  ;;  %v265_v12 = vmul.f32 %v263_v7, %v253_v0 }
  0x13   : > { %v254_v17 = vmul.f32 %v253_v0, %v251_v9  ;;  %v255_v18 = vmul.f32 %v253_v0, %v252_v10  ;;  %v350_v10 = vld [vmem:[%s684_s3] sm:$0xff] }
  0x14   : > { %v646_v15 = vadd.f32 %v264_v11, %v260_v4  ;;  %v267_v16 = vadd.f32 %v265_v12, %v261_v5  ;;  %v351_v11 = vld [vmem:[%s684_s3 + $0x8] sm:$0xff] }
  0x15   : > { %v649_v20 = vadd.f32 %v254_v17, %v249_v13  ;;  %v257_v21 = vadd.f32 %v255_v18, %v250_v14 }
  0x16   : > { %v518_v19 = vpack.i.bf16 %v267_v16, %v646_v15 }
  0x17   : > { %v523_v22 = vpack.i.bf16 %v257_v21, %v649_v20 }
  0x18   : > { %519 = vrot.lane.b32.xlu0 %v518_v19, %s588_s29  ;;  %529 = vrot.lane.b32.xlu1 %v518_v19, %s589_s30 }
  0x19   : > { %539 = vrot.lane.b32.xlu2 %v518_v19, %s590_s6 }
  0x20   : > { %524 = vrot.lane.b32.xlu0 %v523_v22, %s588_s29  ;;  %534 = vrot.lane.b32.xlu1 %v523_v22, %s589_s30 }
  0x21   : > { %544 = vrot.lane.b32.xlu2 %v523_v22, %s590_s6 }
  0x28   : > { %549 = vrot.lane.b32.xlu0 %v518_v19, %s591_s7  ;;  %554 = vrot.lane.b32.xlu1 %v523_v22, %s591_s7 }
  0x29   : > { %559 = vrot.lane.b32.xlu2 %v518_v19, %s592_s8 }
  0x30   : > { %564 = vrot.lane.b32.xlu0 %v523_v22, %s592_s8  ;;  %569 = vrot.lane.b32.xlu1 %v518_v19, %s593_s9 }
  0x31   : > { %574 = vrot.lane.b32.xlu2 %v523_v22, %s593_s9 }
  0x38   : > { %361 = vperm.xlu1 %579, %v353_v30   ;;  %356 = vperm.xlu0 %578, %v352_v31  }
  0x73   : > { %v540_v23 = vpop.permute.xlu2 %539 }
  0x74   : > { %v542_v43 = vunpack.i.h.bf16 %v540_v23  ;;  %v541_v44 = vunpack.i.l.bf16 %v540_v23 }
  0x76   : > { %v321_v53 = vsel %vm319_vm2, %v541_v44, %v542_v43 }
  0x7b   : > { %v545_v28 = vpop.permute.xlu2 %544 }
  0x7c   : > { %v547_v46 = vunpack.i.h.bf16 %v545_v28  ;;  %v546_v47 = vunpack.i.l.bf16 %v545_v28 }
  0x7e   : > { %v320_v56 = vsel %vm319_vm2, %v546_v47, %v547_v46 }
  0x83   : > { %v560_v42 = vpop.permute.xlu2 %559 }
  0x84   : > { %v562_v57 = vunpack.i.h.bf16 %v560_v42  ;;  %v561_v58 = vunpack.i.l.bf16 %v560_v42 }
  0x86   : > { %v295_v0 = vsel %vm293_vm4, %v561_v58, %v562_v57 }
  0x8a   : > { %v520_v24 = vpop.permute.xlu0 %519  ;;  %v530_v25 = vpop.permute.xlu1 %529 }
  0x8b   : > { %v522_v26 = vunpack.i.h.bf16 %v520_v24  ;;  %v521_v27 = vunpack.i.l.bf16 %v520_v24  ;;  %v532_v35 = vunpack.i.h.bf16 %v530_v25  ;;  %v531_v36 = vunpack.i.l.bf16 %v530_v25  ;;  %v575_v60 = vpop.permute.xlu2 %574 }
  0x8c   : > { %v577_v1 = vunpack.i.h.bf16 %v575_v60  ;;  %v576_v2 = vunpack.i.l.bf16 %v575_v60 }
  0x8d   : > { %v347_v29 = vsel %vm345_vm0, %v521_v27, %v522_v26  ;;  %v334_v45 = vsel %vm332_vm1, %v531_v36, %v532_v35 }
  0x8e   : > { %373 = vmatpush.msra.mxu0 %v347_v29  ;;  %489 = vmatpush.msra.mxu1 %v347_v29  ;;  %v281_v9 = vsel %vm280_vm5, %v576_v2, %v577_v1 }
  0x92   : > { %v525_v33 = vpop.permute.xlu0 %524  ;;  %v535_v34 = vpop.permute.xlu1 %534 }
  0x93   : > { %v527_v37 = vunpack.i.h.bf16 %v525_v33  ;;  %v526_v38 = vunpack.i.l.bf16 %v525_v33  ;;  %v537_v39 = vunpack.i.h.bf16 %v535_v34  ;;  %v536_v40 = vunpack.i.l.bf16 %v535_v34 }
  0x95   : > { %v346_v41 = vsel %vm345_vm0, %v526_v38, %v527_v37  ;;  %v333_v48 = vsel %vm332_vm1, %v536_v40, %v537_v39 }
  0x96   : > { %374 = vmatpush.msra.mxu0 %v346_v41  ;;  %490 = vmatpush.msra.mxu1 %v346_v41 }
  0x98   : > { %375 = vmatpush.msra.mxu0 %v334_v45  ;;  %491 = vmatpush.msra.mxu1 %v334_v45 }
  0x9a   : > { %v550_v49 = vpop.permute.xlu0 %549  ;;  %376 = vmatpush.msra.mxu0 %v333_v48  ;;  %492 = vmatpush.msra.mxu1 %v333_v48  ;;  %v555_v50 = vpop.permute.xlu1 %554 }
  0x9b   : > { %v552_v51 = vunpack.i.h.bf16 %v550_v49  ;;  %v551_v52 = vunpack.i.l.bf16 %v550_v49  ;;  %v557_v54 = vunpack.i.h.bf16 %v555_v50  ;;  %v556_v55 = vunpack.i.l.bf16 %v555_v50 }
  0x9c   : > { %377 = vmatpush.msra.mxu0 %v321_v53  ;;  %493 = vmatpush.msra.mxu1 %v321_v53 }
  0x9d   : > { %v308_v59 = vsel %vm306_vm3, %v551_v52, %v552_v51  ;;  %v307_v61 = vsel %vm306_vm3, %v556_v55, %v557_v54 }
  0x9e   : > { %378 = vmatpush.msra.mxu0 %v320_v56  ;;  %494 = vmatpush.msra.mxu1 %v320_v56 }
  0xa0   : > { %379 = vmatpush.msra.mxu0 %v308_v59  ;;  %495 = vmatpush.msra.mxu1 %v308_v59 }
  0xa2   : > { %v565_v62 = vpop.permute.xlu0 %564  ;;  %380 = vmatpush.msra.mxu0 %v307_v61  ;;  %496 = vmatpush.msra.mxu1 %v307_v61  ;;  %v570_v63 = vpop.permute.xlu1 %569 }
  0xa3   : > { %v567_v3 = vunpack.i.h.bf16 %v565_v62  ;;  %v566_v4 = vunpack.i.l.bf16 %v565_v62  ;;  %v572_v5 = vunpack.i.h.bf16 %v570_v63  ;;  %v571_v6 = vunpack.i.l.bf16 %v570_v63 }
  0xa4   : > { %381 = vmatpush.msra.mxu0 %v295_v0  ;;  %497 = vmatpush.msra.mxu1 %v295_v0 }
  0xa5   : > { %v294_v7 = vsel %vm293_vm4, %v566_v4, %v567_v3  ;;  %v282_v8 = vsel %vm280_vm5, %v571_v6, %v572_v5 }
  0xa6   : > { %382 = vmatpush.msra.mxu0 %v294_v7  ;;  %498 = vmatpush.msra.mxu1 %v294_v7 }
  0xa8   : > { %383 = vmatpush.msra.mxu0 %v282_v8  ;;  %499 = vmatpush.msra.mxu1 %v282_v8 }
  0xaa   : > { %384 = vmatpush.msra.mxu0 %v281_v9  ;;  %500 = vmatpush.msra.mxu1 %v281_v9  ;;  %v362_v12 = vpop.permute.xlu1 %361  ;;  %v357_v13 = vpop.permute.xlu0 %356 }
  0xac   : > { %385 = vmatpush.msra.mxu0 %v646_v15  ;;  %501 = vmatpush.msra.mxu1 %v646_v15 }
  0xae   : > { %386 = vmatpush.msra.mxu0 %v649_v20  ;;  %502 = vmatpush.msra.mxu1 %v649_v20 }
  0xaf   : > { %482 = vmatmul.msk.f32.vlgmr.msra.gmra.mxu0 %vm364_vm6, %v350_v10  ;;  %483 = vmatmul.msk.f32.vlgmr.msra.gmra.mxu1 %vm364_vm6, %v351_v11 }
 0x12c   : > { %v388_v14 = vpop.f32.mrf.mxu0  ;;  %v391_v15 = vpop.f32.mrf.mxu1 }
 0x12d   : > { %v389_v16 = vadd.f32 %v388_v14, %v357_v13  ;;  %v392_v17 = vadd.f32 %v391_v15, %v362_v12 }
 0x12f   : > { %v396_v18 = vrot.slane %v389_v16, 4  ;;  %400 = vst [vmem:[%s245_s21] sm:$0xf] %v389_v16  ;;  %v397_v19 = vrot.slane %v392_v17, 4 }
 0x130   : > { %402 = vst [vmem:[%s245_s21 + $0x8] sm:$0xf] %v392_v17 }
 0x131   : > { %401 = vst [vmem:[%s245_s21 + $0x4] sm:$0xf] %v396_v18 }
 0x132   : > { %403 = vst [vmem:[%s245_s21 + $0xc] sm:$0xf] %v397_v19 }
 0x133 PF: > { %s16_s20 = sadd.s32 1, %s586_s20  }
 0x134   : > { %p13_p4 = scmp.ge.s32.totalorder %s16_s20, 4  }
 0x136   :  { %15 = sbr.rel (!%p13_p4) target bundleno = 2 (0x2), region = 73 }

// kernel: generator_forward.23
= control target key start
LH: loop header
LB: loop body
LE: loop exit
PB: predicated region body
PF: predicated region fallthrough
CT: control target
= control target key end

     0   :  { %s789_s20 = smov 0   ;;  %s910_s0 = inlined_call_operand.<no memory space> [shape: f32[1], index: 0, kind: input, shape index: {}]   ;;  %s911_s1 = inlined_call_operand.vmem [shape: f32[2,4,518], index: 1, kind: input, shape index: {}]   ;;  %s912_s2 = inlined_call_operand.vmem [shape: f32[2,4,518], index: 2, kind: input, shape index: {}]   ;;  %s913_s3 = inlined_call_operand.vmem [shape: f32[4,56], index: 3, kind: input, shape index: {}]   ;;  %s914_s4 = inlined_call_operand.vmem [shape: f32[4,1], index: 4, kind: input, shape index: {}]   ;;  %s915_s5 = inlined_call_operand.vmem [shape: f32[2,4,1,512], index: 5, kind: output, shape index: {}]  }
   0x1   :  { %10 = sst [smem:[#allocation2]] %s910_s0 }
   0x2 LB: > { %s642_s21 = sadd.s32 4294967295, %s747_s20   ;;  %p646_p0 = scmp.ge.s32.totalorder %s747_s20, 1  ;;  %s747_s20 = sphi %s789_s20, %s16_s20  }
   0x3   : > { %p198_p1 = scmp.lt.s32.totalorder %s747_s20, 3 }
   0x5   : > { %p199_p2 = pnand %p646_p0, %p198_p1 }
   0x6   : > { %p230_p3 = scmp.lt.s32.totalorder (!%p199_p2), %s642_s21, 1  ;;  %s244_s22 = sld [smem:[#allocation2]] (!%p199_p2) }
   0x7   : > { %202 = sbr.rel (%p199_p2) target bundleno = 347 (0x15b), region = 40  ;;  %s749_s29 = smov (!%p199_p2), 123  }
   0x8   : > { %s750_s30 = smov (!%p199_p2), 122   ;;  %s751_s6 = smov (!%p199_p2), 124  }
   0x9   : > { %s752_s7 = smov (!%p199_p2), 125   ;;  %s753_s8 = smov (!%p199_p2), 126  }
   0xa   : > { %s754_s9 = smov (!%p199_p2), 127  }
   0xc   : > { %s919_s21 = smov (!%p230_p3, %s642_s21), 1  ;;  %v254_v2 = vstv %s244_s22  ;;  %vm313_vm0 = vcmask 1043456   ;;  %vm429_vm1 = vcmask 998400   ;;  %vm410_vm2 = vcmask 1006592  }
   0xd   : > { %s656_s0 = smul.u32 20, %s919_s21  ;;  %vm391_vm3 = vcmask 1014784   ;;  %vm372_vm4 = vcmask 1022976   ;;  %vm353_vm5 = vcmask 1031168   ;;  %vm334_vm6 = vcmask 1039360   ;;  %s649_s14 = sshll.u32 %s919_s21, 4 }
   0xe   : > { %vm445_vm7 = vcmask 457728   ;;  %vm542_vm8 = vcmask 1042434   ;;  %vm548_vm9 = vcmask 1043459   ;;  %vm554_vm10 = vcmask 1044484   ;;  %s243_s17 = scalar_lea.vmem %s915_s5, %s649_s14 }
   0xf   : > { %s234_s25 = scalar_lea.vmem %s911_s1, %s656_s0  ;;  %s239_s28 = scalar_lea.vmem %s912_s2, %s656_s0  ;;  %vm560_vm11 = vcmask 1045509   ;;  %vm540_vm12 = vcmask 1040384   ;;  %vm544_vm13 = vcmask 1041408   ;;  %vm546_vm14 = vcmask 1041409  }
  0x10   : > { %v246_v0 = vld [vmem:[%s234_s25 + $0x8] sm:$0xff]  ;;  %v247_v1 = vld [vmem:[%s234_s25 + $0x10] sm:$0xf]  ;;  %v245_v8 = vld [vmem:[%s234_s25] sm:$0xff]  ;;  %vm550_vm15 = vcmask 1042433  }
  0x11   : > { %v262_v3 = vld [vmem:[%s239_s28 + $0x8] sm:$0xff]  ;;  %v249_v4 = vmax.f32 %v246_v0, 0.0  ;;  %v250_v5 = vmax.f32 %v247_v1, 0.0  ;;  %v252_v6 = vmin.f32 %v246_v0, 0.0  ;;  %v253_v7 = vmin.f32 %v247_v1, 0.0  ;;  %v261_v11 = vld [vmem:[%s239_s28] sm:$0xff] }
  0x12   : > { %v248_v9 = vmax.f32 %v245_v8, 0.0  ;;  %v251_v10 = vmin.f32 %v245_v8, 0.0  ;;  %v268_v14 = vmin.f32 %v262_v3, 0.0  ;;  %v263_v15 = vld [vmem:[%s239_s28 + $0x10] sm:$0xf]  ;;  %v267_v19 = vmin.f32 %v261_v11, 0.0 }
  0x13   : > { %v256_v12 = vmul.f32 %v254_v2, %v252_v6  ;;  %v257_v13 = vmul.f32 %v254_v2, %v253_v7  ;;  %v269_v21 = vmin.f32 %v263_v15, 0.0  ;;  %v265_v22 = vmax.f32 %v262_v3, 0.0 }
  0x14   : > { %v255_v16 = vmul.f32 %v254_v2, %v251_v10  ;;  %v271_v23 = vmul.f32 %v268_v14, %v254_v2  ;;  %v264_v24 = vmax.f32 %v261_v11, 0.0  ;;  %v270_v25 = vmul.f32 %v267_v19, %v254_v2 }
  0x15   : > { %v259_v17 = vadd.f32 %v256_v12, %v249_v4  ;;  %v260_v18 = vadd.f32 %v257_v13, %v250_v5  ;;  %v266_v26 = vmax.f32 %v263_v15, 0.0  ;;  %v272_v27 = vmul.f32 %v269_v21, %v254_v2 }
  0x16   : > { %v258_v20 = vadd.f32 %v255_v16, %v248_v9  ;;  %v274_v28 = vadd.f32 %v271_v23, %v265_v22  ;;  %v273_v29 = vadd.f32 %v270_v25, %v264_v24  ;;  %v439_v23 = vld [vmem:[%s914_s4] sm:$0xf] }
  0x17   : > { %281 = vst [vmem:[#allocation1 + $0x10] ss:$2 sm:$0xff] %v259_v17  ;;  %v275_v32 = vadd.f32 %v272_v27, %v266_v26 }
  0x18   : > { %283 = vst [vmem:[#allocation1 + $0x20] ss:$2 sm:$0xff] %v260_v18 }
  0x19   : > { %279 = vst [vmem:[#allocation1] ss:$2 sm:$0xff] %v258_v20 }
  0x1e   : > { %v286_v30 = vld.sshfl [vmem:[#allocation1 + $0x10] sm:$0xff pattern:$0x75316420]  ;;  %v287_v31 = vld.sshfl [vmem:[#allocation1 + $0x18] sm:$0xff pattern:$0x75316420] }
  0x1f   : > { %300 = vst [vmem:[#allocation1 + $0x11] ss:$2 sm:$0xff] %v274_v28  ;;  %v288_v33 = vld.sshfl [vmem:[#allocation1 + $0x20] sm:$0xff pattern:$0x75316420]  ;;  %v755_v28 = vmov 0  }
  0x20   : > { %v284_v34 = vld.sshfl [vmem:[#allocation1] sm:$0xff pattern:$0x75316420]  ;;  %v285_v35 = vld.sshfl [vmem:[#allocation1 + $0x8] sm:$0xff pattern:$0x75316420]  ;;  %732 = vset.pattern.permute.xlu0 %v755_v28 }
  0x21   : > { %298 = vst [vmem:[#allocation1 + $0x1] ss:$2 sm:$0xff] %v273_v29 }
  0x22   : > { %302 = vst [vmem:[#allocation1 + $0x21] ss:$2 sm:$0xff] %v275_v32  ;;  %v438_v32 = vld [vmem:[%s913_s3] sm:$0xf] }
  0x26   : > { %v305_v36 = vld.sshfl [vmem:[#allocation1 + $0x10] sm:$0xff pattern:$0x75316420]  ;;  %v306_v37 = vld.sshfl [vmem:[#allocation1 + $0x18] sm:$0xff pattern:$0x75316420] }
  0x27   : > { %v807_v38 = vsel %vm313_vm0, %v286_v30, %v305_v36  ;;  %v810_v39 = vsel %vm313_vm0, %v287_v31, %v306_v37 }
  0x28   : > { %v682_v40 = vpack.i.bf16 %v810_v39, %v807_v38  ;;  %v304_v41 = vld.sshfl [vmem:[#allocation1 + $0x8] sm:$0xff pattern:$0x75316420]  ;;  %v303_v46 = vld.sshfl [vmem:[#allocation1] sm:$0xff pattern:$0x75316420] }
  0x29   : > { %v307_v42 = vld.sshfl [vmem:[#allocation1 + $0x20] sm:$0xff pattern:$0x75316420]  ;;  %v815_v43 = vsel %vm313_vm0, %v285_v35, %v304_v41  ;;  %v820_v47 = vsel %vm313_vm0, %v284_v34, %v303_v46 }
  0x2a   : > { %683 = vrot.lane.b32.xlu1 %v682_v40, %s749_s29  ;;  %673 = vrot.lane.b32.xlu0 %v682_v40, %s750_s30  ;;  %v318_v44 = vsel %vm313_vm0, %v288_v33, %v307_v42  ;;  %vm556_vm0 = vcmask 1043458  }
  0x2b   : > { %693 = vrot.lane.b32.xlu2 %v682_v40, %s751_s6  ;;  %v687_v45 = vpack.i.bf16 %v815_v43, %v318_v44 }
  0x32   : > { %688 = vrot.lane.b32.xlu1 %v687_v45, %s749_s29  ;;  %678 = vrot.lane.b32.xlu0 %v687_v45, %s750_s30 }
  0x33   : > { %698 = vrot.lane.b32.xlu2 %v687_v45, %s751_s6 }
  0x3a   : > { %708 = vrot.lane.b32.xlu1 %v687_v45, %s752_s7  ;;  %703 = vrot.lane.b32.xlu0 %v682_v40, %s752_s7 }
  0x3b   : > { %713 = vrot.lane.b32.xlu2 %v682_v40, %s753_s8 }
  0x42   : > { %718 = vrot.lane.b32.xlu0 %v687_v45, %s753_s8  ;;  %419 = vrot.lane.b32.xlu1 %v820_v47, %s750_s30 }
  0x43   : > { %723 = vrot.lane.b32.xlu2 %v682_v40, %s754_s9 }
  0x4a   : > { %728 = vrot.lane.b32.xlu0 %v687_v45, %s754_s9  ;;  %400 = vrot.lane.b32.xlu1 %v820_v47, %s749_s29 }
  0x4b   : > { %381 = vrot.lane.b32.xlu2 %v820_v47, %s751_s6 }
  0x52   : > { %362 = vrot.lane.b32.xlu0 %v820_v47, %s752_s7  ;;  %343 = vrot.lane.b32.xlu1 %v820_v47, %s753_s8 }
  0x53   : > { %324 = vrot.lane.b32.xlu2 %v820_v47, %s754_s9 }
  0x5a   : > { %442 = vperm.xlu0 %732, %v439_v23  }
  0x85   : > { %v694_v48 = vpop.permute.xlu2 %693 }
  0x86   : > { %v696_v50 = vunpack.i.h.bf16 %v694_v48  ;;  %v695_v51 = vunpack.i.l.bf16 %v694_v48 }
  0x88   : > { %v394_v61 = vsel %vm391_vm3, %v695_v51, %v696_v50 }
  0x8d   : > { %v828_v49 = vpop.permute.xlu2 %698 }
  0x8e   : > { %v701_v4 = vunpack.i.h.bf16 %v828_v49  ;;  %v700_v5 = vunpack.i.l.bf16 %v828_v49 }
  0x90   : > { %v393_v13 = vsel %vm391_vm3, %v701_v4, %v695_v51  ;;  %v395_v14 = vsel %vm391_vm3, %v696_v50, %v700_v5 }
  0x95   : > { %v832_v60 = vpop.permute.xlu2 %713 }
  0x96   : > { %v716_v10 = vunpack.i.h.bf16 %v832_v60  ;;  %v715_v11 = vunpack.i.l.bf16 %v832_v60 }
  0x98   : > { %v356_v27 = vsel %vm353_vm5, %v715_v11, %v716_v10 }
  0x9c   : > { %v684_v52 = vpop.permute.xlu1 %683  ;;  %v674_v53 = vpop.permute.xlu0 %673 }
  0x9d   : > { %v686_v54 = vunpack.i.h.bf16 %v684_v52  ;;  %v685_v55 = vunpack.i.l.bf16 %v684_v52  ;;  %v676_v56 = vunpack.i.h.bf16 %v674_v53  ;;  %v675_v57 = vunpack.i.l.bf16 %v674_v53  ;;  %v724_v12 = vpop.permute.xlu2 %723 }
  0x9e   : > { %v726_v15 = vunpack.i.h.bf16 %v724_v12  ;;  %v725_v16 = vunpack.i.l.bf16 %v724_v12 }
  0x9f   : > { %v432_v58 = vsel %vm429_vm1, %v675_v57, %v676_v56  ;;  %v413_v59 = vsel %vm410_vm2, %v685_v55, %v686_v54 }
  0xa0   : > { %498 = vmatpush.msra.mxu2 %v432_v58  ;;  %v337_v29 = vsel %vm334_vm6, %v725_v16, %v726_v15 }
  0xa2   : > { %499 = vmatpush.msra.mxu2 %v413_v59 }
  0xa4   : > { %500 = vmatpush.msra.mxu2 %v394_v61  ;;  %v835_v62 = vpop.permute.xlu1 %688  ;;  %v679_v63 = vpop.permute.xlu0 %678 }
  0xa5   : > { %v691_v0 = vunpack.i.h.bf16 %v835_v62  ;;  %v690_v1 = vunpack.i.l.bf16 %v835_v62  ;;  %v681_v2 = vunpack.i.h.bf16 %v679_v63  ;;  %v680_v3 = vunpack.i.l.bf16 %v679_v63  ;;  %v382_v40 = vpop.permute.xlu2 %381 }
  0xa7   : > { %v431_v6 = vsel %vm429_vm1, %v681_v2, %v675_v57  ;;  %v433_v7 = vsel %vm429_vm1, %v676_v56, %v680_v3  ;;  %v412_v8 = vsel %vm410_vm2, %v691_v0, %v685_v55  ;;  %v414_v9 = vsel %vm410_vm2, %v686_v54, %v690_v1 }
  0xa8   : > { %478 = vmatpush.msra.mxu1 %v431_v6  ;;  %518 = vmatpush.msra.mxu3 %v433_v7  ;;  %v569_v1 = vlaneseq }
  0xaa   : > { %479 = vmatpush.msra.mxu1 %v412_v8  ;;  %519 = vmatpush.msra.mxu3 %v414_v9 }
  0xac   : > { %v709_v17 = vpop.permute.xlu1 %708  ;;  %v704_v18 = vpop.permute.xlu0 %703  ;;  %480 = vmatpush.msra.mxu1 %v393_v13  ;;  %520 = vmatpush.msra.mxu3 %v395_v14 }
  0xad   : > { %v711_v19 = vunpack.i.h.bf16 %v709_v17  ;;  %v710_v20 = vunpack.i.l.bf16 %v709_v17  ;;  %v706_v21 = vunpack.i.h.bf16 %v704_v18  ;;  %v705_v22 = vunpack.i.l.bf16 %v704_v18  ;;  %v325_v53 = vpop.permute.xlu2 %324 }
  0xaf   : > { %v374_v24 = vsel %vm372_vm4, %v711_v19, %v705_v22  ;;  %v375_v25 = vsel %vm372_vm4, %v705_v22, %v706_v21  ;;  %v376_v26 = vsel %vm372_vm4, %v706_v21, %v710_v20 }
  0xb0   : > { %481 = vmatpush.msra.mxu1 %v374_v24  ;;  %501 = vmatpush.msra.mxu2 %v375_v25 }
  0xb1   : > { %521 = vmatpush.msra.mxu3 %v376_v26 }
  0xb2   : > { %502 = vmatpush.msra.mxu2 %v356_v27 }
  0xb4   : > { %v719_v30 = vpop.permute.xlu0 %718  ;;  %v420_v31 = vpop.permute.xlu1 %419  ;;  %503 = vmatpush.msra.mxu2 %v337_v29 }
  0xb5   : > { %v721_v33 = vunpack.i.h.bf16 %v719_v30  ;;  %v720_v34 = vunpack.i.l.bf16 %v719_v30  ;;  %v430_v35 = vsel %vm429_vm1, %v420_v31, %v681_v2  ;;  %vm562_vm1 = vcmask 1044483  }
  0xb6   : > { %458 = vmatpush.msra.mxu0 %v430_v35  ;;  %504 = vmatpush.msra.mxu2 %v807_v38  ;;  %v392_v38 = vsel %vm391_vm3, %v382_v40, %v701_v4 }
  0xb7   : > { %v355_v36 = vsel %vm353_vm5, %v721_v33, %v715_v11  ;;  %v357_v37 = vsel %vm353_vm5, %v716_v10, %v720_v34  ;;  %652 = vmatmul.msk.f32.vlgmr.msra.gmra.mxu2 %vm445_vm7, %v438_v32 }
  0xb8   : > { %482 = vmatpush.msra.mxu1 %v355_v36  ;;  %522 = vmatpush.msra.mxu3 %v357_v37 }
  0xbc   : > { %v729_v41 = vpop.permute.xlu0 %728  ;;  %v401_v42 = vpop.permute.xlu1 %400 }
  0xbd   : > { %v731_v44 = vunpack.i.h.bf16 %v729_v41  ;;  %v730_v45 = vunpack.i.l.bf16 %v729_v41  ;;  %v411_v46 = vsel %vm410_vm2, %v401_v42, %v691_v0  ;;  %vm887_vm2 = vcmp.lt.s32.totalorder %v569_v1, 512 }
  0xbe   : > { %459 = vmatpush.msra.mxu0 %v411_v46 }
  0xbf   : > { %v336_v48 = vsel %vm334_vm6, %v731_v44, %v725_v16  ;;  %v338_v50 = vsel %vm334_vm6, %v726_v15, %v730_v45  ;;  %v335_v55 = vsel %vm334_vm6, %v325_v53, %v731_v44 }
  0xc0   : > { %460 = vmatpush.msra.mxu0 %v392_v38  ;;  %483 = vmatpush.msra.mxu1 %v336_v48 }
  0xc1   : > { %523 = vmatpush.msra.mxu3 %v338_v50 }
  0xc2   : > { %484 = vmatpush.msra.mxu1 %v815_v43 }
  0xc3   : > { %524 = vmatpush.msra.mxu3 %v810_v39  ;;  %651 = vmatmul.msk.f32.vlgmr.msra.gmra.mxu1 %vm445_vm7, %v438_v32 }
  0xc4   : > { %v363_v51 = vpop.permute.xlu0 %362  ;;  %v344_v52 = vpop.permute.xlu1 %343  ;;  %653 = vmatmul.msk.f32.vlgmr.msra.gmra.mxu3 %vm445_vm7, %v438_v32 }
  0xc5   : > { %v373_v49 = vsel %vm372_vm4, %v363_v51, %v711_v19  ;;  %v354_v54 = vsel %vm353_vm5, %v344_v52, %v721_v33 }
  0xc6   : > { %461 = vmatpush.msra.mxu0 %v373_v49 }
  0xc8   : > { %462 = vmatpush.msra.mxu0 %v354_v54 }
  0xca   : > { %463 = vmatpush.msra.mxu0 %v335_v55 }
  0xcc   : > { %464 = vmatpush.msra.mxu0 %v820_v47  ;;  %v443_v43 = vpop.permute.xlu0 %442 }
  0xcd   : > { %650 = vmatmul.msk.f32.vlgmr.msra.gmra.mxu0 %vm445_vm7, %v438_v32 }
 0x13a   : > { %v506_v39 = vpop.f32.mrf.mxu2 }
 0x13b   : > { %v507_v57 = vadd.f32 %v506_v39, %v443_v43 }
 0x13d   : > { %733 = vtanh.f32 %v507_v57 }
 0x140   : > { %v486_v56 = vpop.f32.mrf.mxu1 }
 0x141   : > { %v487_v58 = vadd.f32 %v486_v56, %v443_v43 }
 0x143   : > { %735 = vtanh.f32 %v487_v58  ;;  %v734_v63 = vpop.eup %733 }
 0x144   : > { %v538_v47 = vrot.slane %v734_v63, 6 }
 0x147   : > { %v526_v59 = vpop.f32.mrf.mxu3 }
 0x148   : > { %v527_v60 = vadd.f32 %v526_v59, %v443_v43 }
 0x149   : > { %v736_v0 = vpop.eup %735 }
 0x14a   : > { %737 = vtanh.f32 %v527_v60  ;;  %v466_v61 = vpop.f32.mrf.mxu0  ;;  %v537_v3 = vrot.slane %v736_v0, 7 }
 0x14b   : > { %v467_v62 = vadd.f32 %v466_v61, %v443_v43 }
 0x14d   : > { %739 = vtanh.f32 %v467_v62 }
 0x150   : > { %v738_v2 = vpop.eup %737 }
 0x151   : > { %v539_v4 = vrot.slane %v738_v2, 5 }
 0x153   : > { %v740_v6 = vpop.eup %739  ;;  %v543_v7 = vsel %vm542_vm8, %v538_v47, %v539_v4  ;;  %v549_v8 = vsel %vm548_vm9, %v538_v47, %v539_v4  ;;  %v555_v9 = vsel %vm554_vm10, %v538_v47, %v539_v4  ;;  %v561_v10 = vsel %vm560_vm11, %v538_v47, %v539_v4 }
 0x154   : > { %v541_v11 = vsel %vm540_vm12, %v740_v6, %v537_v3  ;;  %v547_v12 = vsel %vm546_vm14, %v740_v6, %v537_v3  ;;  %v553_v13 = vsel %vm542_vm8, %v740_v6, %v537_v3  ;;  %v559_v14 = vsel %vm548_vm9, %v740_v6, %v537_v3 }
 0x155   : > { %v545_v15 = vsel %vm544_vm13, %v541_v11, %v543_v7  ;;  %v551_v16 = vsel %vm550_vm15, %v547_v12, %v549_v8  ;;  %v557_v17 = vsel %vm556_vm0, %v553_v13, %v555_v9  ;;  %v563_v18 = vsel %vm562_vm1, %v559_v14, %v561_v10 }
 0x156   : > { %v552_v19 = vrot.slane %v551_v16, 1  ;;  %v558_v20 = vrot.slane %v557_v17, 2  ;;  %v564_v21 = vrot.slane %v563_v18, 3  ;;  %573 = vst.msk [vmem:[%s243_s17] sm:$0xf] %vm887_vm2, %v545_v15 }
 0x158   : > { %574 = vst.msk [vmem:[%s243_s17 + $0x4] sm:$0xf] %vm887_vm2, %v552_v19 }
 0x159   : > { %575 = vst.msk [vmem:[%s243_s17 + $0x8] sm:$0xf] %vm887_vm2, %v558_v20 }
 0x15a   : > { %576 = vst.msk [vmem:[%s243_s17 + $0xc] sm:$0xf] %vm887_vm2, %v564_v21 }
 0x15b PF: > { %s16_s20 = sadd.s32 1, %s747_s20  }
 0x15c   : > { %p13_p4 = scmp.ge.s32.totalorder %s16_s20, 4  }
 0x15e   :  { %15 = sbr.rel (!%p13_p4) target bundleno = 2 (0x2), region = 78 }

</bundles_post_ra>
